<compile_context>
chip_gen: v6e
topology: v6e:2x2x1
jax: 0.10.0
libtpu: 0.0.40
codegen_flags: <defaults>
</compile_context>

<pallas_src>
import functools

import numpy as np

import jax
import jax.numpy as jnp
from jax.experimental import pallas as pl
from jax.experimental.pallas import tpu as pltpu


def _bcast_spec(shape):
    zeros = (0,) * len(shape)
    return pl.BlockSpec(shape, lambda b, z=zeros: z)


# ---------------------------------------------------------------------------
# Kernel 1: conv1 (5x5, pad=2) + ReLU + 2x2 max-pool      (one batch item/step)
# ---------------------------------------------------------------------------
def _conv1_pool_kernel(p1_ref, w1_ref, b1_ref, out_ref):
    f32 = jnp.float32
    w1 = w1_ref[...]
    b1 = b1_ref[...]
    m = None
    for q in range(4):                                # (ypar, xpar) parity blocks
        c = jnp.dot(p1_ref[0, q], w1, preferred_element_type=f32) + b1
        c = jnp.maximum(c, 0.0)
        m = c if m is None else jnp.maximum(m, c)
    out_ref[0] = m                                    # pooled 14x14x6, row-major


def conv1_pool(p1, w1, b1):
    B = p1.shape[0]
    return pl.pallas_call(
        _conv1_pool_kernel,
        out_shape=jax.ShapeDtypeStruct((B, 196, 6), jnp.float32),
        grid=(B,),
        in_specs=[
            pl.BlockSpec((1, 4, 196, 25), lambda b: (b, 0, 0, 0)),
            _bcast_spec((25, 6)),
            _bcast_spec((1, 6)),
        ],
        out_specs=pl.BlockSpec((1, 196, 6), lambda b: (b, 0, 0)),
        compiler_params=pltpu.CompilerParams(dimension_semantics=("parallel",)),
    )(p1, w1, b1)


# ---------------------------------------------------------------------------
# Kernel 2: conv2 (5x5 valid) + ReLU + pool, then conv3..conv6 (3x3, pad=1)
#           + ReLU, all fused, activations VMEM-resident.  (one batch item/step)
# ---------------------------------------------------------------------------
def _conv2_to_6_kernel(p2_ref, w2_ref, b2_ref, s_ref,
                       w3_ref, b3_ref, w4_ref, b4_ref,
                       w5_ref, b5_ref, w6_ref, b6_ref, out_ref):
    f32 = jnp.float32
    bf16 = jnp.bfloat16

    # ---- conv2 + ReLU + 2x2 max-pool (parity-major patch blocks) -----------
    w2 = w2_ref[...]
    b2 = b2_ref[...]
    m = None
    for q in range(4):
        c = jnp.dot(p2_ref[0, q], w2, preferred_element_type=f32) + b2
        c = jnp.maximum(c, 0.0)
        m = c if m is None else jnp.maximum(m, c)
    x = m.astype(bf16)                                 # (25, 16), 5x5 grid

    # ---- 3x3/pad=1 convs on the 5x5 grid via constant 0/1 shift matrices ----
    def conv3x3(x_bf, w_ref, bias):
        cout = w_ref.shape[-1]
        acc = jnp.zeros((25, cout), f32)
        for t in range(9):
            # S[t] @ x selects (or zeros, at the padding ring) the shifted taps.
            xt = jnp.dot(s_ref[t], x_bf, preferred_element_type=f32).astype(bf16)
            acc = acc + jnp.dot(xt, w_ref[t], preferred_element_type=f32)
        return jnp.maximum(acc + bias, 0.0)

    x = conv3x3(x, w3_ref, b3_ref[...]).astype(bf16)   # (25, 32)
    x = conv3x3(x, w4_ref, b4_ref[...]).astype(bf16)   # (25, 64)
    x = conv3x3(x, w5_ref, b5_ref[...]).astype(bf16)   # (25, 128)
    x = conv3x3(x, w6_ref, b6_ref[...])                # (25, 256) f32
    out_ref[0] = x.astype(out_ref.dtype)


def conv2_to_6(p2, w2, b2, s, w3, b3, w4, b4, w5, b5, w6, b6):
    B = p2.shape[0]
    in_specs = [
        pl.BlockSpec((1, 4, 25, 150), lambda b: (b, 0, 0, 0)),
        _bcast_spec((150, 16)), _bcast_spec((1, 16)),
        _bcast_spec((9, 25, 25)),
        _bcast_spec((9, 16, 32)), _bcast_spec((1, 32)),
        _bcast_spec((9, 32, 64)), _bcast_spec((1, 64)),
        _bcast_spec((9, 64, 128)), _bcast_spec((1, 128)),
        _bcast_spec((9, 128, 256)), _bcast_spec((1, 256)),
    ]
    return pl.pallas_call(
        _conv2_to_6_kernel,
        out_shape=jax.ShapeDtypeStruct((B, 25, 256), jnp.float32),
        grid=(B,),
        in_specs=in_specs,
        out_specs=pl.BlockSpec((1, 25, 256), lambda b: (b, 0, 0)),
        compiler_params=pltpu.CompilerParams(dimension_semantics=("parallel",)),
    )(p2, w2, b2, s, w3, b3, w4, b4, w5, b5, w6, b6)


# ---------------------------------------------------------------------------
# Kernel 3: fc1 + ReLU + fc2 + ReLU + fc3 (fused, fully VMEM-resident)
# ---------------------------------------------------------------------------
def _fc_kernel(x_ref, w1_ref, b1_ref, w2_ref, b2_ref, w3_ref, b3_ref, o_ref):
    f32 = jnp.float32
    h = jnp.dot(x_ref[...], w1_ref[...], preferred_element_type=f32) + b1_ref[...]
    h = jnp.maximum(h, 0.0).astype(jnp.bfloat16)
    h = jnp.dot(h, w2_ref[...], preferred_element_type=f32) + b2_ref[...]
    h = jnp.maximum(h, 0.0).astype(jnp.bfloat16)
    o_ref[...] = jnp.dot(h, w3_ref[...], preferred_element_type=f32) + b3_ref[...]


def fc_stack(x, w1, b1, w2, b2, w3, b3):
    B = x.shape[0]
    nc = w3.shape[1]
    vmem = functools.partial(pl.BlockSpec, memory_space=pltpu.MemorySpace.VMEM)
    return pl.pallas_call(
        _fc_kernel,
        out_shape=jax.ShapeDtypeStruct((B, nc), jnp.float32),
        in_specs=[vmem() for _ in range(7)],
        out_specs=vmem(),
    )(x, w1, b1, w2, b2, w3, b3)


# ---------------------------------------------------------------------------
# Constant 0/1 shift matrices for 3x3 / pad=1 convs on a 5x5 spatial grid.
# ---------------------------------------------------------------------------
def _shift_matrices_5x5():
    s = np.zeros((9, 25, 25), np.float32)
    for dy in (-1, 0, 1):
        for dx in (-1, 0, 1):
            t = (dy + 1) * 3 + (dx + 1)
            for y in range(5):
                for x in range(5):
                    yy, xx = y + dy, x + dx
                    if 0 <= yy < 5 and 0 <= xx < 5:
                        s[t, y * 5 + x, yy * 5 + xx] = 1.0
    return jnp.asarray(s, jnp.bfloat16)


# ---------------------------------------------------------------------------
# Parameters (deterministic synthetic init, PyTorch layouts)
# ---------------------------------------------------------------------------
def init_params(key, num_class):
    params = {}

    def uinit(k, shape, fan_in):
        bound = 1.0 / float(fan_in) ** 0.5
        return jax.random.uniform(k, shape, jnp.float32, -bound, bound)

    conv_shapes = {
        "conv1": (6, 1, 5, 5),
        "conv2": (16, 6, 5, 5),
        "conv3": (32, 16, 3, 3),
        "conv4": (64, 32, 3, 3),
        "conv5": (128, 64, 3, 3),
        "conv6": (256, 128, 3, 3),
    }
    fc_shapes = {  # stored as (in_features, out_features)
        "fc1": (256 * 5 * 5, 120),
        "fc2": (120, 84),
        "fc3": (84, num_class),
    }

    keys = jax.random.split(key, 2 * (len(conv_shapes) + len(fc_shapes)))
    ki = 0
    for name, (co, ci, kh, kw) in conv_shapes.items():
        fan_in = ci * kh * kw
        params[name + "_w"] = uinit(keys[ki], (co, ci, kh, kw), fan_in); ki += 1
        params[name + "_b"] = uinit(keys[ki], (co,), fan_in); ki += 1
    for name, (fi, fo) in fc_shapes.items():
        params[name + "_w"] = uinit(keys[ki], (fi, fo), fi); ki += 1
        params[name + "_b"] = uinit(keys[ki], (1, fo), fi); ki += 1
    return params


# ---------------------------------------------------------------------------
# Forward pass (mirrors LeNet9.forward)
# ---------------------------------------------------------------------------
def lenet9_forward(x_nchw, params):
    x = x_nchw.astype(jnp.float32)
    B = x.shape[0]
    assert x.shape[1:] == (1, 28, 28), x.shape
    bf16 = jnp.bfloat16

    # ---- conv1 im2col (XLA layout glue), pool-friendly parity-major order ---
    # row layout: (b, q=ypar*2+xpar, r=yo*14+xo, t=ki*5+kj), y=2yo+ypar, x=2xo+xpar
    xp = jnp.pad(x[:, 0], ((0, 0), (2, 2), (2, 2)))                   # (B,32,32)
    taps1 = [xp[:, ki:ki + 28, kj:kj + 28] for ki in range(5) for kj in range(5)]
    p1 = jnp.stack(taps1, axis=-1)                                    # (B,28,28,25)
    p1 = p1.reshape(B, 14, 2, 14, 2, 25).transpose(0, 2, 4, 1, 3, 5)
    p1 = p1.reshape(B, 4, 196, 25).astype(bf16)

    # Repack conv weights tap-major: (Cout,Cin,KH,KW) -> (KH*KW, Cin, Cout), bf16.
    def conv_w(name, k):
        w = params[name + "_w"]
        cout, cin = w.shape[0], w.shape[1]
        return jnp.transpose(w, (2, 3, 1, 0)).reshape(k * k, cin, cout).astype(bf16)

    w1 = conv_w("conv1", 5).reshape(25, 6)
    w2 = conv_w("conv2", 5).reshape(150, 16)          # rows in (tap, cin) order
    w3 = conv_w("conv3", 3)
    w4 = conv_w("conv4", 3)
    w5 = conv_w("conv5", 3)
    w6 = conv_w("conv6", 3)
    cb = {n: params[n + "_b"].reshape(1, -1).astype(jnp.float32)
          for n in ("conv1", "conv2", "conv3", "conv4", "conv5", "conv6")}

    # ---- kernel 1: conv1 + ReLU + pool --------------------------------------
    a1 = conv1_pool(p1, w1, cb["conv1"])               # (B, 196, 6) f32
    a1 = a1.reshape(B, 14, 14, 6)

    # ---- conv2 im2col (XLA glue), parity-major order, features = (tap, cin) --
    taps2 = [a1[:, ki:ki + 10, kj:kj + 10, :] for ki in range(5) for kj in range(5)]
    p2 = jnp.stack(taps2, axis=3)                      # (B,10,10,25,6)
    p2 = p2.reshape(B, 5, 2, 5, 2, 25, 6).transpose(0, 2, 4, 1, 3, 5, 6)
    p2 = p2.reshape(B, 4, 25, 150).astype(bf16)

    s = _shift_matrices_5x5()                          # (9, 25, 25) bf16

    # ---- kernel 2: conv2+pool, conv3..conv6 ----------------------------------
    feats = conv2_to_6(p2, w2, cb["conv2"], s,
                       w3, cb["conv3"], w4, cb["conv4"],
                       w5, cb["conv5"], w6, cb["conv6"])   # (B, 25, 256) f32

    # torch's x.view(-1, 256*5*5) flattens in (c,h,w) order; features here are in
    # (h,w,c) order, so permute fc1's weight rows to match (exact math).
    xf = feats.reshape(B, 25 * 256).astype(bf16)
    wf1 = (params["fc1_w"].reshape(256, 5, 5, -1).transpose(1, 2, 0, 3)
           .reshape(25 * 256, -1).astype(bf16))
    wf2 = params["fc2_w"].astype(bf16)
    wf3 = params["fc3_w"].astype(bf16)
    return fc_stack(xf, wf1, params["fc1_b"].astype(jnp.float32),
                    wf2, params["fc2_b"].astype(jnp.float32),
                    wf3, params["fc3_b"].astype(jnp.float32))


if __name__ == "__main__":
    NUM_CLASS = 10
    key = jax.random.PRNGKey(0)
    k_x, k_p = jax.random.split(key)

    # Input must be 1x28x28 per image so the flatten matches 256*5*5.
    x = jax.random.normal(k_x, (2, 1, 28, 28), dtype=jnp.float32)
    params = init_params(k_p, NUM_CLASS)

    fwd = jax.jit(lenet9_forward)
    out = jax.block_until_ready(fwd(x, params))

    assert out.shape == (2, NUM_CLASS), out.shape
    assert out.dtype == jnp.float32
    print("KERNEL_OK")
</pallas_src>

<mosaic_0001>
module attributes {stable_mosaic.version = 11 : i64} {
  func.func @_conv1_pool_kernel(%arg0: i32, %arg1: memref<1x4x196x25xbf16, #tpu.memory_space<vmem>>, %arg2: memref<25x6xbf16, #tpu.memory_space<vmem>>, %arg3: memref<1x6xf32, #tpu.memory_space<vmem>>, %arg4: memref<1x196x6xf32, #tpu.memory_space<vmem>>) attributes {dimension_semantics = [#tpu.dimension_semantics<parallel>], iteration_bounds = array<i64: 2>, scalar_prefetch = 0 : i64, scratch_operands = 0 : i64, tpu.core_type = #tpu.core_type<tc>, window_params = [{transform_indices = @transform_0, window_bounds = array<i64: 1, 4, 196, 25>}, {pipeline_mode = #tpu.pipeline_mode<synchronous>, transform_indices = @transform_1, window_bounds = array<i64: 25, 6>}, {pipeline_mode = #tpu.pipeline_mode<synchronous>, transform_indices = @transform_2, window_bounds = array<i64: 1, 6>}, {transform_indices = @transform_3, window_bounds = array<i64: 1, 196, 6>}]} {
    %c0 = arith.constant 0 : index
    %c0_0 = arith.constant 0 : index
    %0 = vector.load %arg2[%c0, %c0_0] : memref<25x6xbf16, #tpu.memory_space<vmem>>, vector<25x6xbf16>
    %c0_1 = arith.constant 0 : index
    %c0_2 = arith.constant 0 : index
    %1 = vector.load %arg3[%c0_1, %c0_2] : memref<1x6xf32, #tpu.memory_space<vmem>>, vector<1x6xf32>
    %c0_3 = arith.constant 0 : index
    %c0_4 = arith.constant 0 : index
    %c0_5 = arith.constant 0 : index
    %c0_6 = arith.constant 0 : index
    %2 = vector.load %arg1[%c0_3, %c0_4, %c0_5, %c0_6] : memref<1x4x196x25xbf16, #tpu.memory_space<vmem>>, vector<1x1x196x25xbf16>
    %3 = vector.shape_cast %2 : vector<1x1x196x25xbf16> to vector<196x25xbf16>
    %cst = arith.constant dense<0.000000e+00> : vector<196x6xf32>
    %4 = tpu.matmul %3, %0, %cst {dimension_numbers = #tpu.dot_dimension_numbers<[1], [0], [0], [1], [0, 0, 1, 1], [], []>} : vector<196x25xbf16>, vector<25x6xbf16>, vector<196x6xf32> -> vector<196x6xf32>
    %5 = vector.broadcast %1 : vector<1x6xf32> to vector<196x6xf32>
    %6 = arith.addf %4, %5 : vector<196x6xf32>
    %cst_7 = arith.constant 0.000000e+00 : f32
    %7 = vector.broadcast %cst_7 : f32 to vector<196x6xf32>
    %8 = arith.maximumf %6, %7 : vector<196x6xf32>
    %c0_8 = arith.constant 0 : index
    %c1 = arith.constant 1 : index
    %c0_9 = arith.constant 0 : index
    %c0_10 = arith.constant 0 : index
    %9 = vector.load %arg1[%c0_8, %c1, %c0_9, %c0_10] : memref<1x4x196x25xbf16, #tpu.memory_space<vmem>>, vector<1x1x196x25xbf16>
    %10 = vector.shape_cast %9 : vector<1x1x196x25xbf16> to vector<196x25xbf16>
    %cst_11 = arith.constant dense<0.000000e+00> : vector<196x6xf32>
    %11 = tpu.matmul %10, %0, %cst_11 {dimension_numbers = #tpu.dot_dimension_numbers<[1], [0], [0], [1], [0, 0, 1, 1], [], []>} : vector<196x25xbf16>, vector<25x6xbf16>, vector<196x6xf32> -> vector<196x6xf32>
    %12 = vector.broadcast %1 : vector<1x6xf32> to vector<196x6xf32>
    %13 = arith.addf %11, %12 : vector<196x6xf32>
    %cst_12 = arith.constant 0.000000e+00 : f32
    %14 = vector.broadcast %cst_12 : f32 to vector<196x6xf32>
    %15 = arith.maximumf %13, %14 : vector<196x6xf32>
    %16 = arith.maximumf %8, %15 : vector<196x6xf32>
    %c0_13 = arith.constant 0 : index
    %c2 = arith.constant 2 : index
    %c0_14 = arith.constant 0 : index
    %c0_15 = arith.constant 0 : index
    %17 = vector.load %arg1[%c0_13, %c2, %c0_14, %c0_15] : memref<1x4x196x25xbf16, #tpu.memory_space<vmem>>, vector<1x1x196x25xbf16>
    %18 = vector.shape_cast %17 : vector<1x1x196x25xbf16> to vector<196x25xbf16>
    %cst_16 = arith.constant dense<0.000000e+00> : vector<196x6xf32>
    %19 = tpu.matmul %18, %0, %cst_16 {dimension_numbers = #tpu.dot_dimension_numbers<[1], [0], [0], [1], [0, 0, 1, 1], [], []>} : vector<196x25xbf16>, vector<25x6xbf16>, vector<196x6xf32> -> vector<196x6xf32>
    %20 = vector.broadcast %1 : vector<1x6xf32> to vector<196x6xf32>
    %21 = arith.addf %19, %20 : vector<196x6xf32>
    %cst_17 = arith.constant 0.000000e+00 : f32
    %22 = vector.broadcast %cst_17 : f32 to vector<196x6xf32>
    %23 = arith.maximumf %21, %22 : vector<196x6xf32>
    %24 = arith.maximumf %16, %23 : vector<196x6xf32>
    %c0_18 = arith.constant 0 : index
    %c3 = arith.constant 3 : index
    %c0_19 = arith.constant 0 : index
    %c0_20 = arith.constant 0 : index
    %25 = vector.load %arg1[%c0_18, %c3, %c0_19, %c0_20] : memref<1x4x196x25xbf16, #tpu.memory_space<vmem>>, vector<1x1x196x25xbf16>
    %26 = vector.shape_cast %25 : vector<1x1x196x25xbf16> to vector<196x25xbf16>
    %cst_21 = arith.constant dense<0.000000e+00> : vector<196x6xf32>
    %27 = tpu.matmul %26, %0, %cst_21 {dimension_numbers = #tpu.dot_dimension_numbers<[1], [0], [0], [1], [0, 0, 1, 1], [], []>} : vector<196x25xbf16>, vector<25x6xbf16>, vector<196x6xf32> -> vector<196x6xf32>
    %28 = vector.broadcast %1 : vector<1x6xf32> to vector<196x6xf32>
    %29 = arith.addf %27, %28 : vector<196x6xf32>
    %cst_22 = arith.constant 0.000000e+00 : f32
    %30 = vector.broadcast %cst_22 : f32 to vector<196x6xf32>
    %31 = arith.maximumf %29, %30 : vector<196x6xf32>
    %32 = arith.maximumf %24, %31 : vector<196x6xf32>
    %c0_23 = arith.constant 0 : index
    %c0_24 = arith.constant 0 : index
    %c0_25 = arith.constant 0 : index
    %33 = vector.load %arg4[%c0_23, %c0_24, %c0_25] : memref<1x196x6xf32, #tpu.memory_space<vmem>>, vector<1x196x6xf32>
    %34 = vector.shape_cast %33 : vector<1x196x6xf32> to vector<196x6xf32>
    %35 = vector.shape_cast %32 : vector<196x6xf32> to vector<1x196x6xf32>
    tpu.vector_store %arg4[%c0_23, %c0_24, %c0_25], %35 {strides = array<i32>} : memref<1x196x6xf32, #tpu.memory_space<vmem>>, vector<1x196x6xf32>,
    return
  }
  func.func @transform_0(%arg0: i32) -> (i32, i32, i32, i32) {
    %c0_i32 = arith.constant 0 : i32
    %c0_i32_0 = arith.constant 0 : i32
    %c0_i32_1 = arith.constant 0 : i32
    %c0_i32_2 = arith.constant 0 : i32
    return %arg0, %c0_i32, %c0_i32_0, %c0_i32_1 : i32, i32, i32, i32
  }
  func.func @transform_1(%arg0: i32) -> (i32, i32) {
    %c0_i32 = arith.constant 0 : i32
    %c0_i32_0 = arith.constant 0 : i32
    %c0_i32_1 = arith.constant 0 : i32
    return %c0_i32, %c0_i32_0 : i32, i32
  }
  func.func @transform_2(%arg0: i32) -> (i32, i32) {
    %c0_i32 = arith.constant 0 : i32
    %c0_i32_0 = arith.constant 0 : i32
    %c0_i32_1 = arith.constant 0 : i32
    return %c0_i32, %c0_i32_0 : i32, i32
  }
  func.func @transform_3(%arg0: i32) -> (i32, i32, i32) {
    %c0_i32 = arith.constant 0 : i32
    %c0_i32_0 = arith.constant 0 : i32
    %c0_i32_1 = arith.constant 0 : i32
    return %arg0, %c0_i32, %c0_i32_0 : i32, i32, i32
  }
}

module attributes {stable_mosaic.version = 11 : i64} {
  func.func @_conv2_to_6_kernel(%arg0: i32, %arg1: memref<1x4x25x150xbf16, #tpu.memory_space<vmem>>, %arg2: memref<150x16xbf16, #tpu.memory_space<vmem>>, %arg3: memref<1x16xf32, #tpu.memory_space<vmem>>, %arg4: memref<9x25x25xbf16, #tpu.memory_space<vmem>>, %arg5: memref<9x16x32xbf16, #tpu.memory_space<vmem>>, %arg6: memref<1x32xf32, #tpu.memory_space<vmem>>, %arg7: memref<9x32x64xbf16, #tpu.memory_space<vmem>>, %arg8: memref<1x64xf32, #tpu.memory_space<vmem>>, %arg9: memref<9x64x128xbf16, #tpu.memory_space<vmem>>, %arg10: memref<1x128xf32, #tpu.memory_space<vmem>>, %arg11: memref<9x128x256xbf16, #tpu.memory_space<vmem>>, %arg12: memref<1x256xf32, #tpu.memory_space<vmem>>, %arg13: memref<1x25x256xf32, #tpu.memory_space<vmem>>) attributes {dimension_semantics = [#tpu.dimension_semantics<parallel>], iteration_bounds = array<i64: 2>, scalar_prefetch = 0 : i64, scratch_operands = 0 : i64, tpu.core_type = #tpu.core_type<tc>, window_params = [{transform_indices = @transform_0, window_bounds = array<i64: 1, 4, 25, 150>}, {pipeline_mode = #tpu.pipeline_mode<synchronous>, transform_indices = @transform_1, window_bounds = array<i64: 150, 16>}, {pipeline_mode = #tpu.pipeline_mode<synchronous>, transform_indices = @transform_2, window_bounds = array<i64: 1, 16>}, {pipeline_mode = #tpu.pipeline_mode<synchronous>, transform_indices = @transform_3, window_bounds = array<i64: 9, 25, 25>}, {pipeline_mode = #tpu.pipeline_mode<synchronous>, transform_indices = @transform_4, window_bounds = array<i64: 9, 16, 32>}, {pipeline_mode = #tpu.pipeline_mode<synchronous>, transform_indices = @transform_5, window_bounds = array<i64: 1, 32>}, {pipeline_mode = #tpu.pipeline_mode<synchronous>, transform_indices = @transform_6, window_bounds = array<i64: 9, 32, 64>}, {pipeline_mode = #tpu.pipeline_mode<synchronous>, transform_indices = @transform_7, window_bounds = array<i64: 1, 64>}, {pipeline_mode = #tpu.pipeline_mode<synchronous>, transform_indices = @transform_8, window_bounds = array<i64: 9, 64, 128>}, {pipeline_mode = #tpu.pipeline_mode<synchronous>, transform_indices = @transform_9, window_bounds = array<i64: 1, 128>}, {pipeline_mode = #tpu.pipeline_mode<synchronous>, transform_indices = @transform_10, window_bounds = array<i64: 9, 128, 256>}, {pipeline_mode = #tpu.pipeline_mode<synchronous>, transform_indices = @transform_11, window_bounds = array<i64: 1, 256>}, {transform_indices = @transform_12, window_bounds = array<i64: 1, 25, 256>}]} {
    %c0 = arith.constant 0 : index
    %c0_0 = arith.constant 0 : index
    %0 = vector.load %arg2[%c0, %c0_0] : memref<150x16xbf16, #tpu.memory_space<vmem>>, vector<150x16xbf16>
    %c0_1 = arith.constant 0 : index
    %c0_2 = arith.constant 0 : index
    %1 = vector.load %arg3[%c0_1, %c0_2] : memref<1x16xf32, #tpu.memory_space<vmem>>, vector<1x16xf32>
    %c0_3 = arith.constant 0 : index
    %c0_4 = arith.constant 0 : index
    %c0_5 = arith.constant 0 : index
    %c0_6 = arith.constant 0 : index
    %2 = vector.load %arg1[%c0_3, %c0_4, %c0_5, %c0_6] : memref<1x4x25x150xbf16, #tpu.memory_space<vmem>>, vector<1x1x25x150xbf16>
    %3 = vector.shape_cast %2 : vector<1x1x25x150xbf16> to vector<25x150xbf16>
    %cst = arith.constant dense<0.000000e+00> : vector<25x16xf32>
    %4 = tpu.matmul %3, %0, %cst {dimension_numbers = #tpu.dot_dimension_numbers<[1], [0], [0], [1], [0, 0, 1, 1], [], []>} : vector<25x150xbf16>, vector<150x16xbf16>, vector<25x16xf32> -> vector<25x16xf32>
    %5 = vector.broadcast %1 : vector<1x16xf32> to vector<25x16xf32>
    %6 = arith.addf %4, %5 : vector<25x16xf32>
    %cst_7 = arith.constant 0.000000e+00 : f32
    %7 = vector.broadcast %cst_7 : f32 to vector<25x16xf32>
    %8 = arith.maximumf %6, %7 : vector<25x16xf32>
    %c0_8 = arith.constant 0 : index
    %c1 = arith.constant 1 : index
    %c0_9 = arith.constant 0 : index
    %c0_10 = arith.constant 0 : index
    %9 = vector.load %arg1[%c0_8, %c1, %c0_9, %c0_10] : memref<1x4x25x150xbf16, #tpu.memory_space<vmem>>, vector<1x1x25x150xbf16>
    %10 = vector.shape_cast %9 : vector<1x1x25x150xbf16> to vector<25x150xbf16>
    %cst_11 = arith.constant dense<0.000000e+00> : vector<25x16xf32>
    %11 = tpu.matmul %10, %0, %cst_11 {dimension_numbers = #tpu.dot_dimension_numbers<[1], [0], [0], [1], [0, 0, 1, 1], [], []>} : vector<25x150xbf16>, vector<150x16xbf16>, vector<25x16xf32> -> vector<25x16xf32>
    %12 = vector.broadcast %1 : vector<1x16xf32> to vector<25x16xf32>
    %13 = arith.addf %11, %12 : vector<25x16xf32>
    %cst_12 = arith.constant 0.000000e+00 : f32
    %14 = vector.broadcast %cst_12 : f32 to vector<25x16xf32>
    %15 = arith.maximumf %13, %14 : vector<25x16xf32>
    %16 = arith.maximumf %8, %15 : vector<25x16xf32>
    %c0_13 = arith.constant 0 : index
    %c2 = arith.constant 2 : index
    %c0_14 = arith.constant 0 : index
    %c0_15 = arith.constant 0 : index
    %17 = vector.load %arg1[%c0_13, %c2, %c0_14, %c0_15] : memref<1x4x25x150xbf16, #tpu.memory_space<vmem>>, vector<1x1x25x150xbf16>
    %18 = vector.shape_cast %17 : vector<1x1x25x150xbf16> to vector<25x150xbf16>
    %cst_16 = arith.constant dense<0.000000e+00> : vector<25x16xf32>
    %19 = tpu.matmul %18, %0, %cst_16 {dimension_numbers = #tpu.dot_dimension_numbers<[1], [0], [0], [1], [0, 0, 1, 1], [], []>} : vector<25x150xbf16>, vector<150x16xbf16>, vector<25x16xf32> -> vector<25x16xf32>
    %20 = vector.broadcast %1 : vector<1x16xf32> to vector<25x16xf32>
    %21 = arith.addf %19, %20 : vector<25x16xf32>
    %cst_17 = arith.constant 0.000000e+00 : f32
    %22 = vector.broadcast %cst_17 : f32 to vector<25x16xf32>
    %23 = arith.maximumf %21, %22 : vector<25x16xf32>
    %24 = arith.maximumf %16, %23 : vector<25x16xf32>
    %c0_18 = arith.constant 0 : index
    %c3 = arith.constant 3 : index
    %c0_19 = arith.constant 0 : index
    %c0_20 = arith.constant 0 : index
    %25 = vector.load %arg1[%c0_18, %c3, %c0_19, %c0_20] : memref<1x4x25x150xbf16, #tpu.memory_space<vmem>>, vector<1x1x25x150xbf16>
    %26 = vector.shape_cast %25 : vector<1x1x25x150xbf16> to vector<25x150xbf16>
    %cst_21 = arith.constant dense<0.000000e+00> : vector<25x16xf32>
    %27 = tpu.matmul %26, %0, %cst_21 {dimension_numbers = #tpu.dot_dimension_numbers<[1], [0], [0], [1], [0, 0, 1, 1], [], []>} : vector<25x150xbf16>, vector<150x16xbf16>, vector<25x16xf32> -> vector<25x16xf32>
    %28 = vector.broadcast %1 : vector<1x16xf32> to vector<25x16xf32>
    %29 = arith.addf %27, %28 : vector<25x16xf32>
    %cst_22 = arith.constant 0.000000e+00 : f32
    %30 = vector.broadcast %cst_22 : f32 to vector<25x16xf32>
    %31 = arith.maximumf %29, %30 : vector<25x16xf32>
    %32 = arith.maximumf %24, %31 : vector<25x16xf32>
    %33 = arith.truncf %32 : vector<25x16xf32> to vector<25x16xbf16>
    %c0_23 = arith.constant 0 : index
    %c0_24 = arith.constant 0 : index
    %34 = vector.load %arg6[%c0_23, %c0_24] : memref<1x32xf32, #tpu.memory_space<vmem>>, vector<1x32xf32>
    %cst_25 = arith.constant 0.000000e+00 : f32
    %35 = vector.broadcast %cst_25 : f32 to vector<25x32xf32>
    %c0_26 = arith.constant 0 : index
    %c0_27 = arith.constant 0 : index
    %c0_28 = arith.constant 0 : index
    %36 = vector.load %arg4[%c0_26, %c0_27, %c0_28] : memref<9x25x25xbf16, #tpu.memory_space<vmem>>, vector<1x25x25xbf16>
    %37 = vector.shape_cast %36 : vector<1x25x25xbf16> to vector<25x25xbf16>
    %cst_29 = arith.constant dense<0.000000e+00> : vector<25x16xf32>
    %38 = tpu.matmul %37, %33, %cst_29 {dimension_numbers = #tpu.dot_dimension_numbers<[1], [0], [0], [1], [0, 0, 1, 1], [], []>} : vector<25x25xbf16>, vector<25x16xbf16>, vector<25x16xf32> -> vector<25x16xf32>
    %39 = arith.truncf %38 : vector<25x16xf32> to vector<25x16xbf16>
    %c0_30 = arith.constant 0 : index
    %c0_31 = arith.constant 0 : index
    %c0_32 = arith.constant 0 : index
    %40 = vector.load %arg5[%c0_30, %c0_31, %c0_32] : memref<9x16x32xbf16, #tpu.memory_space<vmem>>, vector<1x16x32xbf16>
    %41 = vector.shape_cast %40 : vector<1x16x32xbf16> to vector<16x32xbf16>
    %cst_33 = arith.constant dense<0.000000e+00> : vector<25x32xf32>
    %42 = tpu.matmul %39, %41, %cst_33 {dimension_numbers = #tpu.dot_dimension_numbers<[1], [0], [0], [1], [0, 0, 1, 1], [], []>} : vector<25x16xbf16>, vector<16x32xbf16>, vector<25x32xf32> -> vector<25x32xf32>
    %43 = arith.addf %35, %42 : vector<25x32xf32>
    %c1_34 = arith.constant 1 : index
    %c0_35 = arith.constant 0 : index
    %c0_36 = arith.constant 0 : index
    %44 = vector.load %arg4[%c1_34, %c0_35, %c0_36] : memref<9x25x25xbf16, #tpu.memory_space<vmem>>, vector<1x25x25xbf16>
    %45 = vector.shape_cast %44 : vector<1x25x25xbf16> to vector<25x25xbf16>
    %cst_37 = arith.constant dense<0.000000e+00> : vector<25x16xf32>
    %46 = tpu.matmul %45, %33, %cst_37 {dimension_numbers = #tpu.dot_dimension_numbers<[1], [0], [0], [1], [0, 0, 1, 1], [], []>} : vector<25x25xbf16>, vector<25x16xbf16>, vector<25x16xf32> -> vector<25x16xf32>
    %47 = arith.truncf %46 : vector<25x16xf32> to vector<25x16xbf16>
    %c1_38 = arith.constant 1 : index
    %c0_39 = arith.constant 0 : index
    %c0_40 = arith.constant 0 : index
    %48 = vector.load %arg5[%c1_38, %c0_39, %c0_40] : memref<9x16x32xbf16, #tpu.memory_space<vmem>>, vector<1x16x32xbf16>
    %49 = vector.shape_cast %48 : vector<1x16x32xbf16> to vector<16x32xbf16>
    %cst_41 = arith.constant dense<0.000000e+00> : vector<25x32xf32>
    %50 = tpu.matmul %47, %49, %cst_41 {dimension_numbers = #tpu.dot_dimension_numbers<[1], [0], [0], [1], [0, 0, 1, 1], [], []>} : vector<25x16xbf16>, vector<16x32xbf16>, vector<25x32xf32> -> vector<25x32xf32>
    %51 = arith.addf %43, %50 : vector<25x32xf32>
    %c2_42 = arith.constant 2 : index
    %c0_43 = arith.constant 0 : index
    %c0_44 = arith.constant 0 : index
    %52 = vector.load %arg4[%c2_42, %c0_43, %c0_44] : memref<9x25x25xbf16, #tpu.memory_space<vmem>>, vector<1x25x25xbf16>
    %53 = vector.shape_cast %52 : vector<1x25x25xbf16> to vector<25x25xbf16>
    %cst_45 = arith.constant dense<0.000000e+00> : vector<25x16xf32>
    %54 = tpu.matmul %53, %33, %cst_45 {dimension_numbers = #tpu.dot_dimension_numbers<[1], [0], [0], [1], [0, 0, 1, 1], [], []>} : vector<25x25xbf16>, vector<25x16xbf16>, vector<25x16xf32> -> vector<25x16xf32>
    %55 = arith.truncf %54 : vector<25x16xf32> to vector<25x16xbf16>
    %c2_46 = arith.constant 2 : index
    %c0_47 = arith.constant 0 : index
    %c0_48 = arith.constant 0 : index
    %56 = vector.load %arg5[%c2_46, %c0_47, %c0_48] : memref<9x16x32xbf16, #tpu.memory_space<vmem>>, vector<1x16x32xbf16>
    %57 = vector.shape_cast %56 : vector<1x16x32xbf16> to vector<16x32xbf16>
    %cst_49 = arith.constant dense<0.000000e+00> : vector<25x32xf32>
    %58 = tpu.matmul %55, %57, %cst_49 {dimension_numbers = #tpu.dot_dimension_numbers<[1], [0], [0], [1], [0, 0, 1, 1], [], []>} : vector<25x16xbf16>, vector<16x32xbf16>, vector<25x32xf32> -> vector<25x32xf32>
    %59 = arith.addf %51, %58 : vector<25x32xf32>
    %c3_50 = arith.constant 3 : index
    %c0_51 = arith.constant 0 : index
    %c0_52 = arith.constant 0 : index
    %60 = vector.load %arg4[%c3_50, %c0_51, %c0_52] : memref<9x25x25xbf16, #tpu.memory_space<vmem>>, vector<1x25x25xbf16>
    %61 = vector.shape_cast %60 : vector<1x25x25xbf16> to vector<25x25xbf16>
    %cst_53 = arith.constant dense<0.000000e+00> : vector<25x16xf32>
    %62 = tpu.matmul %61, %33, %cst_53 {dimension_numbers = #tpu.dot_dimension_numbers<[1], [0], [0], [1], [0, 0, 1, 1], [], []>} : vector<25x25xbf16>, vector<25x16xbf16>, vector<25x16xf32> -> vector<25x16xf32>
    %63 = arith.truncf %62 : vector<25x16xf32> to vector<25x16xbf16>
    %c3_54 = arith.constant 3 : index
    %c0_55 = arith.constant 0 : index
    %c0_56 = arith.constant 0 : index
    %64 = vector.load %arg5[%c3_54, %c0_55, %c0_56] : memref<9x16x32xbf16, #tpu.memory_space<vmem>>, vector<1x16x32xbf16>
    %65 = vector.shape_cast %64 : vector<1x16x32xbf16> to vector<16x32xbf16>
    %cst_57 = arith.constant dense<0.000000e+00> : vector<25x32xf32>
    %66 = tpu.matmul %63, %65, %cst_57 {dimension_numbers = #tpu.dot_dimension_numbers<[1], [0], [0], [1], [0, 0, 1, 1], [], []>} : vector<25x16xbf16>, vector<16x32xbf16>, vector<25x32xf32> -> vector<25x32xf32>
    %67 = arith.addf %59, %66 : vector<25x32xf32>
    %c4 = arith.constant 4 : index
    %c0_58 = arith.constant 0 : index
    %c0_59 = arith.constant 0 : index
    %68 = vector.load %arg4[%c4, %c0_58, %c0_59] : memref<9x25x25xbf16, #tpu.memory_space<vmem>>, vector<1x25x25xbf16>
    %69 = vector.shape_cast %68 : vector<1x25x25xbf16> to vector<25x25xbf16>
    %cst_60 = arith.constant dense<0.000000e+00> : vector<25x16xf32>
    %70 = tpu.matmul %69, %33, %cst_60 {dimension_numbers = #tpu.dot_dimension_numbers<[1], [0], [0], [1], [0, 0, 1, 1], [], []>} : vector<25x25xbf16>, vector<25x16xbf16>, vector<25x16xf32> -> vector<25x16xf32>
    %71 = arith.truncf %70 : vector<25x16xf32> to vector<25x16xbf16>
    %c4_61 = arith.constant 4 : index
    %c0_62 = arith.constant 0 : index
    %c0_63 = arith.constant 0 : index
    %72 = vector.load %arg5[%c4_61, %c0_62, %c0_63] : memref<9x16x32xbf16, #tpu.memory_space<vmem>>, vector<1x16x32xbf16>
    %73 = vector.shape_cast %72 : vector<1x16x32xbf16> to vector<16x32xbf16>
    %cst_64 = arith.constant dense<0.000000e+00> : vector<25x32xf32>
    %74 = tpu.matmul %71, %73, %cst_64 {dimension_numbers = #tpu.dot_dimension_numbers<[1], [0], [0], [1], [0, 0, 1, 1], [], []>} : vector<25x16xbf16>, vector<16x32xbf16>, vector<25x32xf32> -> vector<25x32xf32>
    %75 = arith.addf %67, %74 : vector<25x32xf32>
    %c5 = arith.constant 5 : index
    %c0_65 = arith.constant 0 : index
    %c0_66 = arith.constant 0 : index
    %76 = vector.load %arg4[%c5, %c0_65, %c0_66] : memref<9x25x25xbf16, #tpu.memory_space<vmem>>, vector<1x25x25xbf16>
    %77 = vector.shape_cast %76 : vector<1x25x25xbf16> to vector<25x25xbf16>
    %cst_67 = arith.constant dense<0.000000e+00> : vector<25x16xf32>
    %78 = tpu.matmul %77, %33, %cst_67 {dimension_numbers = #tpu.dot_dimension_numbers<[1], [0], [0], [1], [0, 0, 1, 1], [], []>} : vector<25x25xbf16>, vector<25x16xbf16>, vector<25x16xf32> -> vector<25x16xf32>
    %79 = arith.truncf %78 : vector<25x16xf32> to vector<25x16xbf16>
    %c5_68 = arith.constant 5 : index
    %c0_69 = arith.constant 0 : index
    %c0_70 = arith.constant 0 : index
    %80 = vector.load %arg5[%c5_68, %c0_69, %c0_70] : memref<9x16x32xbf16, #tpu.memory_space<vmem>>, vector<1x16x32xbf16>
    %81 = vector.shape_cast %80 : vector<1x16x32xbf16> to vector<16x32xbf16>
    %cst_71 = arith.constant dense<0.000000e+00> : vector<25x32xf32>
    %82 = tpu.matmul %79, %81, %cst_71 {dimension_numbers = #tpu.dot_dimension_numbers<[1], [0], [0], [1], [0, 0, 1, 1], [], []>} : vector<25x16xbf16>, vector<16x32xbf16>, vector<25x32xf32> -> vector<25x32xf32>
    %83 = arith.addf %75, %82 : vector<25x32xf32>
    %c6 = arith.constant 6 : index
    %c0_72 = arith.constant 0 : index
    %c0_73 = arith.constant 0 : index
    %84 = vector.load %arg4[%c6, %c0_72, %c0_73] : memref<9x25x25xbf16, #tpu.memory_space<vmem>>, vector<1x25x25xbf16>
    %85 = vector.shape_cast %84 : vector<1x25x25xbf16> to vector<25x25xbf16>
    %cst_74 = arith.constant dense<0.000000e+00> : vector<25x16xf32>
    %86 = tpu.matmul %85, %33, %cst_74 {dimension_numbers = #tpu.dot_dimension_numbers<[1], [0], [0], [1], [0, 0, 1, 1], [], []>} : vector<25x25xbf16>, vector<25x16xbf16>, vector<25x16xf32> -> vector<25x16xf32>
    %87 = arith.truncf %86 : vector<25x16xf32> to vector<25x16xbf16>
    %c6_75 = arith.constant 6 : index
    %c0_76 = arith.constant 0 : index
    %c0_77 = arith.constant 0 : index
    %88 = vector.load %arg5[%c6_75, %c0_76, %c0_77] : memref<9x16x32xbf16, #tpu.memory_space<vmem>>, vector<1x16x32xbf16>
    %89 = vector.shape_cast %88 : vector<1x16x32xbf16> to vector<16x32xbf16>
    %cst_78 = arith.constant dense<0.000000e+00> : vector<25x32xf32>
    %90 = tpu.matmul %87, %89, %cst_78 {dimension_numbers = #tpu.dot_dimension_numbers<[1], [0], [0], [1], [0, 0, 1, 1], [], []>} : vector<25x16xbf16>, vector<16x32xbf16>, vector<25x32xf32> -> vector<25x32xf32>
    %91 = arith.addf %83, %90 : vector<25x32xf32>
    %c7 = arith.constant 7 : index
    %c0_79 = arith.constant 0 : index
    %c0_80 = arith.constant 0 : index
    %92 = vector.load %arg4[%c7, %c0_79, %c0_80] : memref<9x25x25xbf16, #tpu.memory_space<vmem>>, vector<1x25x25xbf16>
    %93 = vector.shape_cast %92 : vector<1x25x25xbf16> to vector<25x25xbf16>
    %cst_81 = arith.constant dense<0.000000e+00> : vector<25x16xf32>
    %94 = tpu.matmul %93, %33, %cst_81 {dimension_numbers = #tpu.dot_dimension_numbers<[1], [0], [0], [1], [0, 0, 1, 1], [], []>} : vector<25x25xbf16>, vector<25x16xbf16>, vector<25x16xf32> -> vector<25x16xf32>
    %95 = arith.truncf %94 : vector<25x16xf32> to vector<25x16xbf16>
    %c7_82 = arith.constant 7 : index
    %c0_83 = arith.constant 0 : index
    %c0_84 = arith.constant 0 : index
    %96 = vector.load %arg5[%c7_82, %c0_83, %c0_84] : memref<9x16x32xbf16, #tpu.memory_space<vmem>>, vector<1x16x32xbf16>
    %97 = vector.shape_cast %96 : vector<1x16x32xbf16> to vector<16x32xbf16>
    %cst_85 = arith.constant dense<0.000000e+00> : vector<25x32xf32>
    %98 = tpu.matmul %95, %97, %cst_85 {dimension_numbers = #tpu.dot_dimension_numbers<[1], [0], [0], [1], [0, 0, 1, 1], [], []>} : vector<25x16xbf16>, vector<16x32xbf16>, vector<25x32xf32> -> vector<25x32xf32>
    %99 = arith.addf %91, %98 : vector<25x32xf32>
    %c8 = arith.constant 8 : index
    %c0_86 = arith.constant 0 : index
    %c0_87 = arith.constant 0 : index
    %100 = vector.load %arg4[%c8, %c0_86, %c0_87] : memref<9x25x25xbf16, #tpu.memory_space<vmem>>, vector<1x25x25xbf16>
    %101 = vector.shape_cast %100 : vector<1x25x25xbf16> to vector<25x25xbf16>
    %cst_88 = arith.constant dense<0.000000e+00> : vector<25x16xf32>
    %102 = tpu.matmul %101, %33, %cst_88 {dimension_numbers = #tpu.dot_dimension_numbers<[1], [0], [0], [1], [0, 0, 1, 1], [], []>} : vector<25x25xbf16>, vector<25x16xbf16>, vector<25x16xf32> -> vector<25x16xf32>
    %103 = arith.truncf %102 : vector<25x16xf32> to vector<25x16xbf16>
    %c8_89 = arith.constant 8 : index
    %c0_90 = arith.constant 0 : index
    %c0_91 = arith.constant 0 : index
    %104 = vector.load %arg5[%c8_89, %c0_90, %c0_91] : memref<9x16x32xbf16, #tpu.memory_space<vmem>>, vector<1x16x32xbf16>
    %105 = vector.shape_cast %104 : vector<1x16x32xbf16> to vector<16x32xbf16>
    %cst_92 = arith.constant dense<0.000000e+00> : vector<25x32xf32>
    %106 = tpu.matmul %103, %105, %cst_92 {dimension_numbers = #tpu.dot_dimension_numbers<[1], [0], [0], [1], [0, 0, 1, 1], [], []>} : vector<25x16xbf16>, vector<16x32xbf16>, vector<25x32xf32> -> vector<25x32xf32>
    %107 = arith.addf %99, %106 : vector<25x32xf32>
    %108 = vector.broadcast %34 : vector<1x32xf32> to vector<25x32xf32>
    %109 = arith.addf %107, %108 : vector<25x32xf32>
    %cst_93 = arith.constant 0.000000e+00 : f32
    %110 = vector.broadcast %cst_93 : f32 to vector<25x32xf32>
    %111 = arith.maximumf %109, %110 : vector<25x32xf32>
    %112 = arith.truncf %111 : vector<25x32xf32> to vector<25x32xbf16>
    %c0_94 = arith.constant 0 : index
    %c0_95 = arith.constant 0 : index
    %113 = vector.load %arg8[%c0_94, %c0_95] : memref<1x64xf32, #tpu.memory_space<vmem>>, vector<1x64xf32>
    %cst_96 = arith.constant 0.000000e+00 : f32
    %114 = vector.broadcast %cst_96 : f32 to vector<25x64xf32>
    %c0_97 = arith.constant 0 : index
    %c0_98 = arith.constant 0 : index
    %c0_99 = arith.constant 0 : index
    %115 = vector.load %arg4[%c0_97, %c0_98, %c0_99] : memref<9x25x25xbf16, #tpu.memory_space<vmem>>, vector<1x25x25xbf16>
    %116 = vector.shape_cast %115 : vector<1x25x25xbf16> to vector<25x25xbf16>
    %cst_100 = arith.constant dense<0.000000e+00> : vector<25x32xf32>
    %117 = tpu.matmul %116, %112, %cst_100 {dimension_numbers = #tpu.dot_dimension_numbers<[1], [0], [0], [1], [0, 0, 1, 1], [], []>} : vector<25x25xbf16>, vector<25x32xbf16>, vector<25x32xf32> -> vector<25x32xf32>
    %118 = arith.truncf %117 : vector<25x32xf32> to vector<25x32xbf16>
    %c0_101 = arith.constant 0 : index
    %c0_102 = arith.constant 0 : index
    %c0_103 = arith.constant 0 : index
    %119 = vector.load %arg7[%c0_101, %c0_102, %c0_103] : memref<9x32x64xbf16, #tpu.memory_space<vmem>>, vector<1x32x64xbf16>
    %120 = vector.shape_cast %119 : vector<1x32x64xbf16> to vector<32x64xbf16>
    %cst_104 = arith.constant dense<0.000000e+00> : vector<25x64xf32>
    %121 = tpu.matmul %118, %120, %cst_104 {dimension_numbers = #tpu.dot_dimension_numbers<[1], [0], [0], [1], [0, 0, 1, 1], [], []>} : vector<25x32xbf16>, vector<32x64xbf16>, vector<25x64xf32> -> vector<25x64xf32>
    %122 = arith.addf %114, %121 : vector<25x64xf32>
    %c1_105 = arith.constant 1 : index
    %c0_106 = arith.constant 0 : index
    %c0_107 = arith.constant 0 : index
    %123 = vector.load %arg4[%c1_105, %c0_106, %c0_107] : memref<9x25x25xbf16, #tpu.memory_space<vmem>>, vector<1x25x25xbf16>
    %124 = vector.shape_cast %123 : vector<1x25x25xbf16> to vector<25x25xbf16>
    %cst_108 = arith.constant dense<0.000000e+00> : vector<25x32xf32>
    %125 = tpu.matmul %124, %112, %cst_108 {dimension_numbers = #tpu.dot_dimension_numbers<[1], [0], [0], [1], [0, 0, 1, 1], [], []>} : vector<25x25xbf16>, vector<25x32xbf16>, vector<25x32xf32> -> vector<25x32xf32>
    %126 = arith.truncf %125 : vector<25x32xf32> to vector<25x32xbf16>
    %c1_109 = arith.constant 1 : index
    %c0_110 = arith.constant 0 : index
    %c0_111 = arith.constant 0 : index
    %127 = vector.load %arg7[%c1_109, %c0_110, %c0_111] : memref<9x32x64xbf16, #tpu.memory_space<vmem>>, vector<1x32x64xbf16>
    %128 = vector.shape_cast %127 : vector<1x32x64xbf16> to vector<32x64xbf16>
    %cst_112 = arith.constant dense<0.000000e+00> : vector<25x64xf32>
    %129 = tpu.matmul %126, %128, %cst_112 {dimension_numbers = #tpu.dot_dimension_numbers<[1], [0], [0], [1], [0, 0, 1, 1], [], []>} : vector<25x32xbf16>, vector<32x64xbf16>, vector<25x64xf32> -> vector<25x64xf32>
    %130 = arith.addf %122, %129 : vector<25x64xf32>
    %c2_113 = arith.constant 2 : index
    %c0_114 = arith.constant 0 : index
    %c0_115 = arith.constant 0 : index
    %131 = vector.load %arg4[%c2_113, %c0_114, %c0_115] : memref<9x25x25xbf16, #tpu.memory_space<vmem>>, vector<1x25x25xbf16>
    %132 = vector.shape_cast %131 : vector<1x25x25xbf16> to vector<25x25xbf16>
    %cst_116 = arith.constant dense<0.000000e+00> : vector<25x32xf32>
    %133 = tpu.matmul %132, %112, %cst_116 {dimension_numbers = #tpu.dot_dimension_numbers<[1], [0], [0], [1], [0, 0, 1, 1], [], []>} : vector<25x25xbf16>, vector<25x32xbf16>, vector<25x32xf32> -> vector<25x32xf32>
    %134 = arith.truncf %133 : vector<25x32xf32> to vector<25x32xbf16>
    %c2_117 = arith.constant 2 : index
    %c0_118 = arith.constant 0 : index
    %c0_119 = arith.constant 0 : index
    %135 = vector.load %arg7[%c2_117, %c0_118, %c0_119] : memref<9x32x64xbf16, #tpu.memory_space<vmem>>, vector<1x32x64xbf16>
    %136 = vector.shape_cast %135 : vector<1x32x64xbf16> to vector<32x64xbf16>
    %cst_120 = arith.constant dense<0.000000e+00> : vector<25x64xf32>
    %137 = tpu.matmul %134, %136, %cst_120 {dimension_numbers = #tpu.dot_dimension_numbers<[1], [0], [0], [1], [0, 0, 1, 1], [], []>} : vector<25x32xbf16>, vector<32x64xbf16>, vector<25x64xf32> -> vector<25x64xf32>
    %138 = arith.addf %130, %137 : vector<25x64xf32>
    %c3_121 = arith.constant 3 : index
    %c0_122 = arith.constant 0 : index
    %c0_123 = arith.constant 0 : index
    %139 = vector.load %arg4[%c3_121, %c0_122, %c0_123] : memref<9x25x25xbf16, #tpu.memory_space<vmem>>, vector<1x25x25xbf16>
    %140 = vector.shape_cast %139 : vector<1x25x25xbf16> to vector<25x25xbf16>
    %cst_124 = arith.constant dense<0.000000e+00> : vector<25x32xf32>
    %141 = tpu.matmul %140, %112, %cst_124 {dimension_numbers = #tpu.dot_dimension_numbers<[1], [0], [0], [1], [0, 0, 1, 1], [], []>} : vector<25x25xbf16>, vector<25x32xbf16>, vector<25x32xf32> -> vector<25x32xf32>
    %142 = arith.truncf %141 : vector<25x32xf32> to vector<25x32xbf16>
    %c3_125 = arith.constant 3 : index
    %c0_126 = arith.constant 0 : index
    %c0_127 = arith.constant 0 : index
    %143 = vector.load %arg7[%c3_125, %c0_126, %c0_127] : memref<9x32x64xbf16, #tpu.memory_space<vmem>>, vector<1x32x64xbf16>
    %144 = vector.shape_cast %143 : vector<1x32x64xbf16> to vector<32x64xbf16>
    %cst_128 = arith.constant dense<0.000000e+00> : vector<25x64xf32>
    %145 = tpu.matmul %142, %144, %cst_128 {dimension_numbers = #tpu.dot_dimension_numbers<[1], [0], [0], [1], [0, 0, 1, 1], [], []>} : vector<25x32xbf16>, vector<32x64xbf16>, vector<25x64xf32> -> vector<25x64xf32>
    %146 = arith.addf %138, %145 : vector<25x64xf32>
    %c4_129 = arith.constant 4 : index
    %c0_130 = arith.constant 0 : index
    %c0_131 = arith.constant 0 : index
    %147 = vector.load %arg4[%c4_129, %c0_130, %c0_131] : memref<9x25x25xbf16, #tpu.memory_space<vmem>>, vector<1x25x25xbf16>
    %148 = vector.shape_cast %147 : vector<1x25x25xbf16> to vector<25x25xbf16>
    %cst_132 = arith.constant dense<0.000000e+00> : vector<25x32xf32>
    %149 = tpu.matmul %148, %112, %cst_132 {dimension_numbers = #tpu.dot_dimension_numbers<[1], [0], [0], [1], [0, 0, 1, 1], [], []>} : vector<25x25xbf16>, vector<25x32xbf16>, vector<25x32xf32> -> vector<25x32xf32>
    %150 = arith.truncf %149 : vector<25x32xf32> to vector<25x32xbf16>
    %c4_133 = arith.constant 4 : index
    %c0_134 = arith.constant 0 : index
    %c0_135 = arith.constant 0 : index
    %151 = vector.load %arg7[%c4_133, %c0_134, %c0_135] : memref<9x32x64xbf16, #tpu.memory_space<vmem>>, vector<1x32x64xbf16>
    %152 = vector.shape_cast %151 : vector<1x32x64xbf16> to vector<32x64xbf16>
    %cst_136 = arith.constant dense<0.000000e+00> : vector<25x64xf32>
    %153 = tpu.matmul %150, %152, %cst_136 {dimension_numbers = #tpu.dot_dimension_numbers<[1], [0], [0], [1], [0, 0, 1, 1], [], []>} : vector<25x32xbf16>, vector<32x64xbf16>, vector<25x64xf32> -> vector<25x64xf32>
    %154 = arith.addf %146, %153 : vector<25x64xf32>
    %c5_137 = arith.constant 5 : index
    %c0_138 = arith.constant 0 : index
    %c0_139 = arith.constant 0 : index
    %155 = vector.load %arg4[%c5_137, %c0_138, %c0_139] : memref<9x25x25xbf16, #tpu.memory_space<vmem>>, vector<1x25x25xbf16>
    %156 = vector.shape_cast %155 : vector<1x25x25xbf16> to vector<25x25xbf16>
    %cst_140 = arith.constant dense<0.000000e+00> : vector<25x32xf32>
    %157 = tpu.matmul %156, %112, %cst_140 {dimension_numbers = #tpu.dot_dimension_numbers<[1], [0], [0], [1], [0, 0, 1, 1], [], []>} : vector<25x25xbf16>, vector<25x32xbf16>, vector<25x32xf32> -> vector<25x32xf32>
    %158 = arith.truncf %157 : vector<25x32xf32> to vector<25x32xbf16>
    %c5_141 = arith.constant 5 : index
    %c0_142 = arith.constant 0 : index
    %c0_143 = arith.constant 0 : index
    %159 = vector.load %arg7[%c5_141, %c0_142, %c0_143] : memref<9x32x64xbf16, #tpu.memory_space<vmem>>, vector<1x32x64xbf16>
    %160 = vector.shape_cast %159 : vector<1x32x64xbf16> to vector<32x64xbf16>
    %cst_144 = arith.constant dense<0.000000e+00> : vector<25x64xf32>
    %161 = tpu.matmul %158, %160, %cst_144 {dimension_numbers = #tpu.dot_dimension_numbers<[1], [0], [0], [1], [0, 0, 1, 1], [], []>} : vector<25x32xbf16>, vector<32x64xbf16>, vector<25x64xf32> -> vector<25x64xf32>
    %162 = arith.addf %154, %161 : vector<25x64xf32>
    %c6_145 = arith.constant 6 : index
    %c0_146 = arith.constant 0 : index
    %c0_147 = arith.constant 0 : index
    %163 = vector.load %arg4[%c6_145, %c0_146, %c0_147] : memref<9x25x25xbf16, #tpu.memory_space<vmem>>, vector<1x25x25xbf16>
    %164 = vector.shape_cast %163 : vector<1x25x25xbf16> to vector<25x25xbf16>
    %cst_148 = arith.constant dense<0.000000e+00> : vector<25x32xf32>
    %165 = tpu.matmul %164, %112, %cst_148 {dimension_numbers = #tpu.dot_dimension_numbers<[1], [0], [0], [1], [0, 0, 1, 1], [], []>} : vector<25x25xbf16>, vector<25x32xbf16>, vector<25x32xf32> -> vector<25x32xf32>
    %166 = arith.truncf %165 : vector<25x32xf32> to vector<25x32xbf16>
    %c6_149 = arith.constant 6 : index
    %c0_150 = arith.constant 0 : index
    %c0_151 = arith.constant 0 : index
    %167 = vector.load %arg7[%c6_149, %c0_150, %c0_151] : memref<9x32x64xbf16, #tpu.memory_space<vmem>>, vector<1x32x64xbf16>
    %168 = vector.shape_cast %167 : vector<1x32x64xbf16> to vector<32x64xbf16>
    %cst_152 = arith.constant dense<0.000000e+00> : vector<25x64xf32>
    %169 = tpu.matmul %166, %168, %cst_152 {dimension_numbers = #tpu.dot_dimension_numbers<[1], [0], [0], [1], [0, 0, 1, 1], [], []>} : vector<25x32xbf16>, vector<32x64xbf16>, vector<25x64xf32> -> vector<25x64xf32>
    %170 = arith.addf %162, %169 : vector<25x64xf32>
    %c7_153 = arith.constant 7 : index
    %c0_154 = arith.constant 0 : index
    %c0_155 = arith.constant 0 : index
    %171 = vector.load %arg4[%c7_153, %c0_154, %c0_155] : memref<9x25x25xbf16, #tpu.memory_space<vmem>>, vector<1x25x25xbf16>
    %172 = vector.shape_cast %171 : vector<1x25x25xbf16> to vector<25x25xbf16>
    %cst_156 = arith.constant dense<0.000000e+00> : vector<25x32xf32>
    %173 = tpu.matmul %172, %112, %cst_156 {dimension_numbers = #tpu.dot_dimension_numbers<[1], [0], [0], [1], [0, 0, 1, 1], [], []>} : vector<25x25xbf16>, vector<25x32xbf16>, vector<25x32xf32> -> vector<25x32xf32>
    %174 = arith.truncf %173 : vector<25x32xf32> to vector<25x32xbf16>
    %c7_157 = arith.constant 7 : index
    %c0_158 = arith.constant 0 : index
    %c0_159 = arith.constant 0 : index
    %175 = vector.load %arg7[%c7_157, %c0_158, %c0_159] : memref<9x32x64xbf16, #tpu.memory_space<vmem>>, vector<1x32x64xbf16>
    %176 = vector.shape_cast %175 : vector<1x32x64xbf16> to vector<32x64xbf16>
    %cst_160 = arith.constant dense<0.000000e+00> : vector<25x64xf32>
    %177 = tpu.matmul %174, %176, %cst_160 {dimension_numbers = #tpu.dot_dimension_numbers<[1], [0], [0], [1], [0, 0, 1, 1], [], []>} : vector<25x32xbf16>, vector<32x64xbf16>, vector<25x64xf32> -> vector<25x64xf32>
    %178 = arith.addf %170, %177 : vector<25x64xf32>
    %c8_161 = arith.constant 8 : index
    %c0_162 = arith.constant 0 : index
    %c0_163 = arith.constant 0 : index
    %179 = vector.load %arg4[%c8_161, %c0_162, %c0_163] : memref<9x25x25xbf16, #tpu.memory_space<vmem>>, vector<1x25x25xbf16>
    %180 = vector.shape_cast %179 : vector<1x25x25xbf16> to vector<25x25xbf16>
    %cst_164 = arith.constant dense<0.000000e+00> : vector<25x32xf32>
    %181 = tpu.matmul %180, %112, %cst_164 {dimension_numbers = #tpu.dot_dimension_numbers<[1], [0], [0], [1], [0, 0, 1, 1], [], []>} : vector<25x25xbf16>, vector<25x32xbf16>, vector<25x32xf32> -> vector<25x32xf32>
    %182 = arith.truncf %181 : vector<25x32xf32> to vector<25x32xbf16>
    %c8_165 = arith.constant 8 : index
    %c0_166 = arith.constant 0 : index
    %c0_167 = arith.constant 0 : index
    %183 = vector.load %arg7[%c8_165, %c0_166, %c0_167] : memref<9x32x64xbf16, #tpu.memory_space<vmem>>, vector<1x32x64xbf16>
    %184 = vector.shape_cast %183 : vector<1x32x64xbf16> to vector<32x64xbf16>
    %cst_168 = arith.constant dense<0.000000e+00> : vector<25x64xf32>
    %185 = tpu.matmul %182, %184, %cst_168 {dimension_numbers = #tpu.dot_dimension_numbers<[1], [0], [0], [1], [0, 0, 1, 1], [], []>} : vector<25x32xbf16>, vector<32x64xbf16>, vector<25x64xf32> -> vector<25x64xf32>
    %186 = arith.addf %178, %185 : vector<25x64xf32>
    %187 = vector.broadcast %113 : vector<1x64xf32> to vector<25x64xf32>
    %188 = arith.addf %186, %187 : vector<25x64xf32>
    %cst_169 = arith.constant 0.000000e+00 : f32
    %189 = vector.broadcast %cst_169 : f32 to vector<25x64xf32>
    %190 = arith.maximumf %188, %189 : vector<25x64xf32>
    %191 = arith.truncf %190 : vector<25x64xf32> to vector<25x64xbf16>
    %c0_170 = arith.constant 0 : index
    %c0_171 = arith.constant 0 : index
    %192 = vector.load %arg10[%c0_170, %c0_171] : memref<1x128xf32, #tpu.memory_space<vmem>>, vector<1x128xf32>
    %cst_172 = arith.constant 0.000000e+00 : f32
    %193 = vector.broadcast %cst_172 : f32 to vector<25x128xf32>
    %c0_173 = arith.constant 0 : index
    %c0_174 = arith.constant 0 : index
    %c0_175 = arith.constant 0 : index
    %194 = vector.load %arg4[%c0_173, %c0_174, %c0_175] : memref<9x25x25xbf16, #tpu.memory_space<vmem>>, vector<1x25x25xbf16>
    %195 = vector.shape_cast %194 : vector<1x25x25xbf16> to vector<25x25xbf16>
    %cst_176 = arith.constant dense<0.000000e+00> : vector<25x64xf32>
    %196 = tpu.matmul %195, %191, %cst_176 {dimension_numbers = #tpu.dot_dimension_numbers<[1], [0], [0], [1], [0, 0, 1, 1], [], []>} : vector<25x25xbf16>, vector<25x64xbf16>, vector<25x64xf32> -> vector<25x64xf32>
    %197 = arith.truncf %196 : vector<25x64xf32> to vector<25x64xbf16>
    %c0_177 = arith.constant 0 : index
    %c0_178 = arith.constant 0 : index
    %c0_179 = arith.constant 0 : index
    %198 = vector.load %arg9[%c0_177, %c0_178, %c0_179] : memref<9x64x128xbf16, #tpu.memory_space<vmem>>, vector<1x64x128xbf16>
    %199 = vector.shape_cast %198 : vector<1x64x128xbf16> to vector<64x128xbf16>
    %cst_180 = arith.constant dense<0.000000e+00> : vector<25x128xf32>
    %200 = tpu.matmul %197, %199, %cst_180 {dimension_numbers = #tpu.dot_dimension_numbers<[1], [0], [0], [1], [0, 0, 1, 1], [], []>} : vector<25x64xbf16>, vector<64x128xbf16>, vector<25x128xf32> -> vector<25x128xf32>
    %201 = arith.addf %193, %200 : vector<25x128xf32>
    %c1_181 = arith.constant 1 : index
    %c0_182 = arith.constant 0 : index
    %c0_183 = arith.constant 0 : index
    %202 = vector.load %arg4[%c1_181, %c0_182, %c0_183] : memref<9x25x25xbf16, #tpu.memory_space<vmem>>, vector<1x25x25xbf16>
    %203 = vector.shape_cast %202 : vector<1x25x25xbf16> to vector<25x25xbf16>
    %cst_184 = arith.constant dense<0.000000e+00> : vector<25x64xf32>
    %204 = tpu.matmul %203, %191, %cst_184 {dimension_numbers = #tpu.dot_dimension_numbers<[1], [0], [0], [1], [0, 0, 1, 1], [], []>} : vector<25x25xbf16>, vector<25x64xbf16>, vector<25x64xf32> -> vector<25x64xf32>
    %205 = arith.truncf %204 : vector<25x64xf32> to vector<25x64xbf16>
    %c1_185 = arith.constant 1 : index
    %c0_186 = arith.constant 0 : index
    %c0_187 = arith.constant 0 : index
    %206 = vector.load %arg9[%c1_185, %c0_186, %c0_187] : memref<9x64x128xbf16, #tpu.memory_space<vmem>>, vector<1x64x128xbf16>
    %207 = vector.shape_cast %206 : vector<1x64x128xbf16> to vector<64x128xbf16>
    %cst_188 = arith.constant dense<0.000000e+00> : vector<25x128xf32>
    %208 = tpu.matmul %205, %207, %cst_188 {dimension_numbers = #tpu.dot_dimension_numbers<[1], [0], [0], [1], [0, 0, 1, 1], [], []>} : vector<25x64xbf16>, vector<64x128xbf16>, vector<25x128xf32> -> vector<25x128xf32>
    %209 = arith.addf %201, %208 : vector<25x128xf32>
    %c2_189 = arith.constant 2 : index
    %c0_190 = arith.constant 0 : index
    %c0_191 = arith.constant 0 : index
    %210 = vector.load %arg4[%c2_189, %c0_190, %c0_191] : memref<9x25x25xbf16, #tpu.memory_space<vmem>>, vector<1x25x25xbf16>
    %211 = vector.shape_cast %210 : vector<1x25x25xbf16> to vector<25x25xbf16>
    %cst_192 = arith.constant dense<0.000000e+00> : vector<25x64xf32>
    %212 = tpu.matmul %211, %191, %cst_192 {dimension_numbers = #tpu.dot_dimension_numbers<[1], [0], [0], [1], [0, 0, 1, 1], [], []>} : vector<25x25xbf16>, vector<25x64xbf16>, vector<25x64xf32> -> vector<25x64xf32>
    %213 = arith.truncf %212 : vector<25x64xf32> to vector<25x64xbf16>
    %c2_193 = arith.constant 2 : index
    %c0_194 = arith.constant 0 : index
    %c0_195 = arith.constant 0 : index
    %214 = vector.load %arg9[%c2_193, %c0_194, %c0_195] : memref<9x64x128xbf16, #tpu.memory_space<vmem>>, vector<1x64x128xbf16>
    %215 = vector.shape_cast %214 : vector<1x64x128xbf16> to vector<64x128xbf16>
    %cst_196 = arith.constant dense<0.000000e+00> : vector<25x128xf32>
    %216 = tpu.matmul %213, %215, %cst_196 {dimension_numbers = #tpu.dot_dimension_numbers<[1], [0], [0], [1], [0, 0, 1, 1], [], []>} : vector<25x64xbf16>, vector<64x128xbf16>, vector<25x128xf32> -> vector<25x128xf32>
    %217 = arith.addf %209, %216 : vector<25x128xf32>
    %c3_197 = arith.constant 3 : index
    %c0_198 = arith.constant 0 : index
    %c0_199 = arith.constant 0 : index
    %218 = vector.load %arg4[%c3_197, %c0_198, %c0_199] : memref<9x25x25xbf16, #tpu.memory_space<vmem>>, vector<1x25x25xbf16>
    %219 = vector.shape_cast %218 : vector<1x25x25xbf16> to vector<25x25xbf16>
    %cst_200 = arith.constant dense<0.000000e+00> : vector<25x64xf32>
    %220 = tpu.matmul %219, %191, %cst_200 {dimension_numbers = #tpu.dot_dimension_numbers<[1], [0], [0], [1], [0, 0, 1, 1], [], []>} : vector<25x25xbf16>, vector<25x64xbf16>, vector<25x64xf32> -> vector<25x64xf32>
    %221 = arith.truncf %220 : vector<25x64xf32> to vector<25x64xbf16>
    %c3_201 = arith.constant 3 : index
    %c0_202 = arith.constant 0 : index
    %c0_203 = arith.constant 0 : index
    %222 = vector.load %arg9[%c3_201, %c0_202, %c0_203] : memref<9x64x128xbf16, #tpu.memory_space<vmem>>, vector<1x64x128xbf16>
    %223 = vector.shape_cast %222 : vector<1x64x128xbf16> to vector<64x128xbf16>
    %cst_204 = arith.constant dense<0.000000e+00> : vector<25x128xf32>
    %224 = tpu.matmul %221, %223, %cst_204 {dimension_numbers = #tpu.dot_dimension_numbers<[1], [0], [0], [1], [0, 0, 1, 1], [], []>} : vector<25x64xbf16>, vector<64x128xbf16>, vector<25x128xf32> -> vector<25x128xf32>
    %225 = arith.addf %217, %224 : vector<25x128xf32>
    %c4_205 = arith.constant 4 : index
    %c0_206 = arith.constant 0 : index
    %c0_207 = arith.constant 0 : index
    %226 = vector.load %arg4[%c4_205, %c0_206, %c0_207] : memref<9x25x25xbf16, #tpu.memory_space<vmem>>, vector<1x25x25xbf16>
    %227 = vector.shape_cast %226 : vector<1x25x25xbf16> to vector<25x25xbf16>
    %cst_208 = arith.constant dense<0.000000e+00> : vector<25x64xf32>
    %228 = tpu.matmul %227, %191, %cst_208 {dimension_numbers = #tpu.dot_dimension_numbers<[1], [0], [0], [1], [0, 0, 1, 1], [], []>} : vector<25x25xbf16>, vector<25x64xbf16>, vector<25x64xf32> -> vector<25x64xf32>
    %229 = arith.truncf %228 : vector<25x64xf32> to vector<25x64xbf16>
    %c4_209 = arith.constant 4 : index
    %c0_210 = arith.constant 0 : index
    %c0_211 = arith.constant 0 : index
    %230 = vector.load %arg9[%c4_209, %c0_210, %c0_211] : memref<9x64x128xbf16, #tpu.memory_space<vmem>>, vector<1x64x128xbf16>
    %231 = vector.shape_cast %230 : vector<1x64x128xbf16> to vector<64x128xbf16>
    %cst_212 = arith.constant dense<0.000000e+00> : vector<25x128xf32>
    %232 = tpu.matmul %229, %231, %cst_212 {dimension_numbers = #tpu.dot_dimension_numbers<[1], [0], [0], [1], [0, 0, 1, 1], [], []>} : vector<25x64xbf16>, vector<64x128xbf16>, vector<25x128xf32> -> vector<25x128xf32>
    %233 = arith.addf %225, %232 : vector<25x128xf32>
    %c5_213 = arith.constant 5 : index
    %c0_214 = arith.constant 0 : index
    %c0_215 = arith.constant 0 : index
    %234 = vector.load %arg4[%c5_213, %c0_214, %c0_215] : memref<9x25x25xbf16, #tpu.memory_space<vmem>>, vector<1x25x25xbf16>
    %235 = vector.shape_cast %234 : vector<1x25x25xbf16> to vector<25x25xbf16>
    %cst_216 = arith.constant dense<0.000000e+00> : vector<25x64xf32>
    %236 = tpu.matmul %235, %191, %cst_216 {dimension_numbers = #tpu.dot_dimension_numbers<[1], [0], [0], [1], [0, 0, 1, 1], [], []>} : vector<25x25xbf16>, vector<25x64xbf16>, vector<25x64xf32> -> vector<25x64xf32>
    %237 = arith.truncf %236 : vector<25x64xf32> to vector<25x64xbf16>
    %c5_217 = arith.constant 5 : index
    %c0_218 = arith.constant 0 : index
    %c0_219 = arith.constant 0 : index
    %238 = vector.load %arg9[%c5_217, %c0_218, %c0_219] : memref<9x64x128xbf16, #tpu.memory_space<vmem>>, vector<1x64x128xbf16>
    %239 = vector.shape_cast %238 : vector<1x64x128xbf16> to vector<64x128xbf16>
    %cst_220 = arith.constant dense<0.000000e+00> : vector<25x128xf32>
    %240 = tpu.matmul %237, %239, %cst_220 {dimension_numbers = #tpu.dot_dimension_numbers<[1], [0], [0], [1], [0, 0, 1, 1], [], []>} : vector<25x64xbf16>, vector<64x128xbf16>, vector<25x128xf32> -> vector<25x128xf32>
    %241 = arith.addf %233, %240 : vector<25x128xf32>
    %c6_221 = arith.constant 6 : index
    %c0_222 = arith.constant 0 : index
    %c0_223 = arith.constant 0 : index
    %242 = vector.load %arg4[%c6_221, %c0_222, %c0_223] : memref<9x25x25xbf16, #tpu.memory_space<vmem>>, vector<1x25x25xbf16>
    %243 = vector.shape_cast %242 : vector<1x25x25xbf16> to vector<25x25xbf16>
    %cst_224 = arith.constant dense<0.000000e+00> : vector<25x64xf32>
    %244 = tpu.matmul %243, %191, %cst_224 {dimension_numbers = #tpu.dot_dimension_numbers<[1], [0], [0], [1], [0, 0, 1, 1], [], []>} : vector<25x25xbf16>, vector<25x64xbf16>, vector<25x64xf32> -> vector<25x64xf32>
    %245 = arith.truncf %244 : vector<25x64xf32> to vector<25x64xbf16>
    %c6_225 = arith.constant 6 : index
    %c0_226 = arith.constant 0 : index
    %c0_227 = arith.constant 0 : index
    %246 = vector.load %arg9[%c6_225, %c0_226, %c0_227] : memref<9x64x128xbf16, #tpu.memory_space<vmem>>, vector<1x64x128xbf16>
    %247 = vector.shape_cast %246 : vector<1x64x128xbf16> to vector<64x128xbf16>
    %cst_228 = arith.constant dense<0.000000e+00> : vector<25x128xf32>
    %248 = tpu.matmul %245, %247, %cst_228 {dimension_numbers = #tpu.dot_dimension_numbers<[1], [0], [0], [1], [0, 0, 1, 1], [], []>} : vector<25x64xbf16>, vector<64x128xbf16>, vector<25x128xf32> -> vector<25x128xf32>
    %249 = arith.addf %241, %248 : vector<25x128xf32>
    %c7_229 = arith.constant 7 : index
    %c0_230 = arith.constant 0 : index
    %c0_231 = arith.constant 0 : index
    %250 = vector.load %arg4[%c7_229, %c0_230, %c0_231] : memref<9x25x25xbf16, #tpu.memory_space<vmem>>, vector<1x25x25xbf16>
    %251 = vector.shape_cast %250 : vector<1x25x25xbf16> to vector<25x25xbf16>
    %cst_232 = arith.constant dense<0.000000e+00> : vector<25x64xf32>
    %252 = tpu.matmul %251, %191, %cst_232 {dimension_numbers = #tpu.dot_dimension_numbers<[1], [0], [0], [1], [0, 0, 1, 1], [], []>} : vector<25x25xbf16>, vector<25x64xbf16>, vector<25x64xf32> -> vector<25x64xf32>
    %253 = arith.truncf %252 : vector<25x64xf32> to vector<25x64xbf16>
    %c7_233 = arith.constant 7 : index
    %c0_234 = arith.constant 0 : index
    %c0_235 = arith.constant 0 : index
    %254 = vector.load %arg9[%c7_233, %c0_234, %c0_235] : memref<9x64x128xbf16, #tpu.memory_space<vmem>>, vector<1x64x128xbf16>
    %255 = vector.shape_cast %254 : vector<1x64x128xbf16> to vector<64x128xbf16>
    %cst_236 = arith.constant dense<0.000000e+00> : vector<25x128xf32>
    %256 = tpu.matmul %253, %255, %cst_236 {dimension_numbers = #tpu.dot_dimension_numbers<[1], [0], [0], [1], [0, 0, 1, 1], [], []>} : vector<25x64xbf16>, vector<64x128xbf16>, vector<25x128xf32> -> vector<25x128xf32>
    %257 = arith.addf %249, %256 : vector<25x128xf32>
    %c8_237 = arith.constant 8 : index
    %c0_238 = arith.constant 0 : index
    %c0_239 = arith.constant 0 : index
    %258 = vector.load %arg4[%c8_237, %c0_238, %c0_239] : memref<9x25x25xbf16, #tpu.memory_space<vmem>>, vector<1x25x25xbf16>
    %259 = vector.shape_cast %258 : vector<1x25x25xbf16> to vector<25x25xbf16>
    %cst_240 = arith.constant dense<0.000000e+00> : vector<25x64xf32>
    %260 = tpu.matmul %259, %191, %cst_240 {dimension_numbers = #tpu.dot_dimension_numbers<[1], [0], [0], [1], [0, 0, 1, 1], [], []>} : vector<25x25xbf16>, vector<25x64xbf16>, vector<25x64xf32> -> vector<25x64xf32>
    %261 = arith.truncf %260 : vector<25x64xf32> to vector<25x64xbf16>
    %c8_241 = arith.constant 8 : index
    %c0_242 = arith.constant 0 : index
    %c0_243 = arith.constant 0 : index
    %262 = vector.load %arg9[%c8_241, %c0_242, %c0_243] : memref<9x64x128xbf16, #tpu.memory_space<vmem>>, vector<1x64x128xbf16>
    %263 = vector.shape_cast %262 : vector<1x64x128xbf16> to vector<64x128xbf16>
    %cst_244 = arith.constant dense<0.000000e+00> : vector<25x128xf32>
    %264 = tpu.matmul %261, %263, %cst_244 {dimension_numbers = #tpu.dot_dimension_numbers<[1], [0], [0], [1], [0, 0, 1, 1], [], []>} : vector<25x64xbf16>, vector<64x128xbf16>, vector<25x128xf32> -> vector<25x128xf32>
    %265 = arith.addf %257, %264 : vector<25x128xf32>
    %266 = vector.broadcast %192 : vector<1x128xf32> to vector<25x128xf32>
    %267 = arith.addf %265, %266 : vector<25x128xf32>
    %cst_245 = arith.constant 0.000000e+00 : f32
    %268 = vector.broadcast %cst_245 : f32 to vector<25x128xf32>
    %269 = arith.maximumf %267, %268 : vector<25x128xf32>
    %270 = arith.truncf %269 : vector<25x128xf32> to vector<25x128xbf16>
    %c0_246 = arith.constant 0 : index
    %c0_247 = arith.constant 0 : index
    %271 = vector.load %arg12[%c0_246, %c0_247] : memref<1x256xf32, #tpu.memory_space<vmem>>, vector<1x256xf32>
    %cst_248 = arith.constant 0.000000e+00 : f32
    %272 = vector.broadcast %cst_248 : f32 to vector<25x256xf32>
    %c0_249 = arith.constant 0 : index
    %c0_250 = arith.constant 0 : index
    %c0_251 = arith.constant 0 : index
    %273 = vector.load %arg4[%c0_249, %c0_250, %c0_251] : memref<9x25x25xbf16, #tpu.memory_space<vmem>>, vector<1x25x25xbf16>
    %274 = vector.shape_cast %273 : vector<1x25x25xbf16> to vector<25x25xbf16>
    %cst_252 = arith.constant dense<0.000000e+00> : vector<25x128xf32>
    %275 = tpu.matmul %274, %270, %cst_252 {dimension_numbers = #tpu.dot_dimension_numbers<[1], [0], [0], [1], [0, 0, 1, 1], [], []>} : vector<25x25xbf16>, vector<25x128xbf16>, vector<25x128xf32> -> vector<25x128xf32>
    %276 = arith.truncf %275 : vector<25x128xf32> to vector<25x128xbf16>
    %c0_253 = arith.constant 0 : index
    %c0_254 = arith.constant 0 : index
    %c0_255 = arith.constant 0 : index
    %277 = vector.load %arg11[%c0_253, %c0_254, %c0_255] : memref<9x128x256xbf16, #tpu.memory_space<vmem>>, vector<1x128x256xbf16>
    %278 = vector.shape_cast %277 : vector<1x128x256xbf16> to vector<128x256xbf16>
    %cst_256 = arith.constant dense<0.000000e+00> : vector<25x256xf32>
    %279 = tpu.matmul %276, %278, %cst_256 {dimension_numbers = #tpu.dot_dimension_numbers<[1], [0], [0], [1], [0, 0, 1, 1], [], []>} : vector<25x128xbf16>, vector<128x256xbf16>, vector<25x256xf32> -> vector<25x256xf32>
    %280 = arith.addf %272, %279 : vector<25x256xf32>
    %c1_257 = arith.constant 1 : index
    %c0_258 = arith.constant 0 : index
    %c0_259 = arith.constant 0 : index
    %281 = vector.load %arg4[%c1_257, %c0_258, %c0_259] : memref<9x25x25xbf16, #tpu.memory_space<vmem>>, vector<1x25x25xbf16>
    %282 = vector.shape_cast %281 : vector<1x25x25xbf16> to vector<25x25xbf16>
    %cst_260 = arith.constant dense<0.000000e+00> : vector<25x128xf32>
    %283 = tpu.matmul %282, %270, %cst_260 {dimension_numbers = #tpu.dot_dimension_numbers<[1], [0], [0], [1], [0, 0, 1, 1], [], []>} : vector<25x25xbf16>, vector<25x128xbf16>, vector<25x128xf32> -> vector<25x128xf32>
    %284 = arith.truncf %283 : vector<25x128xf32> to vector<25x128xbf16>
    %c1_261 = arith.constant 1 : index
    %c0_262 = arith.constant 0 : index
    %c0_263 = arith.constant 0 : index
    %285 = vector.load %arg11[%c1_261, %c0_262, %c0_263] : memref<9x128x256xbf16, #tpu.memory_space<vmem>>, vector<1x128x256xbf16>
    %286 = vector.shape_cast %285 : vector<1x128x256xbf16> to vector<128x256xbf16>
    %cst_264 = arith.constant dense<0.000000e+00> : vector<25x256xf32>
    %287 = tpu.matmul %284, %286, %cst_264 {dimension_numbers = #tpu.dot_dimension_numbers<[1], [0], [0], [1], [0, 0, 1, 1], [], []>} : vector<25x128xbf16>, vector<128x256xbf16>, vector<25x256xf32> -> vector<25x256xf32>
    %288 = arith.addf %280, %287 : vector<25x256xf32>
    %c2_265 = arith.constant 2 : index
    %c0_266 = arith.constant 0 : index
    %c0_267 = arith.constant 0 : index
    %289 = vector.load %arg4[%c2_265, %c0_266, %c0_267] : memref<9x25x25xbf16, #tpu.memory_space<vmem>>, vector<1x25x25xbf16>
    %290 = vector.shape_cast %289 : vector<1x25x25xbf16> to vector<25x25xbf16>
    %cst_268 = arith.constant dense<0.000000e+00> : vector<25x128xf32>
    %291 = tpu.matmul %290, %270, %cst_268 {dimension_numbers = #tpu.dot_dimension_numbers<[1], [0], [0], [1], [0, 0, 1, 1], [], []>} : vector<25x25xbf16>, vector<25x128xbf16>, vector<25x128xf32> -> vector<25x128xf32>
    %292 = arith.truncf %291 : vector<25x128xf32> to vector<25x128xbf16>
    %c2_269 = arith.constant 2 : index
    %c0_270 = arith.constant 0 : index
    %c0_271 = arith.constant 0 : index
    %293 = vector.load %arg11[%c2_269, %c0_270, %c0_271] : memref<9x128x256xbf16, #tpu.memory_space<vmem>>, vector<1x128x256xbf16>
    %294 = vector.shape_cast %293 : vector<1x128x256xbf16> to vector<128x256xbf16>
    %cst_272 = arith.constant dense<0.000000e+00> : vector<25x256xf32>
    %295 = tpu.matmul %292, %294, %cst_272 {dimension_numbers = #tpu.dot_dimension_numbers<[1], [0], [0], [1], [0, 0, 1, 1], [], []>} : vector<25x128xbf16>, vector<128x256xbf16>, vector<25x256xf32> -> vector<25x256xf32>
    %296 = arith.addf %288, %295 : vector<25x256xf32>
    %c3_273 = arith.constant 3 : index
    %c0_274 = arith.constant 0 : index
    %c0_275 = arith.constant 0 : index
    %297 = vector.load %arg4[%c3_273, %c0_274, %c0_275] : memref<9x25x25xbf16, #tpu.memory_space<vmem>>, vector<1x25x25xbf16>
    %298 = vector.shape_cast %297 : vector<1x25x25xbf16> to vector<25x25xbf16>
    %cst_276 = arith.constant dense<0.000000e+00> : vector<25x128xf32>
    %299 = tpu.matmul %298, %270, %cst_276 {dimension_numbers = #tpu.dot_dimension_numbers<[1], [0], [0], [1], [0, 0, 1, 1], [], []>} : vector<25x25xbf16>, vector<25x128xbf16>, vector<25x128xf32> -> vector<25x128xf32>
    %300 = arith.truncf %299 : vector<25x128xf32> to vector<25x128xbf16>
    %c3_277 = arith.constant 3 : index
    %c0_278 = arith.constant 0 : index
    %c0_279 = arith.constant 0 : index
    %301 = vector.load %arg11[%c3_277, %c0_278, %c0_279] : memref<9x128x256xbf16, #tpu.memory_space<vmem>>, vector<1x128x256xbf16>
    %302 = vector.shape_cast %301 : vector<1x128x256xbf16> to vector<128x256xbf16>
    %cst_280 = arith.constant dense<0.000000e+00> : vector<25x256xf32>
    %303 = tpu.matmul %300, %302, %cst_280 {dimension_numbers = #tpu.dot_dimension_numbers<[1], [0], [0], [1], [0, 0, 1, 1], [], []>} : vector<25x128xbf16>, vector<128x256xbf16>, vector<25x256xf32> -> vector<25x256xf32>
    %304 = arith.addf %296, %303 : vector<25x256xf32>
    %c4_281 = arith.constant 4 : index
    %c0_282 = arith.constant 0 : index
    %c0_283 = arith.constant 0 : index
    %305 = vector.load %arg4[%c4_281, %c0_282, %c0_283] : memref<9x25x25xbf16, #tpu.memory_space<vmem>>, vector<1x25x25xbf16>
    %306 = vector.shape_cast %305 : vector<1x25x25xbf16> to vector<25x25xbf16>
    %cst_284 = arith.constant dense<0.000000e+00> : vector<25x128xf32>
    %307 = tpu.matmul %306, %270, %cst_284 {dimension_numbers = #tpu.dot_dimension_numbers<[1], [0], [0], [1], [0, 0, 1, 1], [], []>} : vector<25x25xbf16>, vector<25x128xbf16>, vector<25x128xf32> -> vector<25x128xf32>
    %308 = arith.truncf %307 : vector<25x128xf32> to vector<25x128xbf16>
    %c4_285 = arith.constant 4 : index
    %c0_286 = arith.constant 0 : index
    %c0_287 = arith.constant 0 : index
    %309 = vector.load %arg11[%c4_285, %c0_286, %c0_287] : memref<9x128x256xbf16, #tpu.memory_space<vmem>>, vector<1x128x256xbf16>
    %310 = vector.shape_cast %309 : vector<1x128x256xbf16> to vector<128x256xbf16>
    %cst_288 = arith.constant dense<0.000000e+00> : vector<25x256xf32>
    %311 = tpu.matmul %308, %310, %cst_288 {dimension_numbers = #tpu.dot_dimension_numbers<[1], [0], [0], [1], [0, 0, 1, 1], [], []>} : vector<25x128xbf16>, vector<128x256xbf16>, vector<25x256xf32> -> vector<25x256xf32>
    %312 = arith.addf %304, %311 : vector<25x256xf32>
    %c5_289 = arith.constant 5 : index
    %c0_290 = arith.constant 0 : index
    %c0_291 = arith.constant 0 : index
    %313 = vector.load %arg4[%c5_289, %c0_290, %c0_291] : memref<9x25x25xbf16, #tpu.memory_space<vmem>>, vector<1x25x25xbf16>
    %314 = vector.shape_cast %313 : vector<1x25x25xbf16> to vector<25x25xbf16>
    %cst_292 = arith.constant dense<0.000000e+00> : vector<25x128xf32>
    %315 = tpu.matmul %314, %270, %cst_292 {dimension_numbers = #tpu.dot_dimension_numbers<[1], [0], [0], [1], [0, 0, 1, 1], [], []>} : vector<25x25xbf16>, vector<25x128xbf16>, vector<25x128xf32> -> vector<25x128xf32>
    %316 = arith.truncf %315 : vector<25x128xf32> to vector<25x128xbf16>
    %c5_293 = arith.constant 5 : index
    %c0_294 = arith.constant 0 : index
    %c0_295 = arith.constant 0 : index
    %317 = vector.load %arg11[%c5_293, %c0_294, %c0_295] : memref<9x128x256xbf16, #tpu.memory_space<vmem>>, vector<1x128x256xbf16>
    %318 = vector.shape_cast %317 : vector<1x128x256xbf16> to vector<128x256xbf16>
    %cst_296 = arith.constant dense<0.000000e+00> : vector<25x256xf32>
    %319 = tpu.matmul %316, %318, %cst_296 {dimension_numbers = #tpu.dot_dimension_numbers<[1], [0], [0], [1], [0, 0, 1, 1], [], []>} : vector<25x128xbf16>, vector<128x256xbf16>, vector<25x256xf32> -> vector<25x256xf32>
    %320 = arith.addf %312, %319 : vector<25x256xf32>
    %c6_297 = arith.constant 6 : index
    %c0_298 = arith.constant 0 : index
    %c0_299 = arith.constant 0 : index
    %321 = vector.load %arg4[%c6_297, %c0_298, %c0_299] : memref<9x25x25xbf16, #tpu.memory_space<vmem>>, vector<1x25x25xbf16>
    %322 = vector.shape_cast %321 : vector<1x25x25xbf16> to vector<25x25xbf16>
    %cst_300 = arith.constant dense<0.000000e+00> : vector<25x128xf32>
    %323 = tpu.matmul %322, %270, %cst_300 {dimension_numbers = #tpu.dot_dimension_numbers<[1], [0], [0], [1], [0, 0, 1, 1], [], []>} : vector<25x25xbf16>, vector<25x128xbf16>, vector<25x128xf32> -> vector<25x128xf32>
    %324 = arith.truncf %323 : vector<25x128xf32> to vector<25x128xbf16>
    %c6_301 = arith.constant 6 : index
    %c0_302 = arith.constant 0 : index
    %c0_303 = arith.constant 0 : index
    %325 = vector.load %arg11[%c6_301, %c0_302, %c0_303] : memref<9x128x256xbf16, #tpu.memory_space<vmem>>, vector<1x128x256xbf16>
    %326 = vector.shape_cast %325 : vector<1x128x256xbf16> to vector<128x256xbf16>
    %cst_304 = arith.constant dense<0.000000e+00> : vector<25x256xf32>
    %327 = tpu.matmul %324, %326, %cst_304 {dimension_numbers = #tpu.dot_dimension_numbers<[1], [0], [0], [1], [0, 0, 1, 1], [], []>} : vector<25x128xbf16>, vector<128x256xbf16>, vector<25x256xf32> -> vector<25x256xf32>
    %328 = arith.addf %320, %327 : vector<25x256xf32>
    %c7_305 = arith.constant 7 : index
    %c0_306 = arith.constant 0 : index
    %c0_307 = arith.constant 0 : index
    %329 = vector.load %arg4[%c7_305, %c0_306, %c0_307] : memref<9x25x25xbf16, #tpu.memory_space<vmem>>, vector<1x25x25xbf16>
    %330 = vector.shape_cast %329 : vector<1x25x25xbf16> to vector<25x25xbf16>
    %cst_308 = arith.constant dense<0.000000e+00> : vector<25x128xf32>
    %331 = tpu.matmul %330, %270, %cst_308 {dimension_numbers = #tpu.dot_dimension_numbers<[1], [0], [0], [1], [0, 0, 1, 1], [], []>} : vector<25x25xbf16>, vector<25x128xbf16>, vector<25x128xf32> -> vector<25x128xf32>
    %332 = arith.truncf %331 : vector<25x128xf32> to vector<25x128xbf16>
    %c7_309 = arith.constant 7 : index
    %c0_310 = arith.constant 0 : index
    %c0_311 = arith.constant 0 : index
    %333 = vector.load %arg11[%c7_309, %c0_310, %c0_311] : memref<9x128x256xbf16, #tpu.memory_space<vmem>>, vector<1x128x256xbf16>
    %334 = vector.shape_cast %333 : vector<1x128x256xbf16> to vector<128x256xbf16>
    %cst_312 = arith.constant dense<0.000000e+00> : vector<25x256xf32>
    %335 = tpu.matmul %332, %334, %cst_312 {dimension_numbers = #tpu.dot_dimension_numbers<[1], [0], [0], [1], [0, 0, 1, 1], [], []>} : vector<25x128xbf16>, vector<128x256xbf16>, vector<25x256xf32> -> vector<25x256xf32>
    %336 = arith.addf %328, %335 : vector<25x256xf32>
    %c8_313 = arith.constant 8 : index
    %c0_314 = arith.constant 0 : index
    %c0_315 = arith.constant 0 : index
    %337 = vector.load %arg4[%c8_313, %c0_314, %c0_315] : memref<9x25x25xbf16, #tpu.memory_space<vmem>>, vector<1x25x25xbf16>
    %338 = vector.shape_cast %337 : vector<1x25x25xbf16> to vector<25x25xbf16>
    %cst_316 = arith.constant dense<0.000000e+00> : vector<25x128xf32>
    %339 = tpu.matmul %338, %270, %cst_316 {dimension_numbers = #tpu.dot_dimension_numbers<[1], [0], [0], [1], [0, 0, 1, 1], [], []>} : vector<25x25xbf16>, vector<25x128xbf16>, vector<25x128xf32> -> vector<25x128xf32>
    %340 = arith.truncf %339 : vector<25x128xf32> to vector<25x128xbf16>
    %c8_317 = arith.constant 8 : index
    %c0_318 = arith.constant 0 : index
    %c0_319 = arith.constant 0 : index
    %341 = vector.load %arg11[%c8_317, %c0_318, %c0_319] : memref<9x128x256xbf16, #tpu.memory_space<vmem>>, vector<1x128x256xbf16>
    %342 = vector.shape_cast %341 : vector<1x128x256xbf16> to vector<128x256xbf16>
    %cst_320 = arith.constant dense<0.000000e+00> : vector<25x256xf32>
    %343 = tpu.matmul %340, %342, %cst_320 {dimension_numbers = #tpu.dot_dimension_numbers<[1], [0], [0], [1], [0, 0, 1, 1], [], []>} : vector<25x128xbf16>, vector<128x256xbf16>, vector<25x256xf32> -> vector<25x256xf32>
    %344 = arith.addf %336, %343 : vector<25x256xf32>
    %345 = vector.broadcast %271 : vector<1x256xf32> to vector<25x256xf32>
    %346 = arith.addf %344, %345 : vector<25x256xf32>
    %cst_321 = arith.constant 0.000000e+00 : f32
    %347 = vector.broadcast %cst_321 : f32 to vector<25x256xf32>
    %348 = arith.maximumf %346, %347 : vector<25x256xf32>
    %c0_322 = arith.constant 0 : index
    %c0_323 = arith.constant 0 : index
    %c0_324 = arith.constant 0 : index
    %349 = vector.load %arg13[%c0_322, %c0_323, %c0_324] : memref<1x25x256xf32, #tpu.memory_space<vmem>>, vector<1x25x256xf32>
    %350 = vector.shape_cast %349 : vector<1x25x256xf32> to vector<25x256xf32>
    %351 = vector.shape_cast %348 : vector<25x256xf32> to vector<1x25x256xf32>
    tpu.vector_store %arg13[%c0_322, %c0_323, %c0_324], %351 {strides = array<i32>} : memref<1x25x256xf32, #tpu.memory_space<vmem>>, vector<1x25x256xf32>,
    return
  }
  func.func @transform_0(%arg0: i32) -> (i32, i32, i32, i32) {
    %c0_i32 = arith.constant 0 : i32
    %c0_i32_0 = arith.constant 0 : i32
    %c0_i32_1 = arith.constant 0 : i32
    %c0_i32_2 = arith.constant 0 : i32
    return %arg0, %c0_i32, %c0_i32_0, %c0_i32_1 : i32, i32, i32, i32
  }
  func.func @transform_1(%arg0: i32) -> (i32, i32) {
    %c0_i32 = arith.constant 0 : i32
    %c0_i32_0 = arith.constant 0 : i32
    %c0_i32_1 = arith.constant 0 : i32
    return %c0_i32, %c0_i32_0 : i32, i32
  }
  func.func @transform_2(%arg0: i32) -> (i32, i32) {
    %c0_i32 = arith.constant 0 : i32
    %c0_i32_0 = arith.constant 0 : i32
    %c0_i32_1 = arith.constant 0 : i32
    return %c0_i32, %c0_i32_0 : i32, i32
  }
  func.func @transform_3(%arg0: i32) -> (i32, i32, i32) {
    %c0_i32 = arith.constant 0 : i32
    %c0_i32_0 = arith.constant 0 : i32
    %c0_i32_1 = arith.constant 0 : i32
    %c0_i32_2 = arith.constant 0 : i32
    return %c0_i32, %c0_i32_0, %c0_i32_1 : i32, i32, i32
  }
  func.func @transform_4(%arg0: i32) -> (i32, i32, i32) {
    %c0_i32 = arith.constant 0 : i32
    %c0_i32_0 = arith.constant 0 : i32
    %c0_i32_1 = arith.constant 0 : i32
    %c0_i32_2 = arith.constant 0 : i32
    return %c0_i32, %c0_i32_0, %c0_i32_1 : i32, i32, i32
  }
  func.func @transform_5(%arg0: i32) -> (i32, i32) {
    %c0_i32 = arith.constant 0 : i32
    %c0_i32_0 = arith.constant 0 : i32
    %c0_i32_1 = arith.constant 0 : i32
    return %c0_i32, %c0_i32_0 : i32, i32
  }
  func.func @transform_6(%arg0: i32) -> (i32, i32, i32) {
    %c0_i32 = arith.constant 0 : i32
    %c0_i32_0 = arith.constant 0 : i32
    %c0_i32_1 = arith.constant 0 : i32
    %c0_i32_2 = arith.constant 0 : i32
    return %c0_i32, %c0_i32_0, %c0_i32_1 : i32, i32, i32
  }
  func.func @transform_7(%arg0: i32) -> (i32, i32) {
    %c0_i32 = arith.constant 0 : i32
    %c0_i32_0 = arith.constant 0 : i32
    %c0_i32_1 = arith.constant 0 : i32
    return %c0_i32, %c0_i32_0 : i32, i32
  }
  func.func @transform_8(%arg0: i32) -> (i32, i32, i32) {
    %c0_i32 = arith.constant 0 : i32
    %c0_i32_0 = arith.constant 0 : i32
    %c0_i32_1 = arith.constant 0 : i32
    %c0_i32_2 = arith.constant 0 : i32
    return %c0_i32, %c0_i32_0, %c0_i32_1 : i32, i32, i32
  }
  func.func @transform_9(%arg0: i32) -> (i32, i32) {
    %c0_i32 = arith.constant 0 : i32
    %c0_i32_0 = arith.constant 0 : i32
    %c0_i32_1 = arith.constant 0 : i32
    return %c0_i32, %c0_i32_0 : i32, i32
  }
  func.func @transform_10(%arg0: i32) -> (i32, i32, i32) {
    %c0_i32 = arith.constant 0 : i32
    %c0_i32_0 = arith.constant 0 : i32
    %c0_i32_1 = arith.constant 0 : i32
    %c0_i32_2 = arith.constant 0 : i32
    return %c0_i32, %c0_i32_0, %c0_i32_1 : i32, i32, i32
  }
  func.func @transform_11(%arg0: i32) -> (i32, i32) {
    %c0_i32 = arith.constant 0 : i32
    %c0_i32_0 = arith.constant 0 : i32
    %c0_i32_1 = arith.constant 0 : i32
    return %c0_i32, %c0_i32_0 : i32, i32
  }
  func.func @transform_12(%arg0: i32) -> (i32, i32, i32) {
    %c0_i32 = arith.constant 0 : i32
    %c0_i32_0 = arith.constant 0 : i32
    %c0_i32_1 = arith.constant 0 : i32
    return %arg0, %c0_i32, %c0_i32_0 : i32, i32, i32
  }
}

module attributes {stable_mosaic.version = 11 : i64} {
  func.func @_fc_kernel(%arg0: memref<2x6400xbf16, #tpu.memory_space<vmem>>, %arg1: memref<6400x120xbf16, #tpu.memory_space<vmem>>, %arg2: memref<1x120xf32, #tpu.memory_space<vmem>>, %arg3: memref<120x84xbf16, #tpu.memory_space<vmem>>, %arg4: memref<1x84xf32, #tpu.memory_space<vmem>>, %arg5: memref<84x10xbf16, #tpu.memory_space<vmem>>, %arg6: memref<1x10xf32, #tpu.memory_space<vmem>>, %arg7: memref<2x10xf32, #tpu.memory_space<vmem>>) attributes {dimension_semantics = [], scalar_prefetch = 0 : i64, scratch_operands = 0 : i64, tpu.core_type = #tpu.core_type<tc>} {
    %c0 = arith.constant 0 : index
    %c0_0 = arith.constant 0 : index
    %0 = vector.load %arg0[%c0, %c0_0] : memref<2x6400xbf16, #tpu.memory_space<vmem>>, vector<2x6400xbf16>
    %c0_1 = arith.constant 0 : index
    %c0_2 = arith.constant 0 : index
    %1 = vector.load %arg1[%c0_1, %c0_2] : memref<6400x120xbf16, #tpu.memory_space<vmem>>, vector<6400x120xbf16>
    %cst = arith.constant dense<0.000000e+00> : vector<2x120xf32>
    %2 = tpu.matmul %0, %1, %cst {dimension_numbers = #tpu.dot_dimension_numbers<[1], [0], [0], [1], [0, 0, 1, 1], [], []>} : vector<2x6400xbf16>, vector<6400x120xbf16>, vector<2x120xf32> -> vector<2x120xf32>
    %c0_3 = arith.constant 0 : index
    %c0_4 = arith.constant 0 : index
    %3 = vector.load %arg2[%c0_3, %c0_4] : memref<1x120xf32, #tpu.memory_space<vmem>>, vector<1x120xf32>
    %4 = vector.broadcast %3 : vector<1x120xf32> to vector<2x120xf32>
    %5 = arith.addf %2, %4 : vector<2x120xf32>
    %cst_5 = arith.constant 0.000000e+00 : f32
    %6 = vector.broadcast %cst_5 : f32 to vector<2x120xf32>
    %7 = arith.maximumf %5, %6 : vector<2x120xf32>
    %8 = arith.truncf %7 : vector<2x120xf32> to vector<2x120xbf16>
    %c0_6 = arith.constant 0 : index
    %c0_7 = arith.constant 0 : index
    %9 = vector.load %arg3[%c0_6, %c0_7] : memref<120x84xbf16, #tpu.memory_space<vmem>>, vector<120x84xbf16>
    %cst_8 = arith.constant dense<0.000000e+00> : vector<2x84xf32>
    %10 = tpu.matmul %8, %9, %cst_8 {dimension_numbers = #tpu.dot_dimension_numbers<[1], [0], [0], [1], [0, 0, 1, 1], [], []>} : vector<2x120xbf16>, vector<120x84xbf16>, vector<2x84xf32> -> vector<2x84xf32>
    %c0_9 = arith.constant 0 : index
    %c0_10 = arith.constant 0 : index
    %11 = vector.load %arg4[%c0_9, %c0_10] : memref<1x84xf32, #tpu.memory_space<vmem>>, vector<1x84xf32>
    %12 = vector.broadcast %11 : vector<1x84xf32> to vector<2x84xf32>
    %13 = arith.addf %10, %12 : vector<2x84xf32>
    %cst_11 = arith.constant 0.000000e+00 : f32
    %14 = vector.broadcast %cst_11 : f32 to vector<2x84xf32>
    %15 = arith.maximumf %13, %14 : vector<2x84xf32>
    %16 = arith.truncf %15 : vector<2x84xf32> to vector<2x84xbf16>
    %c0_12 = arith.constant 0 : index
    %c0_13 = arith.constant 0 : index
    %17 = vector.load %arg5[%c0_12, %c0_13] : memref<84x10xbf16, #tpu.memory_space<vmem>>, vector<84x10xbf16>
    %cst_14 = arith.constant dense<0.000000e+00> : vector<2x10xf32>
    %18 = tpu.matmul %16, %17, %cst_14 {dimension_numbers = #tpu.dot_dimension_numbers<[1], [0], [0], [1], [0, 0, 1, 1], [], []>} : vector<2x84xbf16>, vector<84x10xbf16>, vector<2x10xf32> -> vector<2x10xf32>
    %c0_15 = arith.constant 0 : index
    %c0_16 = arith.constant 0 : index
    %19 = vector.load %arg6[%c0_15, %c0_16] : memref<1x10xf32, #tpu.memory_space<vmem>>, vector<1x10xf32>
    %20 = vector.broadcast %19 : vector<1x10xf32> to vector<2x10xf32>
    %21 = arith.addf %18, %20 : vector<2x10xf32>
    %c0_17 = arith.constant 0 : index
    %c0_18 = arith.constant 0 : index
    %22 = vector.load %arg7[%c0_17, %c0_18] : memref<2x10xf32, #tpu.memory_space<vmem>>, vector<2x10xf32>
    tpu.vector_store %arg7[%c0_17, %c0_18], %21 {strides = array<i32>} : memref<2x10xf32, #tpu.memory_space<vmem>>, vector<2x10xf32>,
    return
  }
}

</mosaic_0001>

<bundles_post_ra>
// kernel: lenet9_forward.3
= control target key start
LH: loop header
LB: loop body
LE: loop exit
PB: predicated region body
PF: predicated region fallthrough
CT: control target
= control target key end

     0   :  { %s2087_s12 = smov 0   ;;  %s2563_s0 = inlined_call_operand.vmem [shape: bf16[2,4,196,25], index: 0, kind: input, shape index: {}]   ;;  %s2564_s1 = inlined_call_operand.vmem [shape: bf16[25,6], index: 1, kind: input, shape index: {}]   ;;  %s2565_s2 = inlined_call_operand.vmem [shape: f32[1,6], index: 2, kind: input, shape index: {}]   ;;  %s2566_s3 = inlined_call_operand.vmem [shape: f32[2,196,6], index: 3, kind: output, shape index: {}]  }
   0x1 LB: > { %s1514_s13 = sadd.s32 4294967295, %s2062_s12   ;;  %p1518_p0 = scmp.ge.s32.totalorder %s2062_s12, 1  ;;  %s2062_s12 = sphi %s2087_s12, %s13_s12  }
   0x2   : > { %p137_p1 = scmp.lt.s32.totalorder %s2062_s12, 3 }
   0x4   : > { %p138_p2 = pnand %p1518_p0, %p137_p1 }
   0x5   : > { %p161_p3 = scmp.lt.s32.totalorder (!%p138_p2), %s1514_s13, 1 }
   0x6   : > { %141 = sbr.rel (%p138_p2) target bundleno = 425 (0x1a9), region = 32 }
   0xb   : > { %vm322_vm0 = vcmask 1043456   ;;  %v2064_v0 = vmov 0.0   ;;  %v2002_v1 = vld [vmem:[%s2564_s1 + $0x8] sm:$0x1f]   ;;  %vm323_vm1 = vcmask 1044480   ;;  %v2065_v2 = vmov 65535  }
   0xc   : > { %1765 = vmatprep.subr.bf16.mxu0 %v2064_v0  ;;  %1821 = vmatprep.subr.bf16.mxu1 %v2064_v0  ;;  %v324_v3 = vsel %vm322_vm0, 4294967295, %v2065_v2  ;;  %vm2066_vm2 = vmmov 0   ;;  %s2568_s13 = smov (!%p161_p3, %s1514_s13), 1  ;;  %v2003_v6 = vld [vmem:[%s2564_s1] sm:$0xff]   ;;  %vm282_vm3 = vcmask 203776   ;;  %vm1432_vm4 = vcmask 48128  }
   0xd   : > { %v325_v4 = vsel %vm323_vm1, %v324_v3, 0  ;;  %1769 = vmatprep.mubr.msk.bf16.mxu0 %vm2066_vm2, %v2064_v0  ;;  %1825 = vmatprep.mubr.msk.bf16.mxu1 %vm2066_vm2, %v2064_v0  ;;  %s1989_s18 = smul.u32 400, %s2568_s13  ;;  %v2318_v57 = vld [vmem:[%s2565_s2] ss:$0 sm:$0xff]  ;;  %vm1457_vm5 = vcmask 44032  }
   0xe   : > { %v327_v5 = vand.u32 %v2002_v1, %v325_v4  ;;  %s1990_s24 = smul.u32 200, %s2568_s13 }
   0xf   : > { %s2115_s21 = scalar_lea.vmem %s2563_s0, %s1989_s18 }
  0x10   : > { %1766 = vmatpush3.bf16.msra.mxu0 %v327_v5  ;;  %1822 = vmatpush3.bf16.msra.mxu1 %v327_v5  ;;  %v2004_v7 = vld [vmem:[%s2115_s21] sm:$0xff]   ;;  %v2006_v9 = vld [vmem:[%s2115_s21 + $0x8] sm:$0xff]   ;;  %v2008_v11 = vld [vmem:[%s2115_s21 + $0x10] sm:$0xff]   ;;  %s2439_s27 = scalar_lea.vmem %s2566_s3, %s1990_s24 }
  0x11   : > { %1767 = vmatprep.subr.bf16.mxu0 %v2064_v0  ;;  %1823 = vmatprep.subr.bf16.mxu1 %v2064_v0  ;;  %v2005_v8 = vld [vmem:[%s2115_s21 + $0x64] sm:$0xff]   ;;  %v2007_v10 = vld [vmem:[%s2115_s21 + $0x6c] sm:$0xff]   ;;  %v2009_v12 = vld [vmem:[%s2115_s21 + $0x74] sm:$0xff]  }
  0x12   : > { %v2010_v13 = vld [vmem:[%s2115_s21 + $0x18] sm:$0xff]   ;;  %v2012_v15 = vld [vmem:[%s2115_s21 + $0x20] sm:$0xff]   ;;  %v2014_v17 = vld [vmem:[%s2115_s21 + $0x28] sm:$0xff]  }
  0x13   : > { %v2011_v14 = vld [vmem:[%s2115_s21 + $0x7c] sm:$0xff]   ;;  %v2013_v16 = vld [vmem:[%s2115_s21 + $0x84] sm:$0xff]   ;;  %v2015_v18 = vld [vmem:[%s2115_s21 + $0x8c] sm:$0xff]  }
  0x14   : > { %1768 = vmatpush3.bf16.msra.mxu0 %v2003_v6  ;;  %1824 = vmatpush3.bf16.msra.mxu1 %v2003_v6  ;;  %v2016_v19 = vld [vmem:[%s2115_s21 + $0x30] sm:$0xff]   ;;  %v2018_v21 = vld [vmem:[%s2115_s21 + $0x38] sm:$0xff]   ;;  %v2020_v23 = vld [vmem:[%s2115_s21 + $0x40] sm:$0xff]  }
  0x15   : > { %1877 = vmatprep.subr.bf16.mxu0 %v2064_v0  ;;  %1933 = vmatprep.subr.bf16.mxu1 %v2064_v0  ;;  %v2017_v20 = vld [vmem:[%s2115_s21 + $0x94] sm:$0xff]   ;;  %v2019_v22 = vld [vmem:[%s2115_s21 + $0x9c] sm:$0xff]   ;;  %v2021_v24 = vld [vmem:[%s2115_s21 + $0xa4] sm:$0xff]  }
  0x16   : > { %v2022_v25 = vld [vmem:[%s2115_s21 + $0x48] sm:$0xff]   ;;  %v2024_v27 = vld [vmem:[%s2115_s21 + $0x50] sm:$0xff]   ;;  %v2026_v29 = vld [vmem:[%s2115_s21 + $0x58] sm:$0xff]  }
  0x17   : > { %1770 = vmatmul.mubr.msk.bf16.vlgmr.msra.gmra.mxu0 %vm282_vm3, %v2004_v7  ;;  %1826 = vmatmul.mubr.msk.bf16.vlgmr.msra.gmra.mxu1 %vm282_vm3, %v2005_v8  ;;  %v2023_v26 = vld [vmem:[%s2115_s21 + $0xac] sm:$0xff]   ;;  %v2025_v28 = vld [vmem:[%s2115_s21 + $0xb4] sm:$0xff]   ;;  %v2027_v30 = vld [vmem:[%s2115_s21 + $0xbc] sm:$0xff]  }
  0x18   : > { %1878 = vmatpush3.bf16.msra.mxu0 %v327_v5  ;;  %1934 = vmatpush3.bf16.msra.mxu1 %v327_v5  ;;  %v2028_v31 = vld [vmem:[%s2115_s21 + $0x60] ss:$0 sps:$4 sm:$0x33]   ;;  %v2029_v32 = vld [vmem:[%s2115_s21 + $0xc4] ss:$0 sps:$4 sm:$0x33]  }
  0x19   : > { %1773 = vmatprep.mubr.msk.bf16.mxu0 %vm2066_vm2, %v2064_v0  ;;  %1829 = vmatprep.mubr.msk.bf16.mxu1 %vm2066_vm2, %v2064_v0  ;;  %v2030_v33 = vld [vmem:[%s2115_s21 + $0xc8] sm:$0xff]   ;;  %v2032_v35 = vld [vmem:[%s2115_s21 + $0xd0] sm:$0xff]   ;;  %v2034_v37 = vld [vmem:[%s2115_s21 + $0xd8] sm:$0xff]  }
  0x1a   : > { %1879 = vmatprep.subr.bf16.mxu0 %v2064_v0  ;;  %1935 = vmatprep.subr.bf16.mxu1 %v2064_v0  ;;  %v2031_v34 = vld [vmem:[%s2115_s21 + $0x12c] sm:$0xff]   ;;  %v2033_v36 = vld [vmem:[%s2115_s21 + $0x134] sm:$0xff]   ;;  %v2035_v38 = vld [vmem:[%s2115_s21 + $0x13c] sm:$0xff]  }
  0x1b   : > { %v2036_v39 = vld [vmem:[%s2115_s21 + $0xe0] sm:$0xff]   ;;  %v2038_v41 = vld [vmem:[%s2115_s21 + $0xe8] sm:$0xff]   ;;  %v2040_v43 = vld [vmem:[%s2115_s21 + $0xf0] sm:$0xff]  }
  0x1c   : > { %1880 = vmatpush3.bf16.msra.mxu0 %v2003_v6  ;;  %1936 = vmatpush3.bf16.msra.mxu1 %v2003_v6  ;;  %v2037_v40 = vld [vmem:[%s2115_s21 + $0x144] sm:$0xff]   ;;  %v2039_v42 = vld [vmem:[%s2115_s21 + $0x14c] sm:$0xff]   ;;  %v2041_v44 = vld [vmem:[%s2115_s21 + $0x154] sm:$0xff]  }
  0x1d   : > { %v2042_v45 = vld [vmem:[%s2115_s21 + $0xf8] sm:$0xff]   ;;  %v2044_v47 = vld [vmem:[%s2115_s21 + $0x100] sm:$0xff]   ;;  %v2046_v49 = vld [vmem:[%s2115_s21 + $0x108] sm:$0xff]  }
  0x1e   : > { %v2043_v46 = vld [vmem:[%s2115_s21 + $0x15c] sm:$0xff]   ;;  %v2045_v48 = vld [vmem:[%s2115_s21 + $0x164] sm:$0xff]   ;;  %v2047_v50 = vld [vmem:[%s2115_s21 + $0x16c] sm:$0xff]  }
  0x1f   : > { %1774 = vmatmul.mubr.msk.bf16.gmra.mxu0 %vm282_vm3, %v2006_v9  ;;  %1830 = vmatmul.mubr.msk.bf16.gmra.mxu1 %vm282_vm3, %v2007_v10  ;;  %v2048_v51 = vld [vmem:[%s2115_s21 + $0x110] sm:$0xff]   ;;  %v2050_v53 = vld [vmem:[%s2115_s21 + $0x118] sm:$0xff]   ;;  %v2052_v55 = vld [vmem:[%s2115_s21 + $0x120] sm:$0xff]  }
  0x20   : > { %1777 = vmatprep.mubr.msk.bf16.mxu0 %vm2066_vm2, %v2064_v0  ;;  %1833 = vmatprep.mubr.msk.bf16.mxu1 %vm2066_vm2, %v2064_v0  ;;  %v2049_v52 = vld [vmem:[%s2115_s21 + $0x174] sm:$0xff]   ;;  %v2051_v54 = vld [vmem:[%s2115_s21 + $0x17c] sm:$0xff]   ;;  %v2053_v56 = vld [vmem:[%s2115_s21 + $0x184] sm:$0xff]  }
  0x21   : > { %v2054_v5 = vld [vmem:[%s2115_s21 + $0x128] ss:$0 sps:$4 sm:$0x33]   ;;  %v2055_v6 = vld [vmem:[%s2115_s21 + $0x18c] ss:$0 sps:$4 sm:$0x33]  }
  0x27   : > { %1778 = vmatmul.mubr.msk.bf16.gmra.mxu0 %vm282_vm3, %v2008_v11  ;;  %1834 = vmatmul.mubr.msk.bf16.gmra.mxu1 %vm282_vm3, %v2009_v12 }
  0x28   : > { %1781 = vmatprep.mubr.msk.bf16.mxu0 %vm2066_vm2, %v2064_v0  ;;  %1837 = vmatprep.mubr.msk.bf16.mxu1 %vm2066_vm2, %v2064_v0 }
  0x2f   : > { %1782 = vmatmul.mubr.msk.bf16.gmra.mxu0 %vm282_vm3, %v2010_v13  ;;  %1838 = vmatmul.mubr.msk.bf16.gmra.mxu1 %vm282_vm3, %v2011_v14 }
  0x30   : > { %1785 = vmatprep.mubr.msk.bf16.mxu0 %vm2066_vm2, %v2064_v0  ;;  %1841 = vmatprep.mubr.msk.bf16.mxu1 %vm2066_vm2, %v2064_v0 }
  0x37   : > { %1786 = vmatmul.mubr.msk.bf16.gmra.mxu0 %vm282_vm3, %v2012_v15  ;;  %1842 = vmatmul.mubr.msk.bf16.gmra.mxu1 %vm282_vm3, %v2013_v16 }
  0x38   : > { %1789 = vmatprep.mubr.msk.bf16.mxu0 %vm2066_vm2, %v2064_v0  ;;  %1845 = vmatprep.mubr.msk.bf16.mxu1 %vm2066_vm2, %v2064_v0 }
  0x3f   : > { %1790 = vmatmul.mubr.msk.bf16.gmra.mxu0 %vm282_vm3, %v2014_v17  ;;  %1846 = vmatmul.mubr.msk.bf16.gmra.mxu1 %vm282_vm3, %v2015_v18 }
  0x40   : > { %1793 = vmatprep.mubr.msk.bf16.mxu0 %vm2066_vm2, %v2064_v0  ;;  %1849 = vmatprep.mubr.msk.bf16.mxu1 %vm2066_vm2, %v2064_v0 }
  0x47   : > { %1794 = vmatmul.mubr.msk.bf16.gmra.mxu0 %vm282_vm3, %v2016_v19  ;;  %1850 = vmatmul.mubr.msk.bf16.gmra.mxu1 %vm282_vm3, %v2017_v20 }
  0x48   : > { %1797 = vmatprep.mubr.msk.bf16.mxu0 %vm2066_vm2, %v2064_v0  ;;  %1853 = vmatprep.mubr.msk.bf16.mxu1 %vm2066_vm2, %v2064_v0 }
  0x4f   : > { %1798 = vmatmul.mubr.msk.bf16.gmra.mxu0 %vm282_vm3, %v2018_v21  ;;  %1854 = vmatmul.mubr.msk.bf16.gmra.mxu1 %vm282_vm3, %v2019_v22 }
  0x50   : > { %1801 = vmatprep.mubr.msk.bf16.mxu0 %vm2066_vm2, %v2064_v0  ;;  %1857 = vmatprep.mubr.msk.bf16.mxu1 %vm2066_vm2, %v2064_v0 }
  0x57   : > { %1802 = vmatmul.mubr.msk.bf16.gmra.mxu0 %vm282_vm3, %v2020_v23  ;;  %1858 = vmatmul.mubr.msk.bf16.gmra.mxu1 %vm282_vm3, %v2021_v24 }
  0x58   : > { %1805 = vmatprep.mubr.msk.bf16.mxu0 %vm2066_vm2, %v2064_v0  ;;  %1861 = vmatprep.mubr.msk.bf16.mxu1 %vm2066_vm2, %v2064_v0 }
  0x5f   : > { %1806 = vmatmul.mubr.msk.bf16.gmra.mxu0 %vm282_vm3, %v2022_v25  ;;  %1862 = vmatmul.mubr.msk.bf16.gmra.mxu1 %vm282_vm3, %v2023_v26 }
  0x60   : > { %1809 = vmatprep.mubr.msk.bf16.mxu0 %vm2066_vm2, %v2064_v0  ;;  %1865 = vmatprep.mubr.msk.bf16.mxu1 %vm2066_vm2, %v2064_v0 }
  0x67   : > { %1810 = vmatmul.mubr.msk.bf16.gmra.mxu0 %vm282_vm3, %v2024_v27  ;;  %1866 = vmatmul.mubr.msk.bf16.gmra.mxu1 %vm282_vm3, %v2025_v28 }
  0x68   : > { %1813 = vmatprep.mubr.msk.bf16.mxu0 %vm2066_vm2, %v2064_v0  ;;  %1869 = vmatprep.mubr.msk.bf16.mxu1 %vm2066_vm2, %v2064_v0 }
  0x6f   : > { %1814 = vmatmul.mubr.msk.bf16.gmra.mxu0 %vm282_vm3, %v2026_v29  ;;  %1870 = vmatmul.mubr.msk.bf16.gmra.mxu1 %vm282_vm3, %v2027_v30 }
  0x70   : > { %1817 = vmatprep.mubr.msk.bf16.mxu0 %vm2066_vm2, %v2064_v0  ;;  %1873 = vmatprep.mubr.msk.bf16.mxu1 %vm2066_vm2, %v2064_v0 }
  0x77   : > { %1818 = vmatmul.mubr.msk.bf16.gmra.mxu0 %vm282_vm3, %v2028_v31  ;;  %1874 = vmatmul.mubr.msk.bf16.gmra.mxu1 %vm282_vm3, %v2029_v32 }
  0x78   : > { %1881 = vmatprep.mubr.msk.bf16.mxu0 %vm2066_vm2, %v2064_v0  ;;  %1937 = vmatprep.mubr.msk.bf16.mxu1 %vm2066_vm2, %v2064_v0 }
  0x7f   : > { %1882 = vmatmul.mubr.msk.bf16.vlgmr.msra.gmra.mxu0 %vm282_vm3, %v2030_v33  ;;  %1938 = vmatmul.mubr.msk.bf16.vlgmr.msra.gmra.mxu1 %vm282_vm3, %v2031_v34 }
  0x80   : > { %1885 = vmatprep.mubr.msk.bf16.mxu0 %vm2066_vm2, %v2064_v0  ;;  %1941 = vmatprep.mubr.msk.bf16.mxu1 %vm2066_vm2, %v2064_v0 }
  0x87   : > { %1886 = vmatmul.mubr.msk.bf16.gmra.mxu0 %vm282_vm3, %v2032_v35  ;;  %1942 = vmatmul.mubr.msk.bf16.gmra.mxu1 %vm282_vm3, %v2033_v36 }
  0x88   : > { %1889 = vmatprep.mubr.msk.bf16.mxu0 %vm2066_vm2, %v2064_v0  ;;  %1945 = vmatprep.mubr.msk.bf16.mxu1 %vm2066_vm2, %v2064_v0 }
  0x8f   : > { %1890 = vmatmul.mubr.msk.bf16.gmra.mxu0 %vm282_vm3, %v2034_v37  ;;  %1946 = vmatmul.mubr.msk.bf16.gmra.mxu1 %vm282_vm3, %v2035_v38 }
  0x90   : > { %1893 = vmatprep.mubr.msk.bf16.mxu0 %vm2066_vm2, %v2064_v0  ;;  %1949 = vmatprep.mubr.msk.bf16.mxu1 %vm2066_vm2, %v2064_v0 }
  0x97   : > { %1894 = vmatmul.mubr.msk.bf16.gmra.mxu0 %vm282_vm3, %v2036_v39  ;;  %1950 = vmatmul.mubr.msk.bf16.gmra.mxu1 %vm282_vm3, %v2037_v40 }
  0x98   : > { %1897 = vmatprep.mubr.msk.bf16.mxu0 %vm2066_vm2, %v2064_v0  ;;  %1953 = vmatprep.mubr.msk.bf16.mxu1 %vm2066_vm2, %v2064_v0 }
  0x9f   : > { %1898 = vmatmul.mubr.msk.bf16.gmra.mxu0 %vm282_vm3, %v2038_v41  ;;  %1954 = vmatmul.mubr.msk.bf16.gmra.mxu1 %vm282_vm3, %v2039_v42 }
  0xa0   : > { %1901 = vmatprep.mubr.msk.bf16.mxu0 %vm2066_vm2, %v2064_v0  ;;  %1957 = vmatprep.mubr.msk.bf16.mxu1 %vm2066_vm2, %v2064_v0 }
  0xa7   : > { %1902 = vmatmul.mubr.msk.bf16.gmra.mxu0 %vm282_vm3, %v2040_v43  ;;  %1958 = vmatmul.mubr.msk.bf16.gmra.mxu1 %vm282_vm3, %v2041_v44 }
  0xa8   : > { %1905 = vmatprep.mubr.msk.bf16.mxu0 %vm2066_vm2, %v2064_v0  ;;  %1961 = vmatprep.mubr.msk.bf16.mxu1 %vm2066_vm2, %v2064_v0 }
  0xaf   : > { %1906 = vmatmul.mubr.msk.bf16.gmra.mxu0 %vm282_vm3, %v2042_v45  ;;  %1962 = vmatmul.mubr.msk.bf16.gmra.mxu1 %vm282_vm3, %v2043_v46 }
  0xb0   : > { %1909 = vmatprep.mubr.msk.bf16.mxu0 %vm2066_vm2, %v2064_v0  ;;  %1965 = vmatprep.mubr.msk.bf16.mxu1 %vm2066_vm2, %v2064_v0 }
  0xb7   : > { %1910 = vmatmul.mubr.msk.bf16.gmra.mxu0 %vm282_vm3, %v2044_v47  ;;  %1966 = vmatmul.mubr.msk.bf16.gmra.mxu1 %vm282_vm3, %v2045_v48 }
  0xb8   : > { %1913 = vmatprep.mubr.msk.bf16.mxu0 %vm2066_vm2, %v2064_v0  ;;  %1969 = vmatprep.mubr.msk.bf16.mxu1 %vm2066_vm2, %v2064_v0 }
  0xbf   : > { %1914 = vmatmul.mubr.msk.bf16.gmra.mxu0 %vm282_vm3, %v2046_v49  ;;  %1970 = vmatmul.mubr.msk.bf16.gmra.mxu1 %vm282_vm3, %v2047_v50 }
  0xc0   : > { %1917 = vmatprep.mubr.msk.bf16.mxu0 %vm2066_vm2, %v2064_v0  ;;  %1973 = vmatprep.mubr.msk.bf16.mxu1 %vm2066_vm2, %v2064_v0 }
  0xc7   : > { %1918 = vmatmul.mubr.msk.bf16.gmra.mxu0 %vm282_vm3, %v2048_v51  ;;  %1974 = vmatmul.mubr.msk.bf16.gmra.mxu1 %vm282_vm3, %v2049_v52 }
  0xc8   : > { %1921 = vmatprep.mubr.msk.bf16.mxu0 %vm2066_vm2, %v2064_v0  ;;  %1977 = vmatprep.mubr.msk.bf16.mxu1 %vm2066_vm2, %v2064_v0 }
  0xcf   : > { %1922 = vmatmul.mubr.msk.bf16.gmra.mxu0 %vm282_vm3, %v2050_v53  ;;  %1978 = vmatmul.mubr.msk.bf16.gmra.mxu1 %vm282_vm3, %v2051_v54 }
  0xd0   : > { %1925 = vmatprep.mubr.msk.bf16.mxu0 %vm2066_vm2, %v2064_v0  ;;  %1981 = vmatprep.mubr.msk.bf16.mxu1 %vm2066_vm2, %v2064_v0 }
  0xd7   : > { %v363_v58 = vpop.f32.mrf.mxu0  ;;  %v652_v59 = vpop.f32.mrf.mxu1  ;;  %1926 = vmatmul.mubr.msk.bf16.gmra.mxu0 %vm282_vm3, %v2052_v55  ;;  %1982 = vmatmul.mubr.msk.bf16.gmra.mxu1 %vm282_vm3, %v2053_v56 }
  0xd8   : > { %v364_v60 = vadd.f32 %v2318_v57, %v363_v58  ;;  %v653_v61 = vadd.f32 %v2318_v57, %v652_v59  ;;  %1929 = vmatprep.mubr.msk.bf16.mxu0 %vm2066_vm2, %v2064_v0  ;;  %1985 = vmatprep.mubr.msk.bf16.mxu1 %vm2066_vm2, %v2064_v0 }
  0xd9   : > { %v1771_v62 = vpop.f32.mrf.mxu0  ;;  %v1827_v63 = vpop.f32.mrf.mxu1 }
  0xda   : > { %v465_v1 = vmax.f32 %v364_v60, 0.0  ;;  %v754_v2 = vmax.f32 %v653_v61, 0.0 }
  0xdb   : > { %v366_v3 = vpop.f32.mrf.mxu0  ;;  %v655_v4 = vpop.f32.mrf.mxu1 }
  0xdc   : > { %v2330_v7 = vmax.f32 %v465_v1, %v754_v2  ;;  %v367_v8 = vadd.f32 %v2318_v57, %v366_v3  ;;  %v656_v9 = vadd.f32 %v2318_v57, %v655_v4 }
  0xdd   : > { %v1772_v10 = vpop.f32.mrf.mxu0  ;;  %v1828_v11 = vpop.f32.mrf.mxu1 }
  0xde   : > { %v466_v12 = vmax.f32 %v367_v8, 0.0  ;;  %v755_v13 = vmax.f32 %v656_v9, 0.0 }
  0xdf   : > { %v371_v14 = vpop.f32.mrf.mxu0  ;;  %v660_v0 = vpop.f32.mrf.mxu1  ;;  %1930 = vmatmul.mubr.msk.bf16.gmra.mxu0 %vm282_vm3, %v2054_v5  ;;  %1986 = vmatmul.mubr.msk.bf16.gmra.mxu1 %vm282_vm3, %v2055_v6 }
  0xe0   : > { %v2336_v15 = vmax.f32 %v466_v12, %v755_v13  ;;  %v372_v16 = vadd.f32 %v2318_v57, %v371_v14  ;;  %v661_v17 = vadd.f32 %v2318_v57, %v660_v0 }
  0xe1   : > { %v1775_v18 = vpop.f32.mrf.mxu0  ;;  %v1831_v19 = vpop.f32.mrf.mxu1 }
  0xe2   : > { %v467_v20 = vmax.f32 %v372_v16, 0.0  ;;  %v756_v21 = vmax.f32 %v661_v17, 0.0 }
  0xe3   : > { %v374_v22 = vpop.f32.mrf.mxu0  ;;  %v663_v23 = vpop.f32.mrf.mxu1 }
  0xe4   : > { %v2340_v24 = vmax.f32 %v467_v20, %v756_v21  ;;  %v375_v25 = vadd.f32 %v2318_v57, %v374_v22  ;;  %v664_v26 = vadd.f32 %v2318_v57, %v663_v23 }
  0xe5   : > { %v1776_v27 = vpop.f32.mrf.mxu0  ;;  %v1832_v28 = vpop.f32.mrf.mxu1 }
  0xe6   : > { %v468_v29 = vmax.f32 %v375_v25, 0.0  ;;  %v757_v30 = vmax.f32 %v664_v26, 0.0 }
  0xe7   : > { %v379_v31 = vpop.f32.mrf.mxu0  ;;  %v668_v32 = vpop.f32.mrf.mxu1 }
  0xe8   : > { %v2344_v33 = vmax.f32 %v468_v29, %v757_v30  ;;  %v380_v34 = vadd.f32 %v2318_v57, %v379_v31  ;;  %v669_v35 = vadd.f32 %v2318_v57, %v668_v32 }
  0xe9   : > { %v1779_v36 = vpop.f32.mrf.mxu0  ;;  %v1835_v37 = vpop.f32.mrf.mxu1 }
  0xea   : > { %v469_v38 = vmax.f32 %v380_v34, 0.0  ;;  %v758_v39 = vmax.f32 %v669_v35, 0.0 }
  0xeb   : > { %v382_v40 = vpop.f32.mrf.mxu0  ;;  %v671_v41 = vpop.f32.mrf.mxu1 }
  0xec   : > { %v2348_v42 = vmax.f32 %v469_v38, %v758_v39  ;;  %v383_v43 = vadd.f32 %v2318_v57, %v382_v40  ;;  %v672_v44 = vadd.f32 %v2318_v57, %v671_v41 }
  0xed   : > { %v1780_v45 = vpop.f32.mrf.mxu0  ;;  %v1836_v46 = vpop.f32.mrf.mxu1 }
  0xee   : > { %v470_v47 = vmax.f32 %v383_v43, 0.0  ;;  %v759_v48 = vmax.f32 %v672_v44, 0.0 }
  0xef   : > { %v387_v49 = vpop.f32.mrf.mxu0  ;;  %v676_v50 = vpop.f32.mrf.mxu1 }
  0xf0   : > { %v2352_v51 = vmax.f32 %v470_v47, %v759_v48  ;;  %v388_v52 = vadd.f32 %v2318_v57, %v387_v49  ;;  %v677_v53 = vadd.f32 %v2318_v57, %v676_v50 }
  0xf1   : > { %v1783_v54 = vpop.f32.mrf.mxu0  ;;  %v1839_v55 = vpop.f32.mrf.mxu1 }
  0xf2   : > { %v471_v56 = vmax.f32 %v388_v52, 0.0  ;;  %v760_v58 = vmax.f32 %v677_v53, 0.0 }
  0xf3   : > { %v390_v59 = vpop.f32.mrf.mxu0  ;;  %v679_v60 = vpop.f32.mrf.mxu1 }
  0xf4   : > { %v2356_v61 = vmax.f32 %v471_v56, %v760_v58  ;;  %v391_v62 = vadd.f32 %v2318_v57, %v390_v59  ;;  %v680_v63 = vadd.f32 %v2318_v57, %v679_v60 }
  0xf5   : > { %v1784_v1 = vpop.f32.mrf.mxu0  ;;  %v1840_v2 = vpop.f32.mrf.mxu1 }
  0xf6   : > { %v472_v3 = vmax.f32 %v391_v62, 0.0  ;;  %v761_v4 = vmax.f32 %v680_v63, 0.0 }
  0xf7   : > { %v395_v5 = vpop.f32.mrf.mxu0  ;;  %v684_v6 = vpop.f32.mrf.mxu1 }
  0xf8   : > { %v2360_v8 = vmax.f32 %v472_v3, %v761_v4  ;;  %v396_v9 = vadd.f32 %v2318_v57, %v395_v5  ;;  %v685_v10 = vadd.f32 %v2318_v57, %v684_v6 }
  0xf9   : > { %v1787_v11 = vpop.f32.mrf.mxu0  ;;  %v1843_v12 = vpop.f32.mrf.mxu1 }
  0xfa   : > { %v473_v13 = vmax.f32 %v396_v9, 0.0  ;;  %v762_v14 = vmax.f32 %v685_v10, 0.0 }
  0xfb   : > { %v398_v0 = vpop.f32.mrf.mxu0  ;;  %v687_v16 = vpop.f32.mrf.mxu1 }
  0xfc   : > { %v2364_v17 = vmax.f32 %v473_v13, %v762_v14  ;;  %v399_v18 = vadd.f32 %v2318_v57, %v398_v0  ;;  %v688_v19 = vadd.f32 %v2318_v57, %v687_v16 }
  0xfd   : > { %v1788_v20 = vpop.f32.mrf.mxu0  ;;  %v1844_v21 = vpop.f32.mrf.mxu1 }
  0xfe   : > { %v474_v22 = vmax.f32 %v399_v18, 0.0  ;;  %v763_v23 = vmax.f32 %v688_v19, 0.0 }
  0xff   : > { %v403_v25 = vpop.f32.mrf.mxu0  ;;  %v692_v26 = vpop.f32.mrf.mxu1 }
 0x100   : > { %v2368_v27 = vmax.f32 %v474_v22, %v763_v23  ;;  %v404_v28 = vadd.f32 %v2318_v57, %v403_v25  ;;  %v693_v29 = vadd.f32 %v2318_v57, %v692_v26 }
 0x101   : > { %v1791_v30 = vpop.f32.mrf.mxu0  ;;  %v1847_v31 = vpop.f32.mrf.mxu1 }
 0x102   : > { %v475_v32 = vmax.f32 %v404_v28, 0.0  ;;  %v764_v34 = vmax.f32 %v693_v29, 0.0 }
 0x103   : > { %v406_v35 = vpop.f32.mrf.mxu0  ;;  %v695_v36 = vpop.f32.mrf.mxu1 }
 0x104   : > { %v2372_v37 = vmax.f32 %v475_v32, %v764_v34  ;;  %v407_v38 = vadd.f32 %v2318_v57, %v406_v35  ;;  %v696_v39 = vadd.f32 %v2318_v57, %v695_v36 }
 0x105   : > { %v1792_v40 = vpop.f32.mrf.mxu0  ;;  %v1848_v41 = vpop.f32.mrf.mxu1 }
 0x106   : > { %v476_v43 = vmax.f32 %v407_v38, 0.0  ;;  %v765_v44 = vmax.f32 %v696_v39, 0.0 }
 0x107   : > { %v411_v45 = vpop.f32.mrf.mxu0  ;;  %v700_v46 = vpop.f32.mrf.mxu1 }
 0x108   : > { %v2376_v47 = vmax.f32 %v476_v43, %v765_v44  ;;  %v412_v48 = vadd.f32 %v2318_v57, %v411_v45  ;;  %v701_v49 = vadd.f32 %v2318_v57, %v700_v46 }
 0x109   : > { %v1795_v50 = vpop.f32.mrf.mxu0  ;;  %v1851_v52 = vpop.f32.mrf.mxu1 }
 0x10a   : > { %v477_v53 = vmax.f32 %v412_v48, 0.0  ;;  %v766_v54 = vmax.f32 %v701_v49, 0.0 }
 0x10b   : > { %v414_v55 = vpop.f32.mrf.mxu0  ;;  %v703_v56 = vpop.f32.mrf.mxu1 }
 0x10c   : > { %v2380_v58 = vmax.f32 %v477_v53, %v766_v54  ;;  %v415_v59 = vadd.f32 %v2318_v57, %v414_v55  ;;  %v704_v60 = vadd.f32 %v2318_v57, %v703_v56 }
 0x10d   : > { %v1796_v62 = vpop.f32.mrf.mxu0  ;;  %v1852_v63 = vpop.f32.mrf.mxu1 }
 0x10e   : > { %v478_v1 = vmax.f32 %v415_v59, 0.0  ;;  %v767_v2 = vmax.f32 %v704_v60, 0.0 }
 0x10f   : > { %v419_v3 = vpop.f32.mrf.mxu0  ;;  %v708_v4 = vpop.f32.mrf.mxu1 }
 0x110   : > { %v2384_v5 = vmax.f32 %v478_v1, %v767_v2  ;;  %v420_v6 = vadd.f32 %v2318_v57, %v419_v3  ;;  %v709_v9 = vadd.f32 %v2318_v57, %v708_v4 }
 0x111   : > { %v1799_v10 = vpop.f32.mrf.mxu0  ;;  %v1855_v11 = vpop.f32.mrf.mxu1 }
 0x112   : > { %v479_v12 = vmax.f32 %v420_v6, 0.0  ;;  %v768_v13 = vmax.f32 %v709_v9, 0.0 }
 0x113   : > { %v422_v14 = vpop.f32.mrf.mxu0  ;;  %v711_v0 = vpop.f32.mrf.mxu1 }
 0x114   : > { %v2388_v16 = vmax.f32 %v479_v12, %v768_v13  ;;  %v423_v18 = vadd.f32 %v2318_v57, %v422_v14  ;;  %v712_v19 = vadd.f32 %v2318_v57, %v711_v0 }
 0x115   : > { %v1800_v20 = vpop.f32.mrf.mxu0  ;;  %v1856_v21 = vpop.f32.mrf.mxu1 }
 0x116   : > { %v480_v22 = vmax.f32 %v423_v18, 0.0  ;;  %v769_v23 = vmax.f32 %v712_v19, 0.0 }
 0x117   : > { %v427_v25 = vpop.f32.mrf.mxu0  ;;  %v716_v26 = vpop.f32.mrf.mxu1 }
 0x118   : > { %v2392_v28 = vmax.f32 %v480_v22, %v769_v23  ;;  %v428_v29 = vadd.f32 %v2318_v57, %v427_v25  ;;  %v717_v30 = vadd.f32 %v2318_v57, %v716_v26 }
 0x119   : > { %v1803_v31 = vpop.f32.mrf.mxu0  ;;  %v1859_v32 = vpop.f32.mrf.mxu1 }
 0x11a   : > { %v481_v34 = vmax.f32 %v428_v29, 0.0  ;;  %v770_v35 = vmax.f32 %v717_v30, 0.0 }
 0x11b   : > { %v430_v36 = vpop.f32.mrf.mxu0  ;;  %v719_v38 = vpop.f32.mrf.mxu1 }
 0x11c   : > { %v2396_v39 = vmax.f32 %v481_v34, %v770_v35  ;;  %v431_v40 = vadd.f32 %v2318_v57, %v430_v36  ;;  %v720_v41 = vadd.f32 %v2318_v57, %v719_v38 }
 0x11d   : > { %v1804_v43 = vpop.f32.mrf.mxu0  ;;  %v1860_v44 = vpop.f32.mrf.mxu1 }
 0x11e   : > { %v482_v45 = vmax.f32 %v431_v40, 0.0  ;;  %v771_v46 = vmax.f32 %v720_v41, 0.0 }
 0x11f   : > { %v435_v48 = vpop.f32.mrf.mxu0  ;;  %v724_v49 = vpop.f32.mrf.mxu1 }
 0x120   : > { %v2400_v50 = vmax.f32 %v482_v45, %v771_v46  ;;  %v436_v52 = vadd.f32 %v2318_v57, %v435_v48  ;;  %v725_v53 = vadd.f32 %v2318_v57, %v724_v49 }
 0x121   : > { %v1807_v54 = vpop.f32.mrf.mxu0  ;;  %v1863_v55 = vpop.f32.mrf.mxu1 }
 0x122   : > { %v483_v56 = vmax.f32 %v436_v52, 0.0  ;;  %v772_v59 = vmax.f32 %v725_v53, 0.0 }
 0x123   : > { %v438_v60 = vpop.f32.mrf.mxu0  ;;  %v727_v62 = vpop.f32.mrf.mxu1 }
 0x124   : > { %v2404_v63 = vmax.f32 %v483_v56, %v772_v59  ;;  %v439_v1 = vadd.f32 %v2318_v57, %v438_v60  ;;  %v728_v2 = vadd.f32 %v2318_v57, %v727_v62 }
 0x125   : > { %v1808_v3 = vpop.f32.mrf.mxu0  ;;  %v1864_v4 = vpop.f32.mrf.mxu1 }
 0x126   : > { %v484_v6 = vmax.f32 %v439_v1, 0.0  ;;  %v773_v9 = vmax.f32 %v728_v2, 0.0 }
 0x127   : > { %v443_v10 = vpop.f32.mrf.mxu0  ;;  %v732_v11 = vpop.f32.mrf.mxu1 }
 0x128   : > { %v2408_v12 = vmax.f32 %v484_v6, %v773_v9  ;;  %v444_v13 = vadd.f32 %v2318_v57, %v443_v10  ;;  %v733_v14 = vadd.f32 %v2318_v57, %v732_v11 }
 0x129   : > { %v1811_v0 = vpop.f32.mrf.mxu0  ;;  %v1867_v18 = vpop.f32.mrf.mxu1 }
 0x12a   : > { %v485_v19 = vmax.f32 %v444_v13, 0.0  ;;  %v774_v20 = vmax.f32 %v733_v14, 0.0 }
 0x12b   : > { %v446_v21 = vpop.f32.mrf.mxu0  ;;  %v735_v22 = vpop.f32.mrf.mxu1 }
 0x12c   : > { %v2412_v23 = vmax.f32 %v485_v19, %v774_v20  ;;  %v447_v25 = vadd.f32 %v2318_v57, %v446_v21  ;;  %v736_v26 = vadd.f32 %v2318_v57, %v735_v22 }
 0x12d   : > { %v1812_v29 = vpop.f32.mrf.mxu0  ;;  %v1868_v30 = vpop.f32.mrf.mxu1 }
 0x12e   : > { %v486_v31 = vmax.f32 %v447_v25, 0.0  ;;  %v775_v32 = vmax.f32 %v736_v26, 0.0 }
 0x12f   : > { %v451_v34 = vpop.f32.mrf.mxu0  ;;  %v740_v35 = vpop.f32.mrf.mxu1 }
 0x130   : > { %v2416_v36 = vmax.f32 %v486_v31, %v775_v32  ;;  %v452_v38 = vadd.f32 %v2318_v57, %v451_v34  ;;  %v741_v40 = vadd.f32 %v2318_v57, %v740_v35 }
 0x131   : > { %v1815_v41 = vpop.f32.mrf.mxu0  ;;  %v1871_v43 = vpop.f32.mrf.mxu1 }
 0x132   : > { %v487_v44 = vmax.f32 %v452_v38, 0.0  ;;  %v776_v45 = vmax.f32 %v741_v40, 0.0 }
 0x133   : > { %v454_v46 = vpop.f32.mrf.mxu0  ;;  %v743_v48 = vpop.f32.mrf.mxu1 }
 0x134   : > { %v2420_v49 = vmax.f32 %v487_v44, %v776_v45  ;;  %v455_v52 = vadd.f32 %v2318_v57, %v454_v46  ;;  %v744_v53 = vadd.f32 %v2318_v57, %v743_v48 }
 0x135   : > { %v1816_v54 = vpop.f32.mrf.mxu0  ;;  %v1872_v55 = vpop.f32.mrf.mxu1 }
 0x136   : > { %v488_v56 = vmax.f32 %v455_v52, 0.0  ;;  %v777_v59 = vmax.f32 %v744_v53, 0.0 }
 0x137   : > { %v459_v60 = vpop.f32.mrf.mxu0  ;;  %v748_v62 = vpop.f32.mrf.mxu1 }
 0x138   : > { %v2424_v1 = vmax.f32 %v488_v56, %v777_v59  ;;  %v460_v2 = vadd.f32 %v2318_v57, %v459_v60  ;;  %v749_v3 = vadd.f32 %v2318_v57, %v748_v62 }
 0x139   : > { %v1819_v4 = vpop.f32.mrf.mxu0  ;;  %v1875_v6 = vpop.f32.mrf.mxu1 }
 0x13a   : > { %v489_v9 = vmax.f32 %v460_v2, 0.0  ;;  %v778_v10 = vmax.f32 %v749_v3, 0.0 }
 0x13b   : > { %v462_v11 = vpop.f32.mrf.mxu0  ;;  %v751_v13 = vpop.f32.mrf.mxu1 }
 0x13c   : > { %v2428_v14 = vmax.f32 %v489_v9, %v778_v10 }
 0x13d   : > { %v1820_v0 = vpop.f32.mrf.mxu0  ;;  %v1876_v18 = vpop.f32.mrf.mxu1 }
 0x13f   : > { %v966_v19 = vpop.f32.mrf.mxu0  ;;  %v1280_v20 = vpop.f32.mrf.mxu1 }
 0x140   : > { %v967_v21 = vadd.f32 %v2318_v57, %v966_v19  ;;  %v1281_v22 = vadd.f32 %v2318_v57, %v1280_v20 }
 0x141   : > { %v1883_v25 = vpop.f32.mrf.mxu0  ;;  %v1939_v26 = vpop.f32.mrf.mxu1 }
 0x142   : > { %v1068_v29 = vmax.f32 %v967_v21, 0.0  ;;  %v1382_v30 = vmax.f32 %v1281_v22, 0.0 }
 0x143   : > { %v969_v31 = vpop.f32.mrf.mxu0  ;;  %v1283_v32 = vpop.f32.mrf.mxu1 }
 0x144   : > { %v1093_v34 = vmax.f32 %v2330_v7, %v1068_v29  ;;  %v970_v35 = vadd.f32 %v2318_v57, %v969_v31  ;;  %v1284_v38 = vadd.f32 %v2318_v57, %v1283_v32 }
 0x145   : > { %v1884_v40 = vpop.f32.mrf.mxu0  ;;  %v1940_v41 = vpop.f32.mrf.mxu1 }
 0x146   : > { %v1407_v43 = vmax.f32 %v1093_v34, %v1382_v30  ;;  %v1069_v44 = vmax.f32 %v970_v35, 0.0  ;;  %v1383_v48 = vmax.f32 %v1284_v38, 0.0 }
 0x147   : > { %v974_v45 = vpop.f32.mrf.mxu0  ;;  %v1288_v46 = vpop.f32.mrf.mxu1 }
 0x148   : > { %1433 = vst.msk [vmem:[%s2439_s27] sm:$0xff] %vm1432_vm4, %v1407_v43  ;;  %v1094_v7 = vmax.f32 %v2336_v15, %v1069_v44  ;;  %v975_v52 = vadd.f32 %v2318_v57, %v974_v45  ;;  %v1289_v53 = vadd.f32 %v2318_v57, %v1288_v46 }
 0x149   : > { %v1887_v54 = vpop.f32.mrf.mxu0  ;;  %v1943_v55 = vpop.f32.mrf.mxu1 }
 0x14a   : > { %v1408_v56 = vmax.f32 %v1094_v7, %v1383_v48  ;;  %v1070_v59 = vmax.f32 %v975_v52, 0.0  ;;  %v1384_v60 = vmax.f32 %v1289_v53, 0.0 }
 0x14b   : > { %v977_v62 = vpop.f32.mrf.mxu0  ;;  %v1291_v2 = vpop.f32.mrf.mxu1 }
 0x14c   : > { %1434 = vst.msk [vmem:[%s2439_s27 + $0x8] sm:$0xff] %vm1432_vm4, %v1408_v56  ;;  %v1095_v3 = vmax.f32 %v2340_v24, %v1070_v59  ;;  %v978_v4 = vadd.f32 %v2318_v57, %v977_v62  ;;  %v1292_v15 = vadd.f32 %v2318_v57, %v1291_v2 }
 0x14d   : > { %v1888_v6 = vpop.f32.mrf.mxu0  ;;  %v1944_v9 = vpop.f32.mrf.mxu1 }
 0x14e   : > { %v1409_v10 = vmax.f32 %v1095_v3, %v1384_v60  ;;  %v1071_v11 = vmax.f32 %v978_v4, 0.0  ;;  %v1385_v19 = vmax.f32 %v1292_v15, 0.0 }
 0x14f   : > { %v982_v13 = vpop.f32.mrf.mxu0  ;;  %v1296_v0 = vpop.f32.mrf.mxu1 }
 0x150   : > { %1435 = vst.msk [vmem:[%s2439_s27 + $0x10] sm:$0xff] %vm1432_vm4, %v1409_v10  ;;  %v1096_v18 = vmax.f32 %v2344_v33, %v1071_v11  ;;  %v983_v20 = vadd.f32 %v2318_v57, %v982_v13  ;;  %v1297_v24 = vadd.f32 %v2318_v57, %v1296_v0 }
 0x151   : > { %v1891_v21 = vpop.f32.mrf.mxu0  ;;  %v1947_v22 = vpop.f32.mrf.mxu1 }
 0x152   : > { %v1410_v25 = vmax.f32 %v1096_v18, %v1385_v19  ;;  %v1072_v26 = vmax.f32 %v983_v20, 0.0  ;;  %v1386_v29 = vmax.f32 %v1297_v24, 0.0 }
 0x153   : > { %v985_v30 = vpop.f32.mrf.mxu0  ;;  %v1299_v31 = vpop.f32.mrf.mxu1 }
 0x154   : > { %1436 = vst.msk [vmem:[%s2439_s27 + $0x18] sm:$0xff] %vm1432_vm4, %v1410_v25  ;;  %v1097_v32 = vmax.f32 %v2348_v42, %v1072_v26  ;;  %v986_v34 = vadd.f32 %v2318_v57, %v985_v30  ;;  %v1300_v33 = vadd.f32 %v2318_v57, %v1299_v31 }
 0x155   : > { %v1892_v35 = vpop.f32.mrf.mxu0  ;;  %v1948_v38 = vpop.f32.mrf.mxu1 }
 0x156   : > { %v1411_v40 = vmax.f32 %v1097_v32, %v1386_v29  ;;  %v1073_v41 = vmax.f32 %v986_v34, 0.0  ;;  %v1387_v46 = vmax.f32 %v1300_v33, 0.0 }
 0x157   : > { %v990_v43 = vpop.f32.mrf.mxu0  ;;  %v1304_v44 = vpop.f32.mrf.mxu1 }
 0x158   : > { %1437 = vst.msk [vmem:[%s2439_s27 + $0x20] sm:$0xff] %vm1432_vm4, %v1411_v40  ;;  %v1098_v45 = vmax.f32 %v2352_v51, %v1073_v41  ;;  %v991_v7 = vadd.f32 %v2318_v57, %v990_v43  ;;  %v1305_v42 = vadd.f32 %v2318_v57, %v1304_v44 }
 0x159   : > { %v1895_v48 = vpop.f32.mrf.mxu0  ;;  %v1951_v52 = vpop.f32.mrf.mxu1 }
 0x15a   : > { %v1412_v53 = vmax.f32 %v1098_v45, %v1387_v46  ;;  %v1074_v54 = vmax.f32 %v991_v7, 0.0  ;;  %v1388_v55 = vmax.f32 %v1305_v42, 0.0 }
 0x15b   : > { %v993_v56 = vpop.f32.mrf.mxu0  ;;  %v1307_v59 = vpop.f32.mrf.mxu1 }
 0x15c   : > { %1438 = vst.msk [vmem:[%s2439_s27 + $0x28] sm:$0xff] %vm1432_vm4, %v1412_v53  ;;  %v1099_v60 = vmax.f32 %v2356_v61, %v1074_v54  ;;  %v994_v62 = vadd.f32 %v2318_v57, %v993_v56  ;;  %v1308_v51 = vadd.f32 %v2318_v57, %v1307_v59 }
 0x15d   : > { %v1896_v2 = vpop.f32.mrf.mxu0  ;;  %v1952_v3 = vpop.f32.mrf.mxu1 }
 0x15e   : > { %v1413_v4 = vmax.f32 %v1099_v60, %v1388_v55  ;;  %v1075_v15 = vmax.f32 %v994_v62, 0.0  ;;  %v1389_v11 = vmax.f32 %v1308_v51, 0.0 }
 0x15f   : > { %v998_v6 = vpop.f32.mrf.mxu0  ;;  %v1312_v9 = vpop.f32.mrf.mxu1 }
 0x160   : > { %1439 = vst.msk [vmem:[%s2439_s27 + $0x30] sm:$0xff] %vm1432_vm4, %v1413_v4  ;;  %v1100_v10 = vmax.f32 %v2360_v8, %v1075_v15  ;;  %v999_v13 = vadd.f32 %v2318_v57, %v998_v6  ;;  %v1313_v61 = vadd.f32 %v2318_v57, %v1312_v9 }
 0x161   : > { %v1899_v0 = vpop.f32.mrf.mxu0  ;;  %v1955_v18 = vpop.f32.mrf.mxu1 }
 0x162   : > { %v1414_v19 = vmax.f32 %v1100_v10, %v1389_v11  ;;  %v1076_v20 = vmax.f32 %v999_v13, 0.0  ;;  %v1390_v24 = vmax.f32 %v1313_v61, 0.0 }
 0x163   : > { %v1001_v21 = vpop.f32.mrf.mxu0  ;;  %v1315_v22 = vpop.f32.mrf.mxu1 }
 0x164   : > { %1440 = vst.msk [vmem:[%s2439_s27 + $0x38] sm:$0xff] %vm1432_vm4, %v1414_v19  ;;  %v1101_v25 = vmax.f32 %v2364_v17, %v1076_v20  ;;  %v1002_v26 = vadd.f32 %v2318_v57, %v1001_v21  ;;  %v1316_v8 = vadd.f32 %v2318_v57, %v1315_v22 }
 0x165   : > { %v1900_v29 = vpop.f32.mrf.mxu0  ;;  %v1956_v30 = vpop.f32.mrf.mxu1 }
 0x166   : > { %v1415_v31 = vmax.f32 %v1101_v25, %v1390_v24  ;;  %v1077_v32 = vmax.f32 %v1002_v26, 0.0  ;;  %v1391_v38 = vmax.f32 %v1316_v8, 0.0 }
 0x167   : > { %v1006_v34 = vpop.f32.mrf.mxu0  ;;  %v1320_v33 = vpop.f32.mrf.mxu1 }
 0x168   : > { %1441 = vst.msk [vmem:[%s2439_s27 + $0x40] sm:$0xff] %vm1432_vm4, %v1415_v31  ;;  %v1102_v35 = vmax.f32 %v2368_v27, %v1077_v32  ;;  %v1007_v40 = vadd.f32 %v2318_v57, %v1006_v34  ;;  %v1321_v17 = vadd.f32 %v2318_v57, %v1320_v33 }
 0x169   : > { %v1903_v41 = vpop.f32.mrf.mxu0  ;;  %v1959_v43 = vpop.f32.mrf.mxu1 }
 0x16a   : > { %v1416_v44 = vmax.f32 %v1102_v35, %v1391_v38  ;;  %v1078_v45 = vmax.f32 %v1007_v40, 0.0  ;;  %v1392_v46 = vmax.f32 %v1321_v17, 0.0 }
 0x16b   : > { %v1009_v7 = vpop.f32.mrf.mxu0  ;;  %v1323_v42 = vpop.f32.mrf.mxu1 }
 0x16c   : > { %1442 = vst.msk [vmem:[%s2439_s27 + $0x48] sm:$0xff] %vm1432_vm4, %v1416_v44  ;;  %v1103_v48 = vmax.f32 %v2372_v37, %v1078_v45  ;;  %v1010_v52 = vadd.f32 %v2318_v57, %v1009_v7  ;;  %v1324_v27 = vadd.f32 %v2318_v57, %v1323_v42 }
 0x16d   : > { %v1904_v53 = vpop.f32.mrf.mxu0  ;;  %v1960_v54 = vpop.f32.mrf.mxu1 }
 0x16e   : > { %v1417_v55 = vmax.f32 %v1103_v48, %v1392_v46  ;;  %v1079_v56 = vmax.f32 %v1010_v52, 0.0  ;;  %v1393_v51 = vmax.f32 %v1324_v27, 0.0 }
 0x16f   : > { %v1014_v59 = vpop.f32.mrf.mxu0  ;;  %v1328_v60 = vpop.f32.mrf.mxu1 }
 0x170   : > { %1443 = vst.msk [vmem:[%s2439_s27 + $0x50] sm:$0xff] %vm1432_vm4, %v1417_v55  ;;  %v1104_v62 = vmax.f32 %v2376_v47, %v1079_v56  ;;  %v1015_v2 = vadd.f32 %v2318_v57, %v1014_v59  ;;  %v1329_v37 = vadd.f32 %v2318_v57, %v1328_v60 }
 0x171   : > { %v1907_v3 = vpop.f32.mrf.mxu0  ;;  %v1963_v4 = vpop.f32.mrf.mxu1 }
 0x172   : > { %v1418_v15 = vmax.f32 %v1104_v62, %v1393_v51  ;;  %v1080_v6 = vmax.f32 %v1015_v2, 0.0  ;;  %v1394_v9 = vmax.f32 %v1329_v37, 0.0 }
 0x173   : > { %v1017_v10 = vpop.f32.mrf.mxu0  ;;  %v1331_v11 = vpop.f32.mrf.mxu1 }
 0x174   : > { %1444 = vst.msk [vmem:[%s2439_s27 + $0x58] sm:$0xff] %vm1432_vm4, %v1418_v15  ;;  %v1105_v13 = vmax.f32 %v2380_v58, %v1080_v6  ;;  %v1018_v61 = vadd.f32 %v2318_v57, %v1017_v10  ;;  %v1332_v47 = vadd.f32 %v2318_v57, %v1331_v11 }
 0x175   : > { %v1908_v0 = vpop.f32.mrf.mxu0  ;;  %v1964_v18 = vpop.f32.mrf.mxu1 }
 0x176   : > { %v1419_v19 = vmax.f32 %v1105_v13, %v1394_v9  ;;  %v1081_v20 = vmax.f32 %v1018_v61, 0.0  ;;  %v1395_v25 = vmax.f32 %v1332_v47, 0.0 }
 0x177   : > { %v1022_v24 = vpop.f32.mrf.mxu0  ;;  %v1336_v21 = vpop.f32.mrf.mxu1 }
 0x178   : > { %1445 = vst.msk [vmem:[%s2439_s27 + $0x60] sm:$0xff] %vm1432_vm4, %v1419_v19  ;;  %v1106_v22 = vmax.f32 %v2384_v5, %v1081_v20  ;;  %v1023_v26 = vadd.f32 %v2318_v57, %v1022_v24  ;;  %v1337_v58 = vadd.f32 %v2318_v57, %v1336_v21 }
 0x179   : > { %v1911_v8 = vpop.f32.mrf.mxu0  ;;  %v1967_v29 = vpop.f32.mrf.mxu1 }
 0x17a   : > { %v1420_v30 = vmax.f32 %v1106_v22, %v1395_v25  ;;  %v1082_v31 = vmax.f32 %v1023_v26, 0.0  ;;  %v1396_v32 = vmax.f32 %v1337_v58, 0.0 }
 0x17b   : > { %v1025_v34 = vpop.f32.mrf.mxu0  ;;  %v1339_v33 = vpop.f32.mrf.mxu1 }
 0x17c   : > { %1446 = vst.msk [vmem:[%s2439_s27 + $0x68] sm:$0xff] %vm1432_vm4, %v1420_v30  ;;  %v1107_v35 = vmax.f32 %v2388_v16, %v1082_v31  ;;  %v1026_v38 = vadd.f32 %v2318_v57, %v1025_v34  ;;  %v1340_v5 = vadd.f32 %v2318_v57, %v1339_v33 }
 0x17d   : > { %v1912_v40 = vpop.f32.mrf.mxu0  ;;  %v1968_v17 = vpop.f32.mrf.mxu1 }
 0x17e   : > { %v1421_v41 = vmax.f32 %v1107_v35, %v1396_v32  ;;  %v1083_v43 = vmax.f32 %v1026_v38, 0.0  ;;  %v1397_v7 = vmax.f32 %v1340_v5, 0.0 }
 0x17f   : > { %v1030_v44 = vpop.f32.mrf.mxu0  ;;  %v1344_v45 = vpop.f32.mrf.mxu1 }
 0x180   : > { %1447 = vst.msk [vmem:[%s2439_s27 + $0x70] sm:$0xff] %vm1432_vm4, %v1421_v41  ;;  %v1108_v46 = vmax.f32 %v2392_v28, %v1083_v43  ;;  %v1031_v42 = vadd.f32 %v2318_v57, %v1030_v44  ;;  %v1345_v16 = vadd.f32 %v2318_v57, %v1344_v45 }
 0x181   : > { %v1915_v48 = vpop.f32.mrf.mxu0  ;;  %v1971_v52 = vpop.f32.mrf.mxu1 }
 0x182   : > { %v1422_v27 = vmax.f32 %v1108_v46, %v1397_v7  ;;  %v1084_v53 = vmax.f32 %v1031_v42, 0.0  ;;  %v1398_v54 = vmax.f32 %v1345_v16, 0.0 }
 0x183   : > { %v1033_v55 = vpop.f32.mrf.mxu0  ;;  %v1347_v56 = vpop.f32.mrf.mxu1 }
 0x184   : > { %1448 = vst.msk [vmem:[%s2439_s27 + $0x78] sm:$0xff] %vm1432_vm4, %v1422_v27  ;;  %v1109_v59 = vmax.f32 %v2396_v39, %v1084_v53  ;;  %v1034_v60 = vadd.f32 %v2318_v57, %v1033_v55  ;;  %v1348_v28 = vadd.f32 %v2318_v57, %v1347_v56 }
 0x185   : > { %v1916_v62 = vpop.f32.mrf.mxu0  ;;  %v1972_v51 = vpop.f32.mrf.mxu1 }
 0x186   : > { %v1423_v2 = vmax.f32 %v1109_v59, %v1398_v54  ;;  %v1085_v37 = vmax.f32 %v1034_v60, 0.0  ;;  %v1399_v6 = vmax.f32 %v1348_v28, 0.0 }
 0x187   : > { %v1038_v3 = vpop.f32.mrf.mxu0  ;;  %v1352_v4 = vpop.f32.mrf.mxu1 }
 0x188   : > { %1449 = vst.msk [vmem:[%s2439_s27 + $0x80] sm:$0xff] %vm1432_vm4, %v1423_v2  ;;  %v1110_v15 = vmax.f32 %v2400_v50, %v1085_v37  ;;  %v1039_v9 = vadd.f32 %v2318_v57, %v1038_v3  ;;  %v1353_v39 = vadd.f32 %v2318_v57, %v1352_v4 }
 0x189   : > { %v1919_v10 = vpop.f32.mrf.mxu0  ;;  %v1975_v11 = vpop.f32.mrf.mxu1 }
 0x18a   : > { %v1424_v13 = vmax.f32 %v1110_v15, %v1399_v6  ;;  %v1086_v61 = vmax.f32 %v1039_v9, 0.0  ;;  %v1400_v47 = vmax.f32 %v1353_v39, 0.0 }
 0x18b   : > { %v1041_v0 = vpop.f32.mrf.mxu0  ;;  %v1355_v18 = vpop.f32.mrf.mxu1 }
 0x18c   : > { %1450 = vst.msk [vmem:[%s2439_s27 + $0x88] sm:$0xff] %vm1432_vm4, %v1424_v13  ;;  %v1111_v19 = vmax.f32 %v2404_v63, %v1086_v61  ;;  %v1042_v20 = vadd.f32 %v2318_v57, %v1041_v0  ;;  %v1356_v50 = vadd.f32 %v2318_v57, %v1355_v18 }
 0x18d   : > { %v1920_v24 = vpop.f32.mrf.mxu0  ;;  %v1976_v21 = vpop.f32.mrf.mxu1 }
 0x18e   : > { %v1425_v22 = vmax.f32 %v1111_v19, %v1400_v47  ;;  %v1087_v25 = vmax.f32 %v1042_v20, 0.0  ;;  %v1401_v29 = vmax.f32 %v1356_v50, 0.0 }
 0x18f   : > { %v1046_v26 = vpop.f32.mrf.mxu0  ;;  %v1360_v58 = vpop.f32.mrf.mxu1 }
 0x190   : > { %1451 = vst.msk [vmem:[%s2439_s27 + $0x90] sm:$0xff] %vm1432_vm4, %v1425_v22  ;;  %v1112_v8 = vmax.f32 %v2408_v12, %v1087_v25  ;;  %v1047_v30 = vadd.f32 %v2318_v57, %v1046_v26  ;;  %v1361_v63 = vadd.f32 %v2318_v57, %v1360_v58 }
 0x191   : > { %v1923_v31 = vpop.f32.mrf.mxu0  ;;  %v1979_v32 = vpop.f32.mrf.mxu1 }
 0x192   : > { %v1426_v34 = vmax.f32 %v1112_v8, %v1401_v29  ;;  %v1088_v33 = vmax.f32 %v1047_v30, 0.0  ;;  %v1402_v35 = vmax.f32 %v1361_v63, 0.0 }
 0x193   : > { %v1049_v38 = vpop.f32.mrf.mxu0  ;;  %v1363_v5 = vpop.f32.mrf.mxu1 }
 0x194   : > { %1452 = vst.msk [vmem:[%s2439_s27 + $0x98] sm:$0xff] %vm1432_vm4, %v1426_v34  ;;  %v1113_v40 = vmax.f32 %v2412_v23, %v1088_v33  ;;  %v1050_v17 = vadd.f32 %v2318_v57, %v1049_v38  ;;  %v1364_v12 = vadd.f32 %v2318_v57, %v1363_v5 }
 0x195   : > { %v1924_v41 = vpop.f32.mrf.mxu0  ;;  %v1980_v43 = vpop.f32.mrf.mxu1 }
 0x196   : > { %v1427_v44 = vmax.f32 %v1113_v40, %v1402_v35  ;;  %v1089_v45 = vmax.f32 %v1050_v17, 0.0  ;;  %v1403_v16 = vmax.f32 %v1364_v12, 0.0 }
 0x197   : > { %v1054_v46 = vpop.f32.mrf.mxu0  ;;  %v1368_v7 = vpop.f32.mrf.mxu1 }
 0x198   : > { %1453 = vst.msk [vmem:[%s2439_s27 + $0xa0] sm:$0xff] %vm1432_vm4, %v1427_v44  ;;  %v1114_v42 = vmax.f32 %v2416_v36, %v1089_v45  ;;  %v1055_v48 = vadd.f32 %v2318_v57, %v1054_v46  ;;  %v1369_v23 = vadd.f32 %v2318_v57, %v1368_v7 }
 0x199   : > { %v1927_v52 = vpop.f32.mrf.mxu0  ;;  %v1983_v27 = vpop.f32.mrf.mxu1 }
 0x19a   : > { %v1428_v53 = vmax.f32 %v1114_v42, %v1403_v16  ;;  %v1090_v54 = vmax.f32 %v1055_v48, 0.0  ;;  %v1404_v55 = vmax.f32 %v1369_v23, 0.0 }
 0x19b   : > { %v1057_v56 = vpop.f32.mrf.mxu0  ;;  %v1371_v59 = vpop.f32.mrf.mxu1 }
 0x19c   : > { %1454 = vst.msk [vmem:[%s2439_s27 + $0xa8] sm:$0xff] %vm1432_vm4, %v1428_v53  ;;  %v1115_v60 = vmax.f32 %v2420_v49, %v1090_v54  ;;  %v1058_v28 = vadd.f32 %v2318_v57, %v1057_v56  ;;  %v1372_v36 = vadd.f32 %v2318_v57, %v1371_v59 }
 0x19d   : > { %v1928_v62 = vpop.f32.mrf.mxu0  ;;  %v1984_v51 = vpop.f32.mrf.mxu1 }
 0x19e   : > { %v1429_v2 = vmax.f32 %v1115_v60, %v1404_v55  ;;  %v1091_v37 = vmax.f32 %v1058_v28, 0.0  ;;  %v1405_v6 = vmax.f32 %v1372_v36, 0.0 }
 0x19f   : > { %v1062_v3 = vpop.f32.mrf.mxu0  ;;  %v1376_v4 = vpop.f32.mrf.mxu1 }
 0x1a0   : > { %1455 = vst.msk [vmem:[%s2439_s27 + $0xb0] sm:$0xff] %vm1432_vm4, %v1429_v2  ;;  %v1116_v15 = vmax.f32 %v2424_v1, %v1091_v37  ;;  %v1063_v9 = vadd.f32 %v2318_v57, %v1062_v3  ;;  %v1377_v49 = vadd.f32 %v2318_v57, %v1376_v4 }
 0x1a1   : > { %v1931_v39 = vpop.f32.mrf.mxu0  ;;  %v1987_v10 = vpop.f32.mrf.mxu1 }
 0x1a2   : > { %v1430_v11 = vmax.f32 %v1116_v15, %v1405_v6  ;;  %v1092_v13 = vmax.f32 %v1063_v9, 0.0  ;;  %v1406_v61 = vmax.f32 %v1377_v49, 0.0 }
 0x1a3   : > { %v1065_v47 = vpop.f32.mrf.mxu0  ;;  %v1379_v0 = vpop.f32.mrf.mxu1 }
 0x1a4   : > { %1456 = vst.msk [vmem:[%s2439_s27 + $0xb8] sm:$0xff] %vm1432_vm4, %v1430_v11  ;;  %v1117_v18 = vmax.f32 %v2428_v14, %v1092_v13 }
 0x1a5   : > { %v1932_v19 = vpop.f32.mrf.mxu0  ;;  %v1988_v1 = vpop.f32.mrf.mxu1 }
 0x1a6   : > { %v1431_v20 = vmax.f32 %v1117_v18, %v1406_v61 }
 0x1a8   : > { %1458 = vst.msk [vmem:[%s2439_s27 + $0xc0] sm:$0xf] %vm1457_vm5, %v1431_v20 }
 0x1a9 PF: > { %s13_s12 = sadd.s32 1, %s2062_s12  }
 0x1aa   : > { %p10_p4 = scmp.ge.s32.totalorder %s13_s12, 4  }
 0x1ac   :  { %12 = sbr.rel (!%p10_p4) target bundleno = 1 (0x1), region = 65 }

// kernel: lenet9_forward.4
= control target key start
LH: loop header
LB: loop body
LE: loop exit
PB: predicated region body
PF: predicated region fallthrough
CT: control target
= control target key end

     0   :  { %s8437_s21 = smov 0   ;;  %s9908_s0 = inlined_call_operand.vmem [shape: bf16[2,4,25,150], index: 0, kind: input, shape index: {}]   ;;  %s9909_s1 = inlined_call_operand.vmem [shape: bf16[150,16], index: 1, kind: input, shape index: {}]   ;;  %s9910_s2 = inlined_call_operand.vmem [shape: f32[1,16], index: 2, kind: input, shape index: {}]   ;;  %s9911_s3 = inlined_call_operand.vmem [shape: bf16[9,25,25], index: 3, kind: input, shape index: {}]   ;;  %s9912_s4 = inlined_call_operand.vmem [shape: bf16[9,16,32], index: 4, kind: input, shape index: {}]   ;;  %s9913_s5 = inlined_call_operand.vmem [shape: f32[1,32], index: 5, kind: input, shape index: {}]   ;;  %s9914_s6 = inlined_call_operand.vmem [shape: bf16[9,32,64], index: 6, kind: input, shape index: {}]   ;;  %s9915_s7 = inlined_call_operand.vmem [shape: f32[1,64], index: 7, kind: input, shape index: {}]   ;;  %s9916_s8 = inlined_call_operand.vmem [shape: bf16[9,64,128], index: 8, kind: input, shape index: {}]   ;;  %s9917_s9 = inlined_call_operand.vmem [shape: f32[1,128], index: 9, kind: input, shape index: {}]   ;;  %s9918_s10 = inlined_call_operand.vmem [shape: bf16[9,128,256], index: 10, kind: input, shape index: {}]   ;;  %s9919_s11 = inlined_call_operand.vmem [shape: f32[1,256], index: 11, kind: input, shape index: {}]   ;;  %s9920_s12 = inlined_call_operand.vmem [shape: f32[2,25,256], index: 12, kind: output, shape index: {}]  }
   0x1 LB: > { %s6532_s22 = sadd.s32 4294967295, %s8368_s21   ;;  %p6536_p0 = scmp.ge.s32.totalorder %s8368_s21, 1  ;;  %s8368_s21 = sphi %s8437_s21, %s22_s21  }
   0x2   : > { %p362_p1 = scmp.lt.s32.totalorder %s8368_s21, 3 }
   0x4   : > { %p363_p2 = pnand %p6536_p0, %p362_p1 }
   0x5   : > { %p404_p3 = scmp.lt.s32.totalorder (!%p363_p2), %s6532_s22, 1 }
   0x6   : > { %366 = sbr.rel (%p363_p2) target bundleno = 4037 (0xfc5), region = 68 }
   0xb   : > { %v8448_v0 = vld [vmem:[%s9909_s1 + $0x38] sm:$0xff]   ;;  %v8370_v1 = vmov 0   ;;  %v8457_v2 = vld [vmem:[%s9909_s1 + $0x30] sm:$0xff]   ;;  %s9922_s22 = smov (!%p404_p3, %s6532_s22), 1  ;;  %v8468_v3 = vld [vmem:[%s9909_s1 + $0x28] sm:$0xff]   ;;  %vm520_vm0 = vcmask 179200  }
   0xc   : > { %531 = vmatprep.subr.bf16.mxu0 %v8370_v1  ;;  %613 = vmatprep.subr.bf16.mxu1 %v8370_v1  ;;  %s7216_s29 = sshll.u32 %s9922_s22, 7  ;;  %v8483_v4 = vld [vmem:[%s9909_s1 + $0x20] sm:$0xff]   ;;  %v8495_v7 = vld [vmem:[%s9909_s1 + $0x18] sm:$0xff]   ;;  %v8019_v8 = vld [vmem:[%s9909_s1 + $0x48] ss:$0 sps:$4 sm:$0x77]  }
   0xd   : > { %532 = vmatpush1.bf16.msra.mxu0 %v8448_v0  ;;  %614 = vmatpush1.bf16.msra.mxu1 %v8448_v0  ;;  %s8476_s14 = scalar_lea.vmem %s9908_s0, %s7216_s29  ;;  %v8508_v9 = vld [vmem:[%s9909_s1 + $0x10] sm:$0xff]   ;;  %vm527_vm1 = vcmask 1042432   ;;  %v8515_v10 = vld [vmem:[%s9909_s1 + $0x8] sm:$0xff]   ;;  %v8018_v12 = vld [vmem:[%s9909_s1] sm:$0xff]   ;;  %vm859_vm2 = vcmask 203776   ;;  %vm866_vm3 = vcmask 1043456  }
   0xe   : > { %533 = vmatprep.subr.bf16.mxu0 %v8370_v1  ;;  %615 = vmatprep.subr.bf16.mxu1 %v8370_v1  ;;  %v8023_v5 = vld [vmem:[%s8476_s14 + $0x4] ss:$8 sps:$4 sm:$0xff]   ;;  %v8517_v11 = vsel %vm527_vm1, %v8019_v8, 0  ;;  %v8021_v14 = vld [vmem:[%s8476_s14] ss:$8 sps:$4 sm:$0xff]   ;;  %v8609_v29 = vld [vmem:[%s9911_s3 + $0x10] sm:$0xff]  }
   0xf   : > { %6556 = vmatprep.mubr.msk.bf16.mxu0 %vm520_vm0, %v8023_v5  ;;  %v8026_v6 = vld [vmem:[%s8476_s14 + $0x24] ss:$8 sps:$4 sm:$0xff]   ;;  %v8024_v15 = vld [vmem:[%s8476_s14 + $0x20] ss:$8 sps:$4 sm:$0xff]   ;;  %vm867_vm4 = vcmask 1044480   ;;  %vm1007_vm5 = vcmask 130048  }
  0x10   : > { %6566 = vmatprep.mubr.msk.bf16.mxu1 %vm520_vm0, %v8026_v6  ;;  %v8535_v13 = vld [vmem:[%s9909_s1 + $0x40] sm:$0xff]   ;;  %v8027_v16 = vld [vmem:[%s8476_s14 + $0x14] ss:$8 sps:$4 sm:$0x1f]   ;;  %vm2247_vm6 = vcmask 261120   ;;  %vm3422_vm7 = vcmask 523264  }
  0x11   : > { %534 = vmatpush1.bf16.msra.mxu0 %v8457_v2  ;;  %616 = vmatpush1.bf16.msra.mxu1 %v8457_v2  ;;  %v8030_v17 = vld [vmem:[%s8476_s14 + $0x34] ss:$8 sps:$4 sm:$0x1f]   ;;  %v8029_v18 = vld [vmem:[%s8476_s14 + $0x10] ss:$8 sps:$4 sm:$0x1f]  }
  0x12   : > { %535 = vmatprep.subr.bf16.mxu0 %v8370_v1  ;;  %617 = vmatprep.subr.bf16.mxu1 %v8370_v1  ;;  %v8032_v19 = vld [vmem:[%s8476_s14 + $0x30] ss:$8 sps:$4 sm:$0x1f]   ;;  %v8035_v20 = vld [vmem:[%s8476_s14 + $0x44] ss:$8 sps:$4 sm:$0xff]  }
  0x13   : > { %v8038_v21 = vld [vmem:[%s8476_s14 + $0x64] ss:$8 sps:$4 sm:$0xff]   ;;  %v8033_v22 = vld [vmem:[%s8476_s14 + $0x40] ss:$8 sps:$4 sm:$0xff]  }
  0x14   : > { %v8036_v23 = vld [vmem:[%s8476_s14 + $0x60] ss:$8 sps:$4 sm:$0xff]   ;;  %v8039_v24 = vld [vmem:[%s8476_s14 + $0x54] ss:$8 sps:$4 sm:$0x1f]  }
  0x15   : > { %536 = vmatpush1.bf16.msra.mxu0 %v8468_v3  ;;  %618 = vmatpush1.bf16.msra.mxu1 %v8468_v3  ;;  %v8041_v25 = vld [vmem:[%s8476_s14 + $0x74] ss:$8 sps:$4 sm:$0x1f]   ;;  %v8043_v26 = vld [vmem:[%s8476_s14 + $0x50] ss:$8 sps:$4 sm:$0x1f]  }
  0x16   : > { %537 = vmatprep.subr.bf16.mxu0 %v8370_v1  ;;  %619 = vmatprep.subr.bf16.mxu1 %v8370_v1  ;;  %v8044_v27 = vld [vmem:[%s8476_s14 + $0x70] ss:$8 sps:$4 sm:$0x1f]   ;;  %v8604_v28 = vld [vmem:[%s9911_s3] sm:$0xff]   ;;  %s7217_s14 = sshll.u32 %s9922_s22, 6 }
  0x17   : > { %v6541_v50 = vld [vmem:[%s9910_s2] ss:$0 sm:$0xff]  ;;  %s9895_s20 = scalar_lea.vmem %s9920_s12, %s7217_s14 }
  0x19   : > { %538 = vmatpush1.bf16.msra.mxu0 %v8483_v4  ;;  %620 = vmatpush1.bf16.msra.mxu1 %v8483_v4 }
  0x1a   : > { %539 = vmatprep.subr.bf16.mxu0 %v8370_v1  ;;  %621 = vmatprep.subr.bf16.mxu1 %v8370_v1 }
  0x1d   : > { %540 = vmatpush1.bf16.msra.mxu0 %v8495_v7  ;;  %622 = vmatpush1.bf16.msra.mxu1 %v8495_v7 }
  0x1e   : > { %541 = vmatprep.subr.bf16.mxu0 %v8370_v1  ;;  %623 = vmatprep.subr.bf16.mxu1 %v8370_v1 }
  0x21   : > { %542 = vmatpush1.bf16.msra.mxu0 %v8508_v9  ;;  %624 = vmatpush1.bf16.msra.mxu1 %v8508_v9 }
  0x22   : > { %543 = vmatprep.subr.bf16.mxu0 %v8370_v1  ;;  %625 = vmatprep.subr.bf16.mxu1 %v8370_v1 }
  0x25   : > { %544 = vmatpush1.bf16.msra.mxu0 %v8515_v10  ;;  %626 = vmatpush1.bf16.msra.mxu1 %v8515_v10 }
  0x26   : > { %545 = vmatprep.subr.bf16.mxu0 %v8370_v1  ;;  %627 = vmatprep.subr.bf16.mxu1 %v8370_v1 }
  0x29   : > { %546 = vmatpush1.bf16.msra.mxu0 %v8018_v12  ;;  %628 = vmatpush1.bf16.msra.mxu1 %v8018_v12 }
  0x2a   : > { %559 = vmatprep.subr.bf16.mxu0 %v8370_v1  ;;  %641 = vmatprep.subr.bf16.mxu1 %v8370_v1 }
  0x2d   : > { %560 = vmatpush2.bf16.msra.mxu0 %v8517_v11  ;;  %642 = vmatpush2.bf16.msra.mxu1 %v8517_v11 }
  0x2e   : > { %561 = vmatprep.subr.bf16.mxu0 %v8370_v1  ;;  %643 = vmatprep.subr.bf16.mxu1 %v8370_v1 }
  0x31   : > { %562 = vmatpush2.bf16.msra.mxu0 %v8535_v13  ;;  %644 = vmatpush2.bf16.msra.mxu1 %v8535_v13 }
  0x32   : > { %699 = vmatprep.subr.bf16.mxu0 %v8370_v1  ;;  %785 = vmatprep.subr.bf16.mxu1 %v8370_v1 }
  0x34   : > { %564 = vmatmul.mubr.bf16.vlgmr.msra.gmra.mxu0 %v8021_v14  ;;  %646 = vmatmul.mubr.bf16.vlgmr.msra.gmra.mxu1 %v8024_v15 }
  0x35   : > { %700 = vmatpush1.bf16.msra.mxu0 %v8448_v0  ;;  %786 = vmatpush1.bf16.msra.mxu1 %v8448_v0 }
  0x36   : > { %701 = vmatprep.subr.bf16.mxu0 %v8370_v1  ;;  %787 = vmatprep.subr.bf16.mxu1 %v8370_v1 }
  0x37   : > { %6557 = vmatprep.mubr.msk.bf16.mxu0 %vm520_vm0, %v8027_v16  ;;  %6567 = vmatprep.mubr.msk.bf16.mxu1 %vm520_vm0, %v8030_v17 }
  0x39   : > { %702 = vmatpush1.bf16.msra.mxu0 %v8457_v2  ;;  %788 = vmatpush1.bf16.msra.mxu1 %v8457_v2 }
  0x3a   : > { %703 = vmatprep.subr.bf16.mxu0 %v8370_v1  ;;  %789 = vmatprep.subr.bf16.mxu1 %v8370_v1 }
  0x3c   : > { %572 = vmatmul.mubr.bf16.gmra.mxu0 %v8029_v18  ;;  %654 = vmatmul.mubr.bf16.gmra.mxu1 %v8032_v19 }
  0x3d   : > { %704 = vmatpush1.bf16.msra.mxu0 %v8468_v3  ;;  %790 = vmatpush1.bf16.msra.mxu1 %v8468_v3 }
  0x3e   : > { %705 = vmatprep.subr.bf16.mxu0 %v8370_v1  ;;  %791 = vmatprep.subr.bf16.mxu1 %v8370_v1 }
  0x3f   : > { %6576 = vmatprep.mubr.msk.bf16.mxu0 %vm520_vm0, %v8035_v20  ;;  %6586 = vmatprep.mubr.msk.bf16.mxu1 %vm520_vm0, %v8038_v21 }
  0x41   : > { %706 = vmatpush1.bf16.msra.mxu0 %v8483_v4  ;;  %792 = vmatpush1.bf16.msra.mxu1 %v8483_v4 }
  0x42   : > { %707 = vmatprep.subr.bf16.mxu0 %v8370_v1  ;;  %793 = vmatprep.subr.bf16.mxu1 %v8370_v1 }
  0x45   : > { %708 = vmatpush1.bf16.msra.mxu0 %v8495_v7  ;;  %794 = vmatpush1.bf16.msra.mxu1 %v8495_v7 }
  0x46   : > { %709 = vmatprep.subr.bf16.mxu0 %v8370_v1  ;;  %795 = vmatprep.subr.bf16.mxu1 %v8370_v1 }
  0x49   : > { %710 = vmatpush1.bf16.msra.mxu0 %v8508_v9  ;;  %796 = vmatpush1.bf16.msra.mxu1 %v8508_v9 }
  0x4a   : > { %711 = vmatprep.subr.bf16.mxu0 %v8370_v1  ;;  %797 = vmatprep.subr.bf16.mxu1 %v8370_v1 }
  0x4d   : > { %712 = vmatpush1.bf16.msra.mxu0 %v8515_v10  ;;  %798 = vmatpush1.bf16.msra.mxu1 %v8515_v10 }
  0x4e   : > { %713 = vmatprep.subr.bf16.mxu0 %v8370_v1  ;;  %799 = vmatprep.subr.bf16.mxu1 %v8370_v1 }
  0x51   : > { %714 = vmatpush1.bf16.msra.mxu0 %v8018_v12  ;;  %800 = vmatpush1.bf16.msra.mxu1 %v8018_v12 }
  0x52   : > { %727 = vmatprep.subr.bf16.mxu0 %v8370_v1  ;;  %813 = vmatprep.subr.bf16.mxu1 %v8370_v1 }
  0x55   : > { %728 = vmatpush2.bf16.msra.mxu0 %v8517_v11  ;;  %814 = vmatpush2.bf16.msra.mxu1 %v8517_v11 }
  0x56   : > { %729 = vmatprep.subr.bf16.mxu0 %v8370_v1  ;;  %815 = vmatprep.subr.bf16.mxu1 %v8370_v1 }
  0x59   : > { %730 = vmatpush2.bf16.msra.mxu0 %v8535_v13  ;;  %816 = vmatpush2.bf16.msra.mxu1 %v8535_v13 }
  0x5c   : > { %732 = vmatmul.mubr.bf16.vlgmr.msra.gmra.mxu0 %v8033_v22  ;;  %818 = vmatmul.mubr.bf16.vlgmr.msra.gmra.mxu1 %v8036_v23 }
  0x5d   : > { %6577 = vmatprep.mubr.msk.bf16.mxu0 %vm520_vm0, %v8039_v24  ;;  %6587 = vmatprep.mubr.msk.bf16.mxu1 %vm520_vm0, %v8041_v25 }
  0x64   : > { %740 = vmatmul.mubr.bf16.gmra.mxu0 %v8043_v26  ;;  %826 = vmatmul.mubr.bf16.gmra.mxu1 %v8044_v27 }
  0x65   : > { %7483 = vmatprep.mubr.msk.bf16.mxu0 %vm859_vm2, %v8604_v28  ;;  %7491 = vmatprep.mubr.msk.bf16.mxu1 %vm859_vm2, %v8609_v29 }
  0xf4   : > { %v565_v30 = vpop.f32.mrf.mxu0  ;;  %v647_v31 = vpop.f32.mrf.mxu1 }
  0xf5   : > { %v566_v61 = vadd.f32 %v6541_v50, %v565_v30  ;;  %v648_v62 = vadd.f32 %v6541_v50, %v647_v31 }
  0xf6   : > { %v567_v32 = vpop.f32.mrf.mxu0  ;;  %v649_v33 = vpop.f32.mrf.mxu1 }
  0xf7   : > { %v580_v15 = vmax.f32 %v566_v61, 0.0  ;;  %v662_v16 = vmax.f32 %v648_v62, 0.0 }
  0xf8   : > { %v568_v34 = vpop.f32.mrf.mxu0  ;;  %v650_v35 = vpop.f32.mrf.mxu1 }
  0xf9   : > { %v569_v51 = vadd.f32 %v6541_v50, %v568_v34  ;;  %v651_v56 = vadd.f32 %v6541_v50, %v650_v35  ;;  %v8371_v35 = vmov 65535  }
  0xfa   : > { %v570_v36 = vpop.f32.mrf.mxu0  ;;  %v652_v37 = vpop.f32.mrf.mxu1 }
  0xfb   : > { %v581_v63 = vmax.f32 %v569_v51, 0.0  ;;  %v663_v7 = vmax.f32 %v651_v56, 0.0  ;;  %v868_v36 = vsel %vm866_vm3, 4294967295, %v8371_v35  ;;  %v666_v37 = vmax.f32 %v580_v15, %v662_v16  ;;  %v8749_v15 = vld [vmem:[%s9911_s3 + $0x70] sm:$0xff]   ;;  %v8761_v16 = vld [vmem:[%s9911_s3 + $0x78] sm:$0x1f]  }
  0xfc   : > { %v573_v38 = vpop.f32.mrf.mxu0  ;;  %v655_v39 = vpop.f32.mrf.mxu1 }
  0xfd   : > { %v574_v54 = vadd.f32 %v6541_v50, %v573_v38  ;;  %v656_v55 = vadd.f32 %v6541_v50, %v655_v39  ;;  %v667_v23 = vmax.f32 %v581_v63, %v663_v7  ;;  %v8677_v7 = vld [vmem:[%s9911_s3 + $0x30] sm:$0xff]  }
  0xfe   : > { %v575_v40 = vpop.f32.mrf.mxu0  ;;  %v657_v41 = vpop.f32.mrf.mxu1 }
  0xff   : > { %v582_v3 = vmax.f32 %v574_v54, 0.0  ;;  %v664_v4 = vmax.f32 %v656_v55, 0.0  ;;  %v8643_v54 = vld [vmem:[%s9911_s3 + $0x18] sm:$0x1f]   ;;  %v8050_v55 = vld [vmem:[%s9912_s4] sm:$0xff]  }
 0x100   : > { %v576_v42 = vpop.f32.mrf.mxu0  ;;  %v658_v43 = vpop.f32.mrf.mxu1 }
 0x101   : > { %v577_v57 = vadd.f32 %v6541_v50, %v576_v42  ;;  %v659_v58 = vadd.f32 %v6541_v50, %v658_v43  ;;  %v668_v19 = vmax.f32 %v582_v3, %v664_v4  ;;  %v8658_v4 = vld [vmem:[%s9911_s3 + $0x20] sm:$0xff]  }
 0x102   : > { %v578_v44 = vpop.f32.mrf.mxu0  ;;  %v660_v45 = vpop.f32.mrf.mxu1 }
 0x103   : > { %v583_v8 = vmax.f32 %v577_v57, 0.0  ;;  %v665_v9 = vmax.f32 %v659_v58, 0.0 }
 0x105   : > { %v669_v24 = vmax.f32 %v583_v8, %v665_v9  ;;  %v8689_v8 = vld [vmem:[%s9911_s3 + $0x38] sm:$0x1f]   ;;  %v8695_v9 = vld [vmem:[%s9911_s3 + $0x40] sm:$0xff]  }
 0x11c   : > { %v733_v46 = vpop.f32.mrf.mxu0  ;;  %v819_v47 = vpop.f32.mrf.mxu1 }
 0x11d   : > { %v734_v10 = vadd.f32 %v6541_v50, %v733_v46  ;;  %v820_v26 = vadd.f32 %v6541_v50, %v819_v47  ;;  %v8619_v46 = vsel %vm867_vm4, %v868_v36, 0 }
 0x11e   : > { %v735_v48 = vpop.f32.mrf.mxu0  ;;  %v821_v49 = vpop.f32.mrf.mxu1 }
 0x11f   : > { %v748_v25 = vmax.f32 %v734_v10, 0.0  ;;  %v834_v41 = vmax.f32 %v820_v26, 0.0  ;;  %v8707_v10 = vld [vmem:[%s9911_s3 + $0x48] sm:$0x1f]  }
 0x120   : > { %v736_v52 = vpop.f32.mrf.mxu0  ;;  %v822_v53 = vpop.f32.mrf.mxu1 }
 0x121   : > { %v737_v5 = vadd.f32 %v6541_v50, %v736_v52  ;;  %v823_v31 = vadd.f32 %v6541_v50, %v822_v53  ;;  %v752_v42 = vmax.f32 %v666_v37, %v748_v25  ;;  %v8049_v52 = vld [vmem:[%s9912_s4 + $0x8] sm:$0xff]  }
 0x122   : > { %v738_v59 = vpop.f32.mrf.mxu0  ;;  %v824_v60 = vpop.f32.mrf.mxu1  ;;  %v8638_v53 = vld [vmem:[%s9911_s3 + $0x8] sm:$0x1f]  }
 0x123   : > { %v749_v20 = vmax.f32 %v737_v5, 0.0  ;;  %v835_v43 = vmax.f32 %v823_v31, 0.0  ;;  %v838_v49 = vmax.f32 %v752_v42, %v834_v41  ;;  %v8068_v41 = vld [vmem:[%s9912_s4 + $0x28] sm:$0xff]  }
 0x124   : > { %v741_v0 = vpop.f32.mrf.mxu0  ;;  %v827_v2 = vpop.f32.mrf.mxu1 }
 0x125   : > { %v742_v6 = vadd.f32 %v6541_v50, %v741_v0  ;;  %v828_v14 = vadd.f32 %v6541_v50, %v827_v2  ;;  %v753_v38 = vmax.f32 %v667_v23, %v749_v20  ;;  %v8066_v20 = vld [vmem:[%s9912_s4 + $0x18] sm:$0xff]  }
 0x126   : > { %v743_v11 = vpop.f32.mrf.mxu0  ;;  %v829_v12 = vpop.f32.mrf.mxu1 }
 0x127   : > { %v750_v13 = vmax.f32 %v742_v6, 0.0  ;;  %v836_v33 = vmax.f32 %v828_v14, 0.0  ;;  %v839_v47 = vmax.f32 %v753_v38, %v835_v43  ;;  %v8671_v6 = vld [vmem:[%s9911_s3 + $0x28] sm:$0x1f]   ;;  %v8713_v11 = vld [vmem:[%s9911_s3 + $0x50] sm:$0xff]  }
 0x128   : > { %v744_v17 = vpop.f32.mrf.mxu0  ;;  %v830_v18 = vpop.f32.mrf.mxu1  ;;  %v8725_v12 = vld [vmem:[%s9911_s3 + $0x58] sm:$0x1f]   ;;  %v8743_v14 = vld [vmem:[%s9911_s3 + $0x68] sm:$0x1f]  }
 0x129   : > { %v745_v21 = vadd.f32 %v6541_v50, %v744_v17  ;;  %v831_v22 = vadd.f32 %v6541_v50, %v830_v18  ;;  %v754_v32 = vmax.f32 %v668_v19, %v750_v13  ;;  %v8624_v51 = vpack.c.bf16 %v839_v47, %v838_v49  ;;  %v8731_v13 = vld [vmem:[%s9911_s3 + $0x60] sm:$0xff]   ;;  %v8779_v18 = vld [vmem:[%s9911_s3 + $0x88] sm:$0x1f]   ;;  %v8065_v19 = vld [vmem:[%s9912_s4 + $0x10] sm:$0xff]  }
 0x12a   : > { %v746_v27 = vpop.f32.mrf.mxu0  ;;  %v832_v30 = vpop.f32.mrf.mxu1  ;;  %v8767_v17 = vld [vmem:[%s9911_s3 + $0x80] sm:$0xff]   ;;  %v8069_v49 = vld [vmem:[%s9912_s4 + $0x30] sm:$0xff]  }
 0x12b   : > { %v751_v34 = vmax.f32 %v745_v21, 0.0  ;;  %v837_v40 = vmax.f32 %v831_v22, 0.0  ;;  %v840_v44 = vmax.f32 %v754_v32, %v836_v33 }
 0x12d   : > { %v755_v39 = vmax.f32 %v669_v24, %v751_v34  ;;  %v8067_v34 = vld [vmem:[%s9912_s4 + $0x20] sm:$0xff]  }
 0x12f   : > { %v841_v45 = vmax.f32 %v755_v39, %v837_v40 }
 0x131   : > { %v843_v48 = vpack.c.bf16 %v841_v45, %v840_v44 }
 0x133   : > { %v8622_v50 = vand.u32 %v8619_v46, %v843_v48 }
 0x135   : > { %7479 = vmatprep.subr.bf16.mxu0 %v8622_v50  ;;  %7487 = vmatprep.subr.bf16.mxu1 %v8622_v50 }
 0x136   : > { %7480 = vmatpush3.bf16.msra.mxu0 %v8622_v50  ;;  %7488 = vmatpush3.bf16.msra.mxu1 %v8622_v50 }
 0x137   : > { %7481 = vmatprep.subr.bf16.mxu0 %v8624_v51  ;;  %7489 = vmatprep.subr.bf16.mxu1 %v8624_v51 }
 0x13a   : > { %7482 = vmatpush3.bf16.msra.mxu0 %v8624_v51  ;;  %7490 = vmatpush3.bf16.msra.mxu1 %v8624_v51 }
 0x13b   : > { %7495 = vmatprep.subr.bf16.mxu0 %v8049_v52  ;;  %7501 = vmatprep.subr.bf16.mxu1 %v8050_v55 }
 0x13d   : > { %7484 = vmatmul.mubr.msk.bf16.vlgmr.msra.gmra.mxu0 %vm859_vm2, %v8638_v53  ;;  %7492 = vmatmul.mubr.msk.bf16.vlgmr.msra.gmra.mxu1 %vm859_vm2, %v8643_v54 }
 0x13e   : > { %7496 = vmatpush3.bf16.msra.mxu0 %v8049_v52  ;;  %7502 = vmatpush3.bf16.msra.mxu1 %v8050_v55 }
 0x13f   : > { %7507 = vmatprep.subr.bf16.mxu0 %v8622_v50  ;;  %7515 = vmatprep.subr.bf16.mxu1 %v8065_v19 }
 0x1fd   : > { %v7485_v56 = vpop.f32.mrf.mxu0  ;;  %v7493_v57 = vpop.f32.mrf.mxu1 }
 0x1ff   : > { %v907_v58 = vpop.f32.mrf.mxu0  ;;  %v981_v59 = vpop.f32.mrf.mxu1 }
 0x201   : > { %v7486_v60 = vpop.f32.mrf.mxu0  ;;  %v7494_v61 = vpop.f32.mrf.mxu1 }
 0x202   : > { %v923_v62 = vpack.c.bf16 %v7486_v60, %v7485_v56  ;;  %v997_v5 = vpack.c.bf16 %v7494_v61, %v7493_v57 }
 0x203   : > { %v910_v63 = vpop.f32.mrf.mxu0  ;;  %v984_v0 = vpop.f32.mrf.mxu1 }
 0x204   : > { %v922_v2 = vpack.c.bf16 %v910_v63, %v907_v58  ;;  %v996_v3 = vpack.c.bf16 %v984_v0, %v981_v59  ;;  %v8070_v58 = vld [vmem:[%s9912_s4 + $0x38] sm:$0xff]  }
 0x206   : > { %7497 = vmatprep.mubr.msk.bf16.mxu0 %vm1007_vm5, %v996_v3  ;;  %7503 = vmatprep.mubr.msk.bf16.mxu1 %vm1007_vm5, %v922_v2  ;;  %v8071_v2 = vld [vmem:[%s9912_s4 + $0x40] sm:$0xff]  }
 0x207   : > { %7498 = vmatmul.mubr.msk.bf16.vlgmr.msra.gmra.mxu0 %vm1007_vm5, %v997_v5  ;;  %7504 = vmatmul.mubr.msk.bf16.vlgmr.msra.gmra.mxu1 %vm1007_vm5, %v923_v62 }
 0x208   : > { %7508 = vmatpush3.bf16.msra.mxu0 %v8622_v50  ;;  %7511 = vmatprep.mubr.msk.bf16.mxu0 %vm859_vm2, %v8658_v4 }
 0x209   : > { %7509 = vmatprep.subr.bf16.mxu0 %v8624_v51  ;;  %7516 = vmatpush3.bf16.msra.mxu1 %v8065_v19 }
 0x20a   : > { %7529 = vmatprep.subr.bf16.mxu1 %v8066_v20 }
 0x20c   : > { %7510 = vmatpush3.bf16.msra.mxu0 %v8624_v51 }
 0x20d   : > { %7521 = vmatprep.subr.bf16.mxu0 %v8622_v50 }
 0x20f   : > { %7512 = vmatmul.mubr.msk.bf16.vlgmr.msra.gmra.mxu0 %vm859_vm2, %v8671_v6 }
 0x210   : > { %7522 = vmatpush3.bf16.msra.mxu0 %v8622_v50  ;;  %7525 = vmatprep.mubr.msk.bf16.mxu0 %vm859_vm2, %v8677_v7 }
 0x211   : > { %7523 = vmatprep.subr.bf16.mxu0 %v8624_v51 }
 0x214   : > { %7524 = vmatpush3.bf16.msra.mxu0 %v8624_v51 }
 0x215   : > { %7535 = vmatprep.subr.bf16.mxu0 %v8622_v50 }
 0x217   : > { %7526 = vmatmul.mubr.msk.bf16.vlgmr.msra.gmra.mxu0 %vm859_vm2, %v8689_v8 }
 0x218   : > { %7536 = vmatpush3.bf16.msra.mxu0 %v8622_v50  ;;  %7539 = vmatprep.mubr.msk.bf16.mxu0 %vm859_vm2, %v8695_v9 }
 0x219   : > { %7537 = vmatprep.subr.bf16.mxu0 %v8624_v51 }
 0x21c   : > { %7538 = vmatpush3.bf16.msra.mxu0 %v8624_v51 }
 0x21d   : > { %7549 = vmatprep.subr.bf16.mxu0 %v8622_v50 }
 0x21f   : > { %7540 = vmatmul.mubr.msk.bf16.vlgmr.msra.gmra.mxu0 %vm859_vm2, %v8707_v10 }
 0x220   : > { %7550 = vmatpush3.bf16.msra.mxu0 %v8622_v50  ;;  %7553 = vmatprep.mubr.msk.bf16.mxu0 %vm859_vm2, %v8713_v11 }
 0x221   : > { %7551 = vmatprep.subr.bf16.mxu0 %v8624_v51 }
 0x224   : > { %7552 = vmatpush3.bf16.msra.mxu0 %v8624_v51 }
 0x225   : > { %7563 = vmatprep.subr.bf16.mxu0 %v8622_v50 }
 0x227   : > { %7554 = vmatmul.mubr.msk.bf16.vlgmr.msra.gmra.mxu0 %vm859_vm2, %v8725_v12 }
 0x228   : > { %7564 = vmatpush3.bf16.msra.mxu0 %v8622_v50  ;;  %7567 = vmatprep.mubr.msk.bf16.mxu0 %vm859_vm2, %v8731_v13 }
 0x229   : > { %7565 = vmatprep.subr.bf16.mxu0 %v8624_v51 }
 0x22c   : > { %7566 = vmatpush3.bf16.msra.mxu0 %v8624_v51 }
 0x22d   : > { %7577 = vmatprep.subr.bf16.mxu0 %v8622_v50 }
 0x22f   : > { %7568 = vmatmul.mubr.msk.bf16.vlgmr.msra.gmra.mxu0 %vm859_vm2, %v8743_v14 }
 0x230   : > { %7578 = vmatpush3.bf16.msra.mxu0 %v8622_v50  ;;  %7581 = vmatprep.mubr.msk.bf16.mxu0 %vm859_vm2, %v8749_v15 }
 0x231   : > { %7579 = vmatprep.subr.bf16.mxu0 %v8624_v51 }
 0x234   : > { %7580 = vmatpush3.bf16.msra.mxu0 %v8624_v51 }
 0x235   : > { %7591 = vmatprep.subr.bf16.mxu0 %v8622_v50 }
 0x237   : > { %7582 = vmatmul.mubr.msk.bf16.vlgmr.msra.gmra.mxu0 %vm859_vm2, %v8761_v16 }
 0x238   : > { %7592 = vmatpush3.bf16.msra.mxu0 %v8622_v50  ;;  %7595 = vmatprep.mubr.msk.bf16.mxu0 %vm859_vm2, %v8767_v17 }
 0x239   : > { %7593 = vmatprep.subr.bf16.mxu0 %v8624_v51 }
 0x23c   : > { %7594 = vmatpush3.bf16.msra.mxu0 %v8624_v51 }
 0x23f   : > { %7596 = vmatmul.mubr.msk.bf16.vlgmr.msra.gmra.mxu0 %vm859_vm2, %v8779_v18 }
 0x240   : > { %7609 = vmatprep.mubr.msk.bf16.mxu0 %vm859_vm2, %v8604_v28 }
 0x2c7   : > { %v8792_v21 = vpop.f32.mrf.mxu0 }
 0x2c9   : > { %v8794_v22 = vpop.f32.mrf.mxu0 }
 0x2cb   : > { %v8796_v23 = vpop.f32.mrf.mxu0 }
 0x2cd   : > { %v8798_v24 = vpop.f32.mrf.mxu0 }
 0x2cf   : > { %v7513_v25 = vpop.f32.mrf.mxu0 }
 0x2d1   : > { %v1179_v26 = vpop.f32.mrf.mxu0 }
 0x2d3   : > { %v7514_v27 = vpop.f32.mrf.mxu0 }
 0x2d4   : > { %v1195_v32 = vpack.c.bf16 %v7514_v27, %v7513_v25 }
 0x2d5   : > { %v1182_v30 = vpop.f32.mrf.mxu0 }
 0x2d6   : > { %v1194_v31 = vpack.c.bf16 %v1182_v30, %v1179_v26 }
 0x2d7   : > { %v7527_v33 = vpop.f32.mrf.mxu0 }
 0x2d8   : > { %7517 = vmatprep.mubr.msk.bf16.mxu1 %vm1007_vm5, %v1194_v31 }
 0x2d9   : > { %7518 = vmatmul.mubr.msk.bf16.vlgmr.msra.gmra.mxu1 %vm1007_vm5, %v1195_v32  ;;  %v1319_v35 = vpop.f32.mrf.mxu0 }
 0x2da   : > { %7530 = vmatpush3.bf16.msra.mxu1 %v8066_v20 }
 0x2db   : > { %v7528_v36 = vpop.f32.mrf.mxu0  ;;  %7543 = vmatprep.subr.bf16.mxu1 %v8067_v34 }
 0x2dc   : > { %v1335_v39 = vpack.c.bf16 %v7528_v36, %v7527_v33 }
 0x2dd   : > { %v1322_v37 = vpop.f32.mrf.mxu0 }
 0x2de   : > { %v1334_v38 = vpack.c.bf16 %v1322_v37, %v1319_v35 }
 0x2df   : > { %v7541_v40 = vpop.f32.mrf.mxu0 }
 0x2e0   : > { %7531 = vmatprep.mubr.msk.bf16.mxu1 %vm1007_vm5, %v1334_v38 }
 0x2e1   : > { %7532 = vmatmul.mubr.msk.bf16.vlgmr.msra.gmra.mxu1 %vm1007_vm5, %v1335_v39  ;;  %v1459_v42 = vpop.f32.mrf.mxu0 }
 0x2e2   : > { %7544 = vmatpush3.bf16.msra.mxu1 %v8067_v34  ;;  %v7505_v34 = vpop.f32.mrf.mxu1 }
 0x2e3   : > { %v7542_v43 = vpop.f32.mrf.mxu0  ;;  %7557 = vmatprep.subr.bf16.mxu1 %v8068_v41 }
 0x2e4   : > { %v1475_v47 = vpack.c.bf16 %v7542_v43, %v7541_v40  ;;  %v1109_v35 = vpop.f32.mrf.mxu1 }
 0x2e5   : > { %v1462_v44 = vpop.f32.mrf.mxu0 }
 0x2e6   : > { %v1474_v45 = vpack.c.bf16 %v1462_v44, %v1459_v42  ;;  %v7506_v36 = vpop.f32.mrf.mxu1 }
 0x2e7   : > { %v7555_v48 = vpop.f32.mrf.mxu0 }
 0x2e8   : > { %7545 = vmatprep.mubr.msk.bf16.mxu1 %vm1007_vm5, %v1474_v45  ;;  %v1112_v37 = vpop.f32.mrf.mxu1 }
 0x2e9   : > { %7546 = vmatmul.mubr.msk.bf16.vlgmr.msra.gmra.mxu1 %vm1007_vm5, %v1475_v47  ;;  %v1599_v50 = vpop.f32.mrf.mxu0 }
 0x2ea   : > { %7558 = vmatpush3.bf16.msra.mxu1 %v8068_v41 }
 0x2eb   : > { %v7556_v51 = vpop.f32.mrf.mxu0  ;;  %7571 = vmatprep.subr.bf16.mxu1 %v8069_v49 }
 0x2ec   : > { %v1615_v56 = vpack.c.bf16 %v7556_v51, %v7555_v48 }
 0x2ed   : > { %v1602_v52 = vpop.f32.mrf.mxu0 }
 0x2ee   : > { %v1614_v55 = vpack.c.bf16 %v1602_v52, %v1599_v50 }
 0x2ef   : > { %v7569_v57 = vpop.f32.mrf.mxu0 }
 0x2f0   : > { %7559 = vmatprep.mubr.msk.bf16.mxu1 %vm1007_vm5, %v1614_v55 }
 0x2f1   : > { %7560 = vmatmul.mubr.msk.bf16.vlgmr.msra.gmra.mxu1 %vm1007_vm5, %v1615_v56  ;;  %v1739_v59 = vpop.f32.mrf.mxu0 }
 0x2f2   : > { %7572 = vmatpush3.bf16.msra.mxu1 %v8069_v49 }
 0x2f3   : > { %v7570_v60 = vpop.f32.mrf.mxu0  ;;  %7585 = vmatprep.subr.bf16.mxu1 %v8070_v58 }
 0x2f4   : > { %v1755_v63 = vpack.c.bf16 %v7570_v60, %v7569_v57 }
 0x2f5   : > { %v1742_v61 = vpop.f32.mrf.mxu0 }
 0x2f6   : > { %v1754_v62 = vpack.c.bf16 %v1742_v61, %v1739_v59 }
 0x2f7   : > { %v7583_v0 = vpop.f32.mrf.mxu0 }
 0x2f8   : > { %7573 = vmatprep.mubr.msk.bf16.mxu1 %vm1007_vm5, %v1754_v62  ;;  %v1110_v62 = vadd.f32 %v1109_v35, %v8794_v22 }
 0x2f9   : > { %7574 = vmatmul.mubr.msk.bf16.vlgmr.msra.gmra.mxu1 %vm1007_vm5, %v1755_v63  ;;  %v1879_v3 = vpop.f32.mrf.mxu0  ;;  %v1121_v63 = vadd.f32 %v7506_v36, %v8796_v23 }
 0x2fa   : > { %7586 = vmatpush3.bf16.msra.mxu1 %v8070_v58  ;;  %v1118_v58 = vadd.f32 %v7505_v34, %v8792_v21 }
 0x2fb   : > { %v7584_v5 = vpop.f32.mrf.mxu0  ;;  %7599 = vmatprep.subr.bf16.mxu1 %v8071_v2 }
 0x2fc   : > { %v1895_v25 = vpack.c.bf16 %v7584_v5, %v7583_v0 }
 0x2fd   : > { %v1882_v19 = vpop.f32.mrf.mxu0 }
 0x2fe   : > { %v1894_v20 = vpack.c.bf16 %v1882_v19, %v1879_v3  ;;  %v1113_v3 = vadd.f32 %v1112_v37, %v8798_v24 }
 0x2ff   : > { %v7597_v26 = vpop.f32.mrf.mxu0 }
 0x300   : > { %7587 = vmatprep.mubr.msk.bf16.mxu1 %vm1007_vm5, %v1894_v20 }
 0x301   : > { %7588 = vmatmul.mubr.msk.bf16.vlgmr.msra.gmra.mxu1 %vm1007_vm5, %v1895_v25  ;;  %v2019_v27 = vpop.f32.mrf.mxu0 }
 0x302   : > { %7600 = vmatpush3.bf16.msra.mxu1 %v8071_v2 }
 0x303   : > { %v7598_v30 = vpop.f32.mrf.mxu0 }
 0x304   : > { %v2035_v33 = vpack.c.bf16 %v7598_v30, %v7597_v26 }
 0x305   : > { %v2022_v31 = vpop.f32.mrf.mxu0 }
 0x306   : > { %v2034_v32 = vpack.c.bf16 %v2022_v31, %v2019_v27 }
 0x308   : > { %7601 = vmatprep.mubr.msk.bf16.mxu1 %vm1007_vm5, %v2034_v32 }
 0x309   : > { %7602 = vmatmul.mubr.msk.bf16.vlgmr.msra.gmra.mxu1 %vm1007_vm5, %v2035_v33 }
 0x30a   : > { %7617 = vmatprep.mubr.msk.bf16.mxu1 %vm859_vm2, %v8609_v29 }
 0x399   : > { %v7519_v38 = vpop.f32.mrf.mxu1 }
 0x39a   : > { %v1262_v60 = vadd.f32 %v7519_v38, %v1118_v58 }
 0x39b   : > { %v1245_v39 = vpop.f32.mrf.mxu1 }
 0x39c   : > { %v1260_v5 = vadd.f32 %v1245_v39, %v1110_v62 }
 0x39d   : > { %v7520_v40 = vpop.f32.mrf.mxu1 }
 0x39e   : > { %v1263_v19 = vadd.f32 %v7520_v40, %v1121_v63 }
 0x39f   : > { %v1248_v41 = vpop.f32.mrf.mxu1 }
 0x3a0   : > { %v1261_v26 = vadd.f32 %v1248_v41, %v1113_v3  ;;  %v6699_v41 = vld [vmem:[%s9913_s5] ss:$0 sm:$0xff] }
 0x3a1   : > { %v7533_v42 = vpop.f32.mrf.mxu1 }
 0x3a2   : > { %v1402_v0 = vadd.f32 %v7533_v42, %v1262_v60 }
 0x3a3   : > { %v1385_v43 = vpop.f32.mrf.mxu1 }
 0x3a4   : > { %v1400_v27 = vadd.f32 %v1385_v43, %v1260_v5  ;;  %v8072_v5 = vld [vmem:[%s9914_s6 + $0x18] sm:$0xff]  }
 0x3a5   : > { %v7534_v44 = vpop.f32.mrf.mxu1 }
 0x3a6   : > { %v1403_v30 = vadd.f32 %v7534_v44, %v1263_v19  ;;  %v8073_v19 = vld [vmem:[%s9914_s6 + $0x10] sm:$0xff]  }
 0x3a7   : > { %v1388_v45 = vpop.f32.mrf.mxu1 }
 0x3a8   : > { %v1401_v32 = vadd.f32 %v1388_v45, %v1261_v26 }
 0x3a9   : > { %v7547_v47 = vpop.f32.mrf.mxu1 }
 0x3aa   : > { %v1542_v20 = vadd.f32 %v7547_v47, %v1402_v0 }
 0x3ab   : > { %v1525_v48 = vpop.f32.mrf.mxu1 }
 0x3ac   : > { %v1540_v33 = vadd.f32 %v1525_v48, %v1400_v27 }
 0x3ad   : > { %v7548_v49 = vpop.f32.mrf.mxu1 }
 0x3ae   : > { %v1543_v34 = vadd.f32 %v7548_v49, %v1403_v30 }
 0x3af   : > { %v1528_v50 = vpop.f32.mrf.mxu1 }
 0x3b0   : > { %v1541_v35 = vadd.f32 %v1528_v50, %v1401_v32 }
 0x3b1   : > { %v7561_v51 = vpop.f32.mrf.mxu1 }
 0x3b2   : > { %v1682_v31 = vadd.f32 %v7561_v51, %v1542_v20  ;;  %v8074_v20 = vld [vmem:[%s9914_s6 + $0x8] sm:$0xff]  }
 0x3b3   : > { %v1665_v52 = vpop.f32.mrf.mxu1 }
 0x3b4   : > { %v1680_v23 = vadd.f32 %v1665_v52, %v1540_v33 }
 0x3b5   : > { %v7562_v55 = vpop.f32.mrf.mxu1 }
 0x3b6   : > { %v1683_v36 = vadd.f32 %v7562_v55, %v1543_v34 }
 0x3b7   : > { %v1668_v29 = vpop.f32.mrf.mxu1 }
 0x3b8   : > { %v1681_v24 = vadd.f32 %v1668_v29, %v1541_v35 }
 0x3b9   : > { %v7575_v56 = vpop.f32.mrf.mxu1 }
 0x3ba   : > { %v1822_v38 = vadd.f32 %v7575_v56, %v1682_v31 }
 0x3bb   : > { %v1805_v57 = vpop.f32.mrf.mxu1 }
 0x3bc   : > { %v1820_v37 = vadd.f32 %v1805_v57, %v1680_v23 }
 0x3bd   : > { %v7576_v59 = vpop.f32.mrf.mxu1 }
 0x3be   : > { %v1823_v39 = vadd.f32 %v7576_v59, %v1683_v36 }
 0x3bf   : > { %v1808_v61 = vpop.f32.mrf.mxu1 }
 0x3c0   : > { %v1821_v44 = vadd.f32 %v1808_v61, %v1681_v24 }
 0x3c1   : > { %v7589_v2 = vpop.f32.mrf.mxu1 }
 0x3c2   : > { %v1962_v42 = vadd.f32 %v7589_v2, %v1822_v38 }
 0x3c3   : > { %v1945_v25 = vpop.f32.mrf.mxu1 }
 0x3c4   : > { %v1960_v45 = vadd.f32 %v1945_v25, %v1820_v37  ;;  %v8075_v25 = vld [vmem:[%s9914_s6] sm:$0xff]   ;;  %v8080_v37 = vld [vmem:[%s9914_s6 + $0x48] sm:$0xff]  }
 0x3c5   : > { %v7590_v21 = vpop.f32.mrf.mxu1 }
 0x3c6   : > { %v1963_v47 = vadd.f32 %v7590_v21, %v1823_v39 }
 0x3c7   : > { %v1948_v22 = vpop.f32.mrf.mxu1 }
 0x3c8   : > { %v1961_v49 = vadd.f32 %v1948_v22, %v1821_v44  ;;  %v8081_v44 = vld [vmem:[%s9914_s6 + $0x40] sm:$0xff]  }
 0x3c9   : > { %v7603_v58 = vpop.f32.mrf.mxu1 }
 0x3ca   : > { %v2102_v40 = vadd.f32 %v7603_v58, %v1962_v42  ;;  %v8079_v42 = vld [vmem:[%s9914_s6 + $0x30] sm:$0xff]  }
 0x3cb   : > { %v2085_v43 = vpop.f32.mrf.mxu1 }
 0x3cc   : > { %v2112_v51 = vadd.f32 %v6699_v41, %v2102_v40  ;;  %v2100_v50 = vadd.f32 %v2085_v43, %v1960_v45 }
 0x3cd   : > { %v7604_v48 = vpop.f32.mrf.mxu1 }
 0x3ce   : > { %v2103_v52 = vadd.f32 %v7604_v48, %v1963_v47  ;;  %v2116_v29 = vmax.f32 %v2112_v51, 0.0  ;;  %v2110_v57 = vadd.f32 %v6699_v41, %v2100_v50  ;;  %v8082_v48 = vld [vmem:[%s9914_s6 + $0x58] sm:$0xff]  }
 0x3cf   : > { %v2088_v55 = vpop.f32.mrf.mxu1 }
 0x3d0   : > { %v2113_v56 = vadd.f32 %v6699_v41, %v2103_v52  ;;  %v2101_v60 = vadd.f32 %v2088_v55, %v1961_v49  ;;  %v2114_v2 = vmax.f32 %v2110_v57, 0.0  ;;  %v8083_v55 = vld [vmem:[%s9914_s6 + $0x50] sm:$0xff]  }
 0x3d2   : > { %v2117_v59 = vmax.f32 %v2113_v56, 0.0  ;;  %v2111_v62 = vadd.f32 %v6699_v41, %v2101_v60 }
 0x3d4   : > { %v2119_v63 = vpack.c.bf16 %v2117_v59, %v2116_v29  ;;  %v2115_v0 = vmax.f32 %v2111_v62, 0.0  ;;  %v8084_v29 = vld [vmem:[%s9914_s6 + $0x68] sm:$0xff]  }
 0x3d6   : > { %v8839_v3 = vand.u32 %v2119_v63, %v8619_v46  ;;  %v8841_v61 = vpack.c.bf16 %v2115_v0, %v2114_v2  ;;  %v8085_v0 = vld [vmem:[%s9914_s6 + $0x60] sm:$0xff]  }
 0x3d8   : > { %7605 = vmatprep.subr.bf16.mxu0 %v8839_v3  ;;  %7613 = vmatprep.subr.bf16.mxu1 %v8839_v3 }
 0x3d9   : > { %7606 = vmatpush3.bf16.msra.mxu0 %v8839_v3  ;;  %7614 = vmatpush3.bf16.msra.mxu1 %v8839_v3 }
 0x3da   : > { %7607 = vmatprep.subr.bf16.mxu0 %v8841_v61  ;;  %7615 = vmatprep.subr.bf16.mxu1 %v8841_v61 }
 0x3dd   : > { %7608 = vmatpush3.bf16.msra.mxu0 %v8841_v61  ;;  %7616 = vmatpush3.bf16.msra.mxu1 %v8841_v61 }
 0x3de   : > { %7621 = vmatprep.subr.bf16.mxu0 %v8072_v5  ;;  %7629 = vmatprep.subr.bf16.mxu1 %v8074_v20 }
 0x3e0   : > { %7610 = vmatmul.mubr.msk.bf16.vlgmr.msra.gmra.mxu0 %vm859_vm2, %v8638_v53  ;;  %7618 = vmatmul.mubr.msk.bf16.vlgmr.msra.gmra.mxu1 %vm859_vm2, %v8643_v54 }
 0x3e1   : > { %7622 = vmatpush3.bf16.msra.mxu0 %v8072_v5  ;;  %7630 = vmatpush3.bf16.msra.mxu1 %v8074_v20 }
 0x3e2   : > { %7623 = vmatprep.subr.bf16.mxu0 %v8073_v19  ;;  %7631 = vmatprep.subr.bf16.mxu1 %v8075_v25 }
 0x3e5   : > { %7624 = vmatpush3.bf16.msra.mxu0 %v8073_v19  ;;  %7632 = vmatpush3.bf16.msra.mxu1 %v8075_v25 }
 0x3e6   : > { %7637 = vmatprep.subr.bf16.mxu0 %v8839_v3 }
 0x4a0   : > { %v7611_v53 = vpop.f32.mrf.mxu0  ;;  %v7619_v26 = vpop.f32.mrf.mxu1 }
 0x4a2   : > { %v2158_v54 = vpop.f32.mrf.mxu0  ;;  %v2213_v27 = vpop.f32.mrf.mxu1 }
 0x4a4   : > { %v7612_v30 = vpop.f32.mrf.mxu0  ;;  %v7620_v31 = vpop.f32.mrf.mxu1 }
 0x4a5   : > { %v2174_v21 = vpack.c.bf16 %v7612_v30, %v7611_v53  ;;  %v2229_v22 = vpack.c.bf16 %v7620_v31, %v7619_v26  ;;  %v8087_v53 = vld [vmem:[%s9914_s6 + $0x70] sm:$0xff]  }
 0x4a6   : > { %v2161_v32 = vpop.f32.mrf.mxu0  ;;  %v2216_v33 = vpop.f32.mrf.mxu1 }
 0x4a7   : > { %v2173_v34 = vpack.c.bf16 %v2161_v32, %v2158_v54  ;;  %v2228_v38 = vpack.c.bf16 %v2216_v33, %v2213_v27  ;;  %v8088_v27 = vld [vmem:[%s9914_s6 + $0x88] sm:$0xff]   ;;  %v8089_v33 = vld [vmem:[%s9914_s6 + $0x80] sm:$0xff]  }
 0x4a9   : > { %7625 = vmatprep.mubr.msk.bf16.mxu0 %vm2247_vm6, %v2228_v38  ;;  %7633 = vmatprep.mubr.msk.bf16.mxu1 %vm2247_vm6, %v2173_v34 }
 0x4aa   : > { %7626 = vmatmul.mubr.msk.bf16.vlgmr.msra.gmra.mxu0 %vm2247_vm6, %v2229_v22  ;;  %7634 = vmatmul.mubr.msk.bf16.vlgmr.msra.gmra.mxu1 %vm2247_vm6, %v2174_v21 }
 0x4ab   : > { %7638 = vmatpush3.bf16.msra.mxu0 %v8839_v3  ;;  %7641 = vmatprep.mubr.msk.bf16.mxu0 %vm859_vm2, %v8658_v4 }
 0x4ac   : > { %7639 = vmatprep.subr.bf16.mxu0 %v8841_v61 }
 0x4af   : > { %7640 = vmatpush3.bf16.msra.mxu0 %v8841_v61 }
 0x4b0   : > { %7653 = vmatprep.subr.bf16.mxu0 %v8839_v3 }
 0x4b2   : > { %7642 = vmatmul.mubr.msk.bf16.vlgmr.msra.gmra.mxu0 %vm859_vm2, %v8671_v6 }
 0x4b3   : > { %7654 = vmatpush3.bf16.msra.mxu0 %v8839_v3  ;;  %7657 = vmatprep.mubr.msk.bf16.mxu0 %vm859_vm2, %v8677_v7 }
 0x4b4   : > { %7655 = vmatprep.subr.bf16.mxu0 %v8841_v61 }
 0x4b7   : > { %7656 = vmatpush3.bf16.msra.mxu0 %v8841_v61 }
 0x4b8   : > { %7669 = vmatprep.subr.bf16.mxu0 %v8839_v3 }
 0x4ba   : > { %7658 = vmatmul.mubr.msk.bf16.vlgmr.msra.gmra.mxu0 %vm859_vm2, %v8689_v8 }
 0x4bb   : > { %7670 = vmatpush3.bf16.msra.mxu0 %v8839_v3  ;;  %7673 = vmatprep.mubr.msk.bf16.mxu0 %vm859_vm2, %v8695_v9  ;;  %v8076_v9 = vld [vmem:[%s9914_s6 + $0x28] sm:$0xff]  }
 0x4bc   : > { %7671 = vmatprep.subr.bf16.mxu0 %v8841_v61  ;;  %7645 = vmatprep.subr.bf16.mxu1 %v8076_v9 }
 0x4bd   : > { %7646 = vmatpush3.bf16.msra.mxu1 %v8076_v9 }
 0x4bf   : > { %7672 = vmatpush3.bf16.msra.mxu0 %v8841_v61 }
 0x4c0   : > { %7685 = vmatprep.subr.bf16.mxu0 %v8839_v3 }
 0x4c2   : > { %7674 = vmatmul.mubr.msk.bf16.vlgmr.msra.gmra.mxu0 %vm859_vm2, %v8707_v10  ;;  %v8077_v10 = vld [vmem:[%s9914_s6 + $0x20] sm:$0xff]  }
 0x4c3   : > { %7686 = vmatpush3.bf16.msra.mxu0 %v8839_v3  ;;  %7689 = vmatprep.mubr.msk.bf16.mxu0 %vm859_vm2, %v8713_v11  ;;  %v8078_v11 = vld [vmem:[%s9914_s6 + $0x38] sm:$0xff]  }
 0x4c4   : > { %7687 = vmatprep.subr.bf16.mxu0 %v8841_v61  ;;  %7647 = vmatprep.subr.bf16.mxu1 %v8077_v10 }
 0x4c5   : > { %7648 = vmatpush3.bf16.msra.mxu1 %v8077_v10 }
 0x4c6   : > { %7661 = vmatprep.subr.bf16.mxu1 %v8078_v11 }
 0x4c7   : > { %7688 = vmatpush3.bf16.msra.mxu0 %v8841_v61 }
 0x4c8   : > { %7701 = vmatprep.subr.bf16.mxu0 %v8839_v3 }
 0x4ca   : > { %7690 = vmatmul.mubr.msk.bf16.vlgmr.msra.gmra.mxu0 %vm859_vm2, %v8725_v12 }
 0x4cb   : > { %7702 = vmatpush3.bf16.msra.mxu0 %v8839_v3  ;;  %7705 = vmatprep.mubr.msk.bf16.mxu0 %vm859_vm2, %v8731_v13 }
 0x4cc   : > { %7703 = vmatprep.subr.bf16.mxu0 %v8841_v61 }
 0x4cf   : > { %7704 = vmatpush3.bf16.msra.mxu0 %v8841_v61 }
 0x4d0   : > { %7717 = vmatprep.subr.bf16.mxu0 %v8839_v3 }
 0x4d2   : > { %7706 = vmatmul.mubr.msk.bf16.vlgmr.msra.gmra.mxu0 %vm859_vm2, %v8743_v14 }
 0x4d3   : > { %7718 = vmatpush3.bf16.msra.mxu0 %v8839_v3  ;;  %7721 = vmatprep.mubr.msk.bf16.mxu0 %vm859_vm2, %v8749_v15 }
 0x4d4   : > { %7719 = vmatprep.subr.bf16.mxu0 %v8841_v61 }
 0x4d7   : > { %7720 = vmatpush3.bf16.msra.mxu0 %v8841_v61 }
 0x4d8   : > { %7733 = vmatprep.subr.bf16.mxu0 %v8839_v3 }
 0x4da   : > { %7722 = vmatmul.mubr.msk.bf16.vlgmr.msra.gmra.mxu0 %vm859_vm2, %v8761_v16 }
 0x4db   : > { %7734 = vmatpush3.bf16.msra.mxu0 %v8839_v3  ;;  %7737 = vmatprep.mubr.msk.bf16.mxu0 %vm859_vm2, %v8767_v17 }
 0x4dc   : > { %7735 = vmatprep.subr.bf16.mxu0 %v8841_v61 }
 0x4df   : > { %7736 = vmatpush3.bf16.msra.mxu0 %v8841_v61  ;;  %v8086_v61 = vld [vmem:[%s9914_s6 + $0x78] sm:$0xff]  }
 0x4e2   : > { %7738 = vmatmul.mubr.msk.bf16.vlgmr.msra.gmra.mxu0 %vm859_vm2, %v8779_v18 }
 0x4e3   : > { %7753 = vmatprep.mubr.msk.bf16.mxu0 %vm859_vm2, %v8604_v28 }
 0x56a   : > { %v8938_v12 = vpop.f32.mrf.mxu0 }
 0x56c   : > { %v8940_v28 = vpop.f32.mrf.mxu0 }
 0x56e   : > { %v8942_v13 = vpop.f32.mrf.mxu0 }
 0x570   : > { %v8944_v14 = vpop.f32.mrf.mxu0 }
 0x572   : > { %v7643_v15 = vpop.f32.mrf.mxu0 }
 0x574   : > { %v2404_v16 = vpop.f32.mrf.mxu0 }
 0x576   : > { %v7644_v17 = vpop.f32.mrf.mxu0 }
 0x577   : > { %v2420_v23 = vpack.c.bf16 %v7644_v17, %v7643_v15  ;;  %v7635_v15 = vpop.f32.mrf.mxu1 }
 0x578   : > { %v2407_v18 = vpop.f32.mrf.mxu0 }
 0x579   : > { %v2419_v35 = vpack.c.bf16 %v2407_v18, %v2404_v16  ;;  %v2355_v16 = vpop.f32.mrf.mxu1 }
 0x57a   : > { %v7659_v36 = vpop.f32.mrf.mxu0 }
 0x57b   : > { %7649 = vmatprep.mubr.msk.bf16.mxu1 %vm2247_vm6, %v2419_v35  ;;  %v7636_v17 = vpop.f32.mrf.mxu1 }
 0x57c   : > { %7650 = vmatmul.mubr.msk.bf16.vlgmr.msra.gmra.mxu1 %vm2247_vm6, %v2420_v23  ;;  %v2531_v58 = vpop.f32.mrf.mxu0 }
 0x57d   : > { %7662 = vmatpush3.bf16.msra.mxu1 %v8078_v11  ;;  %v8996_v11 = vld [vmem:[%s9911_s3 + $0x10] sm:$0xff]   ;;  %v2358_v18 = vpop.f32.mrf.mxu1 }
 0x57e   : > { %v7660_v24 = vpop.f32.mrf.mxu0  ;;  %7663 = vmatprep.subr.bf16.mxu1 %v8079_v42 }
 0x57f   : > { %v2547_v41 = vpack.c.bf16 %v7660_v24, %v7659_v36 }
 0x580   : > { %v2534_v39 = vpop.f32.mrf.mxu0 }
 0x581   : > { %v2546_v40 = vpack.c.bf16 %v2534_v39, %v2531_v58  ;;  %7664 = vmatpush3.bf16.msra.mxu1 %v8079_v42 }
 0x582   : > { %v7675_v43 = vpop.f32.mrf.mxu0  ;;  %7677 = vmatprep.subr.bf16.mxu1 %v8080_v37 }
 0x583   : > { %7665 = vmatprep.mubr.msk.bf16.mxu1 %vm2247_vm6, %v2546_v40 }
 0x584   : > { %7666 = vmatmul.mubr.msk.bf16.vlgmr.msra.gmra.mxu1 %vm2247_vm6, %v2547_v41  ;;  %v2658_v45 = vpop.f32.mrf.mxu0 }
 0x585   : > { %7678 = vmatpush3.bf16.msra.mxu1 %v8080_v37 }
 0x586   : > { %v7676_v47 = vpop.f32.mrf.mxu0  ;;  %7679 = vmatprep.subr.bf16.mxu1 %v8081_v44 }
 0x587   : > { %v2674_v50 = vpack.c.bf16 %v7676_v47, %v7675_v43 }
 0x588   : > { %v2661_v49 = vpop.f32.mrf.mxu0 }
 0x589   : > { %v2673_v51 = vpack.c.bf16 %v2661_v49, %v2658_v45  ;;  %7680 = vmatpush3.bf16.msra.mxu1 %v8081_v44 }
 0x58a   : > { %v7691_v52 = vpop.f32.mrf.mxu0  ;;  %7693 = vmatprep.subr.bf16.mxu1 %v8082_v48 }
 0x58b   : > { %7681 = vmatprep.mubr.msk.bf16.mxu1 %vm2247_vm6, %v2673_v51 }
 0x58c   : > { %7682 = vmatmul.mubr.msk.bf16.vlgmr.msra.gmra.mxu1 %vm2247_vm6, %v2674_v50  ;;  %v2785_v56 = vpop.f32.mrf.mxu0 }
 0x58d   : > { %7694 = vmatpush3.bf16.msra.mxu1 %v8082_v48 }
 0x58e   : > { %v7692_v60 = vpop.f32.mrf.mxu0  ;;  %7695 = vmatprep.subr.bf16.mxu1 %v8083_v55 }
 0x58f   : > { %v2801_v62 = vpack.c.bf16 %v7692_v60, %v7691_v52  ;;  %v2364_v52 = vadd.f32 %v7635_v15, %v8938_v12 }
 0x590   : > { %v2788_v57 = vpop.f32.mrf.mxu0 }
 0x591   : > { %v2800_v59 = vpack.c.bf16 %v2788_v57, %v2785_v56  ;;  %7696 = vmatpush3.bf16.msra.mxu1 %v8083_v55  ;;  %v2367_v57 = vadd.f32 %v7636_v17, %v8942_v13 }
 0x592   : > { %v7707_v63 = vpop.f32.mrf.mxu0  ;;  %7709 = vmatprep.subr.bf16.mxu1 %v8084_v29 }
 0x593   : > { %7697 = vmatprep.mubr.msk.bf16.mxu1 %vm2247_vm6, %v2800_v59 }
 0x594   : > { %7698 = vmatmul.mubr.msk.bf16.vlgmr.msra.gmra.mxu1 %vm2247_vm6, %v2801_v62  ;;  %v2912_v2 = vpop.f32.mrf.mxu0 }
 0x595   : > { %7710 = vmatpush3.bf16.msra.mxu1 %v8084_v29  ;;  %v2356_v29 = vadd.f32 %v2355_v16, %v8940_v28 }
 0x596   : > { %v7708_v3 = vpop.f32.mrf.mxu0  ;;  %7711 = vmatprep.subr.bf16.mxu1 %v8085_v0 }
 0x597   : > { %v2928_v20 = vpack.c.bf16 %v7708_v3, %v7707_v63  ;;  %v2359_v63 = vadd.f32 %v2358_v18, %v8944_v14 }
 0x598   : > { %v2915_v5 = vpop.f32.mrf.mxu0 }
 0x599   : > { %v2927_v19 = vpack.c.bf16 %v2915_v5, %v2912_v2  ;;  %7712 = vmatpush3.bf16.msra.mxu1 %v8085_v0 }
 0x59a   : > { %v7723_v25 = vpop.f32.mrf.mxu0  ;;  %7725 = vmatprep.subr.bf16.mxu1 %v8086_v61 }
 0x59b   : > { %7713 = vmatprep.mubr.msk.bf16.mxu1 %vm2247_vm6, %v2927_v19 }
 0x59c   : > { %7714 = vmatmul.mubr.msk.bf16.vlgmr.msra.gmra.mxu1 %vm2247_vm6, %v2928_v20  ;;  %v3039_v26 = vpop.f32.mrf.mxu0 }
 0x59d   : > { %7726 = vmatpush3.bf16.msra.mxu1 %v8086_v61 }
 0x59e   : > { %v7724_v54 = vpop.f32.mrf.mxu0  ;;  %7727 = vmatprep.subr.bf16.mxu1 %v8087_v53 }
 0x59f   : > { %v3055_v21 = vpack.c.bf16 %v7724_v54, %v7723_v25 }
 0x5a0   : > { %v3042_v30 = vpop.f32.mrf.mxu0 }
 0x5a1   : > { %v3054_v31 = vpack.c.bf16 %v3042_v30, %v3039_v26  ;;  %7728 = vmatpush3.bf16.msra.mxu1 %v8087_v53 }
 0x5a2   : > { %v7739_v32 = vpop.f32.mrf.mxu0  ;;  %7741 = vmatprep.subr.bf16.mxu1 %v8088_v27 }
 0x5a3   : > { %7729 = vmatprep.mubr.msk.bf16.mxu1 %vm2247_vm6, %v3054_v31 }
 0x5a4   : > { %7730 = vmatmul.mubr.msk.bf16.vlgmr.msra.gmra.mxu1 %vm2247_vm6, %v3055_v21  ;;  %v3166_v34 = vpop.f32.mrf.mxu0 }
 0x5a5   : > { %7742 = vmatpush3.bf16.msra.mxu1 %v8088_v27 }
 0x5a6   : > { %v7740_v38 = vpop.f32.mrf.mxu0  ;;  %7743 = vmatprep.subr.bf16.mxu1 %v8089_v33 }
 0x5a7   : > { %v3182_v10 = vpack.c.bf16 %v7740_v38, %v7739_v32 }
 0x5a8   : > { %v3169_v22 = vpop.f32.mrf.mxu0 }
 0x5a9   : > { %v3181_v9 = vpack.c.bf16 %v3169_v22, %v3166_v34  ;;  %7744 = vmatpush3.bf16.msra.mxu1 %v8089_v33  ;;  %v6786_v22 = vld [vmem:[%s9915_s7] ss:$0 sm:$0xff] }
 0x5ab   : > { %7745 = vmatprep.mubr.msk.bf16.mxu1 %vm2247_vm6, %v3181_v9 }
 0x5ac   : > { %7746 = vmatmul.mubr.msk.bf16.vlgmr.msra.gmra.mxu1 %vm2247_vm6, %v3182_v10 }
 0x5ad   : > { %7761 = vmatprep.mubr.msk.bf16.mxu1 %vm859_vm2, %v8996_v11 }
 0x63c   : > { %v7651_v35 = vpop.f32.mrf.mxu1 }
 0x63d   : > { %v2495_v56 = vadd.f32 %v7651_v35, %v2364_v52  ;;  %v9037_v52 = vld [vmem:[%s9911_s3 + $0x18] sm:$0x1f]  }
 0x63e   : > { %v2478_v23 = vpop.f32.mrf.mxu1 }
 0x63f   : > { %v2493_v0 = vadd.f32 %v2478_v23, %v2356_v29 }
 0x640   : > { %v7652_v36 = vpop.f32.mrf.mxu1 }
 0x641   : > { %v2496_v2 = vadd.f32 %v7652_v36, %v2367_v57 }
 0x642   : > { %v2481_v42 = vpop.f32.mrf.mxu1 }
 0x643   : > { %v2494_v5 = vadd.f32 %v2481_v42, %v2359_v63 }
 0x644   : > { %v7667_v58 = vpop.f32.mrf.mxu1 }
 0x645   : > { %v2622_v59 = vadd.f32 %v7667_v58, %v2495_v56  ;;  %v8097_v56 = vld [vmem:[%s9916_s8 + $0x20] sm:$0xff]  }
 0x646   : > { %v2605_v24 = vpop.f32.mrf.mxu1 }
 0x647   : > { %v2620_v19 = vadd.f32 %v2605_v24, %v2493_v0 }
 0x648   : > { %v7668_v37 = vpop.f32.mrf.mxu1 }
 0x649   : > { %v2623_v20 = vadd.f32 %v7668_v37, %v2496_v2 }
 0x64a   : > { %v2608_v39 = vpop.f32.mrf.mxu1 }
 0x64b   : > { %v2621_v53 = vadd.f32 %v2608_v39, %v2494_v5 }
 0x64c   : > { %v7683_v40 = vpop.f32.mrf.mxu1 }
 0x64d   : > { %v2749_v3 = vadd.f32 %v7683_v40, %v2622_v59 }
 0x64e   : > { %v2732_v41 = vpop.f32.mrf.mxu1 }
 0x64f   : > { %v2747_v26 = vadd.f32 %v2732_v41, %v2620_v19 }
 0x650   : > { %v7684_v43 = vpop.f32.mrf.mxu1 }
 0x651   : > { %v2750_v54 = vadd.f32 %v7684_v43, %v2623_v20 }
 0x652   : > { %v2735_v44 = vpop.f32.mrf.mxu1 }
 0x653   : > { %v2748_v30 = vadd.f32 %v2735_v44, %v2621_v53 }
 0x654   : > { %v7699_v45 = vpop.f32.mrf.mxu1 }
 0x655   : > { %v2876_v25 = vadd.f32 %v7699_v45, %v2749_v3 }
 0x656   : > { %v2859_v47 = vpop.f32.mrf.mxu1 }
 0x657   : > { %v2874_v13 = vadd.f32 %v2859_v47, %v2747_v26  ;;  %v8100_v26 = vld [vmem:[%s9916_s8 + $0x8] sm:$0xff]  }
 0x658   : > { %v7700_v48 = vpop.f32.mrf.mxu1 }
 0x659   : > { %v2877_v31 = vadd.f32 %v7700_v48, %v2750_v54 }
 0x65a   : > { %v2862_v49 = vpop.f32.mrf.mxu1 }
 0x65b   : > { %v2875_v14 = vadd.f32 %v2862_v49, %v2748_v30  ;;  %v8094_v49 = vld [vmem:[%s9916_s8 + $0x38] sm:$0xff]  }
 0x65c   : > { %v7715_v51 = vpop.f32.mrf.mxu1 }
 0x65d   : > { %v3003_v27 = vadd.f32 %v7715_v51, %v2876_v25  ;;  %v8095_v51 = vld [vmem:[%s9916_s8 + $0x30] sm:$0xff]  }
 0x65e   : > { %v2986_v50 = vpop.f32.mrf.mxu1  ;;  %v8099_v25 = vld [vmem:[%s9916_s8 + $0x10] sm:$0xff]  }
 0x65f   : > { %v3001_v33 = vadd.f32 %v2986_v50, %v2874_v13  ;;  %v9030_v50 = vld [vmem:[%s9911_s3 + $0x8] sm:$0x1f]  }
 0x660   : > { %v7716_v55 = vpop.f32.mrf.mxu1 }
 0x661   : > { %v3004_v34 = vadd.f32 %v7716_v55, %v2877_v31  ;;  %v8091_v55 = vld [vmem:[%s9916_s8 + $0x70] sm:$0xff]   ;;  %v8102_v31 = vld [vmem:[%s9916_s8 + $0x58] sm:$0xff]  }
 0x662   : > { %v2989_v60 = vpop.f32.mrf.mxu1 }
 0x663   : > { %v3002_v10 = vadd.f32 %v2989_v60, %v2875_v14  ;;  %v8098_v60 = vld [vmem:[%s9916_s8 + $0x18] sm:$0xff]  }
 0x664   : > { %v7731_v62 = vpop.f32.mrf.mxu1 }
 0x665   : > { %v3130_v21 = vadd.f32 %v7731_v62, %v3003_v27 }
 0x666   : > { %v3113_v61 = vpop.f32.mrf.mxu1 }
 0x667   : > { %v3128_v15 = vadd.f32 %v3113_v61, %v3001_v33 }
 0x668   : > { %v7732_v12 = vpop.f32.mrf.mxu1 }
 0x669   : > { %v3131_v16 = vadd.f32 %v7732_v12, %v3004_v34  ;;  %v8103_v34 = vld [vmem:[%s9916_s8 + $0x50] sm:$0xff]  }
 0x66a   : > { %v3116_v28 = vpop.f32.mrf.mxu1 }
 0x66b   : > { %v3129_v18 = vadd.f32 %v3116_v28, %v3002_v10  ;;  %v8101_v28 = vld [vmem:[%s9916_s8] sm:$0xff]   ;;  %v9110_v10 = vld [vmem:[%s9911_s3 + $0x50] sm:$0xff]  }
 0x66c   : > { %v7747_v32 = vpop.f32.mrf.mxu1 }
 0x66d   : > { %v3257_v38 = vadd.f32 %v7747_v32, %v3130_v21 }
 0x66e   : > { %v3240_v9 = vpop.f32.mrf.mxu1 }
 0x66f   : > { %v3267_v35 = vadd.f32 %v6786_v22, %v3257_v38  ;;  %v3255_v23 = vadd.f32 %v3240_v9, %v3128_v15  ;;  %v8105_v9 = vld [vmem:[%s9916_s8 + $0xb8] sm:$0xff]   ;;  %v8106_v15 = vld [vmem:[%s9916_s8 + $0x40] sm:$0xff]  }
 0x670   : > { %v7748_v17 = vpop.f32.mrf.mxu1 }
 0x671   : > { %v3258_v36 = vadd.f32 %v7748_v17, %v3131_v16  ;;  %v3271_v37 = vmax.f32 %v3267_v35, 0.0  ;;  %v3265_v39 = vadd.f32 %v6786_v22, %v3255_v23  ;;  %v8107_v16 = vld [vmem:[%s9916_s8 + $0xb0] sm:$0xff]   ;;  %v9125_v17 = vld [vmem:[%s9911_s3 + $0x58] sm:$0x1f]   ;;  %v8109_v23 = vld [vmem:[%s9916_s8 + $0xa0] sm:$0xff]  }
 0x672   : > { %v3243_v42 = vpop.f32.mrf.mxu1 }
 0x673   : > { %v3268_v58 = vadd.f32 %v6786_v22, %v3258_v36  ;;  %v3256_v24 = vadd.f32 %v3243_v42, %v3129_v18  ;;  %v3269_v45 = vmax.f32 %v3265_v39, 0.0  ;;  %v8108_v18 = vld [vmem:[%s9916_s8 + $0xa8] sm:$0xff]   ;;  %v8110_v36 = vld [vmem:[%s9916_s8 + $0x98] sm:$0xff]   ;;  %v9145_v42 = vld [vmem:[%s9911_s3 + $0x40] sm:$0xff]  }
 0x674   : > { %v8113_v39 = vld [vmem:[%s9916_s8 + $0x80] sm:$0xff]  }
 0x675   : > { %v3272_v40 = vmax.f32 %v3268_v58, 0.0  ;;  %v3266_v41 = vadd.f32 %v6786_v22, %v3256_v24  ;;  %v8104_v22 = vld [vmem:[%s9916_s8 + $0x48] sm:$0xff]   ;;  %v8111_v58 = vld [vmem:[%s9916_s8 + $0x90] sm:$0xff]  }
 0x676   : > { %v9157_v24 = vld [vmem:[%s9911_s3 + $0x48] sm:$0x1f]  }
 0x677   : > { %v3274_v43 = vpack.c.bf16 %v3272_v40, %v3271_v37  ;;  %v3270_v44 = vmax.f32 %v3266_v41, 0.0  ;;  %v8112_v37 = vld [vmem:[%s9916_s8 + $0x88] sm:$0xff]  }
 0x679   : > { %v9008_v47 = vand.u32 %v3274_v43, %v8619_v46  ;;  %v9010_v48 = vpack.c.bf16 %v3270_v44, %v3269_v45 }
 0x67b   : > { %7749 = vmatprep.subr.bf16.mxu0 %v9008_v47  ;;  %7757 = vmatprep.subr.bf16.mxu1 %v9008_v47 }
 0x67c   : > { %7750 = vmatpush3.bf16.msra.mxu0 %v9008_v47  ;;  %7758 = vmatpush3.bf16.msra.mxu1 %v9008_v47 }
 0x67d   : > { %7751 = vmatprep.subr.bf16.mxu0 %v9010_v48  ;;  %7759 = vmatprep.subr.bf16.mxu1 %v9010_v48 }
 0x680   : > { %7752 = vmatpush3.bf16.msra.mxu0 %v9010_v48  ;;  %7760 = vmatpush3.bf16.msra.mxu1 %v9010_v48 }
 0x681   : > { %7789 = vmatprep.subr.bf16.mxu0 %v9008_v47  ;;  %7765 = vmatprep.subr.bf16.mxu1 %v8094_v49 }
 0x683   : > { %7754 = vmatmul.mubr.msk.bf16.vlgmr.msra.gmra.mxu0 %vm859_vm2, %v9030_v50  ;;  %7762 = vmatmul.mubr.msk.bf16.vlgmr.msra.gmra.mxu1 %vm859_vm2, %v9037_v52 }
 0x684   : > { %7790 = vmatpush3.bf16.msra.mxu0 %v9008_v47  ;;  %7793 = vmatprep.mubr.msk.bf16.mxu0 %vm859_vm2, %v8658_v4  ;;  %v8090_v4 = vld [vmem:[%s9916_s8 + $0x78] sm:$0xff]  }
 0x685   : > { %7791 = vmatprep.subr.bf16.mxu0 %v9010_v48  ;;  %7766 = vmatpush3.bf16.msra.mxu1 %v8094_v49 }
 0x686   : > { %7767 = vmatprep.subr.bf16.mxu1 %v8095_v51 }
 0x688   : > { %7792 = vmatpush3.bf16.msra.mxu0 %v9010_v48 }
 0x689   : > { %7809 = vmatprep.subr.bf16.mxu0 %v9008_v47  ;;  %7768 = vmatpush3.bf16.msra.mxu1 %v8095_v51 }
 0x68b   : > { %7794 = vmatmul.mubr.msk.bf16.vlgmr.msra.gmra.mxu0 %vm859_vm2, %v8671_v6  ;;  %v8092_v6 = vld [vmem:[%s9916_s8 + $0x68] sm:$0xff]  }
 0x68c   : > { %7810 = vmatpush3.bf16.msra.mxu0 %v9008_v47  ;;  %7813 = vmatprep.mubr.msk.bf16.mxu0 %vm859_vm2, %v8677_v7  ;;  %v8093_v7 = vld [vmem:[%s9916_s8 + $0x60] sm:$0xff]  }
 0x68d   : > { %7811 = vmatprep.subr.bf16.mxu0 %v9010_v48 }
 0x690   : > { %7812 = vmatpush3.bf16.msra.mxu0 %v9010_v48 }
 0x691   : > { %7817 = vmatprep.subr.bf16.mxu0 %v8090_v4 }
 0x693   : > { %7814 = vmatmul.mubr.msk.bf16.vlgmr.msra.gmra.mxu0 %vm859_vm2, %v8689_v8  ;;  %v8096_v8 = vld [vmem:[%s9916_s8 + $0x28] sm:$0xff]  }
 0x694   : > { %7818 = vmatpush3.bf16.msra.mxu0 %v8090_v4  ;;  %7769 = vmatprep.subr.bf16.mxu1 %v8096_v8 }
 0x695   : > { %7819 = vmatprep.subr.bf16.mxu0 %v8091_v55  ;;  %7770 = vmatpush3.bf16.msra.mxu1 %v8096_v8 }
 0x696   : > { %7771 = vmatprep.subr.bf16.mxu1 %v8097_v56 }
 0x698   : > { %7820 = vmatpush3.bf16.msra.mxu0 %v8091_v55 }
 0x699   : > { %7821 = vmatprep.subr.bf16.mxu0 %v8092_v6  ;;  %7772 = vmatpush3.bf16.msra.mxu1 %v8097_v56 }
 0x69a   : > { %7777 = vmatprep.subr.bf16.mxu1 %v8098_v60 }
 0x69c   : > { %7822 = vmatpush3.bf16.msra.mxu0 %v8092_v6 }
 0x69d   : > { %7823 = vmatprep.subr.bf16.mxu0 %v8093_v7 }
 0x6a0   : > { %7824 = vmatpush3.bf16.msra.mxu0 %v8093_v7 }
 0x6a1   : > { %7849 = vmatprep.subr.bf16.mxu0 %v9008_v47 }
 0x743   : > { %v7755_v29 = vpop.f32.mrf.mxu0  ;;  %v7763_v57 = vpop.f32.mrf.mxu1 }
 0x745   : > { %v3313_v59 = vpop.f32.mrf.mxu0  ;;  %v3372_v62 = vpop.f32.mrf.mxu1 }
 0x747   : > { %v7756_v63 = vpop.f32.mrf.mxu0  ;;  %v7764_v0 = vpop.f32.mrf.mxu1 }
 0x748   : > { %v3388_v19 = vpack.c.bf16 %v7764_v0, %v7763_v57  ;;  %v3329_v33 = vpack.c.bf16 %v7756_v63, %v7755_v29 }
 0x749   : > { %v3316_v2 = vpop.f32.mrf.mxu0  ;;  %v3375_v3 = vpop.f32.mrf.mxu1 }
 0x74a   : > { %v3328_v61 = vpack.c.bf16 %v3316_v2, %v3313_v59  ;;  %v3387_v5 = vpack.c.bf16 %v3375_v3, %v3372_v62 }
 0x74b   : > { %v7795_v20 = vpop.f32.mrf.mxu0 }
 0x74c   : > { %7773 = vmatprep.mubr.msk.bf16.mxu1 %vm3422_vm7, %v3387_v5 }
 0x74d   : > { %7774 = vmatmul.mubr.msk.bf16.vlgmr.msra.gmra.mxu1 %vm3422_vm7, %v3388_v19  ;;  %v3591_v12 = vpop.f32.mrf.mxu0 }
 0x74e   : > { %7778 = vmatpush3.bf16.msra.mxu1 %v8098_v60  ;;  %7785 = vmatprep.mubr.msk.bf16.mxu1 %vm3422_vm7, %v3328_v61 }
 0x74f   : > { %v7796_v53 = vpop.f32.mrf.mxu0  ;;  %7779 = vmatprep.subr.bf16.mxu1 %v8099_v25 }
 0x750   : > { %v3607_v35 = vpack.c.bf16 %v7796_v53, %v7795_v20 }
 0x751   : > { %v3594_v54 = vpop.f32.mrf.mxu0 }
 0x752   : > { %7780 = vmatpush3.bf16.msra.mxu1 %v8099_v25  ;;  %v3606_v38 = vpack.c.bf16 %v3594_v54, %v3591_v12  ;;  %v9174_v25 = vld [vmem:[%s9911_s3 + $0x70] sm:$0xff]  }
 0x753   : > { %v7815_v27 = vpop.f32.mrf.mxu0  ;;  %7781 = vmatprep.subr.bf16.mxu1 %v8100_v26 }
 0x755   : > { %v3734_v30 = vpop.f32.mrf.mxu0 }
 0x756   : > { %7782 = vmatpush3.bf16.msra.mxu1 %v8100_v26 }
 0x757   : > { %v7816_v13 = vpop.f32.mrf.mxu0  ;;  %7783 = vmatprep.subr.bf16.mxu1 %v8101_v28 }
 0x758   : > { %v3750_v21 = vpack.c.bf16 %v7816_v13, %v7815_v27 }
 0x759   : > { %v3737_v32 = vpop.f32.mrf.mxu0 }
 0x75a   : > { %7784 = vmatpush3.bf16.msra.mxu1 %v8101_v28  ;;  %v3749_v14 = vpack.c.bf16 %v3737_v32, %v3734_v30  ;;  %v9191_v32 = vld [vmem:[%s9911_s3 + $0x78] sm:$0x1f]  }
 0x75b   : > { %7797 = vmatprep.subr.bf16.mxu1 %v8102_v31 }
 0x75c   : > { %7825 = vmatprep.mubr.msk.bf16.mxu0 %vm3422_vm7, %v3749_v14 }
 0x75d   : > { %7786 = vmatmul.mubr.msk.bf16.vlgmr.msra.gmra.mxu1 %vm3422_vm7, %v3329_v33  ;;  %7826 = vmatmul.mubr.msk.bf16.vlgmr.msra.gmra.mxu0 %vm3422_vm7, %v3750_v21 }
 0x75e   : > { %7798 = vmatpush3.bf16.msra.mxu1 %v8102_v31  ;;  %7850 = vmatpush3.bf16.msra.mxu0 %v9008_v47 }
 0x75f   : > { %7851 = vmatprep.subr.bf16.mxu0 %v9010_v48  ;;  %7799 = vmatprep.subr.bf16.mxu1 %v8103_v34 }
 0x760   : > { %7853 = vmatprep.mubr.msk.bf16.mxu0 %vm859_vm2, %v9110_v10  ;;  %7805 = vmatprep.mubr.msk.bf16.mxu1 %vm3422_vm7, %v3606_v38 }
 0x762   : > { %7800 = vmatpush3.bf16.msra.mxu1 %v8103_v34  ;;  %7852 = vmatpush3.bf16.msra.mxu0 %v9010_v48 }
 0x763   : > { %7801 = vmatprep.subr.bf16.mxu1 %v8104_v22  ;;  %7857 = vmatprep.subr.bf16.mxu0 %v8105_v9 }
 0x765   : > { %7854 = vmatmul.mubr.msk.bf16.vlgmr.msra.gmra.mxu0 %vm859_vm2, %v9125_v17 }
 0x766   : > { %7802 = vmatpush3.bf16.msra.mxu1 %v8104_v22  ;;  %7858 = vmatpush3.bf16.msra.mxu0 %v8105_v9  ;;  %v9201_v22 = vld [vmem:[%s9911_s3 + $0x60] sm:$0xff]   ;;  %v8114_v9 = vld [vmem:[%s9916_s8 + $0xd8] sm:$0xff]  }
 0x767   : > { %7803 = vmatprep.subr.bf16.mxu1 %v8106_v15  ;;  %7859 = vmatprep.subr.bf16.mxu0 %v8107_v16 }
 0x76a   : > { %7804 = vmatpush3.bf16.msra.mxu1 %v8106_v15  ;;  %7860 = vmatpush3.bf16.msra.mxu0 %v8107_v16  ;;  %v8115_v15 = vld [vmem:[%s9916_s8 + $0xd0] sm:$0xff]   ;;  %v9216_v16 = vld [vmem:[%s9911_s3 + $0x68] sm:$0x1f]  }
 0x76b   : > { %7829 = vmatprep.subr.bf16.mxu1 %v9008_v47  ;;  %7861 = vmatprep.subr.bf16.mxu0 %v8108_v18 }
 0x76d   : > { %7806 = vmatmul.mubr.msk.bf16.vlgmr.msra.gmra.mxu1 %vm3422_vm7, %v3607_v35  ;;  %v8117_v35 = vld [vmem:[%s9916_s8 + $0xc0] sm:$0xff]  }
 0x76e   : > { %7830 = vmatpush3.bf16.msra.mxu1 %v9008_v47  ;;  %7862 = vmatpush3.bf16.msra.mxu0 %v8108_v18  ;;  %v8116_v18 = vld [vmem:[%s9916_s8 + $0xc8] sm:$0xff]  }
 0x76f   : > { %7831 = vmatprep.subr.bf16.mxu1 %v9010_v48  ;;  %7863 = vmatprep.subr.bf16.mxu0 %v8109_v23 }
 0x770   : > { %7833 = vmatprep.mubr.msk.bf16.mxu1 %vm859_vm2, %v9145_v42 }
 0x772   : > { %7832 = vmatpush3.bf16.msra.mxu1 %v9010_v48  ;;  %7864 = vmatpush3.bf16.msra.mxu0 %v8109_v23  ;;  %v8118_v23 = vld [vmem:[%s9916_s8 + $0xf8] sm:$0xff]  }
 0x773   : > { %7889 = vmatprep.subr.bf16.mxu0 %v9008_v47  ;;  %7837 = vmatprep.subr.bf16.mxu1 %v8110_v36 }
 0x775   : > { %7834 = vmatmul.mubr.msk.bf16.vlgmr.msra.gmra.mxu1 %vm859_vm2, %v9157_v24 }
 0x776   : > { %7838 = vmatpush3.bf16.msra.mxu1 %v8110_v36  ;;  %v8119_v36 = vld [vmem:[%s9916_s8 + $0xf0] sm:$0xff]  }
 0x777   : > { %7839 = vmatprep.subr.bf16.mxu1 %v8111_v58 }
 0x77a   : > { %7840 = vmatpush3.bf16.msra.mxu1 %v8111_v58  ;;  %v8120_v58 = vld [vmem:[%s9916_s8 + $0xe8] sm:$0xff]  }
 0x77b   : > { %7841 = vmatprep.subr.bf16.mxu1 %v8112_v37 }
 0x77e   : > { %7842 = vmatpush3.bf16.msra.mxu1 %v8112_v37  ;;  %v8121_v37 = vld [vmem:[%s9916_s8 + $0xe0] sm:$0xff]  }
 0x77f   : > { %7843 = vmatprep.subr.bf16.mxu1 %v8113_v39 }
 0x782   : > { %7844 = vmatpush3.bf16.msra.mxu1 %v8113_v39 }
 0x783   : > { %7869 = vmatprep.subr.bf16.mxu1 %v9008_v47 }
 0x80d   : > { %v7775_v40 = vpop.f32.mrf.mxu1 }
 0x80f   : > { %v3463_v41 = vpop.f32.mrf.mxu1 }
 0x811   : > { %v7776_v43 = vpop.f32.mrf.mxu1 }
 0x813   : > { %v3466_v44 = vpop.f32.mrf.mxu1 }
 0x81d   : > { %v7787_v45 = vpop.f32.mrf.mxu1  ;;  %v7827_v49 = vpop.f32.mrf.mxu0 }
 0x81e   : > { %v3551_v51 = vadd.f32 %v7787_v45, %v7775_v40 }
 0x81f   : > { %v3542_v4 = vpop.f32.mrf.mxu1  ;;  %v3824_v55 = vpop.f32.mrf.mxu0 }
 0x820   : > { %v3543_v6 = vadd.f32 %v3542_v4, %v3463_v41 }
 0x821   : > { %v7788_v7 = vpop.f32.mrf.mxu1  ;;  %v7828_v8 = vpop.f32.mrf.mxu0 }
 0x822   : > { %v3554_v56 = vadd.f32 %v7788_v7, %v7776_v43 }
 0x823   : > { %v3545_v60 = vpop.f32.mrf.mxu1  ;;  %v3827_v29 = vpop.f32.mrf.mxu0 }
 0x824   : > { %v3546_v57 = vadd.f32 %v3545_v60, %v3466_v44 }
 0x825   : > { %v7855_v59 = vpop.f32.mrf.mxu0 }
 0x827   : > { %v4020_v62 = vpop.f32.mrf.mxu0 }
 0x829   : > { %v7856_v63 = vpop.f32.mrf.mxu0 }
 0x82a   : > { %v4036_v0 = vpack.c.bf16 %v7856_v63, %v7855_v59 }
 0x82b   : > { %v4023_v2 = vpop.f32.mrf.mxu0 }
 0x82c   : > { %v4035_v3 = vpack.c.bf16 %v4023_v2, %v4020_v62 }
 0x82d   : > { %v7807_v61 = vpop.f32.mrf.mxu1 }
 0x82e   : > { %v3698_v5 = vadd.f32 %v7807_v61, %v3551_v51  ;;  %7865 = vmatprep.mubr.msk.bf16.mxu0 %vm3422_vm7, %v4035_v3 }
 0x82f   : > { %v3681_v19 = vpop.f32.mrf.mxu1  ;;  %7866 = vmatmul.mubr.msk.bf16.vlgmr.msra.gmra.mxu0 %vm3422_vm7, %v4036_v0 }
 0x830   : > { %v3696_v20 = vadd.f32 %v3681_v19, %v3543_v6  ;;  %7890 = vmatpush3.bf16.msra.mxu0 %v9008_v47  ;;  %7893 = vmatprep.mubr.msk.bf16.mxu0 %vm859_vm2, %v9174_v25  ;;  %v9178_v12 = vadd.f32 %v7827_v49, %v3698_v5 }
 0x831   : > { %v7808_v53 = vpop.f32.mrf.mxu1  ;;  %7891 = vmatprep.subr.bf16.mxu0 %v9010_v48 }
 0x832   : > { %v3699_v26 = vadd.f32 %v7808_v53, %v3554_v56  ;;  %v9181_v54 = vadd.f32 %v3824_v55, %v3696_v20 }
 0x833   : > { %v3684_v27 = vpop.f32.mrf.mxu1 }
 0x834   : > { %v3697_v28 = vadd.f32 %v3684_v27, %v3546_v57  ;;  %7892 = vmatpush3.bf16.msra.mxu0 %v9010_v48  ;;  %v9184_v30 = vadd.f32 %v7828_v8, %v3699_v26  ;;  %v8354_v26 = vld [vmem:[%s9911_s3 + $0x80] sm:$0xff]   ;;  %v8123_v27 = vld [vmem:[%s9916_s8 + $0x110] sm:$0xff]  }
 0x835   : > { %v7835_v13 = vpop.f32.mrf.mxu1  ;;  %7897 = vmatprep.subr.bf16.mxu0 %v8118_v23 }
 0x836   : > { %v9186_v31 = vadd.f32 %v3827_v29, %v3697_v28  ;;  %v8353_v29 = vld [vmem:[%s9911_s3] sm:$0xff]  }
 0x837   : > { %v3877_v21 = vpop.f32.mrf.mxu1  ;;  %7894 = vmatmul.mubr.msk.bf16.vlgmr.msra.gmra.mxu0 %vm859_vm2, %v9191_v32  ;;  %v8125_v28 = vld [vmem:[%s9916_s8 + $0x100] sm:$0xff]  }
 0x838   : > { %7898 = vmatpush3.bf16.msra.mxu0 %v8118_v23 }
 0x839   : > { %v7836_v14 = vpop.f32.mrf.mxu1  ;;  %7899 = vmatprep.subr.bf16.mxu0 %v8119_v36 }
 0x83a   : > { %v3893_v38 = vpack.c.bf16 %v7836_v14, %v7835_v13 }
 0x83b   : > { %v3880_v33 = vpop.f32.mrf.mxu1 }
 0x83c   : > { %v3892_v34 = vpack.c.bf16 %v3880_v33, %v3877_v21  ;;  %7900 = vmatpush3.bf16.msra.mxu0 %v8119_v36 }
 0x83d   : > { %7901 = vmatprep.subr.bf16.mxu0 %v8120_v58 }
 0x83e   : > { %7845 = vmatprep.mubr.msk.bf16.mxu1 %vm3422_vm7, %v3892_v34 }
 0x83f   : > { %7846 = vmatmul.mubr.msk.bf16.vlgmr.msra.gmra.mxu1 %vm3422_vm7, %v3893_v38 }
 0x840   : > { %7870 = vmatpush3.bf16.msra.mxu1 %v9008_v47  ;;  %7873 = vmatprep.mubr.msk.bf16.mxu1 %vm859_vm2, %v9201_v22 }
 0x841   : > { %7871 = vmatprep.subr.bf16.mxu1 %v9010_v48  ;;  %7902 = vmatpush3.bf16.msra.mxu0 %v8120_v58  ;;  %v8126_v58 = vld [vmem:[%s9918_s10 + $0xf0] ss:$8 sps:$4 sm:$0xff]  }
 0x842   : > { %7903 = vmatprep.subr.bf16.mxu0 %v8121_v37 }
 0x844   : > { %7872 = vmatpush3.bf16.msra.mxu1 %v9010_v48 }
 0x845   : > { %7877 = vmatprep.subr.bf16.mxu1 %v8114_v9  ;;  %7904 = vmatpush3.bf16.msra.mxu0 %v8121_v37 }
 0x847   : > { %7874 = vmatmul.mubr.msk.bf16.vlgmr.msra.gmra.mxu1 %vm859_vm2, %v9216_v16 }
 0x848   : > { %7878 = vmatpush3.bf16.msra.mxu1 %v8114_v9 }
 0x849   : > { %7879 = vmatprep.subr.bf16.mxu1 %v8115_v15 }
 0x84c   : > { %7880 = vmatpush3.bf16.msra.mxu1 %v8115_v15 }
 0x84d   : > { %7881 = vmatprep.subr.bf16.mxu1 %v8116_v18 }
 0x850   : > { %7882 = vmatpush3.bf16.msra.mxu1 %v8116_v18 }
 0x851   : > { %7883 = vmatprep.subr.bf16.mxu1 %v8117_v35 }
 0x854   : > { %7884 = vmatpush3.bf16.msra.mxu1 %v8117_v35 }
 0x855   : > { %7909 = vmatprep.subr.bf16.mxu1 %v9008_v47 }
 0x8ef   : > { %v7867_v39 = vpop.f32.mrf.mxu0 }
 0x8f1   : > { %v4110_v40 = vpop.f32.mrf.mxu0 }
 0x8f3   : > { %v7868_v41 = vpop.f32.mrf.mxu0 }
 0x8f5   : > { %v4113_v43 = vpop.f32.mrf.mxu0 }
 0x8f7   : > { %v7895_v44 = vpop.f32.mrf.mxu0 }
 0x8f9   : > { %v4306_v45 = vpop.f32.mrf.mxu0 }
 0x8fb   : > { %v7896_v49 = vpop.f32.mrf.mxu0 }
 0x8fc   : > { %v4322_v51 = vpack.c.bf16 %v7896_v49, %v7895_v44  ;;  %v8137_v44 = vld [vmem:[%s9918_s10 + $0xc4] ss:$8 sps:$4 sm:$0xff]   ;;  %v8140_v49 = vld [vmem:[%s9918_s10 + $0xb4] ss:$8 sps:$4 sm:$0xff]  }
 0x8fd   : > { %v4309_v4 = vpop.f32.mrf.mxu0 }
 0x8fe   : > { %v4321_v55 = vpack.c.bf16 %v4309_v4, %v4306_v45  ;;  %v8135_v45 = vld [vmem:[%s9918_s10 + $0xc0] ss:$8 sps:$4 sm:$0xff]   ;;  %v8143_v4 = vld [vmem:[%s9918_s10 + $0xa4] ss:$8 sps:$4 sm:$0xff]  }
 0x8ff   : > { %v7847_v6 = vpop.f32.mrf.mxu1 }
 0x900   : > { %v3984_v7 = vadd.f32 %v7847_v6, %v9178_v12  ;;  %7905 = vmatprep.mubr.msk.bf16.mxu0 %vm3422_vm7, %v4321_v55  ;;  %v8141_v55 = vld [vmem:[%s9918_s10 + $0xa0] ss:$8 sps:$4 sm:$0xff]   ;;  %v8146_v6 = vld [vmem:[%s9918_s10 + $0x94] ss:$8 sps:$4 sm:$0xff]  }
 0x901   : > { %v3967_v8 = vpop.f32.mrf.mxu1  ;;  %7906 = vmatmul.mubr.msk.bf16.vlgmr.msra.gmra.mxu0 %vm3422_vm7, %v4322_v51  ;;  %v8138_v51 = vld [vmem:[%s9918_s10 + $0xb0] ss:$8 sps:$4 sm:$0xff]  }
 0x902   : > { %v3982_v56 = vadd.f32 %v3967_v8, %v9181_v54  ;;  %v4127_v60 = vadd.f32 %v7867_v39, %v3984_v7  ;;  %7933 = vmatprep.mubr.msk.bf16.mxu0 %vm859_vm2, %v8353_v29  ;;  %v8355_v54 = vld [vmem:[%s9911_s3 + $0x88] sm:$0x1f]   ;;  %v8144_v7 = vld [vmem:[%s9918_s10 + $0x90] ss:$8 sps:$4 sm:$0xff]  }
 0x903   : > { %v7848_v57 = vpop.f32.mrf.mxu1  ;;  %v8131_v39 = vld [vmem:[%s9918_s10 + $0xe4] ss:$8 sps:$4 sm:$0xff]  }
 0x904   : > { %v3985_v59 = vadd.f32 %v7848_v57, %v9184_v30  ;;  %v4125_v62 = vadd.f32 %v4110_v40, %v3982_v56  ;;  %v8128_v30 = vld [vmem:[%s9918_s10 + $0xf4] ss:$8 sps:$4 sm:$0xff]   ;;  %v8129_v40 = vld [vmem:[%s9918_s10 + $0xe0] ss:$8 sps:$4 sm:$0xff]   ;;  %v8149_v8 = vld [vmem:[%s9918_s10 + $0x84] ss:$8 sps:$4 sm:$0xff]  }
 0x905   : > { %v3970_v63 = vpop.f32.mrf.mxu1  ;;  %v8147_v56 = vld [vmem:[%s9918_s10 + $0x80] ss:$8 sps:$4 sm:$0xff]  }
 0x906   : > { %v3983_v0 = vadd.f32 %v3970_v63, %v9186_v31  ;;  %v4128_v2 = vadd.f32 %v7868_v41, %v3985_v59  ;;  %v8134_v41 = vld [vmem:[%s9918_s10 + $0xd4] ss:$8 sps:$4 sm:$0xff]  }
 0x907   : > { %v7875_v3 = vpop.f32.mrf.mxu1 }
 0x908   : > { %v4126_v61 = vadd.f32 %v4113_v43, %v3983_v0  ;;  %v8132_v43 = vld [vmem:[%s9918_s10 + $0xd0] ss:$8 sps:$4 sm:$0xff]  }
 0x909   : > { %v4163_v5 = vpop.f32.mrf.mxu1 }
 0x90b   : > { %v7876_v19 = vpop.f32.mrf.mxu1 }
 0x90c   : > { %v4179_v53 = vpack.c.bf16 %v7876_v19, %v7875_v3  ;;  %v6923_v3 = vld [vmem:[%s9917_s9] ss:$0 sm:$0xff] }
 0x90d   : > { %v4166_v20 = vpop.f32.mrf.mxu1 }
 0x90e   : > { %v4178_v12 = vpack.c.bf16 %v4166_v20, %v4163_v5 }
 0x910   : > { %7885 = vmatprep.mubr.msk.bf16.mxu1 %vm3422_vm7, %v4178_v12 }
 0x911   : > { %7886 = vmatmul.mubr.msk.bf16.vlgmr.msra.gmra.mxu1 %vm3422_vm7, %v4179_v53 }
 0x912   : > { %7910 = vmatpush3.bf16.msra.mxu1 %v9008_v47  ;;  %7913 = vmatprep.mubr.msk.bf16.mxu1 %vm859_vm2, %v8354_v26  ;;  %v8122_v47 = vld [vmem:[%s9916_s8 + $0x118] sm:$0xff]  }
 0x913   : > { %7911 = vmatprep.subr.bf16.mxu1 %v9010_v48 }
 0x916   : > { %7912 = vmatpush3.bf16.msra.mxu1 %v9010_v48  ;;  %v8124_v48 = vld [vmem:[%s9916_s8 + $0x108] sm:$0xff]  }
 0x917   : > { %7917 = vmatprep.subr.bf16.mxu1 %v8122_v47 }
 0x919   : > { %7914 = vmatmul.mubr.msk.bf16.vlgmr.msra.gmra.mxu1 %vm859_vm2, %v8355_v54 }
 0x91a   : > { %7918 = vmatpush3.bf16.msra.mxu1 %v8122_v47 }
 0x91b   : > { %7919 = vmatprep.subr.bf16.mxu1 %v8123_v27 }
 0x91e   : > { %7920 = vmatpush3.bf16.msra.mxu1 %v8123_v27 }
 0x91f   : > { %7921 = vmatprep.subr.bf16.mxu1 %v8124_v48 }
 0x922   : > { %7922 = vmatpush3.bf16.msra.mxu1 %v8124_v48 }
 0x923   : > { %7923 = vmatprep.subr.bf16.mxu1 %v8125_v28 }
 0x926   : > { %7924 = vmatpush3.bf16.msra.mxu1 %v8125_v28 }
 0x927   : > { %4793 = vmatprep.subr.bf16.mxu1 %v8128_v30 }
 0x9d1   : > { %v7887_v13 = vpop.f32.mrf.mxu1 }
 0x9d2   : > { %v4270_v31 = vadd.f32 %v7887_v13, %v4127_v60  ;;  %v7907_v60 = vpop.f32.mrf.mxu0 }
 0x9d3   : > { %v4253_v21 = vpop.f32.mrf.mxu1 }
 0x9d4   : > { %v4268_v14 = vadd.f32 %v4253_v21, %v4125_v62  ;;  %v4396_v29 = vpop.f32.mrf.mxu0  ;;  %v4413_v59 = vadd.f32 %v7907_v60, %v4270_v31  ;;  %v8182_v60 = vld [vmem:[%s9918_s10 + $0x154] ss:$8 sps:$4 sm:$0xff]  }
 0x9d5   : > { %v7888_v33 = vpop.f32.mrf.mxu1 }
 0x9d6   : > { %v4271_v34 = vadd.f32 %v7888_v33, %v4128_v2  ;;  %v7908_v57 = vpop.f32.mrf.mxu0  ;;  %v4411_v63 = vadd.f32 %v4396_v29, %v4268_v14 }
 0x9d7   : > { %v4256_v38 = vpop.f32.mrf.mxu1 }
 0x9d8   : > { %v4269_v9 = vadd.f32 %v4256_v38, %v4126_v61  ;;  %v4399_v2 = vpop.f32.mrf.mxu0  ;;  %v4414_v5 = vadd.f32 %v7908_v57, %v4271_v34  ;;  %v8150_v34 = vld [vmem:[%s9918_s10 + $0x70] ss:$8 sps:$4 sm:$0xff]  }
 0x9d9   : > { %v7915_v15 = vpop.f32.mrf.mxu1 }
 0x9da   : > { %v4412_v12 = vadd.f32 %v4399_v2, %v4269_v9  ;;  %v8158_v9 = vld [vmem:[%s9918_s10 + $0x54] ss:$8 sps:$4 sm:$0xff]   ;;  %v8183_v2 = vld [vmem:[%s9918_s10 + $0x140] ss:$8 sps:$4 sm:$0xff]  }
 0x9db   : > { %v4449_v18 = vpop.f32.mrf.mxu1 }
 0x9dd   : > { %v7916_v35 = vpop.f32.mrf.mxu1 }
 0x9de   : > { %v4465_v37 = vpack.c.bf16 %v7916_v35, %v7915_v15  ;;  %v8156_v15 = vld [vmem:[%s9918_s10 + $0x50] ss:$8 sps:$4 sm:$0xff]   ;;  %v8164_v35 = vld [vmem:[%s9918_s10 + $0x34] ss:$8 sps:$4 sm:$0xff]  }
 0x9df   : > { %v4452_v23 = vpop.f32.mrf.mxu1 }
 0x9e0   : > { %v4464_v36 = vpack.c.bf16 %v4452_v23, %v4449_v18  ;;  %v8159_v18 = vld [vmem:[%s9918_s10 + $0x40] ss:$8 sps:$4 sm:$0xff]   ;;  %v8162_v23 = vld [vmem:[%s9918_s10 + $0x30] ss:$8 sps:$4 sm:$0xff]  }
 0x9e2   : > { %7925 = vmatprep.mubr.msk.bf16.mxu1 %vm3422_vm7, %v4464_v36  ;;  %v8167_v36 = vld [vmem:[%s9918_s10 + $0x24] ss:$8 sps:$4 sm:$0xff]  }
 0x9e3   : > { %7926 = vmatmul.mubr.msk.bf16.vlgmr.msra.gmra.mxu1 %vm3422_vm7, %v4465_v37  ;;  %v8170_v37 = vld [vmem:[%s9918_s10 + $0x14] ss:$8 sps:$4 sm:$0xff]  }
 0x9e4   : > { %4794 = vmatpush1.bf16.msra.mxu1 %v8126_v58  ;;  %4825 = vmatprep.mubr.bf16.mxu1 %v8370_v1  ;;  %v8165_v58 = vld [vmem:[%s9918_s10 + $0x20] ss:$8 sps:$4 sm:$0xff]  }
 0x9e5   : > { %4795 = vmatprep.subr.bf16.mxu1 %v8131_v39  ;;  %v8168_v39 = vld [vmem:[%s9918_s10 + $0x10] ss:$8 sps:$4 sm:$0xff]  }
 0x9e8   : > { %4796 = vmatpush1.bf16.msra.mxu1 %v8129_v40  ;;  %v8173_v40 = vld [vmem:[%s9918_s10 + $0x4] ss:$8 sps:$4 sm:$0xff]  }
 0x9e9   : > { %4797 = vmatprep.subr.bf16.mxu1 %v8134_v41  ;;  %v8171_v41 = vld [vmem:[%s9918_s10] ss:$8 sps:$4 sm:$0xff]  }
 0x9ec   : > { %4798 = vmatpush1.bf16.msra.mxu1 %v8132_v43  ;;  %v8176_v43 = vld [vmem:[%s9918_s10 + $0x174] ss:$8 sps:$4 sm:$0xff]  }
 0x9ed   : > { %4799 = vmatprep.subr.bf16.mxu1 %v8137_v44 }
 0x9f0   : > { %4800 = vmatpush1.bf16.msra.mxu1 %v8135_v45 }
 0x9f1   : > { %4801 = vmatprep.subr.bf16.mxu1 %v8140_v49 }
 0x9f4   : > { %4802 = vmatpush1.bf16.msra.mxu1 %v8138_v51 }
 0x9f5   : > { %4803 = vmatprep.subr.bf16.mxu1 %v8143_v4  ;;  %v8174_v4 = vld [vmem:[%s9918_s10 + $0x170] ss:$8 sps:$4 sm:$0xff]  }
 0x9f8   : > { %4804 = vmatpush1.bf16.msra.mxu1 %v8141_v55 }
 0x9f9   : > { %4805 = vmatprep.subr.bf16.mxu1 %v8146_v6  ;;  %v8179_v6 = vld [vmem:[%s9918_s10 + $0x164] ss:$8 sps:$4 sm:$0xff]  }
 0x9fc   : > { %4806 = vmatpush1.bf16.msra.mxu1 %v8144_v7 }
 0x9fd   : > { %4807 = vmatprep.subr.bf16.mxu1 %v8149_v8 }
 0xa00   : > { %4808 = vmatpush1.bf16.msra.mxu1 %v8147_v56  ;;  %v8177_v56 = vld [vmem:[%s9918_s10 + $0x160] ss:$8 sps:$4 sm:$0xff]  }
 0xaa3   : > { %v7927_v62 = vpop.f32.mrf.mxu1 }
 0xaa4   : > { %v4556_v0 = vadd.f32 %v7927_v62, %v4413_v59  ;;  %v8180_v59 = vld [vmem:[%s9918_s10 + $0x150] ss:$8 sps:$4 sm:$0xff]  }
 0xaa5   : > { %v4539_v61 = vpop.f32.mrf.mxu1 }
 0xaa6   : > { %v4554_v19 = vadd.f32 %v4539_v61, %v4411_v63  ;;  %v4566_v53 = vadd.f32 %v6923_v3, %v4556_v0  ;;  %v8185_v0 = vld [vmem:[%s9918_s10 + $0x144] ss:$8 sps:$4 sm:$0xff]   ;;  %v8186_v61 = vld [vmem:[%s9918_s10 + $0x130] ss:$8 sps:$4 sm:$0xff]  }
 0xaa7   : > { %v7928_v20 = vpop.f32.mrf.mxu1 }
 0xaa8   : > { %v4557_v26 = vadd.f32 %v7928_v20, %v4414_v5  ;;  %v4564_v47 = vadd.f32 %v6923_v3, %v4554_v19  ;;  %v4570_v28 = vmax.f32 %v4566_v53, 0.0  ;;  %v8191_v19 = vld [vmem:[%s9918_s10 + $0x124] ss:$8 sps:$4 sm:$0xff]   ;;  %v8189_v20 = vld [vmem:[%s9918_s10 + $0x120] ss:$8 sps:$4 sm:$0xff]  }
 0xaa9   : > { %v4542_v54 = vpop.f32.mrf.mxu1  ;;  %v8194_v53 = vld [vmem:[%s9918_s10 + $0x114] ss:$8 sps:$4 sm:$0xff]  }
 0xaaa   : > { %v4567_v27 = vadd.f32 %v6923_v3, %v4557_v26  ;;  %v4555_v48 = vadd.f32 %v4542_v54, %v4412_v12  ;;  %v4568_v31 = vmax.f32 %v4564_v47, 0.0  ;;  %v8356_v12 = vld [vmem:[%s9911_s3 + $0x20] sm:$0xff]   ;;  %v8192_v26 = vld [vmem:[%s9918_s10 + $0x110] ss:$8 sps:$4 sm:$0xff]   ;;  %v8357_v47 = vld [vmem:[%s9911_s3 + $0x28] sm:$0x1f]  }
 0xaab   : > { %v8197_v54 = vld [vmem:[%s9918_s10 + $0x104] ss:$8 sps:$4 sm:$0xff]  }
 0xaac   : > { %v4571_v30 = vmax.f32 %v4567_v27, 0.0  ;;  %v4565_v13 = vadd.f32 %v6923_v3, %v4555_v48  ;;  %v8188_v3 = vld [vmem:[%s9918_s10 + $0x134] ss:$8 sps:$4 sm:$0xff]   ;;  %v8195_v27 = vld [vmem:[%s9918_s10 + $0x100] ss:$8 sps:$4 sm:$0xff]  }
 0xaad   : > { %v8200_v48 = vld [vmem:[%s9918_s10 + $0x1f4] ss:$8 sps:$4 sm:$0xff]  }
 0xaae   : > { %v4573_v21 = vpack.c.bf16 %v4571_v30, %v4570_v28  ;;  %v4569_v14 = vmax.f32 %v4565_v13, 0.0  ;;  %v8358_v28 = vld [vmem:[%s9911_s3 + $0x30] sm:$0xff]   ;;  %v8203_v13 = vld [vmem:[%s9918_s10 + $0x1e4] ss:$8 sps:$4 sm:$0xff]  }
 0xaaf   : > { %v8198_v30 = vld [vmem:[%s9918_s10 + $0x1f0] ss:$8 sps:$4 sm:$0xff]  }
 0xab0   : > { %v9329_v33 = vand.u32 %v4573_v21, %v8619_v46  ;;  %v9331_v38 = vpack.c.bf16 %v4569_v14, %v4568_v31  ;;  %v8152_v46 = vld [vmem:[%s9918_s10 + $0x74] ss:$8 sps:$4 sm:$0xff]   ;;  %v8201_v21 = vld [vmem:[%s9918_s10 + $0x1e0] ss:$8 sps:$4 sm:$0xff]  }
 0xab1   : > { %v8359_v31 = vld [vmem:[%s9911_s3 + $0x38] sm:$0x1f]  }
 0xab2   : > { %7929 = vmatprep.subr.bf16.mxu0 %v9329_v33  ;;  %7945 = vmatprep.subr.bf16.mxu1 %v9329_v33  ;;  %v8206_v14 = vld [vmem:[%s9918_s10 + $0x1d4] ss:$8 sps:$4 sm:$0xff]  }
 0xab3   : > { %7930 = vmatpush3.bf16.msra.mxu0 %v9329_v33 }
 0xab4   : > { %7931 = vmatprep.subr.bf16.mxu0 %v9331_v38 }
 0xab7   : > { %7932 = vmatpush3.bf16.msra.mxu0 %v9331_v38 }
 0xab8   : > { %7937 = vmatprep.subr.bf16.mxu0 %v9329_v33 }
 0xaba   : > { %7934 = vmatmul.mubr.msk.bf16.vlgmr.msra.gmra.mxu0 %vm859_vm2, %v9030_v50  ;;  %v8155_v50 = vld [vmem:[%s9918_s10 + $0x64] ss:$8 sps:$4 sm:$0xff]  }
 0xabb   : > { %7938 = vmatpush3.bf16.msra.mxu0 %v9329_v33  ;;  %7941 = vmatprep.mubr.msk.bf16.mxu0 %vm859_vm2, %v8996_v11  ;;  %v8153_v11 = vld [vmem:[%s9918_s10 + $0x60] ss:$8 sps:$4 sm:$0xff]  }
 0xabc   : > { %7939 = vmatprep.subr.bf16.mxu0 %v9331_v38 }
 0xabf   : > { %7940 = vmatpush3.bf16.msra.mxu0 %v9331_v38 }
 0xac0   : > { %4926 = vmatprep.subr.bf16.mxu0 %v8152_v46  ;;  %v8204_v46 = vld [vmem:[%s9918_s10 + $0x1d0] ss:$8 sps:$4 sm:$0xff]  }
 0xac2   : > { %7942 = vmatmul.mubr.msk.bf16.vlgmr.msra.gmra.mxu0 %vm859_vm2, %v9037_v52  ;;  %v8161_v52 = vld [vmem:[%s9918_s10 + $0x44] ss:$8 sps:$4 sm:$0xff]  }
 0xac3   : > { %4927 = vmatpush1.bf16.msra.mxu0 %v8150_v34  ;;  %4958 = vmatprep.mubr.bf16.mxu0 %v8370_v1  ;;  %v8209_v34 = vld [vmem:[%s9918_s10 + $0x1c4] ss:$8 sps:$4 sm:$0xff]  }
 0xac4   : > { %4928 = vmatprep.subr.bf16.mxu0 %v8155_v50  ;;  %v8207_v50 = vld [vmem:[%s9918_s10 + $0x1c0] ss:$8 sps:$4 sm:$0xff]  }
 0xac7   : > { %4929 = vmatpush1.bf16.msra.mxu0 %v8153_v11  ;;  %v8212_v11 = vld [vmem:[%s9918_s10 + $0x1b4] ss:$8 sps:$4 sm:$0xff]  }
 0xac8   : > { %4930 = vmatprep.subr.bf16.mxu0 %v8158_v9  ;;  %v8210_v9 = vld [vmem:[%s9918_s10 + $0x1b0] ss:$8 sps:$4 sm:$0xff]  }
 0xacb   : > { %4931 = vmatpush1.bf16.msra.mxu0 %v8156_v15  ;;  %v8215_v15 = vld [vmem:[%s9918_s10 + $0x1a4] ss:$8 sps:$4 sm:$0xff]  }
 0xacc   : > { %4932 = vmatprep.subr.bf16.mxu0 %v8161_v52  ;;  %v8213_v52 = vld [vmem:[%s9918_s10 + $0x1a0] ss:$8 sps:$4 sm:$0xff]  }
 0xacf   : > { %4933 = vmatpush1.bf16.msra.mxu0 %v8159_v18  ;;  %v8218_v18 = vld [vmem:[%s9918_s10 + $0x194] ss:$8 sps:$4 sm:$0xff]  }
 0xad0   : > { %4934 = vmatprep.subr.bf16.mxu0 %v8164_v35  ;;  %v8216_v35 = vld [vmem:[%s9918_s10 + $0x190] ss:$8 sps:$4 sm:$0xff]  }
 0xad3   : > { %4935 = vmatpush1.bf16.msra.mxu0 %v8162_v23  ;;  %v8221_v23 = vld [vmem:[%s9918_s10 + $0x184] ss:$8 sps:$4 sm:$0xff]  }
 0xad4   : > { %4936 = vmatprep.subr.bf16.mxu0 %v8167_v36  ;;  %v8219_v36 = vld [vmem:[%s9918_s10 + $0x180] ss:$8 sps:$4 sm:$0xff]  }
 0xad7   : > { %4937 = vmatpush1.bf16.msra.mxu0 %v8165_v58 }
 0xad8   : > { %4938 = vmatprep.subr.bf16.mxu0 %v8170_v37 }
 0xadb   : > { %4939 = vmatpush1.bf16.msra.mxu0 %v8168_v39 }
 0xadc   : > { %4940 = vmatprep.subr.bf16.mxu0 %v8173_v40 }
 0xadf   : > { %4941 = vmatpush1.bf16.msra.mxu0 %v8171_v41 }
 0xae0   : > { %5127 = vmatprep.subr.bf16.mxu0 %v8176_v43 }
 0xb7a   : > { %v7935_v44 = vpop.f32.mrf.mxu0 }
 0xb7c   : > { %v4612_v45 = vpop.f32.mrf.mxu0 }
 0xb7e   : > { %v7936_v49 = vpop.f32.mrf.mxu0 }
 0xb7f   : > { %v4628_v62 = vpack.c.bf16 %v7936_v49, %v7935_v44 }
 0xb80   : > { %v4615_v51 = vpop.f32.mrf.mxu0 }
 0xb81   : > { %v4627_v55 = vpack.c.bf16 %v4615_v51, %v4612_v45 }
 0xb82   : > { %v7943_v7 = vpop.f32.mrf.mxu0 }
 0xb83   : > { %4959 = vmatmul.mubr.bf16.vlgmr.msra.gmra.mxu0 %v4627_v55 }
 0xb84   : > { %5128 = vmatpush1.bf16.msra.mxu0 %v8174_v4  ;;  %v4679_v8 = vpop.f32.mrf.mxu0  ;;  %4968 = vmatprep.mubr.bf16.mxu0 %v8370_v1 }
 0xb85   : > { %5129 = vmatprep.subr.bf16.mxu0 %v8179_v6 }
 0xb86   : > { %v7944_v29 = vpop.f32.mrf.mxu0 }
 0xb87   : > { %v4695_v5 = vpack.c.bf16 %v7944_v29, %v7943_v7 }
 0xb88   : > { %5130 = vmatpush1.bf16.msra.mxu0 %v8177_v56  ;;  %v4682_v57 = vpop.f32.mrf.mxu0 }
 0xb89   : > { %v4694_v63 = vpack.c.bf16 %v4682_v57, %v4679_v8  ;;  %5131 = vmatprep.subr.bf16.mxu0 %v8182_v60 }
 0xb8b   : > { %4826 = vmatmul.mubr.bf16.vlgmr.msra.gmra.mxu1 %v4694_v63  ;;  %4969 = vmatmul.mubr.bf16.gmra.mxu0 %v4628_v62 }
 0xb8c   : > { %7946 = vmatpush3.bf16.msra.mxu1 %v9329_v33  ;;  %5132 = vmatpush1.bf16.msra.mxu0 %v8180_v59 }
 0xb8d   : > { %7947 = vmatprep.subr.bf16.mxu1 %v9331_v38  ;;  %5133 = vmatprep.subr.bf16.mxu0 %v8185_v0 }
 0xb8e   : > { %4835 = vmatprep.mubr.bf16.mxu1 %v8370_v1  ;;  %5159 = vmatprep.mubr.bf16.mxu0 %v8370_v1 }
 0xb90   : > { %7948 = vmatpush3.bf16.msra.mxu1 %v9331_v38  ;;  %5134 = vmatpush1.bf16.msra.mxu0 %v8183_v2 }
 0xb91   : > { %7953 = vmatprep.subr.bf16.mxu1 %v9329_v33  ;;  %5135 = vmatprep.subr.bf16.mxu0 %v8188_v3 }
 0xb93   : > { %4836 = vmatmul.mubr.bf16.gmra.mxu1 %v4695_v5 }
 0xb94   : > { %5136 = vmatpush1.bf16.msra.mxu0 %v8186_v61  ;;  %7949 = vmatprep.mubr.msk.bf16.mxu1 %vm859_vm2, %v8356_v12  ;;  %v8224_v12 = vld [vmem:[%s9918_s10 + $0x274] ss:$8 sps:$4 sm:$0xff]  }
 0xb95   : > { %5137 = vmatprep.subr.bf16.mxu0 %v8191_v19 }
 0xb98   : > { %5138 = vmatpush1.bf16.msra.mxu0 %v8189_v20 }
 0xb99   : > { %5139 = vmatprep.subr.bf16.mxu0 %v8194_v53 }
 0xb9b   : > { %7950 = vmatmul.mubr.msk.bf16.vlgmr.msra.gmra.mxu1 %vm859_vm2, %v8357_v47 }
 0xb9c   : > { %5140 = vmatpush1.bf16.msra.mxu0 %v8192_v26  ;;  %7954 = vmatpush3.bf16.msra.mxu1 %v9329_v33 }
 0xb9d   : > { %7955 = vmatprep.subr.bf16.mxu1 %v9331_v38  ;;  %5141 = vmatprep.subr.bf16.mxu0 %v8197_v54 }
 0xb9e   : > { %7957 = vmatprep.mubr.msk.bf16.mxu1 %vm859_vm2, %v8358_v28  ;;  %v8222_v28 = vld [vmem:[%s9918_s10 + $0x270] ss:$8 sps:$4 sm:$0xff]  }
 0xba0   : > { %5142 = vmatpush1.bf16.msra.mxu0 %v8195_v27  ;;  %7956 = vmatpush3.bf16.msra.mxu1 %v9331_v38  ;;  %v8233_v27 = vld [vmem:[%s9918_s10 + $0x2f4] ss:$8 sps:$4 sm:$0xff]  }
 0xba1   : > { %7961 = vmatprep.subr.bf16.mxu0 %v9329_v33  ;;  %5336 = vmatprep.subr.bf16.mxu1 %v8200_v48 }
 0xba3   : > { %7958 = vmatmul.mubr.msk.bf16.vlgmr.msra.gmra.mxu1 %vm859_vm2, %v8359_v31  ;;  %v8231_v31 = vld [vmem:[%s9918_s10 + $0x2f0] ss:$8 sps:$4 sm:$0xff]  }
 0xba4   : > { %5337 = vmatpush1.bf16.msra.mxu1 %v8198_v30  ;;  %5368 = vmatprep.mubr.bf16.mxu1 %v8370_v1  ;;  %v8227_v30 = vld [vmem:[%s9918_s10 + $0x264] ss:$8 sps:$4 sm:$0xff]  }
 0xba5   : > { %5338 = vmatprep.subr.bf16.mxu1 %v8203_v13  ;;  %v8230_v13 = vld [vmem:[%s9918_s10 + $0x254] ss:$8 sps:$4 sm:$0xff]  }
 0xba8   : > { %5339 = vmatpush1.bf16.msra.mxu1 %v8201_v21  ;;  %v8239_v21 = vld [vmem:[%s9918_s10 + $0x2e4] ss:$8 sps:$4 sm:$0xff]  }
 0xba9   : > { %5340 = vmatprep.subr.bf16.mxu1 %v8206_v14  ;;  %v8234_v14 = vld [vmem:[%s9918_s10 + $0x240] ss:$8 sps:$4 sm:$0xff]  }
 0xbac   : > { %5341 = vmatpush1.bf16.msra.mxu1 %v8204_v46  ;;  %v8237_v46 = vld [vmem:[%s9918_s10 + $0x2e0] ss:$8 sps:$4 sm:$0xff]  }
 0xbad   : > { %5342 = vmatprep.subr.bf16.mxu1 %v8209_v34  ;;  %v8242_v34 = vld [vmem:[%s9918_s10 + $0x234] ss:$8 sps:$4 sm:$0xff]  }
 0xbb0   : > { %5343 = vmatpush1.bf16.msra.mxu1 %v8207_v50  ;;  %v8240_v50 = vld [vmem:[%s9918_s10 + $0x230] ss:$8 sps:$4 sm:$0xff]  }
 0xbb1   : > { %5344 = vmatprep.subr.bf16.mxu1 %v8212_v11  ;;  %v8243_v11 = vld [vmem:[%s9918_s10 + $0x2d0] ss:$8 sps:$4 sm:$0xff]  }
 0xbb4   : > { %5345 = vmatpush1.bf16.msra.mxu1 %v8210_v9  ;;  %v8248_v9 = vld [vmem:[%s9918_s10 + $0x224] ss:$8 sps:$4 sm:$0xff]  }
 0xbb5   : > { %5346 = vmatprep.subr.bf16.mxu1 %v8215_v15  ;;  %v8251_v15 = vld [vmem:[%s9918_s10 + $0x2c4] ss:$8 sps:$4 sm:$0xff]  }
 0xbb8   : > { %5347 = vmatpush1.bf16.msra.mxu1 %v8213_v52  ;;  %v8246_v52 = vld [vmem:[%s9918_s10 + $0x220] ss:$8 sps:$4 sm:$0xff]  }
 0xbb9   : > { %5348 = vmatprep.subr.bf16.mxu1 %v8218_v18  ;;  %v8249_v18 = vld [vmem:[%s9918_s10 + $0x2c0] ss:$8 sps:$4 sm:$0xff]  }
 0xbbc   : > { %5349 = vmatpush1.bf16.msra.mxu1 %v8216_v35  ;;  %v8254_v35 = vld [vmem:[%s9918_s10 + $0x214] ss:$8 sps:$4 sm:$0xff]  }
 0xbbd   : > { %5350 = vmatprep.subr.bf16.mxu1 %v8221_v23  ;;  %v8257_v23 = vld [vmem:[%s9918_s10 + $0x2b4] ss:$8 sps:$4 sm:$0xff]  }
 0xbc0   : > { %5351 = vmatpush1.bf16.msra.mxu1 %v8219_v36  ;;  %v8252_v36 = vld [vmem:[%s9918_s10 + $0x210] ss:$8 sps:$4 sm:$0xff]  }
 0xbc1   : > { %7969 = vmatprep.subr.bf16.mxu1 %v9329_v33 }
 0xc43   : > { %v4960_v58 = vpop.f32.mrf.mxu0 }
 0xc45   : > { %v4962_v37 = vpop.f32.mrf.mxu0 }
 0xc47   : > { %v4964_v39 = vpop.f32.mrf.mxu0 }
 0xc49   : > { %v4966_v40 = vpop.f32.mrf.mxu0 }
 0xc4b   : > { %v4827_v41 = vpop.f32.mrf.mxu1  ;;  %v4970_v49 = vpop.f32.mrf.mxu0 }
 0xc4c   : > { %v9522_v43 = vadd.f32 %v4960_v58, %v4827_v41  ;;  %v8255_v58 = vld [vmem:[%s9918_s10 + $0x2b0] ss:$8 sps:$4 sm:$0xff]   ;;  %v8261_v41 = vld [vmem:[%s9918_s10 + $0x2a0] ss:$8 sps:$4 sm:$0xff]  }
 0xc4d   : > { %v4829_v44 = vpop.f32.mrf.mxu1  ;;  %v4972_v7 = vpop.f32.mrf.mxu0 }
 0xc4e   : > { %v9524_v45 = vadd.f32 %v4962_v37, %v4829_v44  ;;  %v8260_v37 = vld [vmem:[%s9918_s10 + $0x204] ss:$8 sps:$4 sm:$0xff]   ;;  %v8266_v44 = vld [vmem:[%s9918_s10 + $0x294] ss:$8 sps:$4 sm:$0xff]  }
 0xc4f   : > { %v4831_v51 = vpop.f32.mrf.mxu1  ;;  %v4974_v57 = vpop.f32.mrf.mxu0 }
 0xc50   : > { %v9526_v4 = vadd.f32 %v4964_v39, %v4831_v51  ;;  %v8263_v39 = vld [vmem:[%s9918_s10 + $0x2a4] ss:$8 sps:$4 sm:$0xff]  }
 0xc51   : > { %v4833_v55 = vpop.f32.mrf.mxu1  ;;  %v8269_v51 = vld [vmem:[%s9918_s10 + $0x284] ss:$8 sps:$4 sm:$0xff]  }
 0xc52   : > { %v9528_v6 = vadd.f32 %v4966_v40, %v4833_v55  ;;  %v8258_v40 = vld [vmem:[%s9918_s10 + $0x200] ss:$8 sps:$4 sm:$0xff]  }
 0xc53   : > { %v4837_v8 = vpop.f32.mrf.mxu1  ;;  %v8267_v55 = vld [vmem:[%s9918_s10 + $0x280] ss:$8 sps:$4 sm:$0xff]  }
 0xc54   : > { %v9530_v56 = vadd.f32 %v4970_v49, %v4837_v8  ;;  %v8264_v49 = vld [vmem:[%s9918_s10 + $0x290] ss:$8 sps:$4 sm:$0xff]  }
 0xc55   : > { %v4839_v60 = vpop.f32.mrf.mxu1 }
 0xc56   : > { %v9532_v29 = vadd.f32 %v4972_v7, %v4839_v60  ;;  %v4976_v7 = vpop.f32.mrf.mxu0 }
 0xc57   : > { %v4841_v59 = vpop.f32.mrf.mxu1 }
 0xc58   : > { %v9534_v62 = vadd.f32 %v4974_v57, %v4841_v59 }
 0xc59   : > { %v9536_v63 = vpop.f32.mrf.mxu1 }
 0xc5b   : > { %v7951_v0 = vpop.f32.mrf.mxu1 }
 0xc5d   : > { %v5013_v2 = vpop.f32.mrf.mxu1 }
 0xc5f   : > { %v7952_v3 = vpop.f32.mrf.mxu1 }
 0xc60   : > { %v5029_v54 = vpack.c.bf16 %v7952_v3, %v7951_v0 }
 0xc61   : > { %v5016_v61 = vpop.f32.mrf.mxu1 }
 0xc62   : > { %v5028_v5 = vpack.c.bf16 %v5016_v61, %v5013_v2 }
 0xc63   : > { %v7959_v19 = vpop.f32.mrf.mxu1 }
 0xc64   : > { %5160 = vmatmul.mubr.bf16.vlgmr.msra.gmra.mxu0 %v5028_v5 }
 0xc65   : > { %7962 = vmatpush3.bf16.msra.mxu0 %v9329_v33  ;;  %v5222_v20 = vpop.f32.mrf.mxu1  ;;  %5169 = vmatprep.mubr.bf16.mxu0 %v8370_v1 }
 0xc66   : > { %7963 = vmatprep.subr.bf16.mxu0 %v9331_v38 }
 0xc67   : > { %v7960_v53 = vpop.f32.mrf.mxu1 }
 0xc68   : > { %v5238_v48 = vpack.c.bf16 %v7960_v53, %v7959_v19 }
 0xc69   : > { %7964 = vmatpush3.bf16.msra.mxu0 %v9331_v38  ;;  %v5225_v26 = vpop.f32.mrf.mxu1 }
 0xc6a   : > { %v5237_v47 = vpack.c.bf16 %v5225_v26, %v5222_v20  ;;  %5545 = vmatprep.subr.bf16.mxu0 %v8224_v12 }
 0xc6c   : > { %5170 = vmatmul.mubr.bf16.gmra.mxu0 %v5029_v54  ;;  %5369 = vmatmul.mubr.bf16.vlgmr.msra.gmra.mxu1 %v5237_v47 }
 0xc6d   : > { %7970 = vmatpush3.bf16.msra.mxu1 %v9329_v33  ;;  %5378 = vmatprep.mubr.bf16.mxu1 %v8370_v1 }
 0xc6e   : > { %7971 = vmatprep.subr.bf16.mxu1 %v9331_v38  ;;  %7965 = vmatprep.mubr.msk.bf16.mxu0 %vm859_vm2, %v9145_v42  ;;  %v8225_v42 = vld [vmem:[%s9918_s10 + $0x260] ss:$8 sps:$4 sm:$0xff]  }
 0xc71   : > { %7972 = vmatpush3.bf16.msra.mxu1 %v9331_v38 }
 0xc72   : > { %5754 = vmatprep.subr.bf16.mxu1 %v8233_v27  ;;  %v4977_v27 = vadd.f32 %v4976_v7, %v9536_v63  ;;  %v8291_v7 = vld [vmem:[%s9918_s10 + $0x300] ss:$8 sps:$4 sm:$0xff]  }
 0xc74   : > { %5379 = vmatmul.mubr.bf16.gmra.mxu1 %v5238_v48  ;;  %7966 = vmatmul.mubr.msk.bf16.vlgmr.msra.gmra.mxu0 %vm859_vm2, %v9157_v24  ;;  %v8228_v24 = vld [vmem:[%s9918_s10 + $0x250] ss:$8 sps:$4 sm:$0xff]  }
 0xc75   : > { %5546 = vmatpush1.bf16.msra.mxu0 %v8222_v28  ;;  %7973 = vmatprep.mubr.msk.bf16.mxu1 %vm859_vm2, %v9110_v10  ;;  %v8236_v10 = vld [vmem:[%s9918_s10 + $0x244] ss:$8 sps:$4 sm:$0xff]  }
 0xc76   : > { %5547 = vmatprep.subr.bf16.mxu0 %v8227_v30  ;;  %5577 = vmatprep.mubr.bf16.mxu0 %v8370_v1 }
 0xc79   : > { %5548 = vmatpush1.bf16.msra.mxu0 %v8225_v42 }
 0xc7a   : > { %5549 = vmatprep.subr.bf16.mxu0 %v8230_v13 }
 0xc7c   : > { %7974 = vmatmul.mubr.msk.bf16.vlgmr.msra.gmra.mxu1 %vm859_vm2, %v9125_v17  ;;  %v8245_v17 = vld [vmem:[%s9918_s10 + $0x2d4] ss:$8 sps:$4 sm:$0xff]  }
 0xc7d   : > { %5550 = vmatpush1.bf16.msra.mxu0 %v8228_v24  ;;  %5755 = vmatpush1.bf16.msra.mxu1 %v8231_v31 }
 0xc7e   : > { %5551 = vmatprep.subr.bf16.mxu0 %v8236_v10  ;;  %5756 = vmatprep.subr.bf16.mxu1 %v8239_v21 }
 0xc7f   : > { %5786 = vmatprep.mubr.bf16.mxu1 %v8370_v1 }
 0xc81   : > { %5552 = vmatpush1.bf16.msra.mxu0 %v8234_v14  ;;  %5757 = vmatpush1.bf16.msra.mxu1 %v8237_v46 }
 0xc82   : > { %5553 = vmatprep.subr.bf16.mxu0 %v8242_v34  ;;  %5758 = vmatprep.subr.bf16.mxu1 %v8245_v17 }
 0xc85   : > { %5554 = vmatpush1.bf16.msra.mxu0 %v8240_v50  ;;  %5759 = vmatpush1.bf16.msra.mxu1 %v8243_v11 }
 0xc86   : > { %5555 = vmatprep.subr.bf16.mxu0 %v8248_v9  ;;  %5760 = vmatprep.subr.bf16.mxu1 %v8251_v15  ;;  %v8272_v9 = vld [vmem:[%s9918_s10 + $0x374] ss:$8 sps:$4 sm:$0xff]  }
 0xc89   : > { %5556 = vmatpush1.bf16.msra.mxu0 %v8246_v52  ;;  %5761 = vmatpush1.bf16.msra.mxu1 %v8249_v18 }
 0xc8a   : > { %5557 = vmatprep.subr.bf16.mxu0 %v8254_v35  ;;  %5762 = vmatprep.subr.bf16.mxu1 %v8257_v23 }
 0xc8d   : > { %5558 = vmatpush1.bf16.msra.mxu0 %v8252_v36  ;;  %5763 = vmatpush1.bf16.msra.mxu1 %v8255_v58  ;;  %v8270_v36 = vld [vmem:[%s9918_s10 + $0x370] ss:$8 sps:$4 sm:$0xff]   ;;  %v8275_v58 = vld [vmem:[%s9918_s10 + $0x364] ss:$8 sps:$4 sm:$0xff]  }
 0xc8e   : > { %5559 = vmatprep.subr.bf16.mxu0 %v8260_v37  ;;  %5764 = vmatprep.subr.bf16.mxu1 %v8263_v39  ;;  %v8278_v37 = vld [vmem:[%s9918_s10 + $0x354] ss:$8 sps:$4 sm:$0xff]   ;;  %v8281_v39 = vld [vmem:[%s9918_s10 + $0x344] ss:$8 sps:$4 sm:$0xff]  }
 0xc91   : > { %5560 = vmatpush1.bf16.msra.mxu0 %v8258_v40  ;;  %5765 = vmatpush1.bf16.msra.mxu1 %v8261_v41  ;;  %v8284_v40 = vld [vmem:[%s9918_s10 + $0x334] ss:$8 sps:$4 sm:$0xff]   ;;  %v8282_v41 = vld [vmem:[%s9918_s10 + $0x330] ss:$8 sps:$4 sm:$0xff]  }
 0xc92   : > { %7977 = vmatprep.subr.bf16.mxu0 %v9329_v33  ;;  %5766 = vmatprep.subr.bf16.mxu1 %v8266_v44  ;;  %v8285_v44 = vld [vmem:[%s9918_s10 + $0x320] ss:$8 sps:$4 sm:$0xff]  }
 0xc95   : > { %5767 = vmatpush1.bf16.msra.mxu1 %v8264_v49  ;;  %v8290_v49 = vld [vmem:[%s9918_s10 + $0x314] ss:$8 sps:$4 sm:$0xff]  }
 0xc96   : > { %5768 = vmatprep.subr.bf16.mxu1 %v8269_v51  ;;  %v8288_v51 = vld [vmem:[%s9918_s10 + $0x310] ss:$8 sps:$4 sm:$0xff]  }
 0xc99   : > { %5769 = vmatpush1.bf16.msra.mxu1 %v8267_v55  ;;  %v8293_v55 = vld [vmem:[%s9918_s10 + $0x304] ss:$8 sps:$4 sm:$0xff]  }
 0xc9a   : > { %7985 = vmatprep.subr.bf16.mxu1 %v9329_v33 }
 0xd24   : > { %v5161_v8 = vpop.f32.mrf.mxu0 }
 0xd25   : > { %v5180_v60 = vadd.f32 %v5161_v8, %v9522_v43  ;;  %v8296_v8 = vld [vmem:[%s9918_s10 + $0x3f4] ss:$8 sps:$4 sm:$0xff]  }
 0xd26   : > { %v5163_v57 = vpop.f32.mrf.mxu0 }
 0xd27   : > { %v5181_v59 = vadd.f32 %v5163_v57, %v9524_v45  ;;  %v8299_v57 = vld [vmem:[%s9918_s10 + $0x3e4] ss:$8 sps:$4 sm:$0xff]  }
 0xd28   : > { %v5165_v0 = vpop.f32.mrf.mxu0 }
 0xd29   : > { %v5182_v2 = vadd.f32 %v5165_v0, %v9526_v4  ;;  %v8302_v0 = vld [vmem:[%s9918_s10 + $0x3d4] ss:$8 sps:$4 sm:$0xff]  }
 0xd2a   : > { %v5167_v3 = vpop.f32.mrf.mxu0 }
 0xd2b   : > { %v5183_v61 = vadd.f32 %v5167_v3, %v9528_v6  ;;  %v8305_v3 = vld [vmem:[%s9918_s10 + $0x3c4] ss:$8 sps:$4 sm:$0xff]  }
 0xd2c   : > { %v5171_v5 = vpop.f32.mrf.mxu0  ;;  %v5370_v19 = vpop.f32.mrf.mxu1 }
 0xd2d   : > { %v5184_v20 = vadd.f32 %v5171_v5, %v9530_v56  ;;  %v9659_v12 = vadd.f32 %v5370_v19, %v5180_v60  ;;  %v8294_v60 = vld [vmem:[%s9918_s10 + $0x3f0] ss:$8 sps:$4 sm:$0xff]   ;;  %v8308_v5 = vld [vmem:[%s9918_s10 + $0x3b4] ss:$8 sps:$4 sm:$0xff]  }
 0xd2e   : > { %v5173_v53 = vpop.f32.mrf.mxu0  ;;  %v5372_v26 = vpop.f32.mrf.mxu1  ;;  %v8306_v19 = vld [vmem:[%s9918_s10 + $0x3b0] ss:$8 sps:$4 sm:$0xff]  }
 0xd2f   : > { %v5185_v54 = vadd.f32 %v5173_v53, %v9532_v29  ;;  %v9662_v43 = vadd.f32 %v5372_v26, %v5181_v59  ;;  %v8297_v59 = vld [vmem:[%s9918_s10 + $0x3e0] ss:$8 sps:$4 sm:$0xff]   ;;  %v8314_v26 = vld [vmem:[%s9918_s10 + $0x394] ss:$8 sps:$4 sm:$0xff]  }
 0xd30   : > { %v5175_v47 = vpop.f32.mrf.mxu0  ;;  %v5374_v45 = vpop.f32.mrf.mxu1  ;;  %v8309_v53 = vld [vmem:[%s9918_s10 + $0x3a0] ss:$8 sps:$4 sm:$0xff]  }
 0xd31   : > { %v5186_v4 = vadd.f32 %v5175_v47, %v9534_v62  ;;  %v9666_v48 = vadd.f32 %v5374_v45, %v5182_v2  ;;  %v8300_v2 = vld [vmem:[%s9918_s10 + $0x3d0] ss:$8 sps:$4 sm:$0xff]   ;;  %v8317_v47 = vld [vmem:[%s9918_s10 + $0x384] ss:$8 sps:$4 sm:$0xff]   ;;  %v8315_v45 = vld [vmem:[%s9918_s10 + $0x380] ss:$8 sps:$4 sm:$0xff]  }
 0xd32   : > { %v5177_v6 = vpop.f32.mrf.mxu0  ;;  %v5376_v28 = vpop.f32.mrf.mxu1 }
 0xd33   : > { %v5187_v30 = vadd.f32 %v5177_v6, %v4977_v27  ;;  %v9668_v56 = vadd.f32 %v5376_v28, %v5183_v61  ;;  %v8303_v61 = vld [vmem:[%s9918_s10 + $0x3c0] ss:$8 sps:$4 sm:$0xff]  }
 0xd34   : > { %v5380_v42 = vpop.f32.mrf.mxu1  ;;  %v7967_v13 = vpop.f32.mrf.mxu0 }
 0xd35   : > { %v9670_v24 = vadd.f32 %v5380_v42, %v5184_v20  ;;  %v8311_v20 = vld [vmem:[%s9918_s10 + $0x3a4] ss:$8 sps:$4 sm:$0xff]  }
 0xd36   : > { %v5382_v29 = vpop.f32.mrf.mxu1  ;;  %v5431_v31 = vpop.f32.mrf.mxu0 }
 0xd37   : > { %v9672_v10 = vadd.f32 %v5382_v29, %v5185_v54  ;;  %v8312_v54 = vld [vmem:[%s9918_s10 + $0x390] ss:$8 sps:$4 sm:$0xff]  }
 0xd38   : > { %v5384_v21 = vpop.f32.mrf.mxu1  ;;  %v7968_v14 = vpop.f32.mrf.mxu0 }
 0xd39   : > { %v9674_v63 = vadd.f32 %v5384_v21, %v5186_v4  ;;  %v5447_v18 = vpack.c.bf16 %v7968_v14, %v7967_v13 }
 0xd3a   : > { %v5386_v62 = vpop.f32.mrf.mxu1  ;;  %v5434_v46 = vpop.f32.mrf.mxu0 }
 0xd3b   : > { %v9676_v34 = vadd.f32 %v5386_v62, %v5187_v30  ;;  %v5446_v17 = vpack.c.bf16 %v5434_v46, %v5431_v31 }
 0xd3c   : > { %v7975_v50 = vpop.f32.mrf.mxu1 }
 0xd3d   : > { %5578 = vmatmul.mubr.bf16.vlgmr.msra.gmra.mxu0 %v5446_v17 }
 0xd3e   : > { %7978 = vmatpush3.bf16.msra.mxu0 %v9329_v33  ;;  %v5640_v11 = vpop.f32.mrf.mxu1  ;;  %5587 = vmatprep.mubr.bf16.mxu0 %v8370_v1 }
 0xd3f   : > { %7979 = vmatprep.subr.bf16.mxu0 %v9331_v38 }
 0xd40   : > { %v7976_v15 = vpop.f32.mrf.mxu1 }
 0xd41   : > { %v5656_v23 = vpack.c.bf16 %v7976_v15, %v7975_v50 }
 0xd42   : > { %7980 = vmatpush3.bf16.msra.mxu0 %v9331_v38  ;;  %v5643_v52 = vpop.f32.mrf.mxu1 }
 0xd43   : > { %v5655_v35 = vpack.c.bf16 %v5643_v52, %v5640_v11  ;;  %5963 = vmatprep.subr.bf16.mxu0 %v8272_v9 }
 0xd45   : > { %5588 = vmatmul.mubr.bf16.gmra.mxu0 %v5447_v18  ;;  %5787 = vmatmul.mubr.bf16.vlgmr.msra.gmra.mxu1 %v5655_v35 }
 0xd46   : > { %7986 = vmatpush3.bf16.msra.mxu1 %v9329_v33  ;;  %5796 = vmatprep.mubr.bf16.mxu1 %v8370_v1 }
 0xd47   : > { %7987 = vmatprep.subr.bf16.mxu1 %v9331_v38  ;;  %7981 = vmatprep.mubr.msk.bf16.mxu0 %vm859_vm2, %v9201_v22  ;;  %v8273_v22 = vld [vmem:[%s9918_s10 + $0x360] ss:$8 sps:$4 sm:$0xff]  }
 0xd4a   : > { %7988 = vmatpush3.bf16.msra.mxu1 %v9331_v38 }
 0xd4b   : > { %6172 = vmatprep.subr.bf16.mxu1 %v8296_v8  ;;  %v8318_v8 = vld [vmem:[%s9918_s10 + $0x470] ss:$8 sps:$4 sm:$0xff]  }
 0xd4d   : > { %5797 = vmatmul.mubr.bf16.gmra.mxu1 %v5656_v23  ;;  %7982 = vmatmul.mubr.msk.bf16.vlgmr.msra.gmra.mxu0 %vm859_vm2, %v9216_v16  ;;  %v8276_v16 = vld [vmem:[%s9918_s10 + $0x350] ss:$8 sps:$4 sm:$0xff]  }
 0xd4e   : > { %5964 = vmatpush1.bf16.msra.mxu0 %v8270_v36  ;;  %7989 = vmatprep.mubr.msk.bf16.mxu1 %vm859_vm2, %v9174_v25  ;;  %v8279_v25 = vld [vmem:[%s9918_s10 + $0x340] ss:$8 sps:$4 sm:$0xff]  }
 0xd4f   : > { %5965 = vmatprep.subr.bf16.mxu0 %v8275_v58  ;;  %5995 = vmatprep.mubr.bf16.mxu0 %v8370_v1 }
 0xd52   : > { %5966 = vmatpush1.bf16.msra.mxu0 %v8273_v22 }
 0xd53   : > { %5967 = vmatprep.subr.bf16.mxu0 %v8278_v37 }
 0xd55   : > { %7990 = vmatmul.mubr.msk.bf16.vlgmr.msra.gmra.mxu1 %vm859_vm2, %v9191_v32  ;;  %v8287_v32 = vld [vmem:[%s9918_s10 + $0x324] ss:$8 sps:$4 sm:$0xff]  }
 0xd56   : > { %5968 = vmatpush1.bf16.msra.mxu0 %v8276_v16  ;;  %6204 = vmatprep.mubr.bf16.mxu1 %v8370_v1 }
 0xd57   : > { %5969 = vmatprep.subr.bf16.mxu0 %v8281_v39  ;;  %6173 = vmatpush1.bf16.msra.mxu1 %v8294_v60  ;;  %v8361_v60 = vld [vmem:[%s9911_s3 + $0x88] sm:$0x1f]  }
 0xd58   : > { %6174 = vmatprep.subr.bf16.mxu1 %v8299_v57  ;;  %v8321_v57 = vld [vmem:[%s9918_s10 + $0x460] ss:$8 sps:$4 sm:$0xff]  }
 0xd5a   : > { %5970 = vmatpush1.bf16.msra.mxu0 %v8279_v25 }
 0xd5b   : > { %5971 = vmatprep.subr.bf16.mxu0 %v8284_v40  ;;  %6175 = vmatpush1.bf16.msra.mxu1 %v8297_v59  ;;  %v8326_v59 = vld [vmem:[%s9918_s10 + $0x454] ss:$8 sps:$4 sm:$0xff]  }
 0xd5c   : > { %6176 = vmatprep.subr.bf16.mxu1 %v8302_v0  ;;  %v8324_v0 = vld [vmem:[%s9918_s10 + $0x450] ss:$8 sps:$4 sm:$0xff]  }
 0xd5e   : > { %5972 = vmatpush1.bf16.msra.mxu0 %v8282_v41 }
 0xd5f   : > { %5973 = vmatprep.subr.bf16.mxu0 %v8287_v32  ;;  %6177 = vmatpush1.bf16.msra.mxu1 %v8300_v2  ;;  %v8320_v32 = vld [vmem:[%s9918_s10 + $0x474] ss:$8 sps:$4 sm:$0xff]   ;;  %v8329_v2 = vld [vmem:[%s9918_s10 + $0x444] ss:$8 sps:$4 sm:$0xff]  }
 0xd60   : > { %6178 = vmatprep.subr.bf16.mxu1 %v8305_v3  ;;  %v8327_v3 = vld [vmem:[%s9918_s10 + $0x440] ss:$8 sps:$4 sm:$0xff]  }
 0xd62   : > { %5974 = vmatpush1.bf16.msra.mxu0 %v8285_v44 }
 0xd63   : > { %5975 = vmatprep.subr.bf16.mxu0 %v8290_v49  ;;  %6179 = vmatpush1.bf16.msra.mxu1 %v8303_v61  ;;  %v8332_v61 = vld [vmem:[%s9918_s10 + $0x434] ss:$8 sps:$4 sm:$0xff]  }
 0xd64   : > { %6180 = vmatprep.subr.bf16.mxu1 %v8308_v5  ;;  %v8330_v5 = vld [vmem:[%s9918_s10 + $0x430] ss:$8 sps:$4 sm:$0xff]  }
 0xd66   : > { %5976 = vmatpush1.bf16.msra.mxu0 %v8288_v51 }
 0xd67   : > { %5977 = vmatprep.subr.bf16.mxu0 %v8293_v55  ;;  %6181 = vmatpush1.bf16.msra.mxu1 %v8306_v19  ;;  %v8335_v19 = vld [vmem:[%s9918_s10 + $0x424] ss:$8 sps:$4 sm:$0xff]  }
 0xd68   : > { %6182 = vmatprep.subr.bf16.mxu1 %v8311_v20  ;;  %v8333_v20 = vld [vmem:[%s9918_s10 + $0x420] ss:$8 sps:$4 sm:$0xff]  }
 0xd6a   : > { %5978 = vmatpush1.bf16.msra.mxu0 %v8291_v7 }
 0xd6b   : > { %7993 = vmatprep.subr.bf16.mxu0 %v9329_v33  ;;  %6183 = vmatpush1.bf16.msra.mxu1 %v8309_v53  ;;  %v8338_v53 = vld [vmem:[%s9918_s10 + $0x414] ss:$8 sps:$4 sm:$0xff]  }
 0xd6c   : > { %6184 = vmatprep.subr.bf16.mxu1 %v8314_v26  ;;  %v8336_v26 = vld [vmem:[%s9918_s10 + $0x410] ss:$8 sps:$4 sm:$0xff]  }
 0xd6f   : > { %6185 = vmatpush1.bf16.msra.mxu1 %v8312_v54  ;;  %v8341_v54 = vld [vmem:[%s9918_s10 + $0x404] ss:$8 sps:$4 sm:$0xff]  }
 0xd70   : > { %6186 = vmatprep.subr.bf16.mxu1 %v8317_v47  ;;  %v8339_v47 = vld [vmem:[%s9918_s10 + $0x400] ss:$8 sps:$4 sm:$0xff]  }
 0xd73   : > { %6187 = vmatpush1.bf16.msra.mxu1 %v8315_v45 }
 0xdfd   : > { %v5579_v27 = vpop.f32.mrf.mxu0 }
 0xdfe   : > { %v5598_v4 = vadd.f32 %v5579_v27, %v9659_v12 }
 0xdff   : > { %v5581_v6 = vpop.f32.mrf.mxu0 }
 0xe00   : > { %v5599_v28 = vadd.f32 %v5581_v6, %v9662_v43 }
 0xe01   : > { %v5583_v30 = vpop.f32.mrf.mxu0 }
 0xe02   : > { %v5600_v42 = vadd.f32 %v5583_v30, %v9666_v48 }
 0xe03   : > { %v5585_v13 = vpop.f32.mrf.mxu0 }
 0xe04   : > { %v5601_v29 = vadd.f32 %v5585_v13, %v9668_v56 }
 0xe05   : > { %v5589_v31 = vpop.f32.mrf.mxu0  ;;  %v5788_v21 = vpop.f32.mrf.mxu1 }
 0xe06   : > { %v5602_v14 = vadd.f32 %v5589_v31, %v9670_v24  ;;  %v9798_v62 = vadd.f32 %v5788_v21, %v5598_v4 }
 0xe07   : > { %v5591_v46 = vpop.f32.mrf.mxu0  ;;  %v5790_v17 = vpop.f32.mrf.mxu1 }
 0xe08   : > { %v5603_v50 = vadd.f32 %v5591_v46, %v9672_v10  ;;  %v9801_v12 = vadd.f32 %v5790_v17, %v5599_v28 }
 0xe09   : > { %v5593_v11 = vpop.f32.mrf.mxu0  ;;  %v5792_v43 = vpop.f32.mrf.mxu1 }
 0xe0a   : > { %v5604_v9 = vadd.f32 %v5593_v11, %v9674_v63  ;;  %v9804_v48 = vadd.f32 %v5792_v43, %v5600_v42 }
 0xe0b   : > { %v5595_v15 = vpop.f32.mrf.mxu0  ;;  %v5794_v56 = vpop.f32.mrf.mxu1 }
 0xe0c   : > { %v5605_v52 = vadd.f32 %v5595_v15, %v9676_v34  ;;  %v9807_v18 = vadd.f32 %v5794_v56, %v5601_v29 }
 0xe0d   : > { %v5798_v24 = vpop.f32.mrf.mxu1  ;;  %v7983_v35 = vpop.f32.mrf.mxu0 }
 0xe0e   : > { %v9809_v23 = vadd.f32 %v5798_v24, %v5602_v14 }
 0xe0f   : > { %v5800_v36 = vpop.f32.mrf.mxu1  ;;  %v5849_v10 = vpop.f32.mrf.mxu0 }
 0xe10   : > { %v9811_v58 = vadd.f32 %v5800_v36, %v5603_v50 }
 0xe11   : > { %v5802_v22 = vpop.f32.mrf.mxu1  ;;  %v7984_v37 = vpop.f32.mrf.mxu0 }
 0xe12   : > { %v9813_v16 = vadd.f32 %v5802_v22, %v5604_v9  ;;  %v5865_v51 = vpack.c.bf16 %v7984_v37, %v7983_v35 }
 0xe13   : > { %v5804_v63 = vpop.f32.mrf.mxu1  ;;  %v5852_v39 = vpop.f32.mrf.mxu0 }
 0xe14   : > { %v9815_v25 = vadd.f32 %v5804_v63, %v5605_v52  ;;  %v5864_v40 = vpack.c.bf16 %v5852_v39, %v5849_v10  ;;  %v4574_v10 = vld [vmem:[%s9919_s11] sm:$0x3] }
 0xe15   : > { %v7991_v34 = vpop.f32.mrf.mxu1 }
 0xe16   : > { %5996 = vmatmul.mubr.bf16.vlgmr.msra.gmra.mxu0 %v5864_v40 }
 0xe17   : > { %7994 = vmatpush3.bf16.msra.mxu0 %v9329_v33  ;;  %v6058_v41 = vpop.f32.mrf.mxu1  ;;  %6005 = vmatprep.mubr.bf16.mxu0 %v8370_v1  ;;  %v8360_v33 = vld [vmem:[%s9911_s3 + $0x80] sm:$0xff]  }
 0xe18   : > { %7995 = vmatprep.subr.bf16.mxu0 %v9331_v38 }
 0xe19   : > { %v7992_v44 = vpop.f32.mrf.mxu1 }
 0xe1a   : > { %v6074_v7 = vpack.c.bf16 %v7992_v44, %v7991_v34 }
 0xe1b   : > { %7996 = vmatpush3.bf16.msra.mxu0 %v9331_v38  ;;  %v6061_v49 = vpop.f32.mrf.mxu1  ;;  %v8323_v38 = vld [vmem:[%s9918_s10 + $0x464] ss:$8 sps:$4 sm:$0xff]  }
 0xe1c   : > { %v6073_v55 = vpack.c.bf16 %v6061_v49, %v6058_v41  ;;  %6381 = vmatprep.subr.bf16.mxu0 %v8320_v32 }
 0xe1e   : > { %6006 = vmatmul.mubr.bf16.gmra.mxu0 %v5865_v51  ;;  %6205 = vmatmul.mubr.bf16.vlgmr.msra.gmra.mxu1 %v6073_v55 }
 0xe1f   : > { %6214 = vmatprep.mubr.bf16.mxu1 %v8370_v1  ;;  %7997 = vmatprep.mubr.msk.bf16.mxu0 %vm859_vm2, %v8360_v33 }
 0xe26   : > { %6215 = vmatmul.mubr.bf16.gmra.mxu1 %v6074_v7  ;;  %7998 = vmatmul.mubr.msk.bf16.vlgmr.msra.gmra.mxu0 %vm859_vm2, %v8361_v60 }
 0xe27   : > { %6382 = vmatpush1.bf16.msra.mxu0 %v8318_v8  ;;  %6413 = vmatprep.mubr.bf16.mxu0 %v8370_v1 }
 0xe28   : > { %6383 = vmatprep.subr.bf16.mxu0 %v8323_v38 }
 0xe2b   : > { %6384 = vmatpush1.bf16.msra.mxu0 %v8321_v57 }
 0xe2c   : > { %6385 = vmatprep.subr.bf16.mxu0 %v8326_v59 }
 0xe2f   : > { %6386 = vmatpush1.bf16.msra.mxu0 %v8324_v0 }
 0xe30   : > { %6387 = vmatprep.subr.bf16.mxu0 %v8329_v2 }
 0xe33   : > { %6388 = vmatpush1.bf16.msra.mxu0 %v8327_v3 }
 0xe34   : > { %6389 = vmatprep.subr.bf16.mxu0 %v8332_v61 }
 0xe37   : > { %6390 = vmatpush1.bf16.msra.mxu0 %v8330_v5 }
 0xe38   : > { %6391 = vmatprep.subr.bf16.mxu0 %v8335_v19 }
 0xe3b   : > { %6392 = vmatpush1.bf16.msra.mxu0 %v8333_v20 }
 0xe3c   : > { %6393 = vmatprep.subr.bf16.mxu0 %v8338_v53 }
 0xe3f   : > { %6394 = vmatpush1.bf16.msra.mxu0 %v8336_v26 }
 0xe40   : > { %6395 = vmatprep.subr.bf16.mxu0 %v8341_v54 }
 0xe43   : > { %6396 = vmatpush1.bf16.msra.mxu0 %v8339_v47 }
 0xed6   : > { %v5997_v45 = vpop.f32.mrf.mxu0 }
 0xed7   : > { %v6016_v27 = vadd.f32 %v5997_v45, %v9798_v62 }
 0xed8   : > { %v5999_v4 = vpop.f32.mrf.mxu0 }
 0xed9   : > { %v6017_v6 = vadd.f32 %v5999_v4, %v9801_v12 }
 0xeda   : > { %v6001_v28 = vpop.f32.mrf.mxu0 }
 0xedb   : > { %v6018_v30 = vadd.f32 %v6001_v28, %v9804_v48 }
 0xedc   : > { %v6003_v42 = vpop.f32.mrf.mxu0 }
 0xedd   : > { %v6019_v13 = vadd.f32 %v6003_v42, %v9807_v18  ;;  %v6443_v18 = vlaneseq }
 0xede   : > { %v6007_v29 = vpop.f32.mrf.mxu0  ;;  %v6206_v56 = vpop.f32.mrf.mxu1 }
 0xedf   : > { %v6020_v31 = vadd.f32 %v6007_v29, %v9809_v23  ;;  %v6444_v35 = vshrl.u32 %v6443_v18, 7  ;;  %v6225_v37 = vadd.f32 %v6206_v56, %v6016_v27 }
 0xee0   : > { %v6009_v21 = vpop.f32.mrf.mxu0  ;;  %v6208_v52 = vpop.f32.mrf.mxu1 }
 0xee1   : > { %v6021_v14 = vadd.f32 %v6009_v21, %v9811_v58  ;;  %v6445_v36 = vsub.s32 0, %v6444_v35  ;;  %v6449_v58 = vsub.s32 1, %v6444_v35 }
 0xee2   : > { %v6011_v46 = vpop.f32.mrf.mxu0  ;;  %v6210_v24 = vpop.f32.mrf.mxu1 }
 0xee3   : > { %v6022_v17 = vadd.f32 %v6011_v46, %v9813_v16  ;;  %v6446_v16 = vrot.slane %v4574_v10, %v6445_v36  ;;  %v6227_v41 = vadd.f32 %v6210_v24, %v6018_v30 }
 0xee4   : > { %v6013_v50 = vpop.f32.mrf.mxu0  ;;  %v6212_v23 = vpop.f32.mrf.mxu1 }
 0xee5   : > { %v6023_v62 = vadd.f32 %v6013_v50, %v9815_v25  ;;  %v6450_v25 = vrot.slane %v4574_v10, %v6449_v58  ;;  %v6228_v51 = vadd.f32 %v6212_v23, %v6019_v13 }
 0xee6   : > { %v7999_v11 = vpop.f32.mrf.mxu0  ;;  %v6216_v22 = vpop.f32.mrf.mxu1 }
 0xee7   : > { %v6229_v60 = vadd.f32 %v6216_v22, %v6020_v31 }
 0xee8   : > { %v6267_v12 = vpop.f32.mrf.mxu0  ;;  %v6218_v40 = vpop.f32.mrf.mxu1 }
 0xee9   : > { %v6230_v3 = vadd.f32 %v6218_v40, %v6021_v14 }
 0xeea   : > { %v8000_v43 = vpop.f32.mrf.mxu0  ;;  %v6220_v8 = vpop.f32.mrf.mxu1 }
 0xeeb   : > { %v6283_v15 = vpack.c.bf16 %v8000_v43, %v7999_v11  ;;  %v6231_v26 = vadd.f32 %v6220_v8, %v6022_v17 }
 0xeec   : > { %v6270_v9 = vpop.f32.mrf.mxu0  ;;  %v6222_v20 = vpop.f32.mrf.mxu1 }
 0xeed   : > { %v6282_v48 = vpack.c.bf16 %v6270_v9, %v6267_v12  ;;  %v6232_v4 = vadd.f32 %v6222_v20, %v6023_v62 }
 0xeef   : > { %6414 = vmatmul.mubr.bf16.vlgmr.msra.gmra.mxu0 %v6282_v48 }
 0xef0   : > { %6423 = vmatprep.mubr.bf16.mxu0 %v8370_v1  ;;  %v6226_v1 = vadd.f32 %v6208_v52, %v6017_v6 }
 0xef7   : > { %6424 = vmatmul.mubr.bf16.gmra.mxu0 %v6283_v15 }
 0xfaf   : > { %v6415_v63 = vpop.f32.mrf.mxu0 }
 0xfb0   : > { %v6434_v39 = vadd.f32 %v6415_v63, %v6225_v37 }
 0xfb1   : > { %v6417_v34 = vpop.f32.mrf.mxu0 }
 0xfb2   : > { %v6453_v32 = vadd.f32 %v6446_v16, %v6434_v39  ;;  %v6435_v44 = vadd.f32 %v6417_v34, %v6226_v1 }
 0xfb3   : > { %v6419_v49 = vpop.f32.mrf.mxu0 }
 0xfb4   : > { %v6461_v55 = vmax.f32 %v6453_v32, 0.0  ;;  %v6454_v33 = vadd.f32 %v6450_v25, %v6435_v44  ;;  %v6436_v7 = vadd.f32 %v6419_v49, %v6227_v41 }
 0xfb5   : > { %v6421_v38 = vpop.f32.mrf.mxu0 }
 0xfb6   : > { %6469 = vst [vmem:[%s9895_s20] sm:$0xff] %v6461_v55  ;;  %v6462_v57 = vmax.f32 %v6454_v33, 0.0  ;;  %v6455_v59 = vadd.f32 %v6446_v16, %v6436_v7  ;;  %v6437_v0 = vadd.f32 %v6421_v38, %v6228_v51 }
 0xfb7   : > { %v6425_v2 = vpop.f32.mrf.mxu0 }
 0xfb8   : > { %6470 = vst [vmem:[%s9895_s20 + $0x8] sm:$0xff] %v6462_v57  ;;  %v6463_v61 = vmax.f32 %v6455_v59, 0.0  ;;  %v6456_v5 = vadd.f32 %v6450_v25, %v6437_v0  ;;  %v6438_v19 = vadd.f32 %v6425_v2, %v6229_v60 }
 0xfb9   : > { %v6427_v53 = vpop.f32.mrf.mxu0 }
 0xfba   : > { %6471 = vst [vmem:[%s9895_s20 + $0x10] sm:$0xff] %v6463_v61  ;;  %v6464_v54 = vmax.f32 %v6456_v5, 0.0  ;;  %v6457_v47 = vadd.f32 %v6446_v16, %v6438_v19  ;;  %v6439_v45 = vadd.f32 %v6427_v53, %v6230_v3 }
 0xfbb   : > { %v6429_v27 = vpop.f32.mrf.mxu0 }
 0xfbc   : > { %6472 = vst [vmem:[%s9895_s20 + $0x18] sm:$0xff] %v6464_v54  ;;  %v6465_v6 = vmax.f32 %v6457_v47, 0.0  ;;  %v6458_v28 = vadd.f32 %v6450_v25, %v6439_v45  ;;  %v6440_v30 = vadd.f32 %v6429_v27, %v6231_v26 }
 0xfbd   : > { %v6431_v42 = vpop.f32.mrf.mxu0 }
 0xfbe   : > { %6473 = vst [vmem:[%s9895_s20 + $0x20] sm:$0xff] %v6465_v6  ;;  %v6466_v13 = vmax.f32 %v6458_v28, 0.0  ;;  %v6459_v29 = vadd.f32 %v6446_v16, %v6440_v30  ;;  %v6441_v31 = vadd.f32 %v6431_v42, %v6232_v4 }
 0xfc0   : > { %6474 = vst [vmem:[%s9895_s20 + $0x28] sm:$0xff] %v6466_v13  ;;  %v6467_v21 = vmax.f32 %v6459_v29, 0.0  ;;  %v6460_v14 = vadd.f32 %v6450_v25, %v6441_v31 }
 0xfc2   : > { %6475 = vst [vmem:[%s9895_s20 + $0x30] sm:$0x1] %v6467_v21  ;;  %v6468_v46 = vmax.f32 %v6460_v14, 0.0 }
 0xfc4   : > { %6476 = vst [vmem:[%s9895_s20 + $0x38] sm:$0x1] %v6468_v46 }
 0xfc5 PF: > { %s22_s21 = sadd.s32 1, %s8368_s21  }
 0xfc6   : > { %p19_p4 = scmp.ge.s32.totalorder %s22_s21, 4  }
 0xfc8   :  { %21 = sbr.rel (!%p19_p4) target bundleno = 1 (0x1), region = 141 }

// kernel: lenet9_forward.5
= control target key start
LH: loop header
LB: loop body
LE: loop exit
PB: predicated region body
PF: predicated region fallthrough
CT: control target
= control target key end

     0   :  { %v853_v27 = vlaneseq  ;;  %v6317_v35 = vmov 1966171168   ;;  %s7737_s0 = inlined_call_operand.vmem [shape: bf16[2,6400], index: 0, kind: input, shape index: {}]   ;;  %s7738_s1 = inlined_call_operand.vmem [shape: bf16[6400,120], index: 1, kind: input, shape index: {}]   ;;  %s7739_s2 = inlined_call_operand.vmem [shape: f32[1,120], index: 2, kind: input, shape index: {}]   ;;  %s7740_s3 = inlined_call_operand.vmem [shape: bf16[120,84], index: 3, kind: input, shape index: {}]   ;;  %s7741_s4 = inlined_call_operand.vmem [shape: f32[1,84], index: 4, kind: input, shape index: {}]   ;;  %s7742_s5 = inlined_call_operand.vmem [shape: bf16[84,10], index: 5, kind: input, shape index: {}]   ;;  %s7743_s6 = inlined_call_operand.vmem [shape: f32[1,10], index: 6, kind: input, shape index: {}]   ;;  %s7744_s7 = inlined_call_operand.hbm [shape: f32[2,10], index: 7, kind: output, shape index: {}]  }
   0x1   :  { %v5875_v0 = vld [vmem:[%s7738_s1 + $0x78] sm:$0xff]   ;;  %v5879_v4 = vld [vmem:[%s7738_s1 + $0x70] sm:$0xff]   ;;  %v5883_v8 = vld [vmem:[%s7738_s1 + $0x68] sm:$0xff]   ;;  %v851_v36 = vunpack.c.l.s4 %v6317_v35 }
   0x2   :  { %v5876_v1 = vld [vmem:[%s7738_s1 + $0x38] sm:$0xff]   ;;  %5269 = vmatprep.subr.bf16.mxu0 %v5875_v0  ;;  %v5880_v5 = vld [vmem:[%s7738_s1 + $0x30] sm:$0xff]   ;;  %v5884_v9 = vld [vmem:[%s7738_s1 + $0x28] sm:$0xff]   ;;  %v854_v32 = vshrl.u32 %v853_v27, 7 }
   0x3   :  { %v5877_v2 = vld [vmem:[%s7738_s1 + $0xf8] sm:$0xff]   ;;  %5270 = vmatpush3.bf16.msra.mxu0 %v5876_v1  ;;  %v5881_v6 = vld [vmem:[%s7738_s1 + $0xf0] sm:$0xff]   ;;  %v5885_v10 = vld [vmem:[%s7738_s1 + $0xe8] sm:$0xff]   ;;  %v852_v39 = vunpack.c.0.s8 %v851_v36 }
   0x4   :  { %v5878_v3 = vld [vmem:[%s7738_s1 + $0xb8] sm:$0xff]   ;;  %5291 = vmatprep.subr.bf16.mxu1 %v5877_v2  ;;  %5271 = vmatprep.subr.bf16.mxu0 %v5879_v4  ;;  %v5882_v7 = vld [vmem:[%s7738_s1 + $0xb0] sm:$0xff]   ;;  %v5886_v11 = vld [vmem:[%s7738_s1 + $0xa8] sm:$0xff]  }
   0x5   :  { %5292 = vmatpush3.bf16.msra.mxu1 %v5878_v3  ;;  %v5887_v12 = vld [vmem:[%s7738_s1 + $0x60] sm:$0xff]   ;;  %v5891_v16 = vld [vmem:[%s7738_s1 + $0x58] sm:$0xff]   ;;  %v5895_v20 = vld [vmem:[%s7738_s1 + $0x50] sm:$0xff]   ;;  %v6466_v41 = vsub.s32 %v852_v39, %v854_v32 }
   0x6   :  { %5293 = vmatprep.subr.bf16.mxu1 %v5881_v6  ;;  %v5888_v13 = vld [vmem:[%s7738_s1 + $0x20] sm:$0xff]   ;;  %v5892_v17 = vld [vmem:[%s7738_s1 + $0x18] sm:$0xff]   ;;  %v5896_v21 = vld [vmem:[%s7738_s1 + $0x10] sm:$0xff]  }
   0x7   :  { %5272 = vmatpush3.bf16.msra.mxu0 %v5880_v5  ;;  %v5889_v14 = vld [vmem:[%s7738_s1 + $0xe0] sm:$0xff]   ;;  %v5893_v18 = vld [vmem:[%s7738_s1 + $0xd8] sm:$0xff]   ;;  %v5897_v22 = vld [vmem:[%s7738_s1 + $0xd0] sm:$0xff]  }
   0x8   :  { %5273 = vmatprep.subr.bf16.mxu0 %v5883_v8  ;;  %v5890_v15 = vld [vmem:[%s7738_s1 + $0xa0] sm:$0xff]   ;;  %v5894_v19 = vld [vmem:[%s7738_s1 + $0x98] sm:$0xff]   ;;  %v5898_v23 = vld [vmem:[%s7738_s1 + $0x90] sm:$0xff]  }
   0x9   :  { %5294 = vmatpush3.bf16.msra.mxu1 %v5882_v7  ;;  %v5899_v24 = vld [vmem:[%s7738_s1 + $0x48] sm:$0xff]   ;;  %v5903_v29 = vld [vmem:[%s7738_s1 + $0x40] sm:$0xff]   ;;  %v5908_v37 = vld [vmem:[%s7738_s1 + $0x178] sm:$0xff]  }
   0xa   :  { %5295 = vmatprep.subr.bf16.mxu1 %v5885_v10  ;;  %v5900_v25 = vld [vmem:[%s7738_s1 + $0x8] sm:$0xff]   ;;  %v5904_v30 = vld [vmem:[%s7738_s1] sm:$0xff]   ;;  %v5910_v40 = vld [vmem:[%s7738_s1 + $0x1f8] sm:$0xff]  }
   0xb   :  { %5274 = vmatpush3.bf16.msra.mxu0 %v5884_v9  ;;  %v5901_v26 = vld [vmem:[%s7738_s1 + $0xc8] sm:$0xff]   ;;  %v5905_v31 = vld [vmem:[%s7738_s1 + $0xc0] sm:$0xff]   ;;  %v5909_v47 = vld [vmem:[%s7738_s1 + $0x138] sm:$0xff]  }
   0xc   :  { %5275 = vmatprep.subr.bf16.mxu0 %v5887_v12  ;;  %v5902_v28 = vld [vmem:[%s7738_s1 + $0x88] sm:$0xff]   ;;  %v28_v33 = vld [vmem:[%s7737_s0] sm:$0xff]  ;;  %v5911_v49 = vld [vmem:[%s7738_s1 + $0x1b8] sm:$0xff]  }
   0xd   :  { %5296 = vmatpush3.bf16.msra.mxu1 %v5886_v11  ;;  %v5907_v34 = vld [vmem:[%s7738_s1 + $0x80] sm:$0xff]   ;;  %v849_v38 = vcombine.high %v28_v33, %v28_v33  ;;  %v856_v42 = vrot.slane %v28_v33, %v6466_v41  ;;  %v5912_v52 = vld [vmem:[%s7738_s1 + $0x170] sm:$0xff]   ;;  %v5916_v58 = vld [vmem:[%s7738_s1 + $0x168] sm:$0xff]  }
   0xe   :  { %5297 = vmatprep.subr.bf16.mxu1 %v5889_v14  ;;  %v5913_v54 = vld [vmem:[%s7738_s1 + $0x130] sm:$0xff]   ;;  %v5917_v59 = vld [vmem:[%s7738_s1 + $0x128] sm:$0xff]   ;;  %v5920_v62 = vld [vmem:[%s7738_s1 + $0x160] sm:$0xff]  }
   0xf   :  { %5276 = vmatpush3.bf16.msra.mxu0 %v5888_v13  ;;  %v6470_v43 = vrot.slane %v849_v38, %v6466_v41  ;;  %v864_v44 = vcombine.high %v856_v42, %v856_v42  ;;  %v872_v45 = vrot.slane %v856_v42, %v6466_v41  ;;  %v5914_v55 = vld [vmem:[%s7738_s1 + $0x1f0] sm:$0xff]   ;;  %v5918_v60 = vld [vmem:[%s7738_s1 + $0x1e8] sm:$0xff]   ;;  %v5921_v63 = vld [vmem:[%s7738_s1 + $0x120] sm:$0xff]  }
  0x10   :  { %5277 = vmatprep.subr.bf16.mxu0 %v5891_v16  ;;  %v5915_v57 = vld [vmem:[%s7738_s1 + $0x1b0] sm:$0xff]   ;;  %v5919_v61 = vld [vmem:[%s7738_s1 + $0x1a8] sm:$0xff]   ;;  %v5922_v0 = vld [vmem:[%s7738_s1 + $0x1e0] sm:$0xff]  }
  0x11   :  { %5298 = vmatpush3.bf16.msra.mxu1 %v5890_v15  ;;  %v865_v46 = vcombine.high %v6470_v43, %v6470_v43  ;;  %v886_v48 = vrot.slane %v864_v44, %v6466_v41  ;;  %v894_v51 = vcombine.high %v872_v45, %v872_v45  ;;  %v5923_v1 = vld [vmem:[%s7738_s1 + $0x1a0] sm:$0xff]   ;;  %v5924_v2 = vld [vmem:[%s7738_s1 + $0x158] sm:$0xff]   ;;  %v5928_v6 = vld [vmem:[%s7738_s1 + $0x150] sm:$0xff]  }
  0x12   :  { %5299 = vmatprep.subr.bf16.mxu1 %v5893_v18  ;;  %v5925_v3 = vld [vmem:[%s7738_s1 + $0x118] sm:$0xff]   ;;  %v5929_v7 = vld [vmem:[%s7738_s1 + $0x110] sm:$0xff]   ;;  %v5932_v10 = vld [vmem:[%s7738_s1 + $0x148] sm:$0xff]   ;;  %v879_v18 = vrot.slane %v6470_v43, %v6466_v41 }
  0x13   :  { %5278 = vmatpush3.bf16.msra.mxu0 %v5892_v17  ;;  %v893_v50 = vrot.slane %v865_v46, %v6466_v41  ;;  %3647 = vmatprep.mubr.bf16.mxu0 %v886_v48  ;;  %v896_v53 = vcombine.high %v886_v48, %v886_v48  ;;  %v5926_v4 = vld [vmem:[%s7738_s1 + $0x1d8] sm:$0xff]   ;;  %v5930_v8 = vld [vmem:[%s7738_s1 + $0x1d0] sm:$0xff]   ;;  %v5933_v11 = vld [vmem:[%s7738_s1 + $0x108] sm:$0xff]  }
  0x14   :  { %5279 = vmatprep.subr.bf16.mxu0 %v5895_v20  ;;  %v5927_v5 = vld [vmem:[%s7738_s1 + $0x198] sm:$0xff]   ;;  %v5931_v9 = vld [vmem:[%s7738_s1 + $0x190] sm:$0xff]   ;;  %v5934_v12 = vld [vmem:[%s7738_s1 + $0x1c8] sm:$0xff]  }
  0x15   :  { %5300 = vmatpush3.bf16.msra.mxu1 %v5894_v19  ;;  %v897_v56 = vcombine.high %v893_v50, %v893_v50  ;;  %3687 = vmatprep.mubr.bf16.mxu1 %v896_v53  ;;  %v5935_v13 = vld [vmem:[%s7738_s1 + $0x188] sm:$0xff]   ;;  %v5936_v14 = vld [vmem:[%s7738_s1 + $0x140] sm:$0xff]   ;;  %v5940_v19 = vld [vmem:[%s7738_s1 + $0x278] sm:$0xff]  }
  0x16   :  { %5301 = vmatprep.subr.bf16.mxu1 %v5897_v22  ;;  %v5937_v15 = vld [vmem:[%s7738_s1 + $0x100] sm:$0xff]   ;;  %v5941_v20 = vld [vmem:[%s7738_s1 + $0x238] sm:$0xff]   ;;  %v5947_v27 = vld [vmem:[%s7738_s1 + $0x2b0] sm:$0xff]  }
  0x17   :  { %5280 = vmatpush3.bf16.msra.mxu0 %v5896_v21  ;;  %v5938_v16 = vld [vmem:[%s7738_s1 + $0x1c0] sm:$0xff]   ;;  %v5942_v21 = vld [vmem:[%s7738_s1 + $0x2f8] sm:$0xff]   ;;  %v5961_v42 = vld [vmem:[%s7738_s1 + $0x210] sm:$0xff]  }
  0x18   :  { %5281 = vmatprep.subr.bf16.mxu0 %v5899_v24  ;;  %v5939_v17 = vld [vmem:[%s7738_s1 + $0x180] sm:$0xff]   ;;  %v5943_v22 = vld [vmem:[%s7738_s1 + $0x2b8] sm:$0xff]   ;;  %v5944_v24 = vld [vmem:[%s7738_s1 + $0x270] sm:$0xff]  }
  0x19   :  { %5302 = vmatpush3.bf16.msra.mxu1 %v5898_v23  ;;  %v895_v23 = vcombine.high %v879_v18, %v879_v18  ;;  %v5952_v32 = vld [vmem:[%s7738_s1 + $0x260] sm:$0xff]   ;;  %v5956_v36 = vld [vmem:[%s7738_s1 + $0x258] sm:$0xff]   ;;  %v5962_v43 = vld [vmem:[%s7738_s1 + $0x2d0] sm:$0xff]  }
  0x1a   :  { %5303 = vmatprep.subr.bf16.mxu1 %v5901_v26  ;;  %v5946_v26 = vld [vmem:[%s7738_s1 + $0x2f0] sm:$0xff]   ;;  %v5953_v33 = vld [vmem:[%s7738_s1 + $0x220] sm:$0xff]   ;;  %v5958_v38 = vld [vmem:[%s7738_s1 + $0x2d8] sm:$0xff]  }
  0x1b   :  { %5282 = vmatpush3.bf16.msra.mxu0 %v5900_v25  ;;  %v5945_v25 = vld [vmem:[%s7738_s1 + $0x230] sm:$0xff]   ;;  %v5955_v35 = vld [vmem:[%s7738_s1 + $0x2a0] sm:$0xff]   ;;  %v5959_v39 = vld [vmem:[%s7738_s1 + $0x298] sm:$0xff]  }
  0x1c   :  { %5283 = vmatprep.subr.bf16.mxu0 %v5903_v29  ;;  %v5949_v29 = vld [vmem:[%s7738_s1 + $0x228] sm:$0xff]   ;;  %v5963_v44 = vld [vmem:[%s7738_s1 + $0x290] sm:$0xff]  }
  0x1d   :  { %5304 = vmatpush3.bf16.msra.mxu1 %v5902_v28  ;;  %v5948_v28 = vld [vmem:[%s7738_s1 + $0x268] sm:$0xff]  }
  0x1e   :  { %5305 = vmatprep.subr.bf16.mxu1 %v5905_v31  ;;  %v5951_v31 = vld [vmem:[%s7738_s1 + $0x2a8] sm:$0xff]  }
  0x1f   :  { %5284 = vmatpush3.bf16.msra.mxu0 %v5904_v30  ;;  %v5950_v30 = vld [vmem:[%s7738_s1 + $0x2e8] sm:$0xff]  }
  0x20   :  { %5313 = vmatprep.subr.bf16.mxu0 %v5908_v37  ;;  %v5957_v37 = vld [vmem:[%s7738_s1 + $0x218] sm:$0xff]   ;;  %v29_v46 = vld [vmem:[%s7737_s0 + $0x8] sm:$0xff] }
  0x21   :  { %5306 = vmatpush3.bf16.msra.mxu1 %v5907_v34  ;;  %v5954_v34 = vld [vmem:[%s7738_s1 + $0x2e0] sm:$0xff]   ;;  %v905_v48 = vrot.slane %v29_v46, %v6466_v41 }
  0x22   :  { %5335 = vmatprep.subr.bf16.mxu1 %v5910_v40  ;;  %3648 = vmatmul.mubr.bf16.vlgmr.msra.gmra.mxu0 %v872_v45  ;;  %v5960_v40 = vld [vmem:[%s7738_s1 + $0x250] sm:$0xff]   ;;  %v5964_v45 = vld [vmem:[%s7738_s1 + $0x248] sm:$0xff]  }
  0x23   :  { %5314 = vmatpush3.bf16.msra.mxu0 %v5909_v47  ;;  %3727 = vmatprep.mubr.bf16.mxu0 %v893_v50  ;;  %v5965_v47 = vld [vmem:[%s7738_s1 + $0x208] sm:$0xff]  }
  0x24   :  { %3688 = vmatmul.mubr.bf16.vlgmr.msra.gmra.mxu1 %v894_v51  ;;  %5315 = vmatprep.subr.bf16.mxu0 %v5912_v52  ;;  %v5966_v50 = vld [vmem:[%s7738_s1 + $0x2c8] sm:$0xff]   ;;  %v913_v52 = vcombine.high %v905_v48, %v905_v48 }
  0x25   :  { %5336 = vmatpush3.bf16.msra.mxu1 %v5911_v49  ;;  %3767 = vmatprep.mubr.bf16.mxu1 %v897_v56  ;;  %v898_v49 = vcombine.high %v29_v46, %v29_v46  ;;  %v5967_v51 = vld [vmem:[%s7738_s1 + $0x288] sm:$0xff]  }
  0x26   :  { %5337 = vmatprep.subr.bf16.mxu1 %v5914_v55  ;;  %v5969_v55 = vld [vmem:[%s7738_s1 + $0x200] sm:$0xff]   ;;  %v935_v56 = vrot.slane %v913_v52, %v6466_v41  ;;  %v6015_v46 = vld [vmem:[%s7738_s1 + $0x4e8] sm:$0xff]   ;;  %v6021_v52 = vld [vmem:[%s7738_s1 + $0x458] sm:$0xff]  }
  0x27   :  { %5316 = vmatpush3.bf16.msra.mxu0 %v5913_v54  ;;  %v6658_v53 = vrot.slane %v898_v49, %v6466_v41  ;;  %v5968_v54 = vld [vmem:[%s7738_s1 + $0x240] sm:$0xff]  }
  0x28   :  { %5317 = vmatprep.subr.bf16.mxu0 %v5916_v58  ;;  %v5970_v58 = vld [vmem:[%s7738_s1 + $0x2c0] sm:$0xff]  }
  0x29   :  { %5338 = vmatpush3.bf16.msra.mxu1 %v5915_v57  ;;  %v914_v57 = vcombine.high %v6658_v53, %v6658_v53  ;;  %v6018_v49 = vld [vmem:[%s7738_s1 + $0x420] sm:$0xff]  }
  0x2a   :  { %5339 = vmatprep.subr.bf16.mxu1 %v5918_v60  ;;  %v945_v60 = vcombine.high %v935_v56, %v935_v56 }
  0x2b   :  { %5318 = vmatpush3.bf16.msra.mxu0 %v5917_v59  ;;  %v5971_v59 = vld [vmem:[%s7738_s1 + $0x280] sm:$0xff]  }
  0x2c   :  { %5319 = vmatprep.subr.bf16.mxu0 %v5920_v62  ;;  %v5972_v62 = vld [vmem:[%s7738_s1 + $0x378] sm:$0xff]  }
  0x2d   :  { %5340 = vmatpush3.bf16.msra.mxu1 %v5919_v61  ;;  %v921_v61 = vrot.slane %v905_v48, %v6466_v41  ;;  %v6017_v48 = vld [vmem:[%s7738_s1 + $0x460] sm:$0xff]  }
  0x2e   :  { %5341 = vmatprep.subr.bf16.mxu1 %v5922_v0  ;;  %v942_v0 = vrot.slane %v914_v57, %v6466_v41  ;;  %v6026_v57 = vld [vmem:[%s7738_s1 + $0x410] sm:$0xff]  }
  0x2f   :  { %5320 = vmatpush3.bf16.msra.mxu0 %v5921_v63  ;;  %v5973_v63 = vld [vmem:[%s7738_s1 + $0x338] sm:$0xff]  }
  0x30   :  { %5321 = vmatprep.subr.bf16.mxu0 %v5924_v2  ;;  %v5975_v2 = vld [vmem:[%s7738_s1 + $0x3b8] sm:$0xff]  }
  0x31   :  { %5342 = vmatpush3.bf16.msra.mxu1 %v5923_v1  ;;  %v5974_v1 = vld [vmem:[%s7738_s1 + $0x3f8] sm:$0xff]  }
  0x32   :  { %5343 = vmatprep.subr.bf16.mxu1 %v5926_v4  ;;  %v5976_v4 = vld [vmem:[%s7738_s1 + $0x370] sm:$0xff]  }
  0x33   :  { %5322 = vmatpush3.bf16.msra.mxu0 %v5925_v3  ;;  %v943_v3 = vcombine.high %v921_v61, %v921_v61 }
  0x34   :  { %5323 = vmatprep.subr.bf16.mxu0 %v5928_v6  ;;  %v946_v6 = vcombine.high %v942_v0, %v942_v0 }
  0x35   :  { %5344 = vmatpush3.bf16.msra.mxu1 %v5927_v5  ;;  %v5977_v5 = vld [vmem:[%s7738_s1 + $0x330] sm:$0xff]  }
  0x36   :  { %5345 = vmatprep.subr.bf16.mxu1 %v5930_v8  ;;  %v5979_v8 = vld [vmem:[%s7738_s1 + $0x3b0] sm:$0xff]  }
  0x37   :  { %5324 = vmatpush3.bf16.msra.mxu0 %v5929_v7  ;;  %v5978_v7 = vld [vmem:[%s7738_s1 + $0x3f0] sm:$0xff]  }
  0x38   :  { %5325 = vmatprep.subr.bf16.mxu0 %v5932_v10  ;;  %v5981_v10 = vld [vmem:[%s7738_s1 + $0x328] sm:$0xff]  }
  0x39   :  { %5346 = vmatpush3.bf16.msra.mxu1 %v5931_v9  ;;  %v5980_v9 = vld [vmem:[%s7738_s1 + $0x368] sm:$0xff]  }
  0x3a   :  { %5347 = vmatprep.subr.bf16.mxu1 %v5934_v12  ;;  %v5983_v12 = vld [vmem:[%s7738_s1 + $0x3a8] sm:$0xff]  }
  0x3b   :  { %5326 = vmatpush3.bf16.msra.mxu0 %v5933_v11  ;;  %v5982_v11 = vld [vmem:[%s7738_s1 + $0x3e8] sm:$0xff]  }
  0x3c   :  { %5327 = vmatprep.subr.bf16.mxu0 %v5936_v14  ;;  %v5985_v14 = vld [vmem:[%s7738_s1 + $0x320] sm:$0xff]  }
  0x3d   :  { %5348 = vmatpush3.bf16.msra.mxu1 %v5935_v13  ;;  %v5984_v13 = vld [vmem:[%s7738_s1 + $0x360] sm:$0xff]  }
  0x3e   :  { %5349 = vmatprep.subr.bf16.mxu1 %v5938_v16  ;;  %v5987_v16 = vld [vmem:[%s7738_s1 + $0x3a0] sm:$0xff]  }
  0x3f   :  { %5328 = vmatpush3.bf16.msra.mxu0 %v5937_v15  ;;  %v5986_v15 = vld [vmem:[%s7738_s1 + $0x3e0] sm:$0xff]  }
  0x40   :  { %5357 = vmatprep.subr.bf16.mxu0 %v5940_v19  ;;  %v5990_v19 = vld [vmem:[%s7738_s1 + $0x3d8] sm:$0xff]  }
  0x41   :  { %5350 = vmatpush3.bf16.msra.mxu1 %v5939_v17  ;;  %v5988_v17 = vld [vmem:[%s7738_s1 + $0x358] sm:$0xff]  }
  0x42   :  { %3728 = vmatmul.mubr.bf16.vlgmr.msra.gmra.mxu0 %v879_v18  ;;  %5379 = vmatprep.subr.bf16.mxu1 %v5942_v21  ;;  %v5989_v18 = vld [vmem:[%s7738_s1 + $0x318] sm:$0xff]   ;;  %v5992_v21 = vld [vmem:[%s7738_s1 + $0x350] sm:$0xff]  }
  0x43   :  { %5358 = vmatpush3.bf16.msra.mxu0 %v5941_v20  ;;  %3807 = vmatprep.mubr.bf16.mxu0 %v935_v56  ;;  %v5991_v20 = vld [vmem:[%s7738_s1 + $0x398] sm:$0xff]   ;;  %v6025_v56 = vld [vmem:[%s7738_s1 + $0x450] sm:$0xff]  }
  0x44   :  { %3768 = vmatmul.mubr.bf16.vlgmr.msra.gmra.mxu1 %v895_v23  ;;  %5359 = vmatprep.subr.bf16.mxu0 %v5944_v24  ;;  %v5994_v23 = vld [vmem:[%s7738_s1 + $0x3d0] sm:$0xff]  }
  0x45   :  { %5380 = vmatpush3.bf16.msra.mxu1 %v5943_v22  ;;  %3847 = vmatprep.mubr.bf16.mxu1 %v945_v60  ;;  %v5993_v22 = vld [vmem:[%s7738_s1 + $0x310] sm:$0xff]   ;;  %v6029_v60 = vld [vmem:[%s7738_s1 + $0x448] sm:$0xff]  }
  0x46   :  { %5381 = vmatprep.subr.bf16.mxu1 %v5946_v26  ;;  %v5995_v24 = vld [vmem:[%s7738_s1 + $0x390] sm:$0xff]   ;;  %v5997_v26 = vld [vmem:[%s7738_s1 + $0x308] sm:$0xff]  }
  0x47   :  { %5360 = vmatpush3.bf16.msra.mxu0 %v5945_v25  ;;  %v5996_v25 = vld [vmem:[%s7738_s1 + $0x348] sm:$0xff]  }
  0x48   :  { %5361 = vmatprep.subr.bf16.mxu0 %v5948_v28  ;;  %v5999_v28 = vld [vmem:[%s7738_s1 + $0x388] sm:$0xff]  }
  0x49   :  { %5382 = vmatpush3.bf16.msra.mxu1 %v5947_v27  ;;  %v5998_v27 = vld [vmem:[%s7738_s1 + $0x3c8] sm:$0xff]  }
  0x4a   :  { %5383 = vmatprep.subr.bf16.mxu1 %v5950_v30  ;;  %v6001_v30 = vld [vmem:[%s7738_s1 + $0x300] sm:$0xff]  }
  0x4b   :  { %5362 = vmatpush3.bf16.msra.mxu0 %v5949_v29  ;;  %v6000_v29 = vld [vmem:[%s7738_s1 + $0x340] sm:$0xff]  }
  0x4c   :  { %5363 = vmatprep.subr.bf16.mxu0 %v5952_v32  ;;  %v6004_v32 = vld [vmem:[%s7738_s1 + $0x380] sm:$0xff]  }
  0x4d   :  { %5384 = vmatpush3.bf16.msra.mxu1 %v5951_v31  ;;  %v6002_v31 = vld [vmem:[%s7738_s1 + $0x3c0] sm:$0xff]  }
  0x4e   :  { %5385 = vmatprep.subr.bf16.mxu1 %v5954_v34  ;;  %v6005_v34 = vld [vmem:[%s7738_s1 + $0x478] sm:$0xff]  }
  0x4f   :  { %5364 = vmatpush3.bf16.msra.mxu0 %v5953_v33  ;;  %v928_v33 = vrot.slane %v6658_v53, %v6466_v41  ;;  %v6022_v53 = vld [vmem:[%s7738_s1 + $0x418] sm:$0xff]  }
  0x50   :  { %5365 = vmatprep.subr.bf16.mxu0 %v5956_v36  ;;  %v6007_v36 = vld [vmem:[%s7738_s1 + $0x4f8] sm:$0xff]  }
  0x51   :  { %5386 = vmatpush3.bf16.msra.mxu1 %v5955_v35  ;;  %v6006_v35 = vld [vmem:[%s7738_s1 + $0x438] sm:$0xff]  }
  0x52   :  { %5387 = vmatprep.subr.bf16.mxu1 %v5958_v38  ;;  %v944_v38 = vcombine.high %v928_v33, %v928_v33 }
  0x53   :  { %5366 = vmatpush3.bf16.msra.mxu0 %v5957_v37  ;;  %v6008_v37 = vld [vmem:[%s7738_s1 + $0x4b8] sm:$0xff]  }
  0x54   :  { %5367 = vmatprep.subr.bf16.mxu0 %v5960_v40  ;;  %v6010_v40 = vld [vmem:[%s7738_s1 + $0x430] sm:$0xff]  }
  0x55   :  { %5388 = vmatpush3.bf16.msra.mxu1 %v5959_v39  ;;  %v6009_v39 = vld [vmem:[%s7738_s1 + $0x470] sm:$0xff]  }
  0x56   :  { %5389 = vmatprep.subr.bf16.mxu1 %v5962_v43  ;;  %v6012_v43 = vld [vmem:[%s7738_s1 + $0x4b0] sm:$0xff]  }
  0x57   :  { %5368 = vmatpush3.bf16.msra.mxu0 %v5961_v42  ;;  %v6011_v42 = vld [vmem:[%s7738_s1 + $0x4f0] sm:$0xff]  }
  0x58   :  { %5369 = vmatprep.subr.bf16.mxu0 %v5964_v45  ;;  %v6014_v45 = vld [vmem:[%s7738_s1 + $0x428] sm:$0xff]  }
  0x59   :  { %5390 = vmatpush3.bf16.msra.mxu1 %v5963_v44  ;;  %v6013_v44 = vld [vmem:[%s7738_s1 + $0x468] sm:$0xff]  }
  0x5a   :  { %5391 = vmatprep.subr.bf16.mxu1 %v5966_v50  ;;  %v6019_v50 = vld [vmem:[%s7738_s1 + $0x4e0] sm:$0xff]  }
  0x5b   :  { %5370 = vmatpush3.bf16.msra.mxu0 %v5965_v47  ;;  %v6016_v47 = vld [vmem:[%s7738_s1 + $0x4a8] sm:$0xff]  }
  0x5c   :  { %5371 = vmatprep.subr.bf16.mxu0 %v5968_v54  ;;  %v6023_v54 = vld [vmem:[%s7738_s1 + $0x4d8] sm:$0xff]  }
  0x5d   :  { %5392 = vmatpush3.bf16.msra.mxu1 %v5967_v51  ;;  %v6020_v51 = vld [vmem:[%s7738_s1 + $0x4a0] sm:$0xff]  }
  0x5e   :  { %5393 = vmatprep.subr.bf16.mxu1 %v5970_v58  ;;  %v6027_v58 = vld [vmem:[%s7738_s1 + $0x4d0] sm:$0xff]  }
  0x5f   :  { %5372 = vmatpush3.bf16.msra.mxu0 %v5969_v55  ;;  %v6024_v55 = vld [vmem:[%s7738_s1 + $0x498] sm:$0xff]  }
  0x60   :  { %5401 = vmatprep.subr.bf16.mxu0 %v5972_v62  ;;  %v6030_v62 = vld [vmem:[%s7738_s1 + $0x408] sm:$0xff]  }
  0x61   :  { %5394 = vmatpush3.bf16.msra.mxu1 %v5971_v59  ;;  %v6028_v59 = vld [vmem:[%s7738_s1 + $0x490] sm:$0xff]  }
  0x62   :  { %3808 = vmatmul.mubr.bf16.vlgmr.msra.gmra.mxu0 %v921_v61  ;;  %5423 = vmatprep.subr.bf16.mxu1 %v5974_v1  ;;  %v30_v61 = vld [vmem:[%s7737_s0 + $0x10] sm:$0xff]  ;;  %v6031_v1 = vld [vmem:[%s7738_s1 + $0x4c8] sm:$0xff]  }
  0x63   :  { %5402 = vmatpush3.bf16.msra.mxu0 %v5973_v63  ;;  %3887 = vmatprep.mubr.bf16.mxu0 %v942_v0  ;;  %v954_v63 = vrot.slane %v30_v61, %v6466_v41  ;;  %v947_v0 = vcombine.high %v30_v61, %v30_v61  ;;  %v6080_v61 = vld [vmem:[%s7738_s1 + $0x6e8] sm:$0xff]  }
  0x64   :  { %3848 = vmatmul.mubr.bf16.vlgmr.msra.gmra.mxu1 %v943_v3  ;;  %5403 = vmatprep.subr.bf16.mxu0 %v5976_v4 }
  0x65   :  { %5424 = vmatpush3.bf16.msra.mxu1 %v5975_v2  ;;  %3927 = vmatprep.mubr.bf16.mxu1 %v946_v6  ;;  %v6032_v2 = vld [vmem:[%s7738_s1 + $0x488] sm:$0xff]   ;;  %v962_v3 = vcombine.high %v954_v63, %v954_v63  ;;  %v6864_v4 = vrot.slane %v947_v0, %v6466_v41  ;;  %v6034_v6 = vld [vmem:[%s7738_s1 + $0x400] sm:$0xff]  }
  0x66   :  { %5425 = vmatprep.subr.bf16.mxu1 %v5978_v7  ;;  %v6083_v0 = vld [vmem:[%s7738_s1 + $0x620] sm:$0xff]  }
  0x67   :  { %5404 = vmatpush3.bf16.msra.mxu0 %v5977_v5  ;;  %v6033_v5 = vld [vmem:[%s7738_s1 + $0x440] sm:$0xff]   ;;  %v984_v7 = vrot.slane %v962_v3, %v6466_v41  ;;  %v6086_v3 = vld [vmem:[%s7738_s1 + $0x658] sm:$0xff]  }
  0x68   :  { %5405 = vmatprep.subr.bf16.mxu0 %v5980_v9  ;;  %v6035_v9 = vld [vmem:[%s7738_s1 + $0x4c0] sm:$0xff]  }
  0x69   :  { %5426 = vmatpush3.bf16.msra.mxu1 %v5979_v8  ;;  %v963_v8 = vcombine.high %v6864_v4, %v6864_v4 }
  0x6a   :  { %5427 = vmatprep.subr.bf16.mxu1 %v5982_v11  ;;  %v994_v11 = vcombine.high %v984_v7, %v984_v7 }
  0x6b   :  { %5406 = vmatpush3.bf16.msra.mxu0 %v5981_v10  ;;  %v6036_v10 = vld [vmem:[%s7738_s1 + $0x480] sm:$0xff]  }
  0x6c   :  { %5407 = vmatprep.subr.bf16.mxu0 %v5984_v13  ;;  %v6037_v13 = vld [vmem:[%s7738_s1 + $0x578] sm:$0xff]  }
  0x6d   :  { %5428 = vmatpush3.bf16.msra.mxu1 %v5983_v12  ;;  %v970_v12 = vrot.slane %v954_v63, %v6466_v41  ;;  %v6082_v63 = vld [vmem:[%s7738_s1 + $0x660] sm:$0xff]  }
  0x6e   :  { %5429 = vmatprep.subr.bf16.mxu1 %v5986_v15  ;;  %v991_v15 = vrot.slane %v963_v8, %v6466_v41  ;;  %v6091_v8 = vld [vmem:[%s7738_s1 + $0x610] sm:$0xff]  }
  0x6f   :  { %5408 = vmatpush3.bf16.msra.mxu0 %v5985_v14  ;;  %v6038_v14 = vld [vmem:[%s7738_s1 + $0x538] sm:$0xff]  }
  0x70   :  { %5409 = vmatprep.subr.bf16.mxu0 %v5988_v17  ;;  %v6040_v17 = vld [vmem:[%s7738_s1 + $0x5b8] sm:$0xff]  }
  0x71   :  { %5430 = vmatpush3.bf16.msra.mxu1 %v5987_v16  ;;  %v6039_v16 = vld [vmem:[%s7738_s1 + $0x5f8] sm:$0xff]  }
  0x72   :  { %5431 = vmatprep.subr.bf16.mxu1 %v5990_v19  ;;  %v6041_v19 = vld [vmem:[%s7738_s1 + $0x570] sm:$0xff]  }
  0x73   :  { %5410 = vmatpush3.bf16.msra.mxu0 %v5989_v18  ;;  %v992_v18 = vcombine.high %v970_v12, %v970_v12 }
  0x74   :  { %5411 = vmatprep.subr.bf16.mxu0 %v5992_v21  ;;  %v995_v21 = vcombine.high %v991_v15, %v991_v15 }
  0x75   :  { %5432 = vmatpush3.bf16.msra.mxu1 %v5991_v20  ;;  %v6042_v20 = vld [vmem:[%s7738_s1 + $0x530] sm:$0xff]  }
  0x76   :  { %5433 = vmatprep.subr.bf16.mxu1 %v5994_v23  ;;  %v6044_v23 = vld [vmem:[%s7738_s1 + $0x5b0] sm:$0xff]  }
  0x77   :  { %5412 = vmatpush3.bf16.msra.mxu0 %v5993_v22  ;;  %v6043_v22 = vld [vmem:[%s7738_s1 + $0x5f0] sm:$0xff]  }
  0x78   :  { %5413 = vmatprep.subr.bf16.mxu0 %v5996_v25  ;;  %v6046_v25 = vld [vmem:[%s7738_s1 + $0x528] sm:$0xff]  }
  0x79   :  { %5434 = vmatpush3.bf16.msra.mxu1 %v5995_v24  ;;  %v6045_v24 = vld [vmem:[%s7738_s1 + $0x568] sm:$0xff]  }
  0x7a   :  { %5435 = vmatprep.subr.bf16.mxu1 %v5998_v27  ;;  %v6048_v27 = vld [vmem:[%s7738_s1 + $0x5a8] sm:$0xff]  }
  0x7b   :  { %5414 = vmatpush3.bf16.msra.mxu0 %v5997_v26  ;;  %v6047_v26 = vld [vmem:[%s7738_s1 + $0x5e8] sm:$0xff]  }
  0x7c   :  { %5415 = vmatprep.subr.bf16.mxu0 %v6000_v29  ;;  %v6050_v29 = vld [vmem:[%s7738_s1 + $0x520] sm:$0xff]  }
  0x7d   :  { %5436 = vmatpush3.bf16.msra.mxu1 %v5999_v28  ;;  %v6049_v28 = vld [vmem:[%s7738_s1 + $0x560] sm:$0xff]  }
  0x7e   :  { %5437 = vmatprep.subr.bf16.mxu1 %v6002_v31  ;;  %v6052_v31 = vld [vmem:[%s7738_s1 + $0x5a0] sm:$0xff]  }
  0x7f   :  { %5416 = vmatpush3.bf16.msra.mxu0 %v6001_v30  ;;  %v6051_v30 = vld [vmem:[%s7738_s1 + $0x5e0] sm:$0xff]  }
  0x80   :  { %5445 = vmatprep.subr.bf16.mxu0 %v6005_v34  ;;  %v6055_v34 = vld [vmem:[%s7738_s1 + $0x5d8] sm:$0xff]  }
  0x81   :  { %5438 = vmatpush3.bf16.msra.mxu1 %v6004_v32  ;;  %v6053_v32 = vld [vmem:[%s7738_s1 + $0x558] sm:$0xff]  }
  0x82   :  { %3888 = vmatmul.mubr.bf16.vlgmr.msra.gmra.mxu0 %v928_v33  ;;  %5467 = vmatprep.subr.bf16.mxu1 %v6007_v36  ;;  %v6054_v33 = vld [vmem:[%s7738_s1 + $0x518] sm:$0xff]   ;;  %v6057_v36 = vld [vmem:[%s7738_s1 + $0x550] sm:$0xff]  }
  0x83   :  { %5446 = vmatpush3.bf16.msra.mxu0 %v6006_v35  ;;  %3967 = vmatprep.mubr.bf16.mxu0 %v984_v7  ;;  %v6056_v35 = vld [vmem:[%s7738_s1 + $0x598] sm:$0xff]   ;;  %v6090_v7 = vld [vmem:[%s7738_s1 + $0x650] sm:$0xff]  }
  0x84   :  { %3928 = vmatmul.mubr.bf16.vlgmr.msra.gmra.mxu1 %v944_v38  ;;  %5447 = vmatprep.subr.bf16.mxu0 %v6009_v39  ;;  %v6059_v38 = vld [vmem:[%s7738_s1 + $0x5d0] sm:$0xff]  }
  0x85   :  { %5468 = vmatpush3.bf16.msra.mxu1 %v6008_v37  ;;  %4007 = vmatprep.mubr.bf16.mxu1 %v994_v11  ;;  %v6058_v37 = vld [vmem:[%s7738_s1 + $0x510] sm:$0xff]   ;;  %v6094_v11 = vld [vmem:[%s7738_s1 + $0x648] sm:$0xff]  }
  0x86   :  { %5469 = vmatprep.subr.bf16.mxu1 %v6011_v42  ;;  %v6060_v39 = vld [vmem:[%s7738_s1 + $0x590] sm:$0xff]   ;;  %v6062_v42 = vld [vmem:[%s7738_s1 + $0x508] sm:$0xff]  }
  0x87   :  { %5448 = vmatpush3.bf16.msra.mxu0 %v6010_v40  ;;  %v6061_v40 = vld [vmem:[%s7738_s1 + $0x548] sm:$0xff]  }
  0x88   :  { %5449 = vmatprep.subr.bf16.mxu0 %v6013_v44  ;;  %v6064_v44 = vld [vmem:[%s7738_s1 + $0x588] sm:$0xff]  }
  0x89   :  { %5470 = vmatpush3.bf16.msra.mxu1 %v6012_v43  ;;  %v6063_v43 = vld [vmem:[%s7738_s1 + $0x5c8] sm:$0xff]  }
  0x8a   :  { %5471 = vmatprep.subr.bf16.mxu1 %v6015_v46  ;;  %v6066_v46 = vld [vmem:[%s7738_s1 + $0x500] sm:$0xff]  }
  0x8b   :  { %5450 = vmatpush3.bf16.msra.mxu0 %v6014_v45  ;;  %v6065_v45 = vld [vmem:[%s7738_s1 + $0x540] sm:$0xff]  }
  0x8c   :  { %5451 = vmatprep.subr.bf16.mxu0 %v6017_v48  ;;  %v6069_v48 = vld [vmem:[%s7738_s1 + $0x580] sm:$0xff]  }
  0x8d   :  { %5472 = vmatpush3.bf16.msra.mxu1 %v6016_v47  ;;  %v6067_v47 = vld [vmem:[%s7738_s1 + $0x5c0] sm:$0xff]  }
  0x8e   :  { %5473 = vmatprep.subr.bf16.mxu1 %v6019_v50  ;;  %v6070_v50 = vld [vmem:[%s7738_s1 + $0x678] sm:$0xff]  }
  0x8f   :  { %5452 = vmatpush3.bf16.msra.mxu0 %v6018_v49  ;;  %v977_v49 = vrot.slane %v6864_v4, %v6466_v41  ;;  %v6087_v4 = vld [vmem:[%s7738_s1 + $0x618] sm:$0xff]  }
  0x90   :  { %5453 = vmatprep.subr.bf16.mxu0 %v6021_v52  ;;  %v6072_v52 = vld [vmem:[%s7738_s1 + $0x6f8] sm:$0xff]  }
  0x91   :  { %5474 = vmatpush3.bf16.msra.mxu1 %v6020_v51  ;;  %v6071_v51 = vld [vmem:[%s7738_s1 + $0x638] sm:$0xff]  }
  0x92   :  { %5475 = vmatprep.subr.bf16.mxu1 %v6023_v54  ;;  %v993_v54 = vcombine.high %v977_v49, %v977_v49 }
  0x93   :  { %5454 = vmatpush3.bf16.msra.mxu0 %v6022_v53  ;;  %v6073_v53 = vld [vmem:[%s7738_s1 + $0x6b8] sm:$0xff]  }
  0x94   :  { %5455 = vmatprep.subr.bf16.mxu0 %v6025_v56  ;;  %v6075_v56 = vld [vmem:[%s7738_s1 + $0x630] sm:$0xff]  }
  0x95   :  { %5476 = vmatpush3.bf16.msra.mxu1 %v6024_v55  ;;  %v6074_v55 = vld [vmem:[%s7738_s1 + $0x670] sm:$0xff]  }
  0x96   :  { %5477 = vmatprep.subr.bf16.mxu1 %v6027_v58  ;;  %v6077_v58 = vld [vmem:[%s7738_s1 + $0x6b0] sm:$0xff]  }
  0x97   :  { %5456 = vmatpush3.bf16.msra.mxu0 %v6026_v57  ;;  %v6076_v57 = vld [vmem:[%s7738_s1 + $0x6f0] sm:$0xff]  }
  0x98   :  { %5457 = vmatprep.subr.bf16.mxu0 %v6029_v60  ;;  %v6079_v60 = vld [vmem:[%s7738_s1 + $0x628] sm:$0xff]  }
  0x99   :  { %5478 = vmatpush3.bf16.msra.mxu1 %v6028_v59  ;;  %v6078_v59 = vld [vmem:[%s7738_s1 + $0x668] sm:$0xff]  }
  0x9a   :  { %5479 = vmatprep.subr.bf16.mxu1 %v6031_v1  ;;  %v6084_v1 = vld [vmem:[%s7738_s1 + $0x6e0] sm:$0xff]  }
  0x9b   :  { %5458 = vmatpush3.bf16.msra.mxu0 %v6030_v62  ;;  %v6081_v62 = vld [vmem:[%s7738_s1 + $0x6a8] sm:$0xff]  }
  0x9c   :  { %5459 = vmatprep.subr.bf16.mxu0 %v6033_v5  ;;  %v6088_v5 = vld [vmem:[%s7738_s1 + $0x6d8] sm:$0xff]  }
  0x9d   :  { %5480 = vmatpush3.bf16.msra.mxu1 %v6032_v2  ;;  %v6085_v2 = vld [vmem:[%s7738_s1 + $0x6a0] sm:$0xff]  }
  0x9e   :  { %5481 = vmatprep.subr.bf16.mxu1 %v6035_v9  ;;  %v6092_v9 = vld [vmem:[%s7738_s1 + $0x6d0] sm:$0xff]  }
  0x9f   :  { %5460 = vmatpush3.bf16.msra.mxu0 %v6034_v6  ;;  %v6089_v6 = vld [vmem:[%s7738_s1 + $0x698] sm:$0xff]  }
  0xa0   :  { %5489 = vmatprep.subr.bf16.mxu0 %v6037_v13  ;;  %v6096_v13 = vld [vmem:[%s7738_s1 + $0x6c8] sm:$0xff]  }
  0xa1   :  { %5482 = vmatpush3.bf16.msra.mxu1 %v6036_v10  ;;  %v6093_v10 = vld [vmem:[%s7738_s1 + $0x690] sm:$0xff]  }
  0xa2   :  { %3968 = vmatmul.mubr.bf16.vlgmr.msra.gmra.mxu0 %v970_v12  ;;  %5511 = vmatprep.subr.bf16.mxu1 %v6039_v16  ;;  %v31_v12 = vld [vmem:[%s7737_s0 + $0x18] sm:$0xff]  ;;  %v6095_v16 = vld [vmem:[%s7738_s1 + $0x608] sm:$0xff]  }
  0xa3   :  { %5490 = vmatpush3.bf16.msra.mxu0 %v6038_v14  ;;  %4047 = vmatprep.mubr.bf16.mxu0 %v991_v15  ;;  %v1003_v14 = vrot.slane %v31_v12, %v6466_v41  ;;  %v996_v15 = vcombine.high %v31_v12, %v31_v12  ;;  %v6134_v12 = vld [vmem:[%s7738_s1 + $0x780] sm:$0xff]  }
  0xa4   :  { %4008 = vmatmul.mubr.bf16.vlgmr.msra.gmra.mxu1 %v992_v18  ;;  %5491 = vmatprep.subr.bf16.mxu0 %v6041_v19  ;;  %v6098_v18 = vld [vmem:[%s7738_s1 + $0x640] sm:$0xff]  }
  0xa5   :  { %5512 = vmatpush3.bf16.msra.mxu1 %v6040_v17  ;;  %4087 = vmatprep.mubr.bf16.mxu1 %v995_v21  ;;  %v6097_v17 = vld [vmem:[%s7738_s1 + $0x688] sm:$0xff]   ;;  %v1011_v19 = vcombine.high %v1003_v14, %v1003_v14  ;;  %v6099_v21 = vld [vmem:[%s7738_s1 + $0x600] sm:$0xff]  }
  0xa6   :  { %5513 = vmatprep.subr.bf16.mxu1 %v6043_v22  ;;  %v6100_v22 = vld [vmem:[%s7738_s1 + $0x6c0] sm:$0xff]  }
  0xa7   :  { %5492 = vmatpush3.bf16.msra.mxu0 %v6042_v20  ;;  %v7073_v20 = vrot.slane %v996_v15, %v6466_v41  ;;  %v6136_v15 = vld [vmem:[%s7738_s1 + $0x838] sm:$0xff]  }
  0xa8   :  { %5493 = vmatprep.subr.bf16.mxu0 %v6045_v24 }
  0xa9   :  { %5514 = vmatpush3.bf16.msra.mxu1 %v6044_v23  ;;  %v1033_v23 = vrot.slane %v1011_v19, %v6466_v41  ;;  %v1012_v24 = vcombine.high %v7073_v20, %v7073_v20  ;;  %v6139_v19 = vld [vmem:[%s7738_s1 + $0x870] sm:$0xff]  }
  0xaa   :  { %5515 = vmatprep.subr.bf16.mxu1 %v6047_v26  ;;  %v1019_v26 = vrot.slane %v1003_v14, %v6466_v41  ;;  %v6135_v14 = vld [vmem:[%s7738_s1 + $0x878] sm:$0xff]  }
  0xab   :  { %5494 = vmatpush3.bf16.msra.mxu0 %v6046_v25  ;;  %v6101_v25 = vld [vmem:[%s7738_s1 + $0x680] sm:$0xff]  }
  0xac   :  { %5495 = vmatprep.subr.bf16.mxu0 %v6049_v28  ;;  %v1043_v28 = vcombine.high %v1033_v23, %v1033_v23 }
  0xad   :  { %5516 = vmatpush3.bf16.msra.mxu1 %v6048_v27  ;;  %v6102_v27 = vld [vmem:[%s7738_s1 + $0x778] sm:$0xff]  }
  0xae   :  { %5517 = vmatprep.subr.bf16.mxu1 %v6051_v30  ;;  %v1040_v30 = vrot.slane %v1012_v24, %v6466_v41 }
  0xaf   :  { %5496 = vmatpush3.bf16.msra.mxu0 %v6050_v29  ;;  %v6103_v29 = vld [vmem:[%s7738_s1 + $0x738] sm:$0xff]  }
  0xb0   :  { %5497 = vmatprep.subr.bf16.mxu0 %v6053_v32  ;;  %v6105_v32 = vld [vmem:[%s7738_s1 + $0x7b8] sm:$0xff]  }
  0xb1   :  { %5518 = vmatpush3.bf16.msra.mxu1 %v6052_v31  ;;  %v6104_v31 = vld [vmem:[%s7738_s1 + $0x7f8] sm:$0xff]  }
  0xb2   :  { %5519 = vmatprep.subr.bf16.mxu1 %v6055_v34  ;;  %v6106_v34 = vld [vmem:[%s7738_s1 + $0x770] sm:$0xff]  }
  0xb3   :  { %5498 = vmatpush3.bf16.msra.mxu0 %v6054_v33  ;;  %v1041_v33 = vcombine.high %v1019_v26, %v1019_v26 }
  0xb4   :  { %5499 = vmatprep.subr.bf16.mxu0 %v6057_v36  ;;  %v1044_v36 = vcombine.high %v1040_v30, %v1040_v30 }
  0xb5   :  { %5520 = vmatpush3.bf16.msra.mxu1 %v6056_v35  ;;  %v6107_v35 = vld [vmem:[%s7738_s1 + $0x730] sm:$0xff]  }
  0xb6   :  { %5521 = vmatprep.subr.bf16.mxu1 %v6059_v38  ;;  %v4849_v38 = vld [vmem:[%s7739_s2] ss:$0 sm:$0xff] }
  0xb7   :  { %5500 = vmatpush3.bf16.msra.mxu0 %v6058_v37 }
  0xb8   :  { %5501 = vmatprep.subr.bf16.mxu0 %v6061_v40  ;;  %v6109_v40 = vld [vmem:[%s7738_s1 + $0x7b0] sm:$0xff]  }
  0xb9   :  { %5522 = vmatpush3.bf16.msra.mxu1 %v6060_v39  ;;  %v6108_v39 = vld [vmem:[%s7738_s1 + $0x7f0] sm:$0xff]  }
  0xba   :  { %5523 = vmatprep.subr.bf16.mxu1 %v6063_v43 }
  0xbb   :  { %5502 = vmatpush3.bf16.msra.mxu0 %v6062_v42 }
  0xbc   :  { %5503 = vmatprep.subr.bf16.mxu0 %v6065_v45 }
  0xbd   :  { %5524 = vmatpush3.bf16.msra.mxu1 %v6064_v44  ;;  %v6110_v44 = vld [vmem:[%s7738_s1 + $0x768] sm:$0xff]  }
  0xbe   :  { %5525 = vmatprep.subr.bf16.mxu1 %v6067_v47 }
  0xbf   :  { %5504 = vmatpush3.bf16.msra.mxu0 %v6066_v46  ;;  %v6111_v46 = vld [vmem:[%s7738_s1 + $0x728] sm:$0xff]  }
  0xc0   :  { %5533 = vmatprep.subr.bf16.mxu0 %v6070_v50 }
  0xc1   :  { %5526 = vmatpush3.bf16.msra.mxu1 %v6069_v48 }
  0xc2   :  { %4048 = vmatmul.mubr.bf16.vlgmr.msra.gmra.mxu0 %v977_v49  ;;  %5555 = vmatprep.subr.bf16.mxu1 %v6072_v52  ;;  %v6112_v49 = vld [vmem:[%s7738_s1 + $0x7e8] sm:$0xff]  }
  0xc3   :  { %5534 = vmatpush3.bf16.msra.mxu0 %v6071_v51  ;;  %4127 = vmatprep.mubr.bf16.mxu0 %v1033_v23  ;;  %v6113_v52 = vld [vmem:[%s7738_s1 + $0x7a8] sm:$0xff]   ;;  %v6142_v23 = vld [vmem:[%s7738_s1 + $0x8b0] sm:$0xff]  }
  0xc4   :  { %4088 = vmatmul.mubr.bf16.vlgmr.msra.gmra.mxu1 %v993_v54  ;;  %5535 = vmatprep.subr.bf16.mxu0 %v6074_v55  ;;  %v6114_v54 = vld [vmem:[%s7738_s1 + $0x760] sm:$0xff]  }
  0xc5   :  { %5556 = vmatpush3.bf16.msra.mxu1 %v6073_v53  ;;  %4167 = vmatprep.mubr.bf16.mxu1 %v1043_v28  ;;  %v6144_v28 = vld [vmem:[%s7738_s1 + $0x828] sm:$0xff]  }
  0xc6   :  { %5557 = vmatprep.subr.bf16.mxu1 %v6076_v57  ;;  %v6115_v57 = vld [vmem:[%s7738_s1 + $0x720] sm:$0xff]  }
  0xc7   :  { %5536 = vmatpush3.bf16.msra.mxu0 %v6075_v56 }
  0xc8   :  { %5537 = vmatprep.subr.bf16.mxu0 %v6078_v59 }
  0xc9   :  { %5558 = vmatpush3.bf16.msra.mxu1 %v6077_v58  ;;  %v6116_v58 = vld [vmem:[%s7738_s1 + $0x7e0] sm:$0xff]  }
  0xca   :  { %5559 = vmatprep.subr.bf16.mxu1 %v6080_v61  ;;  %v6118_v61 = vld [vmem:[%s7738_s1 + $0x758] sm:$0xff]  }
  0xcb   :  { %5538 = vmatpush3.bf16.msra.mxu0 %v6079_v60  ;;  %v6117_v60 = vld [vmem:[%s7738_s1 + $0x7a0] sm:$0xff]  }
  0xcc   :  { %5539 = vmatprep.subr.bf16.mxu0 %v6082_v63  ;;  %v6120_v63 = vld [vmem:[%s7738_s1 + $0x7d8] sm:$0xff]  }
  0xcd   :  { %5560 = vmatpush3.bf16.msra.mxu1 %v6081_v62  ;;  %v6119_v62 = vld [vmem:[%s7738_s1 + $0x718] sm:$0xff]  }
  0xce   :  { %5561 = vmatprep.subr.bf16.mxu1 %v6084_v1  ;;  %v6122_v1 = vld [vmem:[%s7738_s1 + $0x750] sm:$0xff]  }
  0xcf   :  { %5540 = vmatpush3.bf16.msra.mxu0 %v6083_v0  ;;  %v6121_v0 = vld [vmem:[%s7738_s1 + $0x798] sm:$0xff]  }
  0xd0   :  { %5541 = vmatprep.subr.bf16.mxu0 %v6086_v3  ;;  %v6124_v3 = vld [vmem:[%s7738_s1 + $0x7d0] sm:$0xff]  }
  0xd1   :  { %5562 = vmatpush3.bf16.msra.mxu1 %v6085_v2  ;;  %v6123_v2 = vld [vmem:[%s7738_s1 + $0x710] sm:$0xff]  }
  0xd2   :  { %5563 = vmatprep.subr.bf16.mxu1 %v6088_v5  ;;  %v6126_v5 = vld [vmem:[%s7738_s1 + $0x748] sm:$0xff]  }
  0xd3   :  { %5542 = vmatpush3.bf16.msra.mxu0 %v6087_v4  ;;  %v6125_v4 = vld [vmem:[%s7738_s1 + $0x790] sm:$0xff]  }
  0xd4   :  { %5543 = vmatprep.subr.bf16.mxu0 %v6090_v7  ;;  %v6128_v7 = vld [vmem:[%s7738_s1 + $0x7c8] sm:$0xff]  }
  0xd5   :  { %5564 = vmatpush3.bf16.msra.mxu1 %v6089_v6  ;;  %v6127_v6 = vld [vmem:[%s7738_s1 + $0x708] sm:$0xff]  }
  0xd6   :  { %5565 = vmatprep.subr.bf16.mxu1 %v6092_v9  ;;  %v6130_v9 = vld [vmem:[%s7738_s1 + $0x740] sm:$0xff]  }
  0xd7   :  { %5544 = vmatpush3.bf16.msra.mxu0 %v6091_v8  ;;  %v6129_v8 = vld [vmem:[%s7738_s1 + $0x788] sm:$0xff]  }
  0xd8   :  { %5545 = vmatprep.subr.bf16.mxu0 %v6094_v11  ;;  %v6132_v11 = vld [vmem:[%s7738_s1 + $0x7c0] sm:$0xff]  }
  0xd9   :  { %5566 = vmatpush3.bf16.msra.mxu1 %v6093_v10  ;;  %v6131_v10 = vld [vmem:[%s7738_s1 + $0x700] sm:$0xff]  }
  0xda   :  { %5567 = vmatprep.subr.bf16.mxu1 %v6096_v13  ;;  %v1026_v13 = vrot.slane %v7073_v20, %v6466_v41  ;;  %v6140_v20 = vld [vmem:[%s7738_s1 + $0x830] sm:$0xff]  }
  0xdb   :  { %5546 = vmatpush3.bf16.msra.mxu0 %v6095_v16  ;;  %v6137_v16 = vld [vmem:[%s7738_s1 + $0x8f8] sm:$0xff]  }
  0xdc   :  { %5547 = vmatprep.subr.bf16.mxu0 %v6098_v18  ;;  %v1042_v18 = vcombine.high %v1026_v13, %v1026_v13 }
  0xdd   :  { %5568 = vmatpush3.bf16.msra.mxu1 %v6097_v17  ;;  %v6138_v17 = vld [vmem:[%s7738_s1 + $0x8b8] sm:$0xff]  }
  0xde   :  { %5569 = vmatprep.subr.bf16.mxu1 %v6100_v22  ;;  %v6141_v22 = vld [vmem:[%s7738_s1 + $0x8f0] sm:$0xff]  }
  0xdf   :  { %5548 = vmatpush3.bf16.msra.mxu0 %v6099_v21 }
  0xe0   :  { %5577 = vmatprep.subr.bf16.mxu0 %v6102_v27 }
  0xe1   :  { %5570 = vmatpush3.bf16.msra.mxu1 %v6101_v25 }
  0xe2   :  { %v5285_v37 = vpop.f32.mrf.mxu0  ;;  %4128 = vmatmul.mubr.bf16.vlgmr.msra.gmra.mxu0 %v1019_v26  ;;  %5599 = vmatprep.subr.bf16.mxu1 %v6104_v31  ;;  %v6143_v26 = vld [vmem:[%s7738_s1 + $0x868] sm:$0xff]  }
  0xe3   :  { %5578 = vmatpush3.bf16.msra.mxu0 %v6103_v29  ;;  %4207 = vmatprep.mubr.bf16.mxu0 %v1040_v30  ;;  %v6145_v31 = vld [vmem:[%s7738_s1 + $0x8e8] sm:$0xff]  }
  0xe4   :  { %v5286_v42 = vpop.f32.mrf.mxu0  ;;  %v5307_v43 = vpop.f32.mrf.mxu1  ;;  %4168 = vmatmul.mubr.bf16.vlgmr.msra.gmra.mxu1 %v1041_v33  ;;  %5579 = vmatprep.subr.bf16.mxu0 %v6106_v34  ;;  %v6146_v34 = vld [vmem:[%s7738_s1 + $0x8a8] sm:$0xff]  }
  0xe5   :  { %v5287_v45 = vadd.f32 %v5286_v42, %v5285_v37  ;;  %5600 = vmatpush3.bf16.msra.mxu1 %v6105_v32  ;;  %4247 = vmatprep.mubr.bf16.mxu1 %v1044_v36  ;;  %v6147_v36 = vld [vmem:[%s7738_s1 + $0x860] sm:$0xff]  }
  0xe6   :  { %v5288_v47 = vpop.f32.mrf.mxu0  ;;  %v5308_v48 = vpop.f32.mrf.mxu1  ;;  %5601 = vmatprep.subr.bf16.mxu1 %v6108_v39  ;;  %v6148_v39 = vld [vmem:[%s7738_s1 + $0x820] sm:$0xff]  }
  0xe7   :  { %v3650_v50 = vadd.f32 %v5287_v45, %v4849_v38  ;;  %v5309_v51 = vadd.f32 %v5308_v48, %v5307_v43  ;;  %5580 = vmatpush3.bf16.msra.mxu0 %v6107_v35  ;;  %v6150_v43 = vld [vmem:[%s7738_s1 + $0x8a0] sm:$0xff]   ;;  %v6152_v45 = vld [vmem:[%s7738_s1 + $0x818] sm:$0xff]   ;;  %v6155_v48 = vld [vmem:[%s7738_s1 + $0x850] sm:$0xff]  }
  0xe8   :  { %v5289_v53 = vpop.f32.mrf.mxu0  ;;  %5581 = vmatprep.subr.bf16.mxu0 %v6110_v44  ;;  %v5310_v55 = vpop.f32.mrf.mxu1  ;;  %v6151_v44 = vld [vmem:[%s7738_s1 + $0x858] sm:$0xff]  }
  0xe9   :  { %v7131_v56 = vadd.f32 %v5309_v51, %v3650_v50  ;;  %5602 = vmatpush3.bf16.msra.mxu1 %v6109_v40  ;;  %v6149_v40 = vld [vmem:[%s7738_s1 + $0x8e0] sm:$0xff]   ;;  %v6154_v47 = vld [vmem:[%s7738_s1 + $0x898] sm:$0xff]   ;;  %v6157_v50 = vld [vmem:[%s7738_s1 + $0x8d0] sm:$0xff]  }
  0xea   :  { %5603 = vmatprep.subr.bf16.mxu1 %v6112_v49  ;;  %v5311_v59 = vpop.f32.mrf.mxu1  ;;  %v6156_v49 = vld [vmem:[%s7738_s1 + $0x810] sm:$0xff]   ;;  %v6160_v53 = vld [vmem:[%s7738_s1 + $0x808] sm:$0xff]  }
  0xeb   :  { %5582 = vmatpush3.bf16.msra.mxu0 %v6111_v46  ;;  %v6153_v46 = vld [vmem:[%s7738_s1 + $0x8d8] sm:$0xff]   ;;  %v6158_v51 = vld [vmem:[%s7738_s1 + $0x890] sm:$0xff]   ;;  %v6161_v55 = vld [vmem:[%s7738_s1 + $0x8c8] sm:$0xff]  }
  0xec   :  { %5583 = vmatprep.subr.bf16.mxu0 %v6114_v54  ;;  %v32_v54 = vld [vmem:[%s7737_s0 + $0x20] sm:$0xff] }
  0xed   :  { %5604 = vmatpush3.bf16.msra.mxu1 %v6113_v52  ;;  %v6159_v52 = vld [vmem:[%s7738_s1 + $0x848] sm:$0xff]   ;;  %v6163_v59 = vld [vmem:[%s7738_s1 + $0x840] sm:$0xff]  }
  0xee   :  { %5605 = vmatprep.subr.bf16.mxu1 %v6116_v58  ;;  %v6162_v58 = vld [vmem:[%s7738_s1 + $0x888] sm:$0xff]  }
  0xef   :  { %5584 = vmatpush3.bf16.msra.mxu0 %v6115_v57  ;;  %v1045_v57 = vcombine.high %v32_v54, %v32_v54 }
  0xf0   :  { %5585 = vmatprep.subr.bf16.mxu0 %v6118_v61 }
  0xf1   :  { %5606 = vmatpush3.bf16.msra.mxu1 %v6117_v60  ;;  %v7287_v61 = vrot.slane %v1045_v57, %v6466_v41  ;;  %v6203_v57 = vld [vmem:[%s7738_s1 + $0xab8] sm:$0xff]  }
  0xf2   :  { %5607 = vmatprep.subr.bf16.mxu1 %v6120_v63  ;;  %v6165_v63 = vld [vmem:[%s7738_s1 + $0x8c0] sm:$0xff]  }
  0xf3   :  { %5586 = vmatpush3.bf16.msra.mxu0 %v6119_v62  ;;  %v6164_v62 = vld [vmem:[%s7738_s1 + $0x800] sm:$0xff]  }
  0xf4   :  { %5587 = vmatprep.subr.bf16.mxu0 %v6122_v1  ;;  %v1061_v1 = vcombine.high %v7287_v61, %v7287_v61 }
  0xf5   :  { %5608 = vmatpush3.bf16.msra.mxu1 %v6121_v0 }
  0xf6   :  { %5609 = vmatprep.subr.bf16.mxu1 %v6124_v3 }
  0xf7   :  { %5588 = vmatpush3.bf16.msra.mxu0 %v6123_v2  ;;  %v6166_v2 = vld [vmem:[%s7738_s1 + $0x880] sm:$0xff]  }
  0xf8   :  { %5589 = vmatprep.subr.bf16.mxu0 %v6126_v5 }
  0xf9   :  { %5610 = vmatpush3.bf16.msra.mxu1 %v6125_v4  ;;  %v6167_v4 = vld [vmem:[%s7738_s1 + $0x978] sm:$0xff]  }
  0xfa   :  { %5611 = vmatprep.subr.bf16.mxu1 %v6128_v7  ;;  %v1089_v7 = vrot.slane %v1061_v1, %v6466_v41 }
  0xfb   :  { %5590 = vmatpush3.bf16.msra.mxu0 %v6127_v6  ;;  %v6168_v6 = vld [vmem:[%s7738_s1 + $0x938] sm:$0xff]  }
  0xfc   :  { %5591 = vmatprep.subr.bf16.mxu0 %v6130_v9  ;;  %v6170_v9 = vld [vmem:[%s7738_s1 + $0x9b8] sm:$0xff]  }
  0xfd   :  { %5612 = vmatpush3.bf16.msra.mxu1 %v6129_v8  ;;  %v6169_v8 = vld [vmem:[%s7738_s1 + $0x9f8] sm:$0xff]  }
  0xfe   :  { %5613 = vmatprep.subr.bf16.mxu1 %v6132_v11  ;;  %v6171_v11 = vld [vmem:[%s7738_s1 + $0x970] sm:$0xff]  }
  0xff   :  { %5592 = vmatpush3.bf16.msra.mxu0 %v6131_v10 }
 0x100   :  { %5621 = vmatprep.subr.bf16.mxu0 %v6135_v14 }
 0x101   :  { %5614 = vmatpush3.bf16.msra.mxu1 %v6134_v12  ;;  %v6172_v12 = vld [vmem:[%s7738_s1 + $0x930] sm:$0xff]  }
 0x102   :  { %v5329_v21 = vpop.f32.mrf.mxu0  ;;  %4208 = vmatmul.mubr.bf16.vlgmr.msra.gmra.mxu0 %v1026_v13  ;;  %5643 = vmatprep.subr.bf16.mxu1 %v6137_v16  ;;  %v1093_v13 = vcombine.high %v1089_v7, %v1089_v7  ;;  %v6174_v16 = vld [vmem:[%s7738_s1 + $0x9b0] sm:$0xff]  }
 0x103   :  { %5622 = vmatpush3.bf16.msra.mxu0 %v6136_v15  ;;  %v6173_v15 = vld [vmem:[%s7738_s1 + $0x9f0] sm:$0xff]  }
 0x104   :  { %v5330_v24 = vpop.f32.mrf.mxu0  ;;  %v5351_v25 = vpop.f32.mrf.mxu1  ;;  %4248 = vmatmul.mubr.bf16.vlgmr.msra.gmra.mxu1 %v1042_v18  ;;  %5623 = vmatprep.subr.bf16.mxu0 %v6139_v19  ;;  %v6175_v19 = vld [vmem:[%s7738_s1 + $0x968] sm:$0xff]  }
 0x105   :  { %v5331_v27 = vadd.f32 %v5330_v24, %v5329_v21  ;;  %5644 = vmatpush3.bf16.msra.mxu1 %v6138_v17  ;;  %v6176_v21 = vld [vmem:[%s7738_s1 + $0x928] sm:$0xff]  }
 0x106   :  { %v5332_v29 = vpop.f32.mrf.mxu0  ;;  %v5352_v30 = vpop.f32.mrf.mxu1  ;;  %5645 = vmatprep.subr.bf16.mxu1 %v6141_v22  ;;  %v6177_v24 = vld [vmem:[%s7738_s1 + $0x9e8] sm:$0xff]  }
 0x107   :  { %v3730_v32 = vadd.f32 %v5331_v27, %v7131_v56  ;;  %v5353_v33 = vadd.f32 %v5352_v30, %v5351_v25  ;;  %5624 = vmatpush3.bf16.msra.mxu0 %v6140_v20  ;;  %v1052_v56 = vrot.slane %v32_v54, %v6466_v41  ;;  %v6178_v27 = vld [vmem:[%s7738_s1 + $0x9a8] sm:$0xff]   ;;  %v6179_v29 = vld [vmem:[%s7738_s1 + $0x960] sm:$0xff]   ;;  %v6200_v54 = vld [vmem:[%s7738_s1 + $0xa78] sm:$0xff]  }
 0x108   :  { %v5333_v35 = vpop.f32.mrf.mxu0  ;;  %5625 = vmatprep.subr.bf16.mxu0 %v6143_v26  ;;  %v5354_v37 = vpop.f32.mrf.mxu1 }
 0x109   :  { %v7232_v38 = vadd.f32 %v5353_v33, %v3730_v32  ;;  %5646 = vmatpush3.bf16.msra.mxu1 %v6142_v23  ;;  %v1060_v60 = vcombine.high %v1052_v56, %v1052_v56  ;;  %v1068_v3 = vrot.slane %v1052_v56, %v6466_v41  ;;  %v6180_v32 = vld [vmem:[%s7738_s1 + $0x920] sm:$0xff]   ;;  %v6184_v37 = vld [vmem:[%s7738_s1 + $0x918] sm:$0xff]  }
 0x10a   :  { %5647 = vmatprep.subr.bf16.mxu1 %v6145_v31  ;;  %v5355_v42 = vpop.f32.mrf.mxu1  ;;  %v6181_v33 = vld [vmem:[%s7738_s1 + $0x9e0] sm:$0xff]   ;;  %v6202_v56 = vld [vmem:[%s7738_s1 + $0xaf8] sm:$0xff]  }
 0x10b   :  { %5626 = vmatpush3.bf16.msra.mxu0 %v6144_v28  ;;  %v1082_v0 = vrot.slane %v1060_v60, %v6466_v41  ;;  %v1090_v10 = vcombine.high %v1068_v3, %v1068_v3  ;;  %v6182_v35 = vld [vmem:[%s7738_s1 + $0x9a0] sm:$0xff]   ;;  %v6188_v42 = vld [vmem:[%s7738_s1 + $0x910] sm:$0xff]  }
 0x10c   :  { %5627 = vmatprep.subr.bf16.mxu0 %v6147_v36  ;;  %v6183_v36 = vld [vmem:[%s7738_s1 + $0x958] sm:$0xff]   ;;  %v6205_v60 = vld [vmem:[%s7738_s1 + $0xa30] sm:$0xff]  }
 0x10d   :  { %5648 = vmatpush3.bf16.msra.mxu1 %v6146_v34  ;;  %4287 = vmatprep.mubr.bf16.mxu0 %v1082_v0  ;;  %v1092_v5 = vcombine.high %v1082_v0, %v1082_v0 }
 0x10e   :  { %5649 = vmatprep.subr.bf16.mxu1 %v6149_v40  ;;  %v6187_v40 = vld [vmem:[%s7738_s1 + $0x950] sm:$0xff]  }
 0x10f   :  { %5628 = vmatpush3.bf16.msra.mxu0 %v6148_v39  ;;  %4327 = vmatprep.mubr.bf16.mxu1 %v1092_v5  ;;  %v6186_v39 = vld [vmem:[%s7738_s1 + $0x998] sm:$0xff]  }
 0x110   :  { %5629 = vmatprep.subr.bf16.mxu0 %v6151_v44  ;;  %v6190_v44 = vld [vmem:[%s7738_s1 + $0x990] sm:$0xff]  }
 0x111   :  { %5650 = vmatpush3.bf16.msra.mxu1 %v6150_v43  ;;  %v6189_v43 = vld [vmem:[%s7738_s1 + $0x9d0] sm:$0xff]  }
 0x112   :  { %5651 = vmatprep.subr.bf16.mxu1 %v6153_v46  ;;  %v6192_v46 = vld [vmem:[%s7738_s1 + $0x908] sm:$0xff]  }
 0x113   :  { %5630 = vmatpush3.bf16.msra.mxu0 %v6152_v45  ;;  %v6191_v45 = vld [vmem:[%s7738_s1 + $0x948] sm:$0xff]  }
 0x114   :  { %5631 = vmatprep.subr.bf16.mxu0 %v6155_v48  ;;  %v6194_v48 = vld [vmem:[%s7738_s1 + $0x988] sm:$0xff]  }
 0x115   :  { %5652 = vmatpush3.bf16.msra.mxu1 %v6154_v47  ;;  %v6193_v47 = vld [vmem:[%s7738_s1 + $0x9c8] sm:$0xff]  }
 0x116   :  { %5653 = vmatprep.subr.bf16.mxu1 %v6157_v50  ;;  %v6196_v50 = vld [vmem:[%s7738_s1 + $0x900] sm:$0xff]  }
 0x117   :  { %5632 = vmatpush3.bf16.msra.mxu0 %v6156_v49  ;;  %v6195_v49 = vld [vmem:[%s7738_s1 + $0x940] sm:$0xff]  }
 0x118   :  { %5633 = vmatprep.subr.bf16.mxu0 %v6159_v52  ;;  %v6199_v52 = vld [vmem:[%s7738_s1 + $0x980] sm:$0xff]  }
 0x119   :  { %5654 = vmatpush3.bf16.msra.mxu1 %v6158_v51  ;;  %v6197_v51 = vld [vmem:[%s7738_s1 + $0x9c0] sm:$0xff]  }
 0x11a   :  { %5655 = vmatprep.subr.bf16.mxu1 %v6161_v55  ;;  %v6201_v55 = vld [vmem:[%s7738_s1 + $0xa38] sm:$0xff]  }
 0x11b   :  { %5634 = vmatpush3.bf16.msra.mxu0 %v6160_v53  ;;  %v1075_v53 = vrot.slane %v7287_v61, %v6466_v41 }
 0x11c   :  { %5635 = vmatprep.subr.bf16.mxu0 %v6163_v59  ;;  %v6204_v59 = vld [vmem:[%s7738_s1 + $0xa70] sm:$0xff]  }
 0x11d   :  { %5656 = vmatpush3.bf16.msra.mxu1 %v6162_v58  ;;  %v1091_v58 = vcombine.high %v1075_v53, %v1075_v53 }
 0x11e   :  { %5657 = vmatprep.subr.bf16.mxu1 %v6165_v63  ;;  %v6207_v63 = vld [vmem:[%s7738_s1 + $0xab0] sm:$0xff]  }
 0x11f   :  { %5636 = vmatpush3.bf16.msra.mxu0 %v6164_v62  ;;  %v6206_v62 = vld [vmem:[%s7738_s1 + $0xaf0] sm:$0xff]  }
 0x120   :  { %5665 = vmatprep.subr.bf16.mxu0 %v6167_v4  ;;  %v6209_v4 = vld [vmem:[%s7738_s1 + $0xa28] sm:$0xff]  }
 0x121   :  { %5658 = vmatpush3.bf16.msra.mxu1 %v6166_v2  ;;  %v6208_v2 = vld [vmem:[%s7738_s1 + $0xa68] sm:$0xff]  }
 0x122   :  { %v5373_v14 = vpop.f32.mrf.mxu0  ;;  %4288 = vmatmul.mubr.bf16.vlgmr.msra.gmra.mxu0 %v1068_v3  ;;  %5687 = vmatprep.subr.bf16.mxu1 %v6169_v8 }
 0x123   :  { %5666 = vmatpush3.bf16.msra.mxu0 %v6168_v6  ;;  %4367 = vmatprep.mubr.bf16.mxu0 %v1089_v7  ;;  %v6210_v7 = vld [vmem:[%s7738_s1 + $0xae8] sm:$0xff]  }
 0x124   :  { %v5374_v17 = vpop.f32.mrf.mxu0  ;;  %v5395_v18 = vpop.f32.mrf.mxu1  ;;  %4328 = vmatmul.mubr.bf16.vlgmr.msra.gmra.mxu1 %v1090_v10  ;;  %5667 = vmatprep.subr.bf16.mxu0 %v6171_v11  ;;  %v6211_v10 = vld [vmem:[%s7738_s1 + $0xaa8] sm:$0xff]  }
 0x125   :  { %v5375_v20 = vadd.f32 %v5374_v17, %v5373_v14  ;;  %5688 = vmatpush3.bf16.msra.mxu1 %v6170_v9  ;;  %4407 = vmatprep.mubr.bf16.mxu1 %v1093_v13 }
 0x126   :  { %v5376_v22 = vpop.f32.mrf.mxu0  ;;  %v5396_v23 = vpop.f32.mrf.mxu1  ;;  %5689 = vmatprep.subr.bf16.mxu1 %v6173_v15  ;;  %v6213_v15 = vld [vmem:[%s7738_s1 + $0xa20] sm:$0xff]  }
 0x127   :  { %v3810_v25 = vadd.f32 %v5375_v20, %v7232_v38  ;;  %v5397_v26 = vadd.f32 %v5396_v23, %v5395_v18  ;;  %5668 = vmatpush3.bf16.msra.mxu0 %v6172_v12  ;;  %v6185_v38 = vld [vmem:[%s7738_s1 + $0x9d8] sm:$0xff]   ;;  %v6212_v12 = vld [vmem:[%s7738_s1 + $0xa60] sm:$0xff]   ;;  %v6220_v23 = vld [vmem:[%s7738_s1 + $0xa50] sm:$0xff]  }
 0x128   :  { %v5377_v28 = vpop.f32.mrf.mxu0  ;;  %5669 = vmatprep.subr.bf16.mxu0 %v6175_v19  ;;  %v5398_v30 = vpop.f32.mrf.mxu1  ;;  %v6215_v18 = vld [vmem:[%s7738_s1 + $0xaa0] sm:$0xff]   ;;  %v6216_v19 = vld [vmem:[%s7738_s1 + $0xa58] sm:$0xff]  }
 0x129   :  { %v7343_v31 = vadd.f32 %v5397_v26, %v3810_v25  ;;  %5690 = vmatpush3.bf16.msra.mxu1 %v6174_v16  ;;  %v6214_v16 = vld [vmem:[%s7738_s1 + $0xae0] sm:$0xff]   ;;  %v6217_v20 = vld [vmem:[%s7738_s1 + $0xa18] sm:$0xff]   ;;  %v6222_v25 = vld [vmem:[%s7738_s1 + $0xad0] sm:$0xff]  }
 0x12a   :  { %5691 = vmatprep.subr.bf16.mxu1 %v6177_v24  ;;  %v5399_v34 = vpop.f32.mrf.mxu1  ;;  %v6219_v22 = vld [vmem:[%s7738_s1 + $0xa98] sm:$0xff]   ;;  %v6221_v24 = vld [vmem:[%s7738_s1 + $0xa10] sm:$0xff]   ;;  %v6226_v28 = vld [vmem:[%s7738_s1 + $0xac8] sm:$0xff]  }
 0x12b   :  { %5670 = vmatpush3.bf16.msra.mxu0 %v6176_v21  ;;  %v6218_v21 = vld [vmem:[%s7738_s1 + $0xad8] sm:$0xff]   ;;  %v6223_v26 = vld [vmem:[%s7738_s1 + $0xa90] sm:$0xff]   ;;  %v6225_v30 = vld [vmem:[%s7738_s1 + $0xa08] sm:$0xff]  }
 0x12c   :  { %5671 = vmatprep.subr.bf16.mxu0 %v6179_v29  ;;  %v33_v29 = vld [vmem:[%s7737_s0 + $0x28] sm:$0xff] }
 0x12d   :  { %5692 = vmatpush3.bf16.msra.mxu1 %v6178_v27  ;;  %v6224_v27 = vld [vmem:[%s7738_s1 + $0xa48] sm:$0xff]  }
 0x12e   :  { %5693 = vmatprep.subr.bf16.mxu1 %v6181_v33  ;;  %v6228_v33 = vld [vmem:[%s7738_s1 + $0xa40] sm:$0xff]   ;;  %v6227_v34 = vld [vmem:[%s7738_s1 + $0xa88] sm:$0xff]  }
 0x12f   :  { %5672 = vmatpush3.bf16.msra.mxu0 %v6180_v32  ;;  %v1094_v32 = vcombine.high %v33_v29, %v33_v29 }
 0x130   :  { %5673 = vmatprep.subr.bf16.mxu0 %v6183_v36 }
 0x131   :  { %5694 = vmatpush3.bf16.msra.mxu1 %v6182_v35  ;;  %v7499_v36 = vrot.slane %v1094_v32, %v6466_v41  ;;  %v6267_v32 = vld [vmem:[%s7738_s1 + $0xc70] sm:$0xff]  }
 0x132   :  { %5695 = vmatprep.subr.bf16.mxu1 %v6185_v38  ;;  %v6229_v38 = vld [vmem:[%s7738_s1 + $0xa00] sm:$0xff]  }
 0x133   :  { %5674 = vmatpush3.bf16.msra.mxu0 %v6184_v37  ;;  %v6230_v37 = vld [vmem:[%s7738_s1 + $0xac0] sm:$0xff]  }
 0x134   :  { %5675 = vmatprep.subr.bf16.mxu0 %v6187_v40  ;;  %v1110_v40 = vcombine.high %v7499_v36, %v7499_v36 }
 0x135   :  { %5696 = vmatpush3.bf16.msra.mxu1 %v6186_v39 }
 0x136   :  { %5697 = vmatprep.subr.bf16.mxu1 %v6189_v43  ;;  %v6232_v43 = vld [vmem:[%s7738_s1 + $0xb78] sm:$0xff]  }
 0x137   :  { %5676 = vmatpush3.bf16.msra.mxu0 %v6188_v42 }
 0x138   :  { %5677 = vmatprep.subr.bf16.mxu0 %v6191_v45 }
 0x139   :  { %5698 = vmatpush3.bf16.msra.mxu1 %v6190_v44  ;;  %v6231_v44 = vld [vmem:[%s7738_s1 + $0xa80] sm:$0xff]  }
 0x13a   :  { %5699 = vmatprep.subr.bf16.mxu1 %v6193_v47  ;;  %v6234_v47 = vld [vmem:[%s7738_s1 + $0xbf8] sm:$0xff]  }
 0x13b   :  { %5678 = vmatpush3.bf16.msra.mxu0 %v6192_v46  ;;  %v1138_v46 = vrot.slane %v1110_v40, %v6466_v41 }
 0x13c   :  { %5679 = vmatprep.subr.bf16.mxu0 %v6195_v49 }
 0x13d   :  { %5700 = vmatpush3.bf16.msra.mxu1 %v6194_v48  ;;  %v6233_v48 = vld [vmem:[%s7738_s1 + $0xb38] sm:$0xff]  }
 0x13e   :  { %5701 = vmatprep.subr.bf16.mxu1 %v6197_v51  ;;  %v6235_v51 = vld [vmem:[%s7738_s1 + $0xbb8] sm:$0xff]  }
 0x13f   :  { %5680 = vmatpush3.bf16.msra.mxu0 %v6196_v50  ;;  %v6236_v50 = vld [vmem:[%s7738_s1 + $0xb70] sm:$0xff]  }
 0x140   :  { %5709 = vmatprep.subr.bf16.mxu0 %v6200_v54  ;;  %v6238_v54 = vld [vmem:[%s7738_s1 + $0xbf0] sm:$0xff]  }
 0x141   :  { %5702 = vmatpush3.bf16.msra.mxu1 %v6199_v52  ;;  %v1142_v52 = vcombine.high %v1138_v46, %v1138_v46 }
 0x142   :  { %v5417_v61 = vpop.f32.mrf.mxu0  ;;  %4368 = vmatmul.mubr.bf16.vlgmr.msra.gmra.mxu0 %v1075_v53  ;;  %5731 = vmatprep.subr.bf16.mxu1 %v6202_v56 }
 0x143   :  { %5710 = vmatpush3.bf16.msra.mxu0 %v6201_v55  ;;  %v6237_v55 = vld [vmem:[%s7738_s1 + $0xb30] sm:$0xff]  }
 0x144   :  { %v5418_v0 = vpop.f32.mrf.mxu0  ;;  %v5439_v1 = vpop.f32.mrf.mxu1  ;;  %4408 = vmatmul.mubr.bf16.vlgmr.msra.gmra.mxu1 %v1091_v58  ;;  %5711 = vmatprep.subr.bf16.mxu0 %v6204_v59  ;;  %v6240_v58 = vld [vmem:[%s7738_s1 + $0xb68] sm:$0xff]  }
 0x145   :  { %v5419_v3 = vadd.f32 %v5418_v0, %v5417_v61  ;;  %5732 = vmatpush3.bf16.msra.mxu1 %v6203_v57 }
 0x146   :  { %v5420_v5 = vpop.f32.mrf.mxu0  ;;  %v5440_v6 = vpop.f32.mrf.mxu1  ;;  %5733 = vmatprep.subr.bf16.mxu1 %v6206_v62 }
 0x147   :  { %v3890_v8 = vadd.f32 %v5419_v3, %v7343_v31  ;;  %v5441_v9 = vadd.f32 %v5440_v6, %v5439_v1  ;;  %5712 = vmatpush3.bf16.msra.mxu0 %v6205_v60  ;;  %v1101_v31 = vrot.slane %v33_v29, %v6466_v41  ;;  %v6239_v60 = vld [vmem:[%s7738_s1 + $0xbb0] sm:$0xff]   ;;  %v6264_v29 = vld [vmem:[%s7738_s1 + $0xb80] sm:$0xff]  }
 0x148   :  { %v5421_v11 = vpop.f32.mrf.mxu0  ;;  %5713 = vmatprep.subr.bf16.mxu0 %v6208_v2  ;;  %v5442_v13 = vpop.f32.mrf.mxu1  ;;  %v6241_v2 = vld [vmem:[%s7738_s1 + $0xb28] sm:$0xff]  }
 0x149   :  { %v7444_v14 = vadd.f32 %v5441_v9, %v3890_v8  ;;  %5734 = vmatpush3.bf16.msra.mxu1 %v6207_v63  ;;  %v1109_v35 = vcombine.high %v1101_v31, %v1101_v31  ;;  %v1117_v42 = vrot.slane %v1101_v31, %v6466_v41  ;;  %v6242_v63 = vld [vmem:[%s7738_s1 + $0xbe8] sm:$0xff]   ;;  %v6246_v8 = vld [vmem:[%s7738_s1 + $0xbe0] sm:$0xff]   ;;  %v6248_v11 = vld [vmem:[%s7738_s1 + $0xb58] sm:$0xff]  }
 0x14a   :  { %5735 = vmatprep.subr.bf16.mxu1 %v6210_v7  ;;  %v5443_v17 = vpop.f32.mrf.mxu1  ;;  %v6243_v7 = vld [vmem:[%s7738_s1 + $0xba8] sm:$0xff]   ;;  %v6250_v13 = vld [vmem:[%s7738_s1 + $0xbd8] sm:$0xff]  }
 0x14b   :  { %5714 = vmatpush3.bf16.msra.mxu0 %v6209_v4  ;;  %v1131_v39 = vrot.slane %v1109_v35, %v6466_v41  ;;  %v1139_v49 = vcombine.high %v1117_v42, %v1117_v42  ;;  %v6244_v4 = vld [vmem:[%s7738_s1 + $0xb60] sm:$0xff]   ;;  %v6254_v17 = vld [vmem:[%s7738_s1 + $0xbd0] sm:$0xff]  }
 0x14c   :  { %5715 = vmatprep.subr.bf16.mxu0 %v6212_v12  ;;  %v6247_v12 = vld [vmem:[%s7738_s1 + $0xba0] sm:$0xff]  }
 0x14d   :  { %5736 = vmatpush3.bf16.msra.mxu1 %v6211_v10  ;;  %4447 = vmatprep.mubr.bf16.mxu0 %v1131_v39  ;;  %v1141_v45 = vcombine.high %v1131_v39, %v1131_v39  ;;  %v6245_v10 = vld [vmem:[%s7738_s1 + $0xb20] sm:$0xff]  }
 0x14e   :  { %5737 = vmatprep.subr.bf16.mxu1 %v6214_v16  ;;  %v6251_v16 = vld [vmem:[%s7738_s1 + $0xb98] sm:$0xff]  }
 0x14f   :  { %5716 = vmatpush3.bf16.msra.mxu0 %v6213_v15  ;;  %4487 = vmatprep.mubr.bf16.mxu1 %v1141_v45  ;;  %v6252_v15 = vld [vmem:[%s7738_s1 + $0xb50] sm:$0xff]   ;;  %v6271_v45 = vld [vmem:[%s7738_s1 + $0xc60] sm:$0xff]  }
 0x150   :  { %5717 = vmatprep.subr.bf16.mxu0 %v6216_v19  ;;  %v6256_v19 = vld [vmem:[%s7738_s1 + $0xb48] sm:$0xff]  }
 0x151   :  { %5738 = vmatpush3.bf16.msra.mxu1 %v6215_v18  ;;  %v6253_v18 = vld [vmem:[%s7738_s1 + $0xb10] sm:$0xff]  }
 0x152   :  { %5739 = vmatprep.subr.bf16.mxu1 %v6218_v21  ;;  %v6258_v21 = vld [vmem:[%s7738_s1 + $0xbc8] sm:$0xff]  }
 0x153   :  { %5718 = vmatpush3.bf16.msra.mxu0 %v6217_v20  ;;  %v6255_v20 = vld [vmem:[%s7738_s1 + $0xb90] sm:$0xff]  }
 0x154   :  { %5719 = vmatprep.subr.bf16.mxu0 %v6220_v23  ;;  %v6260_v23 = vld [vmem:[%s7738_s1 + $0xb40] sm:$0xff]  }
 0x155   :  { %5740 = vmatpush3.bf16.msra.mxu1 %v6219_v22  ;;  %v6257_v22 = vld [vmem:[%s7738_s1 + $0xb08] sm:$0xff]  }
 0x156   :  { %5741 = vmatprep.subr.bf16.mxu1 %v6222_v25  ;;  %v6262_v25 = vld [vmem:[%s7738_s1 + $0xbc0] sm:$0xff]  }
 0x157   :  { %5720 = vmatpush3.bf16.msra.mxu0 %v6221_v24  ;;  %v6259_v24 = vld [vmem:[%s7738_s1 + $0xb88] sm:$0xff]  }
 0x158   :  { %5721 = vmatprep.subr.bf16.mxu0 %v6224_v27  ;;  %v1124_v27 = vrot.slane %v7499_v36, %v6466_v41 }
 0x159   :  { %5742 = vmatpush3.bf16.msra.mxu1 %v6223_v26  ;;  %v6261_v26 = vld [vmem:[%s7738_s1 + $0xb00] sm:$0xff]  }
 0x15a   :  { %5743 = vmatprep.subr.bf16.mxu1 %v6226_v28  ;;  %v6265_v28 = vld [vmem:[%s7738_s1 + $0xc78] sm:$0xff]   ;;  %v1140_v31 = vcombine.high %v1124_v27, %v1124_v27 }
 0x15b   :  { %5722 = vmatpush3.bf16.msra.mxu0 %v6225_v30  ;;  %v6266_v30 = vld [vmem:[%s7738_s1 + $0xc38] sm:$0xff]  }
 0x15c   :  { %5723 = vmatprep.subr.bf16.mxu0 %v6228_v33 }
 0x15d   :  { %5744 = vmatpush3.bf16.msra.mxu1 %v6227_v34  ;;  %v6268_v34 = vld [vmem:[%s7738_s1 + $0xc30] sm:$0xff]  }
 0x15e   :  { %5745 = vmatprep.subr.bf16.mxu1 %v6230_v37  ;;  %v6269_v37 = vld [vmem:[%s7738_s1 + $0xc68] sm:$0xff]  }
 0x15f   :  { %5724 = vmatpush3.bf16.msra.mxu0 %v6229_v38 }
 0x160   :  { %5753 = vmatprep.subr.bf16.mxu0 %v6232_v43 }
 0x161   :  { %5746 = vmatpush3.bf16.msra.mxu1 %v6231_v44  ;;  %v6270_v44 = vld [vmem:[%s7738_s1 + $0xc28] sm:$0xff]  }
 0x162   :  { %v5461_v53 = vpop.f32.mrf.mxu0  ;;  %4448 = vmatmul.mubr.bf16.vlgmr.msra.gmra.mxu0 %v1117_v42  ;;  %5775 = vmatprep.subr.bf16.mxu1 %v6234_v47 }
 0x163   :  { %5754 = vmatpush3.bf16.msra.mxu0 %v6233_v48  ;;  %4527 = vmatprep.mubr.bf16.mxu0 %v1138_v46  ;;  %v4850_v46 = vld.sshfl [vmem:[%s7737_s0 + $0x30] sm:$0x11 pattern:$0x75316420] }
 0x164   :  { %v5462_v56 = vpop.f32.mrf.mxu0  ;;  %v5483_v57 = vpop.f32.mrf.mxu1  ;;  %4488 = vmatmul.mubr.bf16.vlgmr.msra.gmra.mxu1 %v1139_v49  ;;  %5755 = vmatprep.subr.bf16.mxu0 %v6236_v50  ;;  %v1150_v49 = vcombine.high %v4850_v46, %v4850_v46 }
 0x165   :  { %v5463_v59 = vadd.f32 %v5462_v56, %v5461_v53  ;;  %5776 = vmatpush3.bf16.msra.mxu1 %v6235_v51  ;;  %4567 = vmatprep.mubr.bf16.mxu1 %v1142_v52  ;;  %v6272_v51 = vld [vmem:[%s7738_s1 + $0xc20] sm:$0xff]   ;;  %v6273_v52 = vld [vmem:[%s7738_s1 + $0xc58] sm:$0xff]   ;;  %v6275_v56 = vld [vmem:[%s7738_s1 + $0xc50] sm:$0xff]  }
 0x166   :  { %v5464_v61 = vpop.f32.mrf.mxu0  ;;  %v5484_v62 = vpop.f32.mrf.mxu1  ;;  %5777 = vmatprep.subr.bf16.mxu1 %v6238_v54  ;;  %v1164_v54 = vrot.slane %v1150_v49, %v6466_v41 }
 0x167   :  { %v3970_v0 = vadd.f32 %v5463_v59, %v7444_v14  ;;  %v5485_v1 = vadd.f32 %v5484_v62, %v5483_v57  ;;  %5756 = vmatpush3.bf16.msra.mxu0 %v6237_v55  ;;  %v6249_v14 = vld [vmem:[%s7738_s1 + $0xb18] sm:$0xff]  }
 0x168   :  { %v5465_v3 = vpop.f32.mrf.mxu0  ;;  %5757 = vmatprep.subr.bf16.mxu0 %v6240_v58  ;;  %v5486_v5 = vpop.f32.mrf.mxu1  ;;  %v6274_v55 = vld [vmem:[%s7738_s1 + $0xc18] sm:$0xff]  }
 0x169   :  { %v7552_v6 = vadd.f32 %v5485_v1, %v3970_v0  ;;  %5778 = vmatpush3.bf16.msra.mxu1 %v6239_v60 }
 0x16a   :  { %5779 = vmatprep.subr.bf16.mxu1 %v6242_v63  ;;  %v5487_v9 = vpop.f32.mrf.mxu1 }
 0x16b   :  { %5758 = vmatpush3.bf16.msra.mxu0 %v6241_v2 }
 0x16c   :  { %5759 = vmatprep.subr.bf16.mxu0 %v6244_v4 }
 0x16d   :  { %5780 = vmatpush3.bf16.msra.mxu1 %v6243_v7 }
 0x16e   :  { %5781 = vmatprep.subr.bf16.mxu1 %v6246_v8 }
 0x16f   :  { %5760 = vmatpush3.bf16.msra.mxu0 %v6245_v10 }
 0x170   :  { %5761 = vmatprep.subr.bf16.mxu0 %v6248_v11 }
 0x171   :  { %5782 = vmatpush3.bf16.msra.mxu1 %v6247_v12 }
 0x172   :  { %5783 = vmatprep.subr.bf16.mxu1 %v6250_v13 }
 0x173   :  { %5762 = vmatpush3.bf16.msra.mxu0 %v6249_v14 }
 0x174   :  { %5763 = vmatprep.subr.bf16.mxu0 %v6252_v15 }
 0x175   :  { %5784 = vmatpush3.bf16.msra.mxu1 %v6251_v16 }
 0x176   :  { %5785 = vmatprep.subr.bf16.mxu1 %v6254_v17 }
 0x177   :  { %5764 = vmatpush3.bf16.msra.mxu0 %v6253_v18 }
 0x178   :  { %5765 = vmatprep.subr.bf16.mxu0 %v6256_v19 }
 0x179   :  { %5786 = vmatpush3.bf16.msra.mxu1 %v6255_v20 }
 0x17a   :  { %5787 = vmatprep.subr.bf16.mxu1 %v6258_v21 }
 0x17b   :  { %5766 = vmatpush3.bf16.msra.mxu0 %v6257_v22 }
 0x17c   :  { %5767 = vmatprep.subr.bf16.mxu0 %v6260_v23 }
 0x17d   :  { %5788 = vmatpush3.bf16.msra.mxu1 %v6259_v24 }
 0x17e   :  { %5789 = vmatprep.subr.bf16.mxu1 %v6262_v25 }
 0x17f   :  { %5768 = vmatpush3.bf16.msra.mxu0 %v6261_v26 }
 0x180   :  { %5797 = vmatprep.subr.bf16.mxu0 %v6265_v28 }
 0x181   :  { %5790 = vmatpush3.bf16.msra.mxu1 %v6264_v29 }
 0x182   :  { %v5505_v33 = vpop.f32.mrf.mxu0  ;;  %4528 = vmatmul.mubr.bf16.vlgmr.msra.gmra.mxu0 %v1124_v27 }
 0x183   :  { %5798 = vmatpush3.bf16.msra.mxu0 %v6266_v30  ;;  %4607 = vmatprep.mubr.bf16.mxu0 %v1164_v54 }
 0x184   :  { %v5506_v35 = vpop.f32.mrf.mxu0  ;;  %v5527_v36 = vpop.f32.mrf.mxu1  ;;  %4568 = vmatmul.mubr.bf16.vlgmr.msra.gmra.mxu1 %v1140_v31  ;;  %5799 = vmatprep.subr.bf16.mxu0 %v6267_v32 }
 0x185   :  { %v5507_v38 = vadd.f32 %v5506_v35, %v5505_v33 }
 0x186   :  { %v5508_v39 = vpop.f32.mrf.mxu0  ;;  %v5528_v40 = vpop.f32.mrf.mxu1 }
 0x187   :  { %v4050_v42 = vadd.f32 %v5507_v38, %v7552_v6  ;;  %v5529_v43 = vadd.f32 %v5528_v40, %v5527_v36  ;;  %5800 = vmatpush3.bf16.msra.mxu0 %v6268_v34 }
 0x188   :  { %v5509_v47 = vpop.f32.mrf.mxu0  ;;  %5801 = vmatprep.subr.bf16.mxu0 %v6269_v37  ;;  %v5530_v48 = vpop.f32.mrf.mxu1 }
 0x189   :  { %v4090_v50 = vadd.f32 %v5529_v43, %v4050_v42 }
 0x18a   :  { %v5531_v53 = vpop.f32.mrf.mxu1 }
 0x18b   :  { %5802 = vmatpush3.bf16.msra.mxu0 %v6270_v44 }
 0x18c   :  { %5803 = vmatprep.subr.bf16.mxu0 %v6271_v45 }
 0x18f   :  { %5804 = vmatpush3.bf16.msra.mxu0 %v6272_v51 }
 0x190   :  { %5805 = vmatprep.subr.bf16.mxu0 %v6273_v52 }
 0x191   :  { %12 = vsyncpa [#allocation3], 0  ;;  %v6276_v57 = vld [vmem:[%s7738_s1 + $0xc10] sm:$0xff]   ;;  %v6277_v58 = vld [vmem:[%s7738_s1 + $0xc48] sm:$0xff]   ;;  %v1157_v62 = vrot.slane %v4850_v46, %v6466_v41  ;;  %vm4688_vm0 = vcmask 1043456   ;;  %v6318_v23 = vmov 0.0  }
 0x192   :  { %v6278_v59 = vld [vmem:[%s7738_s1 + $0xc08] sm:$0xff]   ;;  %v6279_v60 = vld [vmem:[%s7738_s1 + $0xc40] sm:$0xff]   ;;  %v6281_v21 = vld [vmem:[%s7740_s3 + $0x38] ss:$0 sps:$4 sm:$0xff]   ;;  %5835 = vmatprep.subr.bf16.mxu1 %v6318_v23  ;;  %vm6319_vm1 = vmmov 0   ;;  %vm4789_vm2 = vcmask 1041408  }
 0x193   :  { %5806 = vmatpush3.bf16.msra.mxu0 %v6274_v55  ;;  %v6280_v61 = vld [vmem:[%s7738_s1 + $0xc00] sm:$0xff]   ;;  %v4690_v24 = vsel %vm4688_vm0, %v6281_v21, 0  ;;  %v6282_v25 = vld [vmem:[%s7740_s3 + $0x30] sm:$0xff]   ;;  %v6283_v26 = vld [vmem:[%s7740_s3 + $0x28] sm:$0xff]   ;;  %5851 = vmatprep.mubr.msk.bf16.mxu1 %vm6319_vm1, %v6318_v23  ;;  %vm4684_vm3 = vcmask 982016   ;;  %vm4785_vm4 = vcmask 687104  }
 0x194   :  { %5807 = vmatprep.subr.bf16.mxu0 %v6275_v56  ;;  %5836 = vmatpush3.bf16.msra.mxu1 %v4690_v24  ;;  %v6284_v27 = vld [vmem:[%s7740_s3 + $0x20] sm:$0xff]   ;;  %v6285_v28 = vld [vmem:[%s7740_s3 + $0x18] sm:$0xff]   ;;  %v6286_v29 = vld [vmem:[%s7740_s3 + $0x10] sm:$0xff]   ;;  %s6320_s23 = smov [#allocation2]   ;;  %vm4833_vm5 = vcmask 74752  }
 0x195   :  { %5837 = vmatprep.subr.bf16.mxu1 %v6318_v23  ;;  %v6287_v33 = vld [vmem:[%s7740_s3 + $0x8] sm:$0xff]   ;;  %v6288_v42 = vld [vmem:[%s7740_s3] sm:$0xff]   ;;  %v6291_v48 = vld [vmem:[%s7742_s5 + $0x18] sm:$0xff]  }
 0x196   :  { %v6289_v45 = vld [vmem:[%s7742_s5 + $0x28] ss:$0 sps:$4 sm:$0x33]   ;;  %v6290_v47 = vld [vmem:[%s7742_s5 + $0x20] sm:$0xff]   ;;  %v6292_v49 = vld [vmem:[%s7742_s5 + $0x10] sm:$0xff]  }
 0x197   :  { %5808 = vmatpush3.bf16.msra.mxu0 %v6276_v57  ;;  %v4791_v46 = vsel %vm4789_vm2, %v6289_v45, 0 }
 0x198   :  { %5809 = vmatprep.subr.bf16.mxu0 %v6277_v58  ;;  %5838 = vmatpush3.bf16.msra.mxu1 %v6282_v25 }
 0x199   :  { %5839 = vmatprep.subr.bf16.mxu1 %v6318_v23 }
 0x19b   :  { %5810 = vmatpush3.bf16.msra.mxu0 %v6278_v59 }
 0x19c   :  { %5811 = vmatprep.subr.bf16.mxu0 %v6279_v60  ;;  %5840 = vmatpush3.bf16.msra.mxu1 %v6283_v26 }
 0x19d   :  { %5841 = vmatprep.subr.bf16.mxu1 %v6318_v23 }
 0x19f   :  { %5812 = vmatpush3.bf16.msra.mxu0 %v6280_v61 }
 0x1a0   :  { %5855 = vmatprep.subr.bf16.mxu0 %v6318_v23  ;;  %5842 = vmatpush3.bf16.msra.mxu1 %v6284_v27 }
 0x1a1   :  { %5843 = vmatprep.subr.bf16.mxu1 %v6318_v23 }
 0x1a2   :  { %v5549_v63 = vpop.f32.mrf.mxu0  ;;  %4608 = vmatmul.mubr.bf16.vlgmr.msra.gmra.mxu0 %v1157_v62 }
 0x1a3   :  { %5867 = vmatprep.mubr.msk.bf16.mxu0 %vm6319_vm1, %v6318_v23  ;;  %5856 = vmatpush3.bf16.msra.mxu0 %v4791_v46 }
 0x1a4   :  { %v5550_v0 = vpop.f32.mrf.mxu0  ;;  %v5571_v1 = vpop.f32.mrf.mxu1  ;;  %5844 = vmatpush3.bf16.msra.mxu1 %v6285_v28  ;;  %5857 = vmatprep.subr.bf16.mxu0 %v6318_v23 }
 0x1a5   :  { %v5551_v2 = vadd.f32 %v5550_v0, %v5549_v63  ;;  %5845 = vmatprep.subr.bf16.mxu1 %v6318_v23 }
 0x1a6   :  { %v5552_v3 = vpop.f32.mrf.mxu0  ;;  %v5572_v4 = vpop.f32.mrf.mxu1 }
 0x1a7   :  { %v4130_v5 = vadd.f32 %v5551_v2, %v4090_v50  ;;  %v5573_v6 = vadd.f32 %v5572_v4, %v5571_v1  ;;  %5858 = vmatpush3.bf16.msra.mxu0 %v6290_v47 }
 0x1a8   :  { %v5553_v7 = vpop.f32.mrf.mxu0  ;;  %v5574_v8 = vpop.f32.mrf.mxu1  ;;  %5846 = vmatpush3.bf16.msra.mxu1 %v6286_v29  ;;  %5859 = vmatprep.subr.bf16.mxu0 %v6318_v23 }
 0x1a9   :  { %v4170_v9 = vadd.f32 %v5573_v6, %v4130_v5  ;;  %5847 = vmatprep.subr.bf16.mxu1 %v6318_v23 }
 0x1aa   :  { %v5575_v10 = vpop.f32.mrf.mxu1 }
 0x1ab   :  { %5860 = vmatpush3.bf16.msra.mxu0 %v6291_v48 }
 0x1ac   :  { %5848 = vmatpush3.bf16.msra.mxu1 %v6287_v33  ;;  %5861 = vmatprep.subr.bf16.mxu0 %v6318_v23 }
 0x1ad   :  { %5849 = vmatprep.subr.bf16.mxu1 %v6318_v23 }
 0x1af   :  { %5862 = vmatpush3.bf16.msra.mxu0 %v6292_v49 }
 0x1b0   :  { %5850 = vmatpush3.bf16.msra.mxu1 %v6288_v42  ;;  %5863 = vmatprep.subr.bf16.mxu0 %v6318_v23 }
 0x1c2   :  { %v5593_v11 = vpop.f32.mrf.mxu0 }
 0x1c4   :  { %v5594_v12 = vpop.f32.mrf.mxu0  ;;  %v5615_v13 = vpop.f32.mrf.mxu1 }
 0x1c5   :  { %v5595_v14 = vadd.f32 %v5594_v12, %v5593_v11 }
 0x1c6   :  { %v5596_v15 = vpop.f32.mrf.mxu0  ;;  %v5616_v41 = vpop.f32.mrf.mxu1 }
 0x1c7   :  { %v4210_v16 = vadd.f32 %v5595_v14, %v4170_v9  ;;  %v5617_v17 = vadd.f32 %v5616_v41, %v5615_v13 }
 0x1c8   :  { %v5597_v18 = vpop.f32.mrf.mxu0  ;;  %v5618_v19 = vpop.f32.mrf.mxu1 }
 0x1c9   :  { %v4250_v20 = vadd.f32 %v5617_v17, %v4210_v16 }
 0x1ca   :  { %v5619_v22 = vpop.f32.mrf.mxu1 }
 0x1e2   :  { %v5637_v30 = vpop.f32.mrf.mxu0 }
 0x1e4   :  { %v5638_v31 = vpop.f32.mrf.mxu0  ;;  %v5659_v32 = vpop.f32.mrf.mxu1 }
 0x1e5   :  { %v5639_v34 = vadd.f32 %v5638_v31, %v5637_v30  ;;  %v6293_v30 = vld [vmem:[%s7742_s5 + $0x8] sm:$0xff]   ;;  %v6294_v31 = vld [vmem:[%s7742_s5] sm:$0xff]   ;;  %s4841_s5 = sshll.u32 %s6320_s23, 4  ;;  %s4842_s5 = int_to_ptr.vmem [resolvable:$true] %s4841_s5 }
 0x1e6   :  { %v5640_v35 = vpop.f32.mrf.mxu0  ;;  %v5660_v36 = vpop.f32.mrf.mxu1  ;;  %5864 = vmatpush3.bf16.msra.mxu0 %v6293_v30  ;;  %p6300_p1 = scmp.lt.s32.totalorder %s4842_s5, %s4842_s5 }
 0x1e7   :  { %v4290_v37 = vadd.f32 %v5639_v34, %v4250_v20  ;;  %v5661_v38 = vadd.f32 %v5660_v36, %v5659_v32  ;;  %5865 = vmatprep.subr.bf16.mxu0 %v6318_v23  ;;  %v5251_v32 = vld [vmem:[%s7741_s4] ss:$0 sm:$0xff]  ;;  %s6295_s4 = scalar_lea.vmem %s4842_s5, 32 }
 0x1e8   :  { %v5641_v39 = vpop.f32.mrf.mxu0  ;;  %v5662_v40 = vpop.f32.mrf.mxu1  ;;  %v5261_v23 = vld [vmem:[%s7743_s6] ss:$0 sm:$0xff]  ;;  %p6296_p0 = scmp.ne.s32.totalorder %s4842_s5, %s6295_s4  ;;  %p6301_p2 = scmp.lt.s32.totalorder %s6295_s4, %s6295_s4 }
 0x1e9   :  { %v4330_v43 = vadd.f32 %v5661_v38, %v4290_v37 }
 0x1ea   :  { %v5663_v44 = vpop.f32.mrf.mxu1  ;;  %5866 = vmatpush3.bf16.msra.mxu0 %v6294_v31  ;;  %p6302_p3 = por %p6301_p2, %p6300_p1 }
 0x1ec   :  { %p6303_p4 = pnand %p6302_p3, %p6296_p0 }
 0x202   :  { %v5681_v50 = vpop.f32.mrf.mxu0 }
 0x204   :  { %v5682_v51 = vpop.f32.mrf.mxu0  ;;  %v5703_v52 = vpop.f32.mrf.mxu1 }
 0x205   :  { %v5683_v53 = vadd.f32 %v5682_v51, %v5681_v50 }
 0x206   :  { %v5684_v54 = vpop.f32.mrf.mxu0  ;;  %v5704_v55 = vpop.f32.mrf.mxu1 }
 0x207   :  { %v4370_v56 = vadd.f32 %v5683_v53, %v4330_v43  ;;  %v5705_v57 = vadd.f32 %v5704_v55, %v5703_v52 }
 0x208   :  { %v5685_v58 = vpop.f32.mrf.mxu0  ;;  %v5706_v59 = vpop.f32.mrf.mxu1 }
 0x209   :  { %v4410_v60 = vadd.f32 %v5705_v57, %v4370_v56 }
 0x20a   :  { %v5707_v61 = vpop.f32.mrf.mxu1 }
 0x222   :  { %v5725_v62 = vpop.f32.mrf.mxu0 }
 0x224   :  { %v5726_v63 = vpop.f32.mrf.mxu0  ;;  %v5747_v0 = vpop.f32.mrf.mxu1 }
 0x225   :  { %v5727_v14 = vadd.f32 %v5726_v63, %v5725_v62 }
 0x226   :  { %v5728_v1 = vpop.f32.mrf.mxu0  ;;  %v5748_v2 = vpop.f32.mrf.mxu1 }
 0x227   :  { %v4450_v15 = vadd.f32 %v5727_v14, %v4410_v60  ;;  %v5749_v41 = vadd.f32 %v5748_v2, %v5747_v0 }
 0x228   :  { %v5729_v3 = vpop.f32.mrf.mxu0  ;;  %v5750_v4 = vpop.f32.mrf.mxu1 }
 0x229   :  { %v4490_v17 = vadd.f32 %v5749_v41, %v4450_v15 }
 0x22a   :  { %v5751_v5 = vpop.f32.mrf.mxu1 }
 0x242   :  { %v5769_v6 = vpop.f32.mrf.mxu0 }
 0x244   :  { %v5770_v7 = vpop.f32.mrf.mxu0  ;;  %v5791_v8 = vpop.f32.mrf.mxu1 }
 0x245   :  { %v5771_v16 = vadd.f32 %v5770_v7, %v5769_v6 }
 0x246   :  { %v5772_v9 = vpop.f32.mrf.mxu0  ;;  %v5792_v10 = vpop.f32.mrf.mxu1 }
 0x247   :  { %v4530_v18 = vadd.f32 %v5771_v16, %v4490_v17  ;;  %v5793_v19 = vadd.f32 %v5792_v10, %v5791_v8 }
 0x248   :  { %v5773_v11 = vpop.f32.mrf.mxu0  ;;  %v5794_v12 = vpop.f32.mrf.mxu1 }
 0x249   :  { %v4570_v22 = vadd.f32 %v5793_v19, %v4530_v18 }
 0x24a   :  { %v5795_v13 = vpop.f32.mrf.mxu1 }
 0x262   :  { %v5813_v20 = vpop.f32.mrf.mxu0 }
 0x264   :  { %v5814_v21 = vpop.f32.mrf.mxu0 }
 0x265   :  { %v5815_v24 = vadd.f32 %v5814_v21, %v5813_v20 }
 0x266   :  { %v5816_v25 = vpop.f32.mrf.mxu0 }
 0x267   :  { %v4610_v26 = vadd.f32 %v5815_v24, %v4570_v22 }
 0x268   :  { %v5817_v27 = vpop.f32.mrf.mxu0 }
 0x269   :  { %v4615_v28 = vmax.f32 %v4610_v26, 0.0 }
 0x26b   :  { %v4616_v29 = vpack.c.bf16 %v4615_v28, %v4615_v28 }
 0x26d   :  { %5852 = vmatmul.mubr.msk.bf16.vlgmr.msra.gmra.mxu1 %vm4684_vm3, %v4616_v29 }
 0x32d   :  { %v4726_v33 = vpop.f32.mrf.mxu1 }
 0x32e   :  { %v4727_v34 = vadd.f32 %v5251_v32, %v4726_v33 }
 0x32f   :  { %v5853_v35 = vpop.f32.mrf.mxu1 }
 0x330   :  { %v4732_v36 = vmax.f32 %v4727_v34, 0.0 }
 0x331   :  { %v4729_v37 = vpop.f32.mrf.mxu1 }
 0x332   :  { %v4733_v38 = vpack.c.bf16 %v4732_v36, %v4732_v36 }
 0x333   :  { %v5854_v39 = vpop.f32.mrf.mxu1 }
 0x334   :  { %5868 = vmatmul.mubr.msk.bf16.vlgmr.msra.gmra.mxu0 %vm4785_vm4, %v4733_v38 }
 0x3f4   :  { %v4827_v40 = vpop.f32.mrf.mxu0 }
 0x3f5   :  { %v4828_v42 = vadd.f32 %v5261_v23, %v4827_v40 }
 0x3f6   :  { %v5869_v43 = vpop.f32.mrf.mxu0 }
 0x3f7   :  { %4834 = vst.msk [vmem:[#allocation2] sm:$0x3] %vm4833_vm5, %v4828_v42 }
 0x3f8   :  { %v4830_v44 = vpop.f32.mrf.mxu0 }
 0x3f9   :  { %6306 = shalt.err (!%p6303_p4)
}
 0x3fa   :  { %4844 = dma.vmem_to_hbm [thread:$0]  %s4842_s5, 32, %s7744_s7, [#allocation3]   ;;  %v5870_v45 = vpop.f32.mrf.mxu0 }
 0x3fb   :  { %6315 = dma.done.wait [#allocation3], 32  }
 0x3fc   :  { %6316 = vsyncadd [#allocation3], 4294967264 }
 0x3fd   :  { %4848 = vsyncpa [#allocation3], 1 }

</bundles_post_ra>
